<compile_context>
chip_gen: v7x
topology: tpu7x:2x2x1
jax: 0.10.0
libtpu: 0.0.40
codegen_flags: <defaults>
</compile_context>

<pallas_src>
import jax
import jax.numpy as jnp
import numpy as np
from jax import lax
from jax.experimental import pallas as pl
from jax.experimental.pallas import tpu as pltpu


def _make_kernel(num_heads, block_j, compute_dtype):
    def kernel(vlen_ref,                          # SMEM prefetch: [batch] int32 (seq_len + lex_num)
               q_ref, k_ref, v_ref, r_ref,        # (1,L,H) (1,TJ,H) (1,TJ,H) (1,L,TJ,H)
               wq_ref, bq_ref, wk_ref, bk_ref,    # (H,H), (1,H) ...
               wv_ref, bv_ref, wr_ref, br_ref,
               o_ref,                             # (1,L,H)
               qh_scr, acc_scr, m_scr, l_scr):    # (L,H) (L,H) (L,NH) (L,NH) f32 scratch
        b = pl.program_id(0)
        j = pl.program_id(1)
        n_chunks = pl.num_programs(1)

        L = q_ref.shape[1]
        H = q_ref.shape[2]
        d = H // num_heads
        TJ = block_j
        cdt = compute_dtype

        # ---- per-batch init: project Q for all heads at once, reset accumulators ----
        @pl.when(j == 0)
        def _init():
            qh = jnp.dot(q_ref[0], wq_ref[...],
                         preferred_element_type=jnp.float32) + bq_ref[...]
            qh_scr[...] = qh
            acc_scr[...] = jnp.zeros(acc_scr.shape, jnp.float32)
            m_scr[...] = jnp.full(m_scr.shape, -jnp.inf, jnp.float32)
            l_scr[...] = jnp.zeros(l_scr.shape, jnp.float32)

        # ---- project K/V rows and the rel slab for this key chunk (lane-dense, N = H) ----
        k = k_ref[0]                                         # (TJ, H)
        v = v_ref[0]                                         # (TJ, H)
        r = r_ref[0].reshape(L * TJ, H)                      # (L*TJ, H)

        kh_all = jnp.dot(k, wk_ref[...], preferred_element_type=jnp.float32) + bk_ref[...]
        vh_all = jnp.dot(v, wv_ref[...], preferred_element_type=jnp.float32) + bv_ref[...]
        rh_all = (jnp.dot(r, wr_ref[...], preferred_element_type=jnp.float32)
                  + br_ref[...]).reshape(L, TJ, H)           # (L, TJ, H) f32

        qh_all = qh_scr[...]                                 # (L, H) f32
        m_all = m_scr[...]                                   # (L, NH)
        l_all = l_scr[...]                                   # (L, NH)
        acc_all = acc_scr[...]                               # (L, H)

        # Column-validity mask for this chunk (cols >= seq_len + lex_num -> -1e15).
        vlen = vlen_ref[b]
        col = j * TJ + lax.broadcasted_iota(jnp.int32, (L, TJ), 1)
        valid = col < vlen

        new_m, new_l, new_acc = [], [], []
        for h in range(num_heads):
            sl = slice(h * d, (h + 1) * d)
            qh = qh_all[:, sl]                               # (L, d)  f32
            kh = kh_all[:, sl]                               # (TJ, d) f32
            vh = vh_all[:, sl]                               # (TJ, d) f32
            rh = rh_all[:, :, sl]                            # (L, TJ, d) f32

            # A_C = Q K^T for this head/chunk (MXU).
            a_c = lax.dot_general(qh.astype(cdt), kh.astype(cdt),
                                  (((1,), (1,)), ((), ())),
                                  preferred_element_type=jnp.float32)    # (L, TJ)
            # B_D[i, jj] = sum_d qh[i, d] * rh[i, jj, d]  (chunked VPU mul + lane reduce).
            b_d = jnp.sum(qh[:, None, :] * rh, axis=-1)                  # (L, TJ)

            s = jnp.where(valid, a_c + b_d, jnp.float32(-1e15))

            m_old = m_all[:, h:h + 1]                                    # (L, 1)
            l_old = l_all[:, h:h + 1]                                    # (L, 1)
            acc_old = acc_all[:, sl]                                     # (L, d)

            m_new = jnp.maximum(m_old, jnp.max(s, axis=-1, keepdims=True))
            alpha = jnp.exp(m_old - m_new)
            p = jnp.exp(s - m_new)                                       # (L, TJ)

            l_new = alpha * l_old + jnp.sum(p, axis=-1, keepdims=True)
            pv = jnp.dot(p.astype(cdt), vh.astype(cdt),
                         preferred_element_type=jnp.float32)             # (L, d)
            acc_new = alpha * acc_old + pv

            new_m.append(m_new)
            new_l.append(l_new)
            new_acc.append(acc_new)

        # Full-width (lane-dense) scratch writebacks.
        m_scr[...] = jnp.concatenate(new_m, axis=-1)
        l_scr[...] = jnp.concatenate(new_l, axis=-1)
        acc_scr[...] = jnp.concatenate(new_acc, axis=-1)

        # ---- per-batch finalize: normalize and write one lane-dense (L, H) slab ----
        @pl.when(j == n_chunks - 1)
        def _finalize():
            outs = []
            for h in range(num_heads):
                sl = slice(h * d, (h + 1) * d)
                inv = pl.reciprocal(l_scr[:, h:h + 1], approx=True)      # (L, 1)
                outs.append(acc_scr[:, sl] * inv)
            o_ref[0] = jnp.concatenate(outs, axis=-1).astype(o_ref.dtype)

    return kernel


def multihead_attention_lattice_rel(key, query, value, seq_len, lex_num,
                                    rel_pos_embedding, params, num_heads,
                                    *, block_j=None, compute_dtype=jnp.float32):
    """Pallas forward pass. Returns [batch, max_seq_len, hidden] (float32)."""
    B, L, H = key.shape
    d = H // num_heads
    assert d * num_heads == H
    assert L % 8 == 0, "pad max_seq_len to a multiple of 8"

    if block_j is None:
        block_j = 128 if (L % 128 == 0) else L
    assert L % block_j == 0 and block_j % 8 == 0
    n_chunks = L // block_j

    vlen = (seq_len + lex_num).astype(jnp.int32)                       # (B,)

    def cast(x):
        return x if compute_dtype == jnp.float32 else x.astype(compute_dtype)

    key_c, query_c = cast(key), cast(query)
    value_c, rel_c = cast(value), cast(rel_pos_embedding)
    wq, wk = cast(params["wq"]), cast(params["wk"])
    wv, wr = cast(params["wv"]), cast(params["wr"])
    bq = params["bq"].reshape(1, H).astype(jnp.float32)
    bk = params["bk"].reshape(1, H).astype(jnp.float32)
    bv = params["bv"].reshape(1, H).astype(jnp.float32)
    br = params["br"].reshape(1, H).astype(jnp.float32)

    w_spec = pl.BlockSpec((H, H), lambda b, j, vlen: (0, 0))
    b_spec = pl.BlockSpec((1, H), lambda b, j, vlen: (0, 0))

    grid_spec = pltpu.PrefetchScalarGridSpec(
        num_scalar_prefetch=1,
        grid=(B, n_chunks),
        in_specs=[
            pl.BlockSpec((1, L, H), lambda b, j, vlen: (b, 0, 0)),             # query (full rows)
            pl.BlockSpec((1, block_j, H), lambda b, j, vlen: (b, j, 0)),       # key chunk
            pl.BlockSpec((1, block_j, H), lambda b, j, vlen: (b, j, 0)),       # value chunk
            pl.BlockSpec((1, L, block_j, H), lambda b, j, vlen: (b, 0, j, 0)), # rel chunk
            w_spec, b_spec,   # w_q
            w_spec, b_spec,   # w_k
            w_spec, b_spec,   # w_v
            w_spec, b_spec,   # w_r
        ],
        out_specs=pl.BlockSpec((1, L, H), lambda b, j, vlen: (b, 0, 0)),
        scratch_shapes=[
            pltpu.VMEM((L, H), jnp.float32),           # projected Q
            pltpu.VMEM((L, H), jnp.float32),           # output accumulator (heads on lanes)
            pltpu.VMEM((L, num_heads), jnp.float32),   # running max
            pltpu.VMEM((L, num_heads), jnp.float32),   # running denom
        ],
    )

    kernel = _make_kernel(num_heads, block_j, compute_dtype)

    out = pl.pallas_call(
        kernel,
        out_shape=jax.ShapeDtypeStruct((B, L, H), jnp.float32),
        grid_spec=grid_spec,
        compiler_params=pltpu.CompilerParams(
            dimension_semantics=("parallel", "arbitrary"),
            vmem_limit_bytes=64 * 1024 * 1024),
    )(vlen, query_c, key_c, value_c, rel_c,
      wq, bq, wk, bk, wv, bv, wr, br)

    return out


def _reference_forward(key, query, value, seq_len, lex_num, rel, params, num_heads):
    """Pure-JAX reference reproducing the PyTorch forward exactly."""
    B, L, H = key.shape
    d = H // num_heads
    K = key @ params["wk"] + params["bk"]
    Q = query @ params["wq"] + params["bq"]
    V = value @ params["wv"] + params["bv"]
    R = rel @ params["wr"] + params["br"]
    Kh = K.reshape(B, L, num_heads, d).transpose(0, 2, 1, 3)
    Qh = Q.reshape(B, L, num_heads, d).transpose(0, 2, 1, 3)
    Vh = V.reshape(B, L, num_heads, d).transpose(0, 2, 1, 3)
    Rh = R.reshape(B, L, L, num_heads, d)
    a_c = jnp.einsum("bhid,bhjd->bhij", Qh, Kh)
    b_d = jnp.einsum("bhid,bijhd->bhij", Qh, Rh)
    score = a_c + b_d
    vlen = seq_len + lex_num
    mask = jnp.arange(L)[None, :] < vlen[:, None]                 # (B, L)
    score = jnp.where(mask[:, None, None, :], score, -1e15)
    p = jax.nn.softmax(score, axis=-1)
    out = jnp.einsum("bhij,bhjd->bhid", p, Vh)
    return out.transpose(0, 2, 1, 3).reshape(B, L, H)


if __name__ == "__main__":
    B, L, H, NH = 2, 32, 32, 4
    TJ = 16   # two key chunks -> exercises the online-softmax carry across chunks

    root = jax.random.PRNGKey(0)
    keys = jax.random.split(root, 16)
    scale = 1.0 / np.sqrt(H)

    params = {
        "wk": jax.random.normal(keys[0], (H, H), jnp.float32) * scale,
        "bk": jax.random.normal(keys[1], (H,), jnp.float32) * 0.1,
        "wq": jax.random.normal(keys[2], (H, H), jnp.float32) * scale,
        "bq": jax.random.normal(keys[3], (H,), jnp.float32) * 0.1,
        "wv": jax.random.normal(keys[4], (H, H), jnp.float32) * scale,
        "bv": jax.random.normal(keys[5], (H,), jnp.float32) * 0.1,
        "wr": jax.random.normal(keys[6], (H, H), jnp.float32) * scale,
        "br": jax.random.normal(keys[7], (H,), jnp.float32) * 0.1,
    }
    # w_final is declared in __init__ but unused in forward(); intentionally omitted.

    key_in = jax.random.normal(keys[8], (B, L, H), jnp.float32)
    query_in = jax.random.normal(keys[9], (B, L, H), jnp.float32)
    value_in = jax.random.normal(keys[10], (B, L, H), jnp.float32)
    rel_in = jax.random.normal(keys[11], (B, L, L, H), jnp.float32)
    seq_len = jnp.array([5, 9], dtype=jnp.int32)
    lex_num = jnp.array([3, 12], dtype=jnp.int32)   # vlen = [8, 21]: exercises partial + fully-masked chunks

    ref = _reference_forward(key_in, query_in, value_in, seq_len, lex_num,
                             rel_in, params, NH)

    # f32 compute path: tight check (approx reciprocal in softmax -> ~1e-4 rel).
    out = multihead_attention_lattice_rel(key_in, query_in, value_in, seq_len, lex_num,
                                          rel_in, params, NH,
                                          block_j=TJ, compute_dtype=jnp.float32)
    out = jax.block_until_ready(out)
    np.testing.assert_allclose(np.asarray(out), np.asarray(ref), rtol=5e-3, atol=5e-3)

    # bf16 MXU path: smoke check (compiles, runs, finite, in the right ballpark).
    out_bf16 = multihead_attention_lattice_rel(key_in, query_in, value_in, seq_len, lex_num,
                                               rel_in, params, NH,
                                               block_j=TJ, compute_dtype=jnp.bfloat16)
    out_bf16 = jax.block_until_ready(out_bf16)
    assert bool(jnp.all(jnp.isfinite(out_bf16)))
    assert float(jnp.max(jnp.abs(out_bf16 - ref))) < 0.5

    print("KERNEL_OK")
</pallas_src>

<mosaic_0001>
module attributes {stable_mosaic.version = 11 : i64} {
  func.func @kernel(%arg0: i32, %arg1: i32, %arg2: memref<2xi32, #tpu.memory_space<smem>>, %arg3: memref<1x32x32xf32, #tpu.memory_space<vmem>>, %arg4: memref<1x16x32xf32, #tpu.memory_space<vmem>>, %arg5: memref<1x16x32xf32, #tpu.memory_space<vmem>>, %arg6: memref<1x32x16x32xf32, #tpu.memory_space<vmem>>, %arg7: memref<32x32xf32, #tpu.memory_space<vmem>>, %arg8: memref<1x32xf32, #tpu.memory_space<vmem>>, %arg9: memref<32x32xf32, #tpu.memory_space<vmem>>, %arg10: memref<1x32xf32, #tpu.memory_space<vmem>>, %arg11: memref<32x32xf32, #tpu.memory_space<vmem>>, %arg12: memref<1x32xf32, #tpu.memory_space<vmem>>, %arg13: memref<32x32xf32, #tpu.memory_space<vmem>>, %arg14: memref<1x32xf32, #tpu.memory_space<vmem>>, %arg15: memref<1x32x32xf32, #tpu.memory_space<vmem>>, %arg16: memref<32x32xf32, #tpu.memory_space<vmem>>, %arg17: memref<32x32xf32, #tpu.memory_space<vmem>>, %arg18: memref<32x4xf32, #tpu.memory_space<vmem>>, %arg19: memref<32x4xf32, #tpu.memory_space<vmem>>) attributes {dimension_semantics = [#tpu.dimension_semantics<parallel>, #tpu.dimension_semantics<arbitrary>], iteration_bounds = array<i64: 2, 2>, scalar_prefetch = 1 : i64, scratch_operands = 4 : i64, tpu.core_type = #tpu.core_type<tc>, window_params = [{transform_indices = @transform_0, window_bounds = array<i64: 1, 32, 32>}, {transform_indices = @transform_1, window_bounds = array<i64: 1, 16, 32>}, {transform_indices = @transform_2, window_bounds = array<i64: 1, 16, 32>}, {transform_indices = @transform_3, window_bounds = array<i64: 1, 32, 16, 32>}, {pipeline_mode = #tpu.pipeline_mode<synchronous>, transform_indices = @transform_4, window_bounds = array<i64: 32, 32>}, {pipeline_mode = #tpu.pipeline_mode<synchronous>, transform_indices = @transform_5, window_bounds = array<i64: 1, 32>}, {pipeline_mode = #tpu.pipeline_mode<synchronous>, transform_indices = @transform_6, window_bounds = array<i64: 32, 32>}, {pipeline_mode = #tpu.pipeline_mode<synchronous>, transform_indices = @transform_7, window_bounds = array<i64: 1, 32>}, {pipeline_mode = #tpu.pipeline_mode<synchronous>, transform_indices = @transform_8, window_bounds = array<i64: 32, 32>}, {pipeline_mode = #tpu.pipeline_mode<synchronous>, transform_indices = @transform_9, window_bounds = array<i64: 1, 32>}, {pipeline_mode = #tpu.pipeline_mode<synchronous>, transform_indices = @transform_10, window_bounds = array<i64: 32, 32>}, {pipeline_mode = #tpu.pipeline_mode<synchronous>, transform_indices = @transform_11, window_bounds = array<i64: 1, 32>}, {transform_indices = @transform_12, window_bounds = array<i64: 1, 32, 32>}]} {
    %c0_i32 = arith.constant 0 : i32
    %0 = arith.cmpi eq, %arg1, %c0_i32 : i32
    %1 = arith.extui %0 : i1 to i32
    %c0_i32_0 = arith.constant 0 : i32
    %2 = arith.cmpi ne, %1, %c0_i32_0 : i32
    scf.if %2 {
      %c0_63 = arith.constant 0 : index
      %c0_64 = arith.constant 0 : index
      %c0_65 = arith.constant 0 : index
      %171 = vector.load %arg3[%c0_63, %c0_64, %c0_65] : memref<1x32x32xf32, #tpu.memory_space<vmem>>, vector<1x32x32xf32>
      %172 = vector.shape_cast %171 : vector<1x32x32xf32> to vector<32x32xf32>
      %c0_66 = arith.constant 0 : index
      %c0_67 = arith.constant 0 : index
      %173 = vector.load %arg7[%c0_66, %c0_67] : memref<32x32xf32, #tpu.memory_space<vmem>>, vector<32x32xf32>
      %cst_68 = arith.constant dense<0.000000e+00> : vector<32x32xf32>
      %174 = tpu.matmul %172, %173, %cst_68 {dimension_numbers = #tpu.dot_dimension_numbers<[1], [0], [0], [1], [0, 0, 1, 1], [], []>} : vector<32x32xf32>, vector<32x32xf32>, vector<32x32xf32> -> vector<32x32xf32>
      %c0_69 = arith.constant 0 : index
      %c0_70 = arith.constant 0 : index
      %175 = vector.load %arg8[%c0_69, %c0_70] : memref<1x32xf32, #tpu.memory_space<vmem>>, vector<1x32xf32>
      %176 = vector.broadcast %175 : vector<1x32xf32> to vector<32x32xf32>
      %177 = arith.addf %174, %176 : vector<32x32xf32>
      %c0_71 = arith.constant 0 : index
      %c0_72 = arith.constant 0 : index
      %178 = vector.load %arg16[%c0_71, %c0_72] : memref<32x32xf32, #tpu.memory_space<vmem>>, vector<32x32xf32>
      tpu.vector_store %arg16[%c0_71, %c0_72], %177 {strides = array<i32>} : memref<32x32xf32, #tpu.memory_space<vmem>>, vector<32x32xf32>,
      %cst_73 = arith.constant 0.000000e+00 : f32
      %179 = vector.broadcast %cst_73 : f32 to vector<32x32xf32>
      %c0_74 = arith.constant 0 : index
      %c0_75 = arith.constant 0 : index
      %180 = vector.load %arg17[%c0_74, %c0_75] : memref<32x32xf32, #tpu.memory_space<vmem>>, vector<32x32xf32>
      tpu.vector_store %arg17[%c0_74, %c0_75], %179 {strides = array<i32>} : memref<32x32xf32, #tpu.memory_space<vmem>>, vector<32x32xf32>,
      %cst_76 = arith.constant 0xFF800000 : f32
      %181 = vector.broadcast %cst_76 : f32 to vector<32x4xf32>
      %c0_77 = arith.constant 0 : index
      %c0_78 = arith.constant 0 : index
      %182 = vector.load %arg18[%c0_77, %c0_78] : memref<32x4xf32, #tpu.memory_space<vmem>>, vector<32x4xf32>
      tpu.vector_store %arg18[%c0_77, %c0_78], %181 {strides = array<i32>} : memref<32x4xf32, #tpu.memory_space<vmem>>, vector<32x4xf32>,
      %cst_79 = arith.constant 0.000000e+00 : f32
      %183 = vector.broadcast %cst_79 : f32 to vector<32x4xf32>
      %c0_80 = arith.constant 0 : index
      %c0_81 = arith.constant 0 : index
      %184 = vector.load %arg19[%c0_80, %c0_81] : memref<32x4xf32, #tpu.memory_space<vmem>>, vector<32x4xf32>
      tpu.vector_store %arg19[%c0_80, %c0_81], %183 {strides = array<i32>} : memref<32x4xf32, #tpu.memory_space<vmem>>, vector<32x4xf32>,
    } else {
    }
    %c0 = arith.constant 0 : index
    %c0_1 = arith.constant 0 : index
    %c0_2 = arith.constant 0 : index
    %3 = vector.load %arg4[%c0, %c0_1, %c0_2] : memref<1x16x32xf32, #tpu.memory_space<vmem>>, vector<1x16x32xf32>
    %4 = vector.shape_cast %3 : vector<1x16x32xf32> to vector<16x32xf32>
    %c0_3 = arith.constant 0 : index
    %c0_4 = arith.constant 0 : index
    %c0_5 = arith.constant 0 : index
    %5 = vector.load %arg5[%c0_3, %c0_4, %c0_5] : memref<1x16x32xf32, #tpu.memory_space<vmem>>, vector<1x16x32xf32>
    %6 = vector.shape_cast %5 : vector<1x16x32xf32> to vector<16x32xf32>
    %c0_6 = arith.constant 0 : index
    %c0_7 = arith.constant 0 : index
    %c0_8 = arith.constant 0 : index
    %c0_9 = arith.constant 0 : index
    %7 = vector.load %arg6[%c0_6, %c0_7, %c0_8, %c0_9] : memref<1x32x16x32xf32, #tpu.memory_space<vmem>>, vector<1x32x16x32xf32>
    %8 = vector.shape_cast %7 : vector<1x32x16x32xf32> to vector<32x16x32xf32>
    %9 = vector.shape_cast %8 : vector<32x16x32xf32> to vector<512x32xf32>
    %c0_10 = arith.constant 0 : index
    %c0_11 = arith.constant 0 : index
    %10 = vector.load %arg9[%c0_10, %c0_11] : memref<32x32xf32, #tpu.memory_space<vmem>>, vector<32x32xf32>
    %cst = arith.constant dense<0.000000e+00> : vector<16x32xf32>
    %11 = tpu.matmul %4, %10, %cst {dimension_numbers = #tpu.dot_dimension_numbers<[1], [0], [0], [1], [0, 0, 1, 1], [], []>} : vector<16x32xf32>, vector<32x32xf32>, vector<16x32xf32> -> vector<16x32xf32>
    %c0_12 = arith.constant 0 : index
    %c0_13 = arith.constant 0 : index
    %12 = vector.load %arg10[%c0_12, %c0_13] : memref<1x32xf32, #tpu.memory_space<vmem>>, vector<1x32xf32>
    %13 = vector.broadcast %12 : vector<1x32xf32> to vector<16x32xf32>
    %14 = arith.addf %11, %13 : vector<16x32xf32>
    %c0_14 = arith.constant 0 : index
    %c0_15 = arith.constant 0 : index
    %15 = vector.load %arg11[%c0_14, %c0_15] : memref<32x32xf32, #tpu.memory_space<vmem>>, vector<32x32xf32>
    %cst_16 = arith.constant dense<0.000000e+00> : vector<16x32xf32>
    %16 = tpu.matmul %6, %15, %cst_16 {dimension_numbers = #tpu.dot_dimension_numbers<[1], [0], [0], [1], [0, 0, 1, 1], [], []>} : vector<16x32xf32>, vector<32x32xf32>, vector<16x32xf32> -> vector<16x32xf32>
    %c0_17 = arith.constant 0 : index
    %c0_18 = arith.constant 0 : index
    %17 = vector.load %arg12[%c0_17, %c0_18] : memref<1x32xf32, #tpu.memory_space<vmem>>, vector<1x32xf32>
    %18 = vector.broadcast %17 : vector<1x32xf32> to vector<16x32xf32>
    %19 = arith.addf %16, %18 : vector<16x32xf32>
    %c0_19 = arith.constant 0 : index
    %c0_20 = arith.constant 0 : index
    %20 = vector.load %arg13[%c0_19, %c0_20] : memref<32x32xf32, #tpu.memory_space<vmem>>, vector<32x32xf32>
    %cst_21 = arith.constant dense<0.000000e+00> : vector<512x32xf32>
    %21 = tpu.matmul %9, %20, %cst_21 {dimension_numbers = #tpu.dot_dimension_numbers<[1], [0], [0], [1], [0, 0, 1, 1], [], []>} : vector<512x32xf32>, vector<32x32xf32>, vector<512x32xf32> -> vector<512x32xf32>
    %c0_22 = arith.constant 0 : index
    %c0_23 = arith.constant 0 : index
    %22 = vector.load %arg14[%c0_22, %c0_23] : memref<1x32xf32, #tpu.memory_space<vmem>>, vector<1x32xf32>
    %23 = vector.broadcast %22 : vector<1x32xf32> to vector<512x32xf32>
    %24 = arith.addf %21, %23 : vector<512x32xf32>
    %25 = vector.shape_cast %24 : vector<512x32xf32> to vector<32x16x32xf32>
    %c0_24 = arith.constant 0 : index
    %c0_25 = arith.constant 0 : index
    %26 = vector.load %arg16[%c0_24, %c0_25] : memref<32x32xf32, #tpu.memory_space<vmem>>, vector<32x32xf32>
    %c0_26 = arith.constant 0 : index
    %c0_27 = arith.constant 0 : index
    %27 = vector.load %arg18[%c0_26, %c0_27] : memref<32x4xf32, #tpu.memory_space<vmem>>, vector<32x4xf32>
    %c0_28 = arith.constant 0 : index
    %c0_29 = arith.constant 0 : index
    %28 = vector.load %arg19[%c0_28, %c0_29] : memref<32x4xf32, #tpu.memory_space<vmem>>, vector<32x4xf32>
    %c0_30 = arith.constant 0 : index
    %c0_31 = arith.constant 0 : index
    %29 = vector.load %arg17[%c0_30, %c0_31] : memref<32x32xf32, #tpu.memory_space<vmem>>, vector<32x32xf32>
    %30 = arith.index_cast %arg0 : i32 to index
    %31 = memref.load %arg2[%30] : memref<2xi32, #tpu.memory_space<smem>>
    %c16_i32 = arith.constant 16 : i32
    %32 = arith.muli %arg1, %c16_i32 : i32
    %33 = tpu.iota {dimensions = array<i32: 1>} : vector<32x16xi32>
    %34 = vector.broadcast %32 : i32 to vector<32x16xi32>
    %35 = arith.addi %34, %33 : vector<32x16xi32>
    %36 = vector.broadcast %31 : i32 to vector<32x16xi32>
    %37 = arith.cmpi slt, %35, %36 : vector<32x16xi32>
    %38 = vector.extract_strided_slice %26 {offsets = [0, 0], sizes = [32, 8], strides = [1, 1]} : vector<32x32xf32> to vector<32x8xf32>
    %39 = vector.extract_strided_slice %14 {offsets = [0, 0], sizes = [16, 8], strides = [1, 1]} : vector<16x32xf32> to vector<16x8xf32>
    %40 = vector.extract_strided_slice %19 {offsets = [0, 0], sizes = [16, 8], strides = [1, 1]} : vector<16x32xf32> to vector<16x8xf32>
    %41 = vector.extract_strided_slice %25 {offsets = [0, 0, 0], sizes = [32, 16, 8], strides = [1, 1, 1]} : vector<32x16x32xf32> to vector<32x16x8xf32>
    %cst_32 = arith.constant dense<0.000000e+00> : vector<32x16xf32>
    %42 = tpu.matmul %38, %39, %cst_32 {dimension_numbers = #tpu.dot_dimension_numbers<[1], [1], [0], [0], [0, 0, 1, 0], [], []>} : vector<32x8xf32>, vector<16x8xf32>, vector<32x16xf32> -> vector<32x16xf32>
    %43 = vector.shape_cast %38 : vector<32x8xf32> to vector<32x1x8xf32>
    %44 = vector.broadcast %43 : vector<32x1x8xf32> to vector<32x16x8xf32>
    %45 = arith.mulf %44, %41 : vector<32x16x8xf32>
    %cst_33 = arith.constant dense<0.000000e+00> : vector<32x16xf32>
    %46 = vector.multi_reduction <add>, %45, %cst_33 [2] : vector<32x16x8xf32> to vector<32x16xf32>
    %47 = arith.addf %42, %46 : vector<32x16xf32>
    %cst_34 = arith.constant -9.99999986E+14 : f32
    %48 = vector.broadcast %cst_34 : f32 to vector<32x16xf32>
    %49 = arith.select %37, %47, %48 : vector<32x16xi1>, vector<32x16xf32>
    %50 = vector.extract_strided_slice %27 {offsets = [0, 0], sizes = [32, 1], strides = [1, 1]} : vector<32x4xf32> to vector<32x1xf32>
    %51 = vector.extract_strided_slice %28 {offsets = [0, 0], sizes = [32, 1], strides = [1, 1]} : vector<32x4xf32> to vector<32x1xf32>
    %52 = vector.extract_strided_slice %29 {offsets = [0, 0], sizes = [32, 8], strides = [1, 1]} : vector<32x32xf32> to vector<32x8xf32>
    %cst_35 = arith.constant dense<0xFF800000> : vector<32xf32>
    %53 = vector.multi_reduction <maximumf>, %49, %cst_35 [1] : vector<32x16xf32> to vector<32xf32>
    %54 = vector.shape_cast %53 : vector<32xf32> to vector<32x1xf32>
    %55 = arith.maximumf %50, %54 : vector<32x1xf32>
    %56 = arith.subf %50, %55 : vector<32x1xf32>
    %57 = math.exp %56 : vector<32x1xf32>
    %58 = vector.broadcast %55 : vector<32x1xf32> to vector<32x16xf32>
    %59 = arith.subf %49, %58 : vector<32x16xf32>
    %60 = math.exp %59 : vector<32x16xf32>
    %61 = arith.mulf %57, %51 : vector<32x1xf32>
    %cst_36 = arith.constant dense<0.000000e+00> : vector<32xf32>
    %62 = vector.multi_reduction <add>, %60, %cst_36 [1] : vector<32x16xf32> to vector<32xf32>
    %63 = vector.shape_cast %62 : vector<32xf32> to vector<32x1xf32>
    %64 = arith.addf %61, %63 : vector<32x1xf32>
    %cst_37 = arith.constant dense<0.000000e+00> : vector<32x8xf32>
    %65 = tpu.matmul %60, %40, %cst_37 {dimension_numbers = #tpu.dot_dimension_numbers<[1], [0], [0], [1], [0, 0, 1, 1], [], []>} : vector<32x16xf32>, vector<16x8xf32>, vector<32x8xf32> -> vector<32x8xf32>
    %66 = vector.broadcast %57 : vector<32x1xf32> to vector<32x8xf32>
    %67 = arith.mulf %66, %52 : vector<32x8xf32>
    %68 = arith.addf %67, %65 : vector<32x8xf32>
    %69 = vector.extract_strided_slice %26 {offsets = [0, 8], sizes = [32, 8], strides = [1, 1]} : vector<32x32xf32> to vector<32x8xf32>
    %70 = vector.extract_strided_slice %14 {offsets = [0, 8], sizes = [16, 8], strides = [1, 1]} : vector<16x32xf32> to vector<16x8xf32>
    %71 = vector.extract_strided_slice %19 {offsets = [0, 8], sizes = [16, 8], strides = [1, 1]} : vector<16x32xf32> to vector<16x8xf32>
    %72 = vector.extract_strided_slice %25 {offsets = [0, 0, 8], sizes = [32, 16, 8], strides = [1, 1, 1]} : vector<32x16x32xf32> to vector<32x16x8xf32>
    %cst_38 = arith.constant dense<0.000000e+00> : vector<32x16xf32>
    %73 = tpu.matmul %69, %70, %cst_38 {dimension_numbers = #tpu.dot_dimension_numbers<[1], [1], [0], [0], [0, 0, 1, 0], [], []>} : vector<32x8xf32>, vector<16x8xf32>, vector<32x16xf32> -> vector<32x16xf32>
    %74 = vector.shape_cast %69 : vector<32x8xf32> to vector<32x1x8xf32>
    %75 = vector.broadcast %74 : vector<32x1x8xf32> to vector<32x16x8xf32>
    %76 = arith.mulf %75, %72 : vector<32x16x8xf32>
    %cst_39 = arith.constant dense<0.000000e+00> : vector<32x16xf32>
    %77 = vector.multi_reduction <add>, %76, %cst_39 [2] : vector<32x16x8xf32> to vector<32x16xf32>
    %78 = arith.addf %73, %77 : vector<32x16xf32>
    %cst_40 = arith.constant -9.99999986E+14 : f32
    %79 = vector.broadcast %cst_40 : f32 to vector<32x16xf32>
    %80 = arith.select %37, %78, %79 : vector<32x16xi1>, vector<32x16xf32>
    %81 = vector.extract_strided_slice %27 {offsets = [0, 1], sizes = [32, 1], strides = [1, 1]} : vector<32x4xf32> to vector<32x1xf32>
    %82 = vector.extract_strided_slice %28 {offsets = [0, 1], sizes = [32, 1], strides = [1, 1]} : vector<32x4xf32> to vector<32x1xf32>
    %83 = vector.extract_strided_slice %29 {offsets = [0, 8], sizes = [32, 8], strides = [1, 1]} : vector<32x32xf32> to vector<32x8xf32>
    %cst_41 = arith.constant dense<0xFF800000> : vector<32xf32>
    %84 = vector.multi_reduction <maximumf>, %80, %cst_41 [1] : vector<32x16xf32> to vector<32xf32>
    %85 = vector.shape_cast %84 : vector<32xf32> to vector<32x1xf32>
    %86 = arith.maximumf %81, %85 : vector<32x1xf32>
    %87 = arith.subf %81, %86 : vector<32x1xf32>
    %88 = math.exp %87 : vector<32x1xf32>
    %89 = vector.broadcast %86 : vector<32x1xf32> to vector<32x16xf32>
    %90 = arith.subf %80, %89 : vector<32x16xf32>
    %91 = math.exp %90 : vector<32x16xf32>
    %92 = arith.mulf %88, %82 : vector<32x1xf32>
    %cst_42 = arith.constant dense<0.000000e+00> : vector<32xf32>
    %93 = vector.multi_reduction <add>, %91, %cst_42 [1] : vector<32x16xf32> to vector<32xf32>
    %94 = vector.shape_cast %93 : vector<32xf32> to vector<32x1xf32>
    %95 = arith.addf %92, %94 : vector<32x1xf32>
    %cst_43 = arith.constant dense<0.000000e+00> : vector<32x8xf32>
    %96 = tpu.matmul %91, %71, %cst_43 {dimension_numbers = #tpu.dot_dimension_numbers<[1], [0], [0], [1], [0, 0, 1, 1], [], []>} : vector<32x16xf32>, vector<16x8xf32>, vector<32x8xf32> -> vector<32x8xf32>
    %97 = vector.broadcast %88 : vector<32x1xf32> to vector<32x8xf32>
    %98 = arith.mulf %97, %83 : vector<32x8xf32>
    %99 = arith.addf %98, %96 : vector<32x8xf32>
    %100 = vector.extract_strided_slice %26 {offsets = [0, 16], sizes = [32, 8], strides = [1, 1]} : vector<32x32xf32> to vector<32x8xf32>
    %101 = vector.extract_strided_slice %14 {offsets = [0, 16], sizes = [16, 8], strides = [1, 1]} : vector<16x32xf32> to vector<16x8xf32>
    %102 = vector.extract_strided_slice %19 {offsets = [0, 16], sizes = [16, 8], strides = [1, 1]} : vector<16x32xf32> to vector<16x8xf32>
    %103 = vector.extract_strided_slice %25 {offsets = [0, 0, 16], sizes = [32, 16, 8], strides = [1, 1, 1]} : vector<32x16x32xf32> to vector<32x16x8xf32>
    %cst_44 = arith.constant dense<0.000000e+00> : vector<32x16xf32>
    %104 = tpu.matmul %100, %101, %cst_44 {dimension_numbers = #tpu.dot_dimension_numbers<[1], [1], [0], [0], [0, 0, 1, 0], [], []>} : vector<32x8xf32>, vector<16x8xf32>, vector<32x16xf32> -> vector<32x16xf32>
    %105 = vector.shape_cast %100 : vector<32x8xf32> to vector<32x1x8xf32>
    %106 = vector.broadcast %105 : vector<32x1x8xf32> to vector<32x16x8xf32>
    %107 = arith.mulf %106, %103 : vector<32x16x8xf32>
    %cst_45 = arith.constant dense<0.000000e+00> : vector<32x16xf32>
    %108 = vector.multi_reduction <add>, %107, %cst_45 [2] : vector<32x16x8xf32> to vector<32x16xf32>
    %109 = arith.addf %104, %108 : vector<32x16xf32>
    %cst_46 = arith.constant -9.99999986E+14 : f32
    %110 = vector.broadcast %cst_46 : f32 to vector<32x16xf32>
    %111 = arith.select %37, %109, %110 : vector<32x16xi1>, vector<32x16xf32>
    %112 = vector.extract_strided_slice %27 {offsets = [0, 2], sizes = [32, 1], strides = [1, 1]} : vector<32x4xf32> to vector<32x1xf32>
    %113 = vector.extract_strided_slice %28 {offsets = [0, 2], sizes = [32, 1], strides = [1, 1]} : vector<32x4xf32> to vector<32x1xf32>
    %114 = vector.extract_strided_slice %29 {offsets = [0, 16], sizes = [32, 8], strides = [1, 1]} : vector<32x32xf32> to vector<32x8xf32>
    %cst_47 = arith.constant dense<0xFF800000> : vector<32xf32>
    %115 = vector.multi_reduction <maximumf>, %111, %cst_47 [1] : vector<32x16xf32> to vector<32xf32>
    %116 = vector.shape_cast %115 : vector<32xf32> to vector<32x1xf32>
    %117 = arith.maximumf %112, %116 : vector<32x1xf32>
    %118 = arith.subf %112, %117 : vector<32x1xf32>
    %119 = math.exp %118 : vector<32x1xf32>
    %120 = vector.broadcast %117 : vector<32x1xf32> to vector<32x16xf32>
    %121 = arith.subf %111, %120 : vector<32x16xf32>
    %122 = math.exp %121 : vector<32x16xf32>
    %123 = arith.mulf %119, %113 : vector<32x1xf32>
    %cst_48 = arith.constant dense<0.000000e+00> : vector<32xf32>
    %124 = vector.multi_reduction <add>, %122, %cst_48 [1] : vector<32x16xf32> to vector<32xf32>
    %125 = vector.shape_cast %124 : vector<32xf32> to vector<32x1xf32>
    %126 = arith.addf %123, %125 : vector<32x1xf32>
    %cst_49 = arith.constant dense<0.000000e+00> : vector<32x8xf32>
    %127 = tpu.matmul %122, %102, %cst_49 {dimension_numbers = #tpu.dot_dimension_numbers<[1], [0], [0], [1], [0, 0, 1, 1], [], []>} : vector<32x16xf32>, vector<16x8xf32>, vector<32x8xf32> -> vector<32x8xf32>
    %128 = vector.broadcast %119 : vector<32x1xf32> to vector<32x8xf32>
    %129 = arith.mulf %128, %114 : vector<32x8xf32>
    %130 = arith.addf %129, %127 : vector<32x8xf32>
    %131 = vector.extract_strided_slice %26 {offsets = [0, 24], sizes = [32, 8], strides = [1, 1]} : vector<32x32xf32> to vector<32x8xf32>
    %132 = vector.extract_strided_slice %14 {offsets = [0, 24], sizes = [16, 8], strides = [1, 1]} : vector<16x32xf32> to vector<16x8xf32>
    %133 = vector.extract_strided_slice %19 {offsets = [0, 24], sizes = [16, 8], strides = [1, 1]} : vector<16x32xf32> to vector<16x8xf32>
    %134 = vector.extract_strided_slice %25 {offsets = [0, 0, 24], sizes = [32, 16, 8], strides = [1, 1, 1]} : vector<32x16x32xf32> to vector<32x16x8xf32>
    %cst_50 = arith.constant dense<0.000000e+00> : vector<32x16xf32>
    %135 = tpu.matmul %131, %132, %cst_50 {dimension_numbers = #tpu.dot_dimension_numbers<[1], [1], [0], [0], [0, 0, 1, 0], [], []>} : vector<32x8xf32>, vector<16x8xf32>, vector<32x16xf32> -> vector<32x16xf32>
    %136 = vector.shape_cast %131 : vector<32x8xf32> to vector<32x1x8xf32>
    %137 = vector.broadcast %136 : vector<32x1x8xf32> to vector<32x16x8xf32>
    %138 = arith.mulf %137, %134 : vector<32x16x8xf32>
    %cst_51 = arith.constant dense<0.000000e+00> : vector<32x16xf32>
    %139 = vector.multi_reduction <add>, %138, %cst_51 [2] : vector<32x16x8xf32> to vector<32x16xf32>
    %140 = arith.addf %135, %139 : vector<32x16xf32>
    %cst_52 = arith.constant -9.99999986E+14 : f32
    %141 = vector.broadcast %cst_52 : f32 to vector<32x16xf32>
    %142 = arith.select %37, %140, %141 : vector<32x16xi1>, vector<32x16xf32>
    %143 = vector.extract_strided_slice %27 {offsets = [0, 3], sizes = [32, 1], strides = [1, 1]} : vector<32x4xf32> to vector<32x1xf32>
    %144 = vector.extract_strided_slice %28 {offsets = [0, 3], sizes = [32, 1], strides = [1, 1]} : vector<32x4xf32> to vector<32x1xf32>
    %145 = vector.extract_strided_slice %29 {offsets = [0, 24], sizes = [32, 8], strides = [1, 1]} : vector<32x32xf32> to vector<32x8xf32>
    %cst_53 = arith.constant dense<0xFF800000> : vector<32xf32>
    %146 = vector.multi_reduction <maximumf>, %142, %cst_53 [1] : vector<32x16xf32> to vector<32xf32>
    %147 = vector.shape_cast %146 : vector<32xf32> to vector<32x1xf32>
    %148 = arith.maximumf %143, %147 : vector<32x1xf32>
    %149 = arith.subf %143, %148 : vector<32x1xf32>
    %150 = math.exp %149 : vector<32x1xf32>
    %151 = vector.broadcast %148 : vector<32x1xf32> to vector<32x16xf32>
    %152 = arith.subf %142, %151 : vector<32x16xf32>
    %153 = math.exp %152 : vector<32x16xf32>
    %154 = arith.mulf %150, %144 : vector<32x1xf32>
    %cst_54 = arith.constant dense<0.000000e+00> : vector<32xf32>
    %155 = vector.multi_reduction <add>, %153, %cst_54 [1] : vector<32x16xf32> to vector<32xf32>
    %156 = vector.shape_cast %155 : vector<32xf32> to vector<32x1xf32>
    %157 = arith.addf %154, %156 : vector<32x1xf32>
    %cst_55 = arith.constant dense<0.000000e+00> : vector<32x8xf32>
    %158 = tpu.matmul %153, %133, %cst_55 {dimension_numbers = #tpu.dot_dimension_numbers<[1], [0], [0], [1], [0, 0, 1, 1], [], []>} : vector<32x16xf32>, vector<16x8xf32>, vector<32x8xf32> -> vector<32x8xf32>
    %159 = vector.broadcast %150 : vector<32x1xf32> to vector<32x8xf32>
    %160 = arith.mulf %159, %145 : vector<32x8xf32>
    %161 = arith.addf %160, %158 : vector<32x8xf32>
    %162 = tpu.concatenate %55, %86, %117, %148 in 1 : vector<32x1xf32>, vector<32x1xf32>, vector<32x1xf32>, vector<32x1xf32> -> vector<32x4xf32>
    %c0_56 = arith.constant 0 : index
    %c0_57 = arith.constant 0 : index
    %163 = vector.load %arg18[%c0_56, %c0_57] : memref<32x4xf32, #tpu.memory_space<vmem>>, vector<32x4xf32>
    tpu.vector_store %arg18[%c0_56, %c0_57], %162 {strides = array<i32>} : memref<32x4xf32, #tpu.memory_space<vmem>>, vector<32x4xf32>,
    %164 = tpu.concatenate %64, %95, %126, %157 in 1 : vector<32x1xf32>, vector<32x1xf32>, vector<32x1xf32>, vector<32x1xf32> -> vector<32x4xf32>
    %c0_58 = arith.constant 0 : index
    %c0_59 = arith.constant 0 : index
    %165 = vector.load %arg19[%c0_58, %c0_59] : memref<32x4xf32, #tpu.memory_space<vmem>>, vector<32x4xf32>
    tpu.vector_store %arg19[%c0_58, %c0_59], %164 {strides = array<i32>} : memref<32x4xf32, #tpu.memory_space<vmem>>, vector<32x4xf32>,
    %166 = tpu.concatenate %68, %99, %130, %161 in 1 : vector<32x8xf32>, vector<32x8xf32>, vector<32x8xf32>, vector<32x8xf32> -> vector<32x32xf32>
    %c0_60 = arith.constant 0 : index
    %c0_61 = arith.constant 0 : index
    %167 = vector.load %arg17[%c0_60, %c0_61] : memref<32x32xf32, #tpu.memory_space<vmem>>, vector<32x32xf32>
    tpu.vector_store %arg17[%c0_60, %c0_61], %166 {strides = array<i32>} : memref<32x32xf32, #tpu.memory_space<vmem>>, vector<32x32xf32>,
    %c1_i32 = arith.constant 1 : i32
    %168 = arith.cmpi eq, %arg1, %c1_i32 : i32
    %169 = arith.extui %168 : i1 to i32
    %c0_i32_62 = arith.constant 0 : i32
    %170 = arith.cmpi ne, %169, %c0_i32_62 : i32
    scf.if %170 {
      %c0_63 = arith.constant 0 : index
      %c0_64 = arith.constant 0 : index
      %171 = vector.load %arg19[%c0_63, %c0_64] : memref<32x4xf32, #tpu.memory_space<vmem>>, vector<32x1xf32>
      %172 = tpu.reciprocal %171 {approx = true} : vector<32x1xf32> -> vector<32x1xf32>
      %c0_65 = arith.constant 0 : index
      %c0_66 = arith.constant 0 : index
      %173 = vector.load %arg17[%c0_65, %c0_66] : memref<32x32xf32, #tpu.memory_space<vmem>>, vector<32x8xf32>
      %174 = vector.broadcast %172 : vector<32x1xf32> to vector<32x8xf32>
      %175 = arith.mulf %173, %174 : vector<32x8xf32>
      %c0_67 = arith.constant 0 : index
      %c1 = arith.constant 1 : index
      %176 = vector.load %arg19[%c0_67, %c1] : memref<32x4xf32, #tpu.memory_space<vmem>>, vector<32x1xf32>
      %177 = tpu.reciprocal %176 {approx = true} : vector<32x1xf32> -> vector<32x1xf32>
      %c0_68 = arith.constant 0 : index
      %c8 = arith.constant 8 : index
      %178 = vector.load %arg17[%c0_68, %c8] : memref<32x32xf32, #tpu.memory_space<vmem>>, vector<32x8xf32>
      %179 = vector.broadcast %177 : vector<32x1xf32> to vector<32x8xf32>
      %180 = arith.mulf %178, %179 : vector<32x8xf32>
      %c0_69 = arith.constant 0 : index
      %c2 = arith.constant 2 : index
      %181 = vector.load %arg19[%c0_69, %c2] : memref<32x4xf32, #tpu.memory_space<vmem>>, vector<32x1xf32>
      %182 = tpu.reciprocal %181 {approx = true} : vector<32x1xf32> -> vector<32x1xf32>
      %c0_70 = arith.constant 0 : index
      %c16 = arith.constant 16 : index
      %183 = vector.load %arg17[%c0_70, %c16] : memref<32x32xf32, #tpu.memory_space<vmem>>, vector<32x8xf32>
      %184 = vector.broadcast %182 : vector<32x1xf32> to vector<32x8xf32>
      %185 = arith.mulf %183, %184 : vector<32x8xf32>
      %c0_71 = arith.constant 0 : index
      %c3 = arith.constant 3 : index
      %186 = vector.load %arg19[%c0_71, %c3] : memref<32x4xf32, #tpu.memory_space<vmem>>, vector<32x1xf32>
      %187 = tpu.reciprocal %186 {approx = true} : vector<32x1xf32> -> vector<32x1xf32>
      %c0_72 = arith.constant 0 : index
      %c24 = arith.constant 24 : index
      %188 = vector.load %arg17[%c0_72, %c24] : memref<32x32xf32, #tpu.memory_space<vmem>>, vector<32x8xf32>
      %189 = vector.broadcast %187 : vector<32x1xf32> to vector<32x8xf32>
      %190 = arith.mulf %188, %189 : vector<32x8xf32>
      %191 = tpu.concatenate %175, %180, %185, %190 in 1 : vector<32x8xf32>, vector<32x8xf32>, vector<32x8xf32>, vector<32x8xf32> -> vector<32x32xf32>
      %c0_73 = arith.constant 0 : index
      %c0_74 = arith.constant 0 : index
      %c0_75 = arith.constant 0 : index
      %192 = vector.load %arg15[%c0_73, %c0_74, %c0_75] : memref<1x32x32xf32, #tpu.memory_space<vmem>>, vector<1x32x32xf32>
      %193 = vector.shape_cast %192 : vector<1x32x32xf32> to vector<32x32xf32>
      %194 = vector.shape_cast %191 : vector<32x32xf32> to vector<1x32x32xf32>
      tpu.vector_store %arg15[%c0_73, %c0_74, %c0_75], %194 {strides = array<i32>} : memref<1x32x32xf32, #tpu.memory_space<vmem>>, vector<1x32x32xf32>,
    } else {
    }
    return
  }
  func.func @transform_0(%arg0: i32, %arg1: i32, %arg2: memref<2xi32, #tpu.memory_space<smem>>) -> (i32, i32, i32) {
    %c0_i32 = arith.constant 0 : i32
    %c0_i32_0 = arith.constant 0 : i32
    %c0_i32_1 = arith.constant 0 : i32
    return %arg0, %c0_i32, %c0_i32_0 : i32, i32, i32
  }
  func.func @transform_1(%arg0: i32, %arg1: i32, %arg2: memref<2xi32, #tpu.memory_space<smem>>) -> (i32, i32, i32) {
    %c0_i32 = arith.constant 0 : i32
    %c0_i32_0 = arith.constant 0 : i32
    return %arg0, %arg1, %c0_i32 : i32, i32, i32
  }
  func.func @transform_2(%arg0: i32, %arg1: i32, %arg2: memref<2xi32, #tpu.memory_space<smem>>) -> (i32, i32, i32) {
    %c0_i32 = arith.constant 0 : i32
    %c0_i32_0 = arith.constant 0 : i32
    return %arg0, %arg1, %c0_i32 : i32, i32, i32
  }
  func.func @transform_3(%arg0: i32, %arg1: i32, %arg2: memref<2xi32, #tpu.memory_space<smem>>) -> (i32, i32, i32, i32) {
    %c0_i32 = arith.constant 0 : i32
    %c0_i32_0 = arith.constant 0 : i32
    %c0_i32_1 = arith.constant 0 : i32
    return %arg0, %c0_i32, %arg1, %c0_i32_0 : i32, i32, i32, i32
  }
  func.func @transform_4(%arg0: i32, %arg1: i32, %arg2: memref<2xi32, #tpu.memory_space<smem>>) -> (i32, i32) {
    %c0_i32 = arith.constant 0 : i32
    %c0_i32_0 = arith.constant 0 : i32
    %c0_i32_1 = arith.constant 0 : i32
    return %c0_i32, %c0_i32_0 : i32, i32
  }
  func.func @transform_5(%arg0: i32, %arg1: i32, %arg2: memref<2xi32, #tpu.memory_space<smem>>) -> (i32, i32) {
    %c0_i32 = arith.constant 0 : i32
    %c0_i32_0 = arith.constant 0 : i32
    %c0_i32_1 = arith.constant 0 : i32
    return %c0_i32, %c0_i32_0 : i32, i32
  }
  func.func @transform_6(%arg0: i32, %arg1: i32, %arg2: memref<2xi32, #tpu.memory_space<smem>>) -> (i32, i32) {
    %c0_i32 = arith.constant 0 : i32
    %c0_i32_0 = arith.constant 0 : i32
    %c0_i32_1 = arith.constant 0 : i32
    return %c0_i32, %c0_i32_0 : i32, i32
  }
  func.func @transform_7(%arg0: i32, %arg1: i32, %arg2: memref<2xi32, #tpu.memory_space<smem>>) -> (i32, i32) {
    %c0_i32 = arith.constant 0 : i32
    %c0_i32_0 = arith.constant 0 : i32
    %c0_i32_1 = arith.constant 0 : i32
    return %c0_i32, %c0_i32_0 : i32, i32
  }
  func.func @transform_8(%arg0: i32, %arg1: i32, %arg2: memref<2xi32, #tpu.memory_space<smem>>) -> (i32, i32) {
    %c0_i32 = arith.constant 0 : i32
    %c0_i32_0 = arith.constant 0 : i32
    %c0_i32_1 = arith.constant 0 : i32
    return %c0_i32, %c0_i32_0 : i32, i32
  }
  func.func @transform_9(%arg0: i32, %arg1: i32, %arg2: memref<2xi32, #tpu.memory_space<smem>>) -> (i32, i32) {
    %c0_i32 = arith.constant 0 : i32
    %c0_i32_0 = arith.constant 0 : i32
    %c0_i32_1 = arith.constant 0 : i32
    return %c0_i32, %c0_i32_0 : i32, i32
  }
  func.func @transform_10(%arg0: i32, %arg1: i32, %arg2: memref<2xi32, #tpu.memory_space<smem>>) -> (i32, i32) {
    %c0_i32 = arith.constant 0 : i32
    %c0_i32_0 = arith.constant 0 : i32
    %c0_i32_1 = arith.constant 0 : i32
    return %c0_i32, %c0_i32_0 : i32, i32
  }
  func.func @transform_11(%arg0: i32, %arg1: i32, %arg2: memref<2xi32, #tpu.memory_space<smem>>) -> (i32, i32) {
    %c0_i32 = arith.constant 0 : i32
    %c0_i32_0 = arith.constant 0 : i32
    %c0_i32_1 = arith.constant 0 : i32
    return %c0_i32, %c0_i32_0 : i32, i32
  }
  func.func @transform_12(%arg0: i32, %arg1: i32, %arg2: memref<2xi32, #tpu.memory_space<smem>>) -> (i32, i32, i32) {
    %c0_i32 = arith.constant 0 : i32
    %c0_i32_0 = arith.constant 0 : i32
    %c0_i32_1 = arith.constant 0 : i32
    return %arg0, %c0_i32, %c0_i32_0 : i32, i32, i32
  }
}

</mosaic_0001>

<bundles_post_ra>
// kernel: tpu_custom_call.1
= control target key start
LH: loop header
LB: loop body
LE: loop exit
PB: predicated region body
PF: predicated region fallthrough
CT: control target
= control target key end

     0   :  { %s12155_s0 = inlined_call_operand.hbm [shape: s32[2], index: 0, kind: input, shape index: {}]   ;;  %s12156_s1 = inlined_call_operand.hbm [shape: f32[2,32,32], index: 1, kind: input, shape index: {}]   ;;  %s12157_s2 = inlined_call_operand.hbm [shape: f32[2,32,32], index: 2, kind: input, shape index: {}]   ;;  %s12158_s3 = inlined_call_operand.hbm [shape: f32[2,32,32], index: 3, kind: input, shape index: {}]   ;;  %s12159_s4 = inlined_call_operand.hbm [shape: f32[2,32,32,32], index: 4, kind: input, shape index: {}]   ;;  %s12160_s5 = inlined_call_operand.hbm [shape: f32[32,32], index: 5, kind: input, shape index: {}]   ;;  %s12161_s6 = inlined_call_operand.hbm [shape: f32[1,32], index: 6, kind: input, shape index: {}]   ;;  %s12162_s7 = inlined_call_operand.hbm [shape: f32[32,32], index: 7, kind: input, shape index: {}]   ;;  %s12163_s8 = inlined_call_operand.hbm [shape: f32[1,32], index: 8, kind: input, shape index: {}]   ;;  %s12164_s9 = inlined_call_operand.hbm [shape: f32[32,32], index: 9, kind: input, shape index: {}]   ;;  %s12165_s10 = inlined_call_operand.hbm [shape: f32[1,32], index: 10, kind: input, shape index: {}]   ;;  %s12166_s11 = inlined_call_operand.hbm [shape: f32[32,32], index: 11, kind: input, shape index: {}]   ;;  %s12167_s12 = inlined_call_operand.hbm [shape: f32[1,32], index: 12, kind: input, shape index: {}]   ;;  %s12168_s13 = inlined_call_operand.hbm [shape: f32[2,32,32], index: 13, kind: output, shape index: {}]  }
   0x1   :  { %12370 = sst [smem:[#allocation152_spill]] %s12156_s1  ;;  %s7810_s27 = scalar_lea.hbm %s12155_s0, 16 }
   0x2   :  { %12371 = sst [smem:[#allocation153_spill]] %s12157_s2  ;;  %p7811_p0 = scmp.ne.s32.totalorder %s12155_s0, %s7810_s27 }
   0x3   :  { %12372 = sst [smem:[#allocation154_spill]] %s12159_s4  ;;  %p7814_p1 = scmp.lt.u32.totalorder %s7810_s27, %s12155_s0 }
   0x4   :  { %12373 = sst [smem:[#allocation155_spill]] %s12160_s5 }
   0x5   :  { %12374 = sst [smem:[#allocation156_spill]] %s12161_s6  ;;  %p7816_p2 = pnand %p7814_p1, %p7811_p0 }
   0x6   :  { %12375 = sst [smem:[#allocation157_spill]] %s12162_s7 }
   0x7   :  { %12376 = sst [smem:[#allocation158_spill]] %s12163_s8 }
   0x8   :  { %12377 = sst [smem:[#allocation159_spill]] %s12168_s13 }
   0x9   :  { %7819 = shalt.err (!%p7816_p2)  }
   0xa   :  { %s8282_s15 = smov [#allocation7]  }
   0xb   :  { %19 = dma.hbm_to_smem %s12155_s0, 16, %s8282_s15, [#allocation6] }
   0xc   :  { %8200 = dma.done.wait [#allocation6], 16 }
   0xd   :  { %8201 = vsyncadd [#allocation6], 4294967280 }
   0xe   :  { %21 = sfence }
   0xf   :  { %22 = vsyncpa [#allocation9], 0 }
  0x10   :  { %24 = vsyncpa [#allocation9 + $0x1], 0 }
  0x11   :  { %25 = vsyncpa [#allocation12], 0 }
  0x12   :  { %27 = vsyncpa [#allocation12 + $0x1], 0 }
  0x13   :  { %28 = vsyncpa [#allocation15], 0 }
  0x14   :  { %30 = vsyncpa [#allocation15 + $0x1], 0 }
  0x15   :  { %31 = vsyncpa [#allocation18], 0 }
  0x16   :  { %32 = vsyncpa [#allocation21], 0 }
  0x17   :  { %33 = vsyncpa [#allocation24], 0 }
  0x18   :  { %34 = vsyncpa [#allocation27], 0 }
  0x19   :  { %35 = vsyncpa [#allocation10], 0 }
  0x1a   :  { %37 = vsyncpa [#allocation10 + $0x1], 0  ;;  %s8405_s18 = smov 0   ;;  %s8407_s19 = smov 0  }
  0x1b   :  { %s8409_s0 = smov 0   ;;  %s8411_s20 = smov 0  }
  0x1c   :  { %s8413_s21 = smov 0   ;;  %s8415_s22 = smov 0  }
  0x1d   :  { %s8417_s23 = smov 0   ;;  %s8419_s24 = smov 0  }
  0x1e   :  { %s8421_s25 = smov 0   ;;  %s8423_s26 = smov 0  }
  0x1f   :  { %s8425_s27 = smov 0  }
  0x20 LB: > { %12378 = sst [smem:[#allocation42_spill]] %s8244_s19  ;;  %s8461_s28 = sadd.s32 4294967295, %s8280_s27   ;;  %s8280_s27 = sphi %s8425_s27, %s43_s27   ;;  %s8276_s26 = sphi %s8423_s26, %s12816_s26   ;;  %s8272_s25 = sphi %s8421_s25, %s12815_s25   ;;  %s8268_s24 = sphi %s8419_s24, %s12814_s24   ;;  %s8264_s23 = sphi %s8417_s23, %s12813_s23   ;;  %s8260_s22 = sphi %s8415_s22, %s12812_s22   ;;  %s8256_s21 = sphi %s8413_s21, %s12811_s21   ;;  %s8252_s20 = sphi %s8411_s20, %s12805_s20   ;;  %s8248_s0 = sphi %s8409_s0, %s12810_s0   ;;  %s8244_s19 = sphi %s8407_s19, %s12809_s19   ;;  %s8240_s18 = sphi %s8405_s18, %s12803_s18  }
  0x21   : > { %12379 = sst [smem:[#allocation43_spill]] %s8252_s20  ;;  %s6841_s29 = sadd.s32 4294967294, %s8280_s27  }
  0x22   : > { %12380 = sst [smem:[#allocation44_spill]] %s8256_s21  ;;  %s52_s30 = sadd.s32 1, %s8272_s25 }
  0x23   : > { %12381 = sst [smem:[#allocation45_spill]] %s8264_s23  ;;  %s55_s14 = sadd.s32 1, %s8276_s26 }
  0x24   : > { %12382 = sst [smem:[#allocation46_spill]] %s8268_s24  ;;  %p53_p3 = scmp.ge.s32.totalorder %s52_s30, 2 }
  0x25   : > { %12383 = sst [smem:[#allocation47_spill]] %s8461_s28  ;;  %s62_s15 = sadd.s32 1, %s8260_s22 }
  0x26   : > { %p69_p4 = scmp.ne.s32.totalorder %s8260_s22, %s8256_s21  ;;  %p70_p5 = scmp.eq.s32.totalorder %s8280_s27, 0 }
  0x27   : > { %s12818_s30 = smov (%p53_p3, %s52_s30), 0  ;;  %s12820_s14 = smov (!%p53_p3, %s55_s14), %s8276_s26 }
  0x28   : > { %12384 = sst [smem:[#allocation48_spill]] %s12818_s30  ;;  %p8478_p6 = por %p70_p5, %p69_p4 }
  0x29   : > { %p12177_p7 = scmp.ne.s32.totalorder %s8256_s21, %s8252_s20  ;;  %p57_p8 = scmp.ge.s32.totalorder %s12820_s14, 2 }
  0x2a   : > { %s12385_s16 = scalar_select %p8478_p6, 1, 0 }
  0x2b   : > { %p12187_p9 = scmp.eq.s32.totalorder %s8461_s28, 0  ;;  %s86_s17 = ssub.s32 %s8272_s25, %s12818_s30 }
  0x2c   : > { %12386 = sst [smem:[#allocation49_spill]] %s12385_s16  ;;  %s90_s13 = sadd.s32 1, %s8248_s0 }
  0x2d   : > { %s12822_s14 = smov (%p57_p8, %s12820_s14), 0  ;;  %p8495_p10 = por %p12187_p9, %p12177_p7 }
  0x2e   : > { %12387 = sst [smem:[#allocation50_spill]] %s12822_s14  ;;  %p97_p11 = scmp.ne.s32.totalorder %s8248_s0, %s8244_s19 }
  0x2f   : > { %s12388_s24 = scalar_select %p8495_p10, 1, 0 }
  0x30   : > { %s59_s23 = ssub.s32 %s8276_s26, %s12822_s14  ;;  %p103_p12 = scmp.ne.s32.totalorder %s8244_s19, %s8240_s18 }
  0x31   : > { %12389 = sst [smem:[#allocation51_spill]] %s12388_s24  ;;  %p60_p13 = scmp.eq.s32.totalorder %s59_s23, 0 }
  0x32   : > { %s87_s30 = sor.u32 %s86_s17, %s59_s23  ;;  %p8507_p1 = por %p97_p11, %p70_p5 }
  0x33   : > { %p88_p0 = scmp.eq.s32.totalorder %s87_s30, 0  ;;  %p8519_p2 = por %p103_p12, %p12187_p9 }
  0x34   : > { %s12390_s4 = scalar_select %p8507_p1, 1, 0 }
  0x35   : > { %s8512_s1 = scalar_select %p60_p13, %s8260_s22, %s62_s15  }
  0x36   : > { %s8515_s16 = scalar_select %p88_p0, %s8248_s0, %s90_s13  }
  0x37   : > { %12391 = sst [smem:[#allocation52_spill]] %s8512_s1  ;;  %p351_p3 = scmp.eq.s32.totalorder %s8461_s28, 3 }
  0x38   : > { %12392 = sst [smem:[#allocation53_spill]] %s8515_s16  ;;  %p357_p8 = scmp.eq.s32.totalorder %s6841_s29, 3 }
  0x39   : > { %s12393_s24 = scalar_select %p8519_p2, 1, 0 }
  0x3a   : > { %p6842_p7 = scmp.ge.s32.totalorder %s8280_s27, 1  ;;  %p8528_p10 = por %p351_p3, %p69_p4 }
  0x3b   : > { %12394 = sst [smem:[#allocation54_spill]] %s12393_s24  ;;  %p364_p5 = scmp.lt.s32.totalorder %s8280_s27, 5 }
  0x3c   : > { %s12395_s18 = scalar_select %p8528_p10, 1, 0 }
  0x3d   : > { %p12397_p11 = scmp.ne.s32.totalorder %s8256_s21, %s8252_s20  ;;  %p8540_p0 = pnand %p6842_p7, %p364_p5 }
  0x3e   : > { %12396 = sst [smem:[#allocation55_spill]] %s12395_s18  ;;  %s8283_s30 = smov [#allocation17]  }
  0x3f   : > { %p8536_p13 = por %p357_p8, %p12397_p11  ;;  %s390_s15 = sshll.u32 %s8283_s30, 4  ;;  %s391_s15 = int_to_ptr.vmem [resolvable:$true] %s390_s15 }
  0x40   : > { %s12400_s13 = scalar_select %p8540_p0, 1, 0 }
  0x41   : > { %s12398_s23 = scalar_select %p8536_p13, 1, 0 }
  0x42   : > { %p7494_p12 = pneg %p8540_p0  ;;  %s8284_s29 = smov [#allocation20]  }
  0x43   : > { %12399 = sst [smem:[#allocation56_spill]] %s12398_s23  ;;  %s414_s17 = sshll.u32 %s8284_s29, 4  ;;  %s8552_s17 = int_to_ptr.vmem [resolvable:$true] %s414_s17 }
  0x44   : > { %p8548_p4 = pnand %p7494_p12, %p12187_p9  ;;  %s8285_s1 = smov [#allocation23]  }
  0x45   : > { %s438_s16 = sshll.u32 %s8285_s1, 4  ;;  %s12402_s6 = sld [smem:[#allocation156_spill]]  ;;  %s8554_s16 = int_to_ptr.vmem [resolvable:$true] %s438_s16 }
  0x46   : > { %p8564_p3 = pneg %p8548_p4 }
  0x4b   : > { %s7820_s30 = scalar_lea.hbm %s12402_s6, 16 }
  0x4c   : > { %p7821_p7 = scmp.ne.s32.totalorder %s12402_s6, %s7820_s30  ;;  %p7827_p11 = scmp.lt.u32.totalorder %s7820_s30, %s12402_s6 }
  0x4e   : > { %p7823_p8 = pnand %p8564_p3, %p7821_p7 }
  0x50   : > { %p7824_p5 = pneg %p7823_p8 }
  0x52   : > { %p7829_p12 = pnand %p7827_p11, %p7824_p5 }
  0x54   : > { %7832 = shalt.err (!%p7829_p12)
}
  0x55   : > { %s7833_s20 = scalar_lea.vmem %s391_s15, 16  ;;  %s7840_s24 = scalar_lea.vmem %s391_s15, 32 }
  0x56   : > { %p7834_p9 = scmp.ne.s32.totalorder %s391_s15, %s7833_s20  ;;  %p7841_p2 = scmp.lt.s32.totalorder %s391_s15, %s391_s15 }
  0x57   : > { %p7842_p0 = scmp.lt.s32.totalorder %s7840_s24, %s7833_s20 }
  0x58   : > { %p7836_p13 = pnand %p7834_p9, %p8564_p3 }
  0x59   : > { %p7843_p6 = por %p7842_p0, %p7841_p2 }
  0x5a   : > { %p7837_p10 = pneg %p7836_p13 }
  0x5c   : > { %p7844_p1 = pnand %p7843_p6, %p7837_p10 }
  0x5e   : > { %7847 = shalt.err (!%p7844_p1)
}
  0x5f   : > { %7500 = dma.hbm_to_vmem [thread:$0]  (!%p8548_p4), %s12402_s6, 16, %s391_s15, [#allocation18]  }
  0x60   : > { %s12404_s8 = sld [smem:[#allocation158_spill]] }
  0x66   : > { %s7848_s1 = scalar_lea.hbm %s12404_s8, 16 }
  0x67   : > { %p7849_p9 = scmp.ne.s32.totalorder %s12404_s8, %s7848_s1  ;;  %p7855_p6 = scmp.lt.u32.totalorder %s7848_s1, %s12404_s8 }
  0x69   : > { %p7851_p13 = pnand %p7849_p9, %p8564_p3 }
  0x6b   : > { %p7852_p2 = pneg %p7851_p13 }
  0x6d   : > { %p7857_p10 = pnand %p7855_p6, %p7852_p2 }
  0x6f   : > { %7860 = shalt.err (!%p7857_p10)
}
  0x70   : > { %s7861_s15 = scalar_lea.vmem %s8552_s17, 16  ;;  %s7868_s21 = scalar_lea.vmem %s8552_s17, 32 }
  0x71   : > { %p7862_p1 = scmp.ne.s32.totalorder %s8552_s17, %s7861_s15  ;;  %p7869_p8 = scmp.lt.s32.totalorder %s8552_s17, %s8552_s17 }
  0x72   : > { %p7870_p5 = scmp.lt.s32.totalorder %s7868_s21, %s7861_s15 }
  0x73   : > { %p7864_p0 = pnand %p7862_p1, %p8564_p3 }
  0x74   : > { %p7871_p11 = por %p7870_p5, %p7869_p8 }
  0x75   : > { %p7865_p7 = pneg %p7864_p0 }
  0x77   : > { %p7872_p12 = pnand %p7871_p11, %p7865_p7 }
  0x79   : > { %7875 = shalt.err (!%p7872_p12)
}
  0x7a   : > { %7506 = dma.hbm_to_vmem [thread:$0]  (!%p8548_p4), %s12404_s8, 16, %s8552_s17, [#allocation21]  }
  0x7b   : > { %s7876_s30 = scalar_lea.hbm %s12165_s10, 16 }
  0x7c   : > { %p7877_p9 = scmp.ne.s32.totalorder %s12165_s10, %s7876_s30  ;;  %p7883_p6 = scmp.lt.u32.totalorder %s7876_s30, %s12165_s10 }
  0x7e   : > { %p7879_p13 = pnand %p7877_p9, %p8564_p3 }
  0x80   : > { %p7880_p2 = pneg %p7879_p13 }
  0x82   : > { %p7885_p10 = pnand %p7883_p6, %p7880_p2 }
  0x84   : > { %7888 = shalt.err (!%p7885_p10)
}
  0x85   : > { %s7889_s17 = scalar_lea.vmem %s8554_s16, 16  ;;  %s7896_s21 = scalar_lea.vmem %s8554_s16, 32 }
  0x86   : > { %p7890_p1 = scmp.ne.s32.totalorder %s8554_s16, %s7889_s17  ;;  %p7897_p8 = scmp.lt.s32.totalorder %s8554_s16, %s8554_s16 }
  0x87   : > { %p7898_p5 = scmp.lt.s32.totalorder %s7896_s21, %s7889_s17 }
  0x88   : > { %p7892_p0 = pnand %p7890_p1, %p8564_p3 }
  0x89   : > { %p7899_p11 = por %p7898_p5, %p7897_p8 }
  0x8a   : > { %p7893_p7 = pneg %p7892_p0 }
  0x8c   : > { %p7900_p12 = pnand %p7899_p11, %p7893_p7 }
  0x8e   : > { %7903 = shalt.err (!%p7900_p12)
}
  0x8f   : > { %7512 = dma.hbm_to_vmem [thread:$0]  (!%p8548_p4), %s12165_s10, 16, %s8554_s16, [#allocation24]  }
  0x90   : > { %s8286_s23 = smov [#allocation16]   ;;  %s12405_s5 = sld [smem:[#allocation155_spill]] }
  0x91   : > { %s376_s19 = sshll.u32 %s8286_s23, 4  ;;  %s377_s19 = int_to_ptr.vmem [resolvable:$true] %s376_s19 }
  0x96   : > { %s7904_s20 = scalar_lea.hbm %s12405_s5, 512 }
  0x97   : > { %p7905_p9 = scmp.ne.s32.totalorder %s12405_s5, %s7904_s20  ;;  %p7911_p6 = scmp.lt.u32.totalorder %s7904_s20, %s12405_s5 }
  0x99   : > { %p7907_p13 = pnand %p7905_p9, %p8564_p3 }
  0x9b   : > { %p7908_p2 = pneg %p7907_p13 }
  0x9d   : > { %p7913_p10 = pnand %p7911_p6, %p7908_p2 }
  0x9f   : > { %7916 = shalt.err (!%p7913_p10)
}
  0xa0   : > { %s7917_s16 = scalar_lea.vmem %s377_s19, 512  ;;  %p7925_p8 = scmp.lt.s32.totalorder %s377_s19, %s377_s19 }
  0xa1   : > { %p7918_p1 = scmp.ne.s32.totalorder %s377_s19, %s7917_s16  ;;  %p7926_p5 = scmp.lt.s32.totalorder %s7917_s16, %s7917_s16 }
  0xa3   : > { %p7920_p0 = pnand %p7918_p1, %p8564_p3  ;;  %p7927_p11 = por %p7926_p5, %p7925_p8 }
  0xa5   : > { %p7921_p7 = pneg %p7920_p0 }
  0xa7   : > { %p7928_p12 = pnand %p7927_p11, %p7921_p7 }
  0xa9   : > { %7931 = shalt.err (!%p7928_p12)
}
  0xaa   : > { %s8287_s28 = smov 128   ;;  %s8288_s18 = smov 8  }
  0xab   : > { %7497 = dma.hbm_to_vmem [thread:$0]  (!%p8548_p4), %s12405_s5, 512, %s377_s19, [#allocation15], %s8287_s28, %s8287_s28, %s8288_s18  }
  0xac   : > { %s8289_s1 = smov [#allocation19]   ;;  %s8290_s24 = smov [#allocation22]  }
  0xad   : > { %s400_s20 = sshll.u32 %s8289_s1, 4  ;;  %s424_s15 = sshll.u32 %s8290_s24, 4  ;;  %s401_s20 = int_to_ptr.vmem [resolvable:$true] %s400_s20  ;;  %s8649_s15 = int_to_ptr.vmem [resolvable:$true] %s424_s15 }
  0xae   : > { %s12406_s7 = sld [smem:[#allocation157_spill]] }
  0xb4   : > { %s7932_s16 = scalar_lea.hbm %s12406_s7, 512 }
  0xb5   : > { %p7933_p9 = scmp.ne.s32.totalorder %s12406_s7, %s7932_s16  ;;  %p7939_p6 = scmp.lt.u32.totalorder %s7932_s16, %s12406_s7 }
  0xb7   : > { %p7935_p13 = pnand %p7933_p9, %p8564_p3 }
  0xb9   : > { %p7936_p2 = pneg %p7935_p13 }
  0xbb   : > { %p7941_p10 = pnand %p7939_p6, %p7936_p2 }
  0xbd   : > { %7944 = shalt.err (!%p7941_p10)
}
  0xbe   : > { %s7945_s30 = scalar_lea.vmem %s401_s20, 512  ;;  %p7953_p8 = scmp.lt.s32.totalorder %s401_s20, %s401_s20 }
  0xbf   : > { %p7946_p1 = scmp.ne.s32.totalorder %s401_s20, %s7945_s30  ;;  %p7954_p5 = scmp.lt.s32.totalorder %s7945_s30, %s7945_s30 }
  0xc1   : > { %p7948_p0 = pnand %p7946_p1, %p8564_p3  ;;  %p7955_p11 = por %p7954_p5, %p7953_p8 }
  0xc3   : > { %p7949_p7 = pneg %p7948_p0 }
  0xc5   : > { %p7956_p12 = pnand %p7955_p11, %p7949_p7 }
  0xc7   : > { %7959 = shalt.err (!%p7956_p12)
}
  0xc8   : > { %7503 = dma.hbm_to_vmem [thread:$0]  (!%p8548_p4), %s12406_s7, 512, %s401_s20, [#allocation18], %s8287_s28, %s8287_s28, %s8288_s18  }
  0xc9   : > { %s7960_s17 = scalar_lea.hbm %s12164_s9, 512 }
  0xca   : > { %p7961_p9 = scmp.ne.s32.totalorder %s12164_s9, %s7960_s17  ;;  %p7967_p6 = scmp.lt.u32.totalorder %s7960_s17, %s12164_s9 }
  0xcc   : > { %p7963_p13 = pnand %p7961_p9, %p8564_p3 }
  0xce   : > { %p7964_p2 = pneg %p7963_p13 }
  0xd0   : > { %p7969_p10 = pnand %p7967_p6, %p7964_p2 }
  0xd2   : > { %7972 = shalt.err (!%p7969_p10)
}
  0xd3   : > { %s7973_s20 = scalar_lea.vmem %s8649_s15, 512  ;;  %p7981_p8 = scmp.lt.s32.totalorder %s8649_s15, %s8649_s15 }
  0xd4   : > { %p7974_p1 = scmp.ne.s32.totalorder %s8649_s15, %s7973_s20  ;;  %p7982_p5 = scmp.lt.s32.totalorder %s7973_s20, %s7973_s20 }
  0xd6   : > { %p7976_p0 = pnand %p7974_p1, %p8564_p3  ;;  %p7983_p11 = por %p7982_p5, %p7981_p8 }
  0xd8   : > { %p7977_p7 = pneg %p7976_p0 }
  0xda   : > { %p7984_p12 = pnand %p7983_p11, %p7977_p7 }
  0xdc   : > { %7987 = shalt.err (!%p7984_p12)
}
  0xdd   : > { %7509 = dma.hbm_to_vmem [thread:$0]  (!%p8548_p4), %s12164_s9, 512, %s8649_s15, [#allocation21], %s8287_s28, %s8287_s28, %s8288_s18  }
  0xde   : > { %s8291_s8 = smov [#allocation25]   ;;  %s8292_s24 = smov [#allocation26]  }
  0xdf   : > { %s448_s1 = sshll.u32 %s8291_s8, 4  ;;  %s462_s17 = sshll.u32 %s8292_s24, 4  ;;  %s449_s1 = int_to_ptr.vmem [resolvable:$true] %s448_s1  ;;  %s8698_s17 = int_to_ptr.vmem [resolvable:$true] %s462_s17 }
  0xe0   : > { %s7988_s23 = scalar_lea.hbm %s12166_s11, 512 }
  0xe1   : > { %p7989_p9 = scmp.ne.s32.totalorder %s12166_s11, %s7988_s23  ;;  %p7995_p6 = scmp.lt.u32.totalorder %s7988_s23, %s12166_s11 }
  0xe3   : > { %p7991_p13 = pnand %p7989_p9, %p8564_p3 }
  0xe5   : > { %p7992_p2 = pneg %p7991_p13 }
  0xe7   : > { %p7997_p10 = pnand %p7995_p6, %p7992_p2 }
  0xe9   : > { %8000 = shalt.err (!%p7997_p10)
}
  0xea   : > { %s8001_s6 = scalar_lea.vmem %s449_s1, 512  ;;  %p8009_p8 = scmp.lt.s32.totalorder %s449_s1, %s449_s1 }
  0xeb   : > { %p8002_p1 = scmp.ne.s32.totalorder %s449_s1, %s8001_s6  ;;  %p8010_p5 = scmp.lt.s32.totalorder %s8001_s6, %s8001_s6 }
  0xed   : > { %p8004_p0 = pnand %p8002_p1, %p8564_p3  ;;  %p8011_p11 = por %p8010_p5, %p8009_p8 }
  0xef   : > { %p8005_p7 = pneg %p8004_p0 }
  0xf1   : > { %p8012_p12 = pnand %p8011_p11, %p8005_p7 }
  0xf3   : > { %8015 = shalt.err (!%p8012_p12)
}
  0xf4   : > { %7515 = dma.hbm_to_vmem [thread:$0]  (!%p8548_p4), %s12166_s11, 512, %s449_s1, [#allocation24], %s8287_s28, %s8287_s28, %s8288_s18  }
  0xf5   : > { %s8016_s23 = scalar_lea.hbm %s12167_s12, 16 }
  0xf6   : > { %p8017_p9 = scmp.ne.s32.totalorder %s12167_s12, %s8016_s23  ;;  %p8023_p6 = scmp.lt.u32.totalorder %s8016_s23, %s12167_s12 }
  0xf8   : > { %p8019_p13 = pnand %p8017_p9, %p8564_p3 }
  0xfa   : > { %p8020_p2 = pneg %p8019_p13 }
  0xfc   : > { %p8025_p10 = pnand %p8023_p6, %p8020_p2 }
  0xfe   : > { %8028 = shalt.err (!%p8025_p10)
}
  0xff   : > { %s8029_s28 = scalar_lea.vmem %s8698_s17, 16  ;;  %s8036_s18 = scalar_lea.vmem %s8698_s17, 32 }
 0x100   : > { %p8030_p1 = scmp.ne.s32.totalorder %s8698_s17, %s8029_s28  ;;  %p8037_p8 = scmp.lt.s32.totalorder %s8698_s17, %s8698_s17 }
 0x101   : > { %p8038_p5 = scmp.lt.s32.totalorder %s8036_s18, %s8029_s28 }
 0x102   : > { %p8032_p0 = pnand %p8030_p1, %p8564_p3 }
 0x103   : > { %p8039_p11 = por %p8038_p5, %p8037_p8 }
 0x104   : > { %p8033_p7 = pneg %p8032_p0 }
 0x106   : > { %p8040_p12 = pnand %p8039_p11, %p8033_p7 }
 0x108   : > { %8043 = shalt.err (!%p8040_p12)
}
 0x109   : > { %7518 = dma.hbm_to_vmem [thread:$0]  (!%p8548_p4), %s12167_s12, 16, %s8698_s17, [#allocation27]  }
 0x10a   : > { %p6851_p9 = scmp.ge.s32.totalorder %s8280_s27, 4 }
 0x10b   : > { %s12196_s29 = sand.u32 (!%p6851_p9), 1, %s8280_s27   ;;  %s12198_s8 = sand.u32 (!%p6851_p9), 1, %s8248_s0  }
 0x10c   : > { %469 = sbr.rel (%p6851_p9) target bundleno = 370 (0x172), region = 48  ;;  %s8750_s14 = sshll.u32 (!%p6851_p9), %s12198_s8, 4 }
 0x10d   : > { %s12197_s24 = sshll.u32 (!%p6851_p9), %s8272_s25, 1  ;;  %s6857_s21 = sshll.u32 (!%p6851_p9), %s8276_s26, 2 }
 0x10e   : > { %s498_s17 = scalar_lea.vmem (!%p6851_p9), [#allocation11], %s8750_s14  ;;  %s504_s23 = sadd.s32 (!%p6851_p9), %s6857_s21, %s12197_s24 }
 0x10f   : > { %s507_s16 = sshll.u32 (!%p6851_p9), %s498_s17, 4  ;;  %s6858_s19 = sshll.u32 (!%p6851_p9), %s504_s23, 7  ;;  %s8757_s16 = int_to_ptr.vmem [resolvable:$true] %s507_s16 }
 0x110   : > { %s12407_s2 = sld [smem:[#allocation153_spill]] (!%p6851_p9)  ;;  %s8767_s1 = scalar_lea.hbm (!%p6851_p9), %s12158_s3, %s6858_s19 }
 0x111   : > { %s8771_s6 = scalar_lea.sflag (!%p6851_p9), [#allocation12], %s12196_s29  ;;  %p12408_p3 = scmp.ne.s32.totalorder (!%p6851_p9), %s12390_s4, 0 }
 0x116   : > { %s8762_s15 = scalar_lea.hbm %s12407_s2, %s6858_s19  ;;  %s8048_s20 = scalar_lea.hbm %s12407_s2, 1024 }
 0x117   : > { %s8044_s21 = scalar_lea.hbm %s8762_s15, 256  ;;  %p8049_p6 = scmp.lt.u32.totalorder %s8762_s15, %s12407_s2 }
 0x118   : > { %p8045_p4 = scmp.ne.s32.totalorder %s8762_s15, %s8044_s21  ;;  %p8050_p10 = scmp.lt.u32.totalorder %s8048_s20, %s8044_s21 }
 0x119   : > { %p8052_p0 = scmp.lt.u32.totalorder %s8044_s21, %s8762_s15 }
 0x11a   : > { %p8046_p13 = pnand %p8045_p4, %p12408_p3  ;;  %p8051_p1 = por %p8050_p10, %p8049_p6 }
 0x11c   : > { %p8047_p2 = pneg %p8046_p13  ;;  %p8053_p7 = por %p8052_p0, %p8051_p1 }
 0x11e   : > { %p8054_p8 = pnand %p8053_p7, %p8047_p2 }
 0x120   : > { %8057 = shalt.err (!%p8054_p8)
}
 0x121   : > { %s8058_s19 = scalar_lea.vmem %s8757_s16, 256  ;;  %s8293_s18 = smov [#allocation11]  }
 0x122   : > { %p8059_p5 = scmp.ne.s32.totalorder %s8757_s16, %s8058_s19  ;;  %s8062_s17 = sshll.u32 %s8293_s18, 4  ;;  %s8063_s17 = int_to_ptr.vmem [resolvable:$false] %s8062_s17 }
 0x123   : > { %s8064_s23 = scalar_lea.vmem %s8063_s17, 512  ;;  %p8065_p9 = scmp.lt.s32.totalorder %s8757_s16, %s8063_s17 }
 0x124   : > { %p8060_p11 = pnand %p8059_p5, %p12408_p3  ;;  %p8066_p4 = scmp.lt.s32.totalorder %s8064_s23, %s8058_s19 }
 0x126   : > { %p8061_p12 = pneg %p8060_p11  ;;  %p8067_p13 = por %p8066_p4, %p8065_p9 }
 0x128   : > { %p8068_p6 = pnand %p8067_p13, %p8061_p12 }
 0x12a   : > { %8071 = shalt.err (!%p8068_p6)
}
 0x12b   : > { %s8294_s21 = smov 128   ;;  %s12409_s20 = sld [smem:[#allocation49_spill]] }
 0x12c   : > { %s8295_s30 = smov 8   ;;  %s521_s28 = scalar_lea.vmem [#allocation13], %s8750_s14 }
 0x12d   : > { %7462 = dma.hbm_to_vmem [thread:$0]  (%p12408_p3), %s8762_s15, 256, %s8757_s16, %s8771_s6, %s8294_s21, %s8294_s21, %s8295_s30  }
 0x12e   : > { %s530_s19 = sshll.u32 %s521_s28, 4  ;;  %s473_s18 = sand.u32 1, %s8260_s22   ;;  %s8808_s19 = int_to_ptr.vmem [resolvable:$true] %s530_s19 }
 0x12f   : > { %s6852_s17 = sshll.u32 %s473_s18, 5  ;;  %s7007_s23 = sshll.u32 %s8276_s26, 9 }
 0x130   : > { %s12410_s8 = sld [smem:[#allocation152_spill]]  ;;  %s477_s5 = scalar_lea.vmem [#allocation8], %s6852_s17 }
 0x131   : > { %s484_s7 = sshll.u32 %s477_s5, 4  ;;  %s8810_s14 = scalar_lea.sflag [#allocation9], %s473_s18  ;;  %s8806_s7 = int_to_ptr.vmem [resolvable:$true] %s484_s7 }
 0x132   : > { %p12411_p10 = scmp.ne.s32.totalorder %s12409_s20, 0 }
 0x136   : > { %s8804_s2 = scalar_lea.hbm %s12410_s8, %s7007_s23  ;;  %s8076_s15 = scalar_lea.hbm %s12410_s8, 1024 }
 0x137   : > { %s8072_s16 = scalar_lea.hbm %s8804_s2, 512  ;;  %p8077_p7 = scmp.lt.u32.totalorder %s8804_s2, %s12410_s8 }
 0x138   : > { %p8073_p2 = scmp.ne.s32.totalorder %s8804_s2, %s8072_s16  ;;  %p8078_p8 = scmp.lt.u32.totalorder %s8076_s15, %s8072_s16 }
 0x139   : > { %p8080_p11 = scmp.lt.u32.totalorder %s8072_s16, %s8804_s2 }
 0x13a   : > { %p8074_p1 = pnand %p8073_p2, %p12411_p10  ;;  %p8079_p5 = por %p8078_p8, %p8077_p7 }
 0x13c   : > { %p8075_p0 = pneg %p8074_p1  ;;  %p8081_p12 = por %p8080_p11, %p8079_p5 }
 0x13e   : > { %p8082_p9 = pnand %p8081_p12, %p8075_p0 }
 0x140   : > { %8085 = shalt.err (!%p8082_p9)
}
 0x141   : > { %s8086_s5 = scalar_lea.vmem %s8806_s7, 512  ;;  %s8296_s18 = smov [#allocation8]  }
 0x142   : > { %p8087_p4 = scmp.ne.s32.totalorder %s8806_s7, %s8086_s5  ;;  %s8090_s17 = sshll.u32 %s8296_s18, 4  ;;  %s8091_s17 = int_to_ptr.vmem [resolvable:$false] %s8090_s17 }
 0x143   : > { %s8092_s29 = scalar_lea.vmem %s8091_s17, 1024  ;;  %p8093_p2 = scmp.lt.s32.totalorder %s8806_s7, %s8091_s17 }
 0x144   : > { %p8088_p13 = pnand %p8087_p4, %p12411_p10  ;;  %p8094_p1 = scmp.lt.s32.totalorder %s8092_s29, %s8086_s5 }
 0x146   : > { %p8089_p6 = pneg %p8088_p13  ;;  %p8095_p7 = por %p8094_p1, %p8093_p2 }
 0x148   : > { %p8096_p8 = pnand %p8095_p7, %p8089_p6 }
 0x14a   : > { %8099 = shalt.err (!%p8096_p8)
}
 0x14b   : > { %7461 = dma.hbm_to_vmem [thread:$0]  (%p12411_p10), %s8804_s2, 512, %s8806_s7, %s8810_s14, %s8294_s21, %s8294_s21, %s8295_s30  }
 0x14c   : > { %s8100_s16 = scalar_lea.hbm %s8767_s1, 256  ;;  %s8104_s20 = scalar_lea.hbm %s12158_s3, 1024 }
 0x14d   : > { %p8101_p0 = scmp.ne.s32.totalorder %s8767_s1, %s8100_s16  ;;  %p8105_p12 = scmp.lt.u32.totalorder %s8767_s1, %s12158_s3 }
 0x14e   : > { %p8106_p9 = scmp.lt.u32.totalorder %s8104_s20, %s8100_s16  ;;  %p8108_p13 = scmp.lt.u32.totalorder %s8100_s16, %s8767_s1 }
 0x14f   : > { %p8102_p5 = pnand %p8101_p0, %p12408_p3 }
 0x150   : > { %p8107_p4 = por %p8106_p9, %p8105_p12 }
 0x151   : > { %p8103_p11 = pneg %p8102_p5 }
 0x152   : > { %p8109_p6 = por %p8108_p13, %p8107_p4 }
 0x154   : > { %p8110_p2 = pnand %p8109_p6, %p8103_p11 }
 0x156   : > { %8113 = shalt.err (!%p8110_p2)
}
 0x157   : > { %s8114_s2 = scalar_lea.vmem %s8808_s19, 256  ;;  %s8297_s7 = smov [#allocation13]  }
 0x158   : > { %p8115_p10 = scmp.ne.s32.totalorder %s8808_s19, %s8114_s2  ;;  %s8118_s14 = sshll.u32 %s8297_s7, 4  ;;  %s8119_s14 = int_to_ptr.vmem [resolvable:$false] %s8118_s14 }
 0x159   : > { %s8120_s5 = scalar_lea.vmem %s8119_s14, 512  ;;  %p8121_p8 = scmp.lt.s32.totalorder %s8808_s19, %s8119_s14 }
 0x15a   : > { %p8116_p1 = pnand %p8115_p10, %p12408_p3  ;;  %p8122_p0 = scmp.lt.s32.totalorder %s8120_s5, %s8114_s2 }
 0x15c   : > { %p8117_p7 = pneg %p8116_p1  ;;  %p8123_p5 = por %p8122_p0, %p8121_p8 }
 0x15e   : > { %p8124_p12 = pnand %p8123_p5, %p8117_p7 }
 0x160   : > { %8127 = shalt.err (!%p8124_p12)
}
 0x161   : > { %7463 = dma.hbm_to_vmem [thread:$0]  (%p12408_p3), %s8767_s1, 256, %s8808_s19, %s8771_s6, %s8294_s21, %s8294_s21, %s8295_s30  }
 0x162   : > { %s12412_s18 = sand.u32 1, %s8248_s0   ;;  %s6865_s29 = sshll.u32 %s8276_s26, 7 }
 0x163   : > { %s6863_s17 = sshll.u32 %s12412_s18, 9  ;;  %s12413_s16 = sshll.u32 %s8272_s25, 1 }
 0x164   : > { %s550_s24 = sadd.s32 %s6865_s29, %s12413_s16  ;;  %s544_s15 = scalar_lea.vmem [#allocation14], %s6863_s17 }
 0x165   : > { %s565_s20 = sshll.u32 %s544_s15, 4  ;;  %s6866_s28 = sshll.u32 %s550_s24, 7  ;;  %s566_s20 = int_to_ptr.vmem [resolvable:$true] %s565_s20 }
 0x166   : > { %s7464_s1 = scalar_select %p12408_p3, [#allocation0], [#allocation31] }
 0x167   : > { %s8298_s6 = smov 512   ;;  %s8299_s30 = smov 256  }
 0x168   : > { %7465 = sst [smem:[#allocation30]] (%p12408_p3), %s8298_s6  ;;  %s8300_s19 = smov 2  }
 0x169   : > { %s557_s21 = sld [smem:[%s7464_s1]]   ;;  %s8301_s23 = smov 128  }
 0x16a   : > { %7466 = sst [smem:[#allocation30 + $0x1]] (%p12408_p3), %s8299_s30  ;;  %s12414_s14 = sld [smem:[#allocation154_spill]] }
 0x16b   : > { %7467 = sst [smem:[#allocation30 + $0x2]] (%p12408_p3), %s8300_s19  ;;  %s8302_s18 = smov 8  }
 0x16c   : > { %7468 = sst [smem:[#allocation30 + $0x3]] (%p12408_p3), %s8301_s23  ;;  %s12415_s16 = sand.u32 1, %s8280_s27  }
 0x16d   : > { %7469 = sst [smem:[#allocation30 + $0x4]] (%p12408_p3), %s8301_s23  ;;  %s541_s24 = scalar_lea.sflag [#allocation15], %s12415_s16 }
 0x16e   : > { %7470 = sst [smem:[#allocation30 + $0x5]] (%p12408_p3), %s8302_s18  ;;  %s8303_s15 = smov [#allocation29]  }
 0x16f   : > { %s6867_s17 = sshll.u32 %s557_s21, 26 }
 0x170   : > { %s552_s5 = scalar_lea.hbm %s12414_s14, %s6866_s28  ;;  %s6868_s29 = sadd.s32 134217728, %s6867_s17 }
 0x171   : > { %7471 = dma.general (%p12408_p3), %s552_s5, 8192, %s566_s20, %s541_s24, %s8303_s15, [#allocation30], %s6868_s29, 0  }
 0x172 PF: > { %p12416_p11 = scmp.ne.s32.totalorder %s12400_s13, 0 }
 0x174   : > { %590 = sbr.rel (%p12416_p11) target bundleno = 3616 (0xe20), region = 68 }
 0x17b   : > { %s12417_s1 = sld [smem:[#allocation44_spill]]  ;;  %s12418_s6 = sld [smem:[#allocation51_spill]] }
 0x181   : > { %s8891_s30 = sand.u32 1, %s12417_s1   ;;  %p12419_p9 = scmp.ne.s32.totalorder %s12418_s6, 0 }
 0x182   : > { %s6870_s28 = sshll.u32 %s8891_s30, 5  ;;  %s593_s19 = scalar_lea.sflag [#allocation9], %s8891_s30 }
 0x183   : > { %s8895_s23 = scalar_lea.vmem [#allocation8], %s6870_s28 }
 0x184   : > { %8203 = dma.done.wait (%p12419_p9), %s593_s19, 512  }
 0x185   : > { %8205 = vsyncadd (%p12419_p9), %s593_s19, 4294966784  ;;  %s12420_s4 = sld [smem:[#allocation47_spill]]  ;;  %s12421_s20 = sld [smem:[#allocation42_spill]] }
 0x186   : > { %s12422_s21 = sld [smem:[#allocation54_spill]] }
 0x18b   : > { %s601_s13 = sand.u32 1, %s12420_s4   ;;  %s603_s2 = sand.u32 1, %s12421_s20  }
 0x18c   : > { %s8903_s7 = sshll.u32 %s603_s2, 4  ;;  %s602_s14 = scalar_lea.sflag [#allocation12], %s601_s13 }
 0x18d   : > { %s605_s5 = scalar_lea.vmem [#allocation11], %s8903_s7  ;;  %p12423_p3 = scmp.ne.s32.totalorder %s12422_s21, 0 }
 0x18f   : > { %8207 = dma.done.wait (%p12423_p3), %s602_s14, 512  }
 0x190   : > { %8209 = vsyncadd (%p12423_p3), %s602_s14, 4294966784  ;;  %s6873_s18 = sshll.u32 %s603_s2, 9  ;;  %s614_s17 = scalar_lea.vmem [#allocation13], %s8903_s7 }
 0x191   : > { %s620_s29 = scalar_lea.sflag [#allocation15], %s601_s13  ;;  %s8911_s16 = scalar_lea.vmem [#allocation14], %s6873_s18 }
 0x192   : > { %8211 = dma.done.wait (%p12423_p3), %s620_s29, 8192  }
 0x193   : > { %8213 = vsyncadd (%p12423_p3), %s620_s29, 4294959104  ;;  %p12424_p4 = scmp.eq.s32.totalorder %s12420_s4, 0 }
 0x195   : > { %8215 = dma.done.wait (%p12424_p4), [#allocation15], 512   ;;  %p12425_p13 = pmov %p12424_p4 }
 0x196   : > { %p12426_p6 = pmov %p12424_p4 }
 0x197   : > { %8217 = vsyncadd (%p12425_p13), [#allocation15], 4294966784 }
 0x198   : > { %8219 = dma.done.wait (%p12426_p6), [#allocation18], 528   ;;  %p12427_p2 = pmov %p12424_p4 }
 0x19a   : > { %8221 = vsyncadd (%p12427_p2), [#allocation18], 4294966768  ;;  %p12428_p10 = pmov %p12427_p2 }
 0x19b   : > { %p12429_p1 = pmov %p12427_p2 }
 0x19c   : > { %8223 = dma.done.wait (%p12428_p10), [#allocation21], 528  }
 0x19d   : > { %8225 = vsyncadd (%p12429_p1), [#allocation21], 4294966768  ;;  %p12430_p7 = pmov %p12429_p1 }
 0x19e   : > { %p12431_p8 = pmov %p12429_p1 }
 0x19f   : > { %8227 = dma.done.wait (%p12430_p7), [#allocation24], 528  }
 0x1a0   : > { %8229 = vsyncadd (%p12431_p8), [#allocation24], 4294966768  ;;  %p12432_p0 = pmov %p12429_p1 }
 0x1a2   : > { %8231 = dma.done.wait (%p12432_p0), [#allocation27], 16   ;;  %p12433_p5 = pmov %p12432_p0 }
 0x1a3   : > { %s8937_s24 = scalar_lea.vmem [#allocation28], %s6870_s28  ;;  %s12434_s15 = sld [smem:[#allocation45_spill]] }
 0x1a4   : > { %8233 = vsyncadd (%p12433_p5), [#allocation27], 4294967280 }
 0x1a9   : > { %p6883_p12 = scmp.ne.s32.totalorder %s12434_s15, 0 }
 0x1aa   : > { %v722_v0 = vld [vmem:[#allocation16] sm:$0xff] (!%p6883_p12)  ;;  %v723_v1 = vld [vmem:[#allocation16 + $0x8] sm:$0xff] (!%p6883_p12)  ;;  %v724_v2 = vld [vmem:[#allocation16 + $0x10] sm:$0xff] (!%p6883_p12)  ;;  %vm733_vm0 = vcmask (!%p6883_p12), 261120   ;;  %vm839_vm1 = vcmask (!%p6883_p12), 31744   ;;  %v8304_v6 = vmov (!%p6883_p12), 0.0  }
 0x1ab   : > { %717 = sbr.rel (%p6883_p12) target bundleno = 654 (0x28e), region = 120  ;;  %v7365_v3 = vpack.c.bf16 (!%p6883_p12), %v723_v1, %v722_v0  ;;  %v725_v4 = vld [vmem:[#allocation16 + $0x18] sm:$0xff] (!%p6883_p12)  ;;  %v718_v5 = vld [vmem:[%s8895_s23] sm:$0xff] (!%p6883_p12)  ;;  %835 = vst.msk [vmem:[#allocation3] sm:$0xff] (!%p6883_p12), %vm733_vm0, %v8304_v6  ;;  %836 = vst.msk [vmem:[#allocation3 + $0x8] sm:$0xff] (!%p6883_p12), %vm733_vm0, %v8304_v6  ;;  %v8305_v9 = vmov (!%p6883_p12), -inf  }
 0x1ac   : > { %837 = vst.msk [vmem:[#allocation3 + $0x10] sm:$0xff] (!%p6883_p12), %vm733_vm0, %v8304_v6  ;;  %838 = vst.msk [vmem:[#allocation3 + $0x18] sm:$0xff] (!%p6883_p12), %vm733_vm0, %v8304_v6  ;;  %v720_v7 = vld [vmem:[%s8895_s23 + $0x10] sm:$0xff] (!%p6883_p12)  ;;  %v7369_v8 = vpack.c.bf16 (!%p6883_p12), %v725_v4, %v724_v2  ;;  %7153 = vmatprep.mubr.msk.f32.mxu0 (!%p6883_p12), %vm733_vm0, %v718_v5  ;;  %v719_v10 = vld [vmem:[%s8895_s23 + $0x8] sm:$0xff] (!%p6883_p12) }
 0x1ad   : > { %844 = vst.msk [vmem:[#allocation5] sm:$0xff] (!%p6883_p12), %vm839_vm1, %v8304_v6  ;;  %845 = vst.msk [vmem:[#allocation5 + $0x8] sm:$0xff] (!%p6883_p12), %vm839_vm1, %v8304_v6  ;;  %7156 = vmatprep.mubr.msk.f32.mxu1 (!%p6883_p12), %vm733_vm0, %v720_v7  ;;  %7366 = vmatprep.subr.bf16.mxu0 (!%p6883_p12), %v7365_v3  ;;  %v721_v11 = vld [vmem:[%s8895_s23 + $0x18] sm:$0xff] (!%p6883_p12)  ;;  %v6884_v12 = vld [vmem:[#allocation17] ss:$0 sm:$0xff] (!%p6883_p12) }
 0x1ae   : > { %846 = vst.msk [vmem:[#allocation5 + $0x10] sm:$0xff] (!%p6883_p12), %vm839_vm1, %v8304_v6  ;;  %847 = vst.msk [vmem:[#allocation5 + $0x18] sm:$0xff] (!%p6883_p12), %vm839_vm1, %v8304_v6  ;;  %7437 = vmatprep.subr.bf16.mxu1 (!%p6883_p12), %v7365_v3  ;;  %7368 = vmatpush3.bf16.msra.mxu0 (!%p6883_p12), %v7365_v3 }
 0x1af   : > { %840 = vst.msk [vmem:[#allocation4] sm:$0xff] (!%p6883_p12), %vm839_vm1, %v8305_v9  ;;  %841 = vst.msk [vmem:[#allocation4 + $0x8] sm:$0xff] (!%p6883_p12), %vm839_vm1, %v8305_v9  ;;  %7439 = vmatpush3.bf16.msra.mxu1 (!%p6883_p12), %v7365_v3  ;;  %7370 = vmatprep.subr.bf16.mxu0 (!%p6883_p12), %v7369_v8 }
 0x1b0   : > { %842 = vst.msk [vmem:[#allocation4 + $0x10] sm:$0xff] (!%p6883_p12), %vm839_vm1, %v8305_v9  ;;  %843 = vst.msk [vmem:[#allocation4 + $0x18] sm:$0xff] (!%p6883_p12), %vm839_vm1, %v8305_v9  ;;  %7438 = vmatprep.subr.bf16.mxu1 (!%p6883_p12), %v7369_v8 }
 0x1b2   : > { %7372 = vmatpush3.bf16.msra.mxu0 %v7369_v8 }
 0x1b3   : > { %7440 = vmatpush3.bf16.msra.mxu1 %v7369_v8 }
 0x1b5   : > { %7154 = vmatmul.mubr.msk.f32.vlgmr.msra.gmra.mrb[0].mxu0 %vm733_vm0, %v719_v10 }
 0x1b6   : > { %7157 = vmatmul.mubr.msk.f32.vlgmr.msra.gmra.mrb[0].mxu1 %vm733_vm0, %v721_v11 }
 0x288   : > { %v7155_v13 = vpop.f32.mrb[0].mxu0 }
 0x289   : > { %v7158_v14 = vpop.f32.mrb[0].mxu1  ;;  %v818_v15 = vadd.f32 %v7155_v13, %v6884_v12  ;;  %v812_v17 = vpop.f32.mrb[1].mxu0 }
 0x28a   : > { %v828_v16 = vadd.f32 %v7158_v14, %v6884_v12  ;;  %v822_v18 = vpop.f32.mrb[1].mxu1  ;;  %v813_v19 = vadd.f32 %v6884_v12, %v812_v17 }
 0x28b   : > { %v823_v20 = vadd.f32 %v6884_v12, %v822_v18  ;;  %832 = vst.msk [vmem:[#allocation2 + $0x8] sm:$0xff] %vm733_vm0, %v818_v15 }
 0x28c   : > { %834 = vst.msk [vmem:[#allocation2 + $0x18] sm:$0xff] %vm733_vm0, %v828_v16  ;;  %831 = vst.msk [vmem:[#allocation2] sm:$0xff] %vm733_vm0, %v813_v19 }
 0x28d   : > { %833 = vst.msk [vmem:[#allocation2 + $0x10] sm:$0xff] %vm733_vm0, %v823_v20 }
 0x28e PF: > { %v916_v21 = vld [vmem:[#allocation19] sm:$0xff]  ;;  %v917_v22 = vld [vmem:[#allocation19 + $0x8] sm:$0xff]  ;;  %vm927_vm2 = vcmask 261120   ;;  %v918_v26 = vld [vmem:[#allocation19 + $0x10] sm:$0xff]  ;;  %vm2137_vm3 = vcmask 64512   ;;  %s8307_s1 = smov 120  }
 0x28f   : > { %v1009_v23 = vld [vmem:[#allocation22] sm:$0xff]  ;;  %v7373_v24 = vpack.c.bf16 %v917_v22, %v916_v21  ;;  %v1010_v25 = vld [vmem:[#allocation22 + $0x8] sm:$0xff]  ;;  %v919_v27 = vld [vmem:[#allocation19 + $0x18] sm:$0xff]  ;;  %s12505_s6 = sld [smem:[#allocation46_spill]]  ;;  %s12506_s28 = sld [smem:[#allocation45_spill]]  ;;  %vm2403_vm5 = vcmask 130112  }
 0x290   : > { %v7381_v28 = vpack.c.bf16 %v1010_v25, %v1009_v23  ;;  %v7377_v29 = vpack.c.bf16 %v919_v27, %v918_v26  ;;  %v1011_v30 = vld [vmem:[#allocation22 + $0x10] sm:$0xff]  ;;  %v1012_v31 = vld [vmem:[#allocation22 + $0x18] sm:$0xff]  ;;  %v1101_v35 = vld [vmem:[#allocation25] sm:$0xff]  ;;  %vm2684_vm6 = vcmask 1041409   ;;  %vm2686_vm7 = vcmask 1042434   ;;  %s8309_s4 = smov 112  }
 0x291   : > { %v848_v32 = vld [vmem:[%s605_s5] sm:$0xff]  ;;  %7374 = vmatprep.subr.bf16.mxu0 %v7373_v24  ;;  %v7385_v33 = vpack.c.bf16 %v1012_v31, %v1011_v30  ;;  %v849_v40 = vld [vmem:[%s605_s5 + $0x8] sm:$0xff]  ;;  %vm9128_vm4 = vmpackc.low %vm2137_vm3, %vm2137_vm3  ;;  %vm2688_vm8 = vcmask 1043459   ;;  %vm2690_vm9 = vcmask 1044484   ;;  %vm2692_vm10 = vcmask 1045509   ;;  %s8311_s20 = smov 104  }
 0x292   : > { %7167 = vmatprep.mubr.msk.f32.mxu0 %vm927_vm2, %v848_v32  ;;  %v850_v34 = vld [vmem:[%s614_s17] sm:$0xff]  ;;  %7382 = vmatprep.subr.bf16.mxu1 %v7381_v28  ;;  %v851_v41 = vld [vmem:[%s614_s17 + $0x8] sm:$0xff]  ;;  %vm2694_vm11 = vcmask 1046534   ;;  %vm2696_vm12 = vcmask 1047559   ;;  %vm2826_vm14 = vcmask 130048   ;;  %vm6422_vm15 = vcmask 7168  }
 0x293   : > { %7376 = vmatpush3.bf16.msra.mxu0 %v7373_v24  ;;  %v1102_v36 = vld [vmem:[#allocation25 + $0x8] sm:$0xff]  ;;  %7384 = vmatpush3.bf16.msra.mxu1 %v7381_v28  ;;  %v1103_v38 = vld [vmem:[#allocation25 + $0x10] sm:$0xff]  ;;  %v1104_v39 = vld [vmem:[#allocation25 + $0x18] sm:$0xff]  ;;  %vm6427_vm0 = vcmask 15360   ;;  %vm6432_vm1 = vcmask 23552   ;;  %s8314_s21 = smov 8  }
 0x294   : > { %7378 = vmatprep.subr.bf16.mxu0 %v7377_v29  ;;  %v7389_v37 = vpack.c.bf16 %v1102_v36, %v1101_v35  ;;  %7386 = vmatprep.subr.bf16.mxu1 %v7385_v33  ;;  %v7393_v42 = vpack.c.bf16 %v1104_v39, %v1103_v38  ;;  %v852_v43 = vld [vmem:[%s8911_s16] sm:$0xff]  ;;  %v853_v45 = vld [vmem:[%s8911_s16 + $0x8] sm:$0xff]  ;;  %v854_v47 = vld [vmem:[%s8911_s16 + $0x10] sm:$0xff]  ;;  %s8315_s13 = smov 16   ;;  %s8316_s2 = smov 24  }
 0x295   : > { %7178 = vmatprep.mubr.msk.f32.mxu1 %vm927_vm2, %v850_v34  ;;  %v900_v44 = vld [vmem:[%s8911_s16 + $0x180] sm:$0xff]  ;;  %v901_v46 = vld [vmem:[%s8911_s16 + $0x188] sm:$0xff]  ;;  %v902_v48 = vld [vmem:[%s8911_s16 + $0x190] sm:$0xff]  ;;  %s9754_s19 = sld [smem:[#allocation7 + %s12505_s6]]  ;;  %s6960_s23 = sshll.u32 %s12506_s28, 4 }
 0x296   : > { %v855_v49 = vld [vmem:[%s8911_s16 + $0x18] sm:$0xff]  ;;  %v856_v51 = vld [vmem:[%s8911_s16 + $0x20] sm:$0xff]  ;;  %v857_v53 = vld [vmem:[%s8911_s16 + $0x28] sm:$0xff]  ;;  %p7001_p11 = scmp.ne.s32.totalorder %s12506_s28, 1 }
 0x297   : > { %7380 = vmatpush3.bf16.msra.mxu0 %v7377_v29  ;;  %7388 = vmatpush3.bf16.msra.mxu1 %v7385_v33  ;;  %v903_v50 = vld [vmem:[%s8911_s16 + $0x198] sm:$0xff]  ;;  %v904_v52 = vld [vmem:[%s8911_s16 + $0x1a0] sm:$0xff]  ;;  %v905_v54 = vld [vmem:[%s8911_s16 + $0x1a8] sm:$0xff] }
 0x298   : > { %7390 = vmatprep.subr.bf16.mxu0 %v7389_v37  ;;  %7441 = vmatprep.subr.bf16.mxu1 %v7389_v37  ;;  %v858_v55 = vld [vmem:[%s8911_s16 + $0x30] sm:$0xff]  ;;  %v859_v57 = vld [vmem:[%s8911_s16 + $0x38] sm:$0xff]  ;;  %v860_v59 = vld [vmem:[%s8911_s16 + $0x40] sm:$0xff] }
 0x299   : > { %v906_v56 = vld [vmem:[%s8911_s16 + $0x1b0] sm:$0xff]  ;;  %v907_v58 = vld [vmem:[%s8911_s16 + $0x1b8] sm:$0xff]  ;;  %v908_v60 = vld [vmem:[%s8911_s16 + $0x1c0] sm:$0xff] }
 0x29a   : > { %7168 = vmatmul.mubr.msk.f32.vlgmr.msra.gmra.mrb[0].mxu0 %vm927_vm2, %v849_v40  ;;  %7179 = vmatmul.mubr.msk.f32.vlgmr.msra.gmra.mrb[0].mxu1 %vm927_vm2, %v851_v41  ;;  %v861_v61 = vld [vmem:[%s8911_s16 + $0x48] sm:$0xff]  ;;  %v862_v63 = vld [vmem:[%s8911_s16 + $0x50] sm:$0xff]  ;;  %v863_v1 = vld [vmem:[%s8911_s16 + $0x58] sm:$0xff] }
 0x29b   : > { %7392 = vmatpush3.bf16.msra.mxu0 %v7389_v37  ;;  %7443 = vmatpush3.bf16.msra.mxu1 %v7389_v37  ;;  %v909_v62 = vld [vmem:[%s8911_s16 + $0x1c8] sm:$0xff]  ;;  %v910_v0 = vld [vmem:[%s8911_s16 + $0x1d0] sm:$0xff]  ;;  %v911_v2 = vld [vmem:[%s8911_s16 + $0x1d8] sm:$0xff] }
 0x29c   : > { %7394 = vmatprep.subr.bf16.mxu0 %v7393_v42  ;;  %7442 = vmatprep.subr.bf16.mxu1 %v7393_v42  ;;  %v864_v3 = vld [vmem:[%s8911_s16 + $0x60] sm:$0xff]  ;;  %v865_v5 = vld [vmem:[%s8911_s16 + $0x68] sm:$0xff]  ;;  %v866_v7 = vld [vmem:[%s8911_s16 + $0x70] sm:$0xff] }
 0x29d   : > { %7189 = vmatprep.mubr.msk.f32.mxu0 %vm927_vm2, %v852_v43  ;;  %7261 = vmatprep.mubr.msk.f32.mxu1 %vm927_vm2, %v900_v44  ;;  %v912_v4 = vld [vmem:[%s8911_s16 + $0x1e0] sm:$0xff]  ;;  %v913_v6 = vld [vmem:[%s8911_s16 + $0x1e8] sm:$0xff]  ;;  %v914_v8 = vld [vmem:[%s8911_s16 + $0x1f0] sm:$0xff]  ;;  %v12199_v44 = vlaneseq }
 0x29e   : > { %v867_v9 = vld [vmem:[%s8911_s16 + $0x78] sm:$0xff]  ;;  %v868_v10 = vld [vmem:[%s8911_s16 + $0x80] sm:$0xff]  ;;  %v869_v12 = vld [vmem:[%s8911_s16 + $0x88] sm:$0xff] }
 0x29f   : > { %7396 = vmatpush3.bf16.msra.mxu0 %v7393_v42  ;;  %7444 = vmatpush3.bf16.msra.mxu1 %v7393_v42  ;;  %v915_v11 = vld [vmem:[%s8911_s16 + $0x1f8] sm:$0xff]  ;;  %v870_v13 = vld [vmem:[%s8911_s16 + $0x90] sm:$0xff]  ;;  %v872_v15 = vld [vmem:[%s8911_s16 + $0xa0] sm:$0xff] }
 0x2a0   : > { %v871_v14 = vld [vmem:[%s8911_s16 + $0x98] sm:$0xff]  ;;  %v873_v16 = vld [vmem:[%s8911_s16 + $0xa8] sm:$0xff]  ;;  %v874_v17 = vld [vmem:[%s8911_s16 + $0xb0] sm:$0xff] }
 0x2a1   : > { %v875_v18 = vld [vmem:[%s8911_s16 + $0xb8] sm:$0xff]  ;;  %v876_v19 = vld [vmem:[%s8911_s16 + $0xc0] sm:$0xff]  ;;  %v877_v20 = vld [vmem:[%s8911_s16 + $0xc8] sm:$0xff] }
 0x2a2   : > { %7190 = vmatmul.mubr.msk.f32.vlgmr.msra.gmra.mrb[2].mxu0 %vm927_vm2, %v853_v45  ;;  %7262 = vmatmul.mubr.msk.f32.vlgmr.msra.gmra.mrb[2].mxu1 %vm927_vm2, %v901_v46  ;;  %v878_v21 = vld [vmem:[%s8911_s16 + $0xd0] sm:$0xff]  ;;  %v879_v22 = vld [vmem:[%s8911_s16 + $0xd8] sm:$0xff]  ;;  %v880_v23 = vld [vmem:[%s8911_s16 + $0xe0] sm:$0xff]  ;;  %v8306_v45 = vmov 1966171168  }
 0x2a3   : > { %7192 = vmatprep.mubr.msk.f32.mxu0 %vm927_vm2, %v854_v47  ;;  %7264 = vmatprep.mubr.msk.f32.mxu1 %vm927_vm2, %v902_v48  ;;  %v881_v24 = vld [vmem:[%s8911_s16 + $0xe8] sm:$0xff]  ;;  %v882_v25 = vld [vmem:[%s8911_s16 + $0xf0] sm:$0xff]  ;;  %v883_v26 = vld [vmem:[%s8911_s16 + $0xf8] sm:$0xff]  ;;  %v1719_v46 = vunpack.c.l.s4 %v8306_v45  ;;  %v9109_v48 = vshrl.u32 %v12199_v44, 7 }
 0x2a4   : > { %v884_v27 = vld [vmem:[%s8911_s16 + $0x100] sm:$0xff]  ;;  %v885_v28 = vld [vmem:[%s8911_s16 + $0x108] sm:$0xff]  ;;  %v886_v29 = vld [vmem:[%s8911_s16 + $0x110] sm:$0xff] }
 0x2a5   : > { %v887_v30 = vld [vmem:[%s8911_s16 + $0x118] sm:$0xff]  ;;  %v888_v31 = vld [vmem:[%s8911_s16 + $0x120] sm:$0xff]  ;;  %v889_v32 = vld [vmem:[%s8911_s16 + $0x128] sm:$0xff]  ;;  %v1720_v47 = vunpack.c.0.s8 %v1719_v46 }
 0x2a6   : > { %7193 = vmatmul.mubr.msk.f32.gmra.mrb[4].mxu0 %vm927_vm2, %v855_v49  ;;  %7265 = vmatmul.mubr.msk.f32.gmra.mrb[4].mxu1 %vm927_vm2, %v903_v50  ;;  %v890_v33 = vld [vmem:[%s8911_s16 + $0x130] sm:$0xff]  ;;  %v891_v34 = vld [vmem:[%s8911_s16 + $0x138] sm:$0xff]  ;;  %v892_v35 = vld [vmem:[%s8911_s16 + $0x140] sm:$0xff] }
 0x2a7   : > { %7195 = vmatprep.mubr.msk.f32.mxu0 %vm927_vm2, %v856_v51  ;;  %7267 = vmatprep.mubr.msk.f32.mxu1 %vm927_vm2, %v904_v52  ;;  %v893_v36 = vld [vmem:[%s8911_s16 + $0x148] sm:$0xff]  ;;  %v894_v37 = vld [vmem:[%s8911_s16 + $0x150] sm:$0xff]  ;;  %v9093_v38 = vld [vmem:[#allocation2] sm:$0xff]  ;;  %v9112_v49 = vsub.s32 %v1720_v47, %v9109_v48 }
 0x2a8   : > { %v895_v39 = vld [vmem:[%s8911_s16 + $0x158] sm:$0xff]  ;;  %v896_v40 = vld [vmem:[%s8911_s16 + $0x160] sm:$0xff]  ;;  %v897_v41 = vld [vmem:[%s8911_s16 + $0x168] sm:$0xff] }
 0x2a9   : > { %v898_v42 = vld [vmem:[%s8911_s16 + $0x170] sm:$0xff]  ;;  %v899_v43 = vld [vmem:[%s8911_s16 + $0x178] sm:$0xff]  ;;  %v6889_v51 = vld [vmem:[#allocation20] ss:$0 sm:$0xff]  ;;  %v1724_v52 = vrot.slane %v9093_v38, %v9112_v49 }
 0x2aa   : > { %7196 = vmatmul.mubr.msk.f32.gmra.mrb[6].mxu0 %vm927_vm2, %v857_v53  ;;  %7268 = vmatmul.mubr.msk.f32.gmra.mrb[6].mxu1 %vm927_vm2, %v905_v54  ;;  %v9114_v50 = vld [vmem:[#allocation2 + $0x18] sm:$0xff]  ;;  %v6892_v53 = vld [vmem:[#allocation23] ss:$0 sm:$0xff] }
 0x2ab   : > { %7198 = vmatprep.mubr.msk.f32.mxu0 %vm927_vm2, %v858_v55  ;;  %7270 = vmatprep.mubr.msk.f32.mxu1 %vm927_vm2, %v906_v56  ;;  %v1871_v54 = vrot.slane %v9114_v50, %v9112_v49 }
 0x2ae   : > { %7199 = vmatmul.mubr.msk.f32.gmra.mrb[8].mxu0 %vm927_vm2, %v859_v57  ;;  %7271 = vmatmul.mubr.msk.f32.gmra.mrb[8].mxu1 %vm927_vm2, %v907_v58 }
 0x2af   : > { %7201 = vmatprep.mubr.msk.f32.mxu0 %vm927_vm2, %v860_v59  ;;  %7273 = vmatprep.mubr.msk.f32.mxu1 %vm927_vm2, %v908_v60 }
 0x2b2   : > { %7202 = vmatmul.mubr.msk.f32.gmra.mrb[10].mxu0 %vm927_vm2, %v861_v61  ;;  %7274 = vmatmul.mubr.msk.f32.gmra.mrb[10].mxu1 %vm927_vm2, %v909_v62  ;;  %v9121_v62 = vrot.slane %v1724_v52, %v9112_v49 }
 0x2b3   : > { %7204 = vmatprep.mubr.msk.f32.mxu0 %vm927_vm2, %v862_v63  ;;  %7276 = vmatprep.mubr.msk.f32.mxu1 %vm927_vm2, %v910_v0  ;;  %v9124_v63 = vsub.s32 0, %v9109_v48 }
 0x2b6   : > { %7205 = vmatmul.mubr.msk.f32.gmra.mrb[12].mxu0 %vm927_vm2, %v863_v1  ;;  %7277 = vmatmul.mubr.msk.f32.gmra.mrb[12].mxu1 %vm927_vm2, %v911_v2  ;;  %v12435_v1 = vmov 0  ;;  %v9133_v2 = vrot.slane %v1871_v54, %v9112_v49 }
 0x2b7   : > { %7207 = vmatprep.mubr.msk.f32.mxu0 %vm927_vm2, %v864_v3  ;;  %7279 = vmatprep.mubr.msk.f32.mxu1 %vm927_vm2, %v912_v4  ;;  %v12436_v1 = vsel %vm9128_vm4, 4294967295, %v12435_v1  ;;  %v1732_v3 = vcombine.high %v1724_v52, %v1724_v52  ;;  %v1879_v4 = vcombine.high %v1871_v54, %v1871_v54 }
 0x2b8   : > { %12437 = vst [vmem:[#allocation57_spill] sm:$0xff] %v12436_v1 }
 0x2ba   : > { %7208 = vmatmul.mubr.msk.f32.gmra.mrb[14].mxu0 %vm927_vm2, %v865_v5  ;;  %7280 = vmatmul.mubr.msk.f32.gmra.mrb[14].mxu1 %vm927_vm2, %v913_v6 }
 0x2bb   : > { %7210 = vmatprep.mubr.msk.f32.mxu0 %vm927_vm2, %v866_v7  ;;  %7282 = vmatprep.mubr.msk.f32.mxu1 %vm927_vm2, %v914_v8 }
 0x2be   : > { %7211 = vmatmul.mubr.msk.f32.gmra.mrb[16].mxu0 %vm927_vm2, %v867_v9  ;;  %7283 = vmatmul.mubr.msk.f32.gmra.mrb[16].mxu1 %vm927_vm2, %v915_v11  ;;  %v9141_v9 = vld [vmem:[#allocation26] ss:$0 sm:$0xff]  ;;  %v9148_v11 = vrot.slane %v1732_v3, %v9112_v49 }
 0x2bf   : > { %7213 = vmatprep.mubr.msk.f32.mxu0 %vm927_vm2, %v868_v10  ;;  %7289 = vmatprep.mubr.msk.f32.mxu1 %vm2137_vm3, %v9093_v38  ;;  %v1916_v10 = vrot.slane %v9121_v62, %v9124_v63 }
 0x2c2   : > { %7214 = vmatmul.mubr.msk.f32.gmra.mrb[18].mxu0 %vm927_vm2, %v869_v12 }
 0x2c3   : > { %7216 = vmatprep.mubr.msk.f32.mxu0 %vm927_vm2, %v870_v13  ;;  %v2012_v13 = vrot.slane %v9133_v2, %v9124_v63 }
 0x2c6   : > { %7217 = vmatmul.mubr.msk.f32.gmra.mrb[20].mxu0 %vm927_vm2, %v871_v14  ;;  %v9153_v14 = vrot.slane %v1879_v4, %v9112_v49  ;;  %v1764_v4 = vcombine.high %v9148_v11, %v9148_v11 }
 0x2c7   : > { %7219 = vmatprep.mubr.msk.f32.mxu0 %vm927_vm2, %v872_v15 }
 0x2ca   : > { %7220 = vmatmul.mubr.msk.f32.gmra.mrb[22].mxu0 %vm927_vm2, %v873_v16 }
 0x2cb   : > { %7222 = vmatprep.mubr.msk.f32.mxu0 %vm927_vm2, %v874_v17 }
 0x2ce   : > { %7223 = vmatmul.mubr.msk.f32.gmra.mrb[24].mxu0 %vm927_vm2, %v875_v18 }
 0x2cf   : > { %7225 = vmatprep.mubr.msk.f32.mxu0 %vm927_vm2, %v876_v19 }
 0x2d2   : > { %7226 = vmatmul.mubr.msk.f32.gmra.mrb[26].mxu0 %vm927_vm2, %v877_v20 }
 0x2d3   : > { %7228 = vmatprep.mubr.msk.f32.mxu0 %vm927_vm2, %v878_v21 }
 0x2d6   : > { %7229 = vmatmul.mubr.msk.f32.gmra.mrb[28].mxu0 %vm927_vm2, %v879_v22  ;;  %v1920_v22 = vrot.slane %v9148_v11, %v9124_v63 }
 0x2d7   : > { %7231 = vmatprep.mubr.msk.f32.mxu0 %vm927_vm2, %v880_v23  ;;  %v9162_v23 = vld [vmem:[#allocation2 + $0x8] sm:$0xff] }
 0x2da   : > { %7232 = vmatmul.mubr.msk.f32.gmra.mrb[30].mxu0 %vm927_vm2, %v881_v24 }
 0x2db   : > { %7234 = vmatprep.mubr.msk.f32.mxu0 %vm927_vm2, %v882_v25 }
 0x2de   : > { %7235 = vmatmul.mubr.msk.f32.gmra.mrb[32].mxu0 %vm927_vm2, %v883_v26  ;;  %v2016_v26 = vrot.slane %v9153_v14, %v9124_v63 }
 0x2df   : > { %7237 = vmatprep.mubr.msk.f32.mxu0 %vm927_vm2, %v884_v27 }
 0x2e2   : > { %7238 = vmatmul.mubr.msk.f32.gmra.mrb[34].mxu0 %vm927_vm2, %v885_v28 }
 0x2e3   : > { %7240 = vmatprep.mubr.msk.f32.mxu0 %vm927_vm2, %v886_v29 }
 0x2e6   : > { %7241 = vmatmul.mubr.msk.f32.gmra.mrb[36].mxu0 %vm927_vm2, %v887_v30 }
 0x2e7   : > { %7243 = vmatprep.mubr.msk.f32.mxu0 %vm927_vm2, %v888_v31 }
 0x2ea   : > { %7244 = vmatmul.mubr.msk.f32.gmra.mrb[38].mxu0 %vm927_vm2, %v889_v32 }
 0x2eb   : > { %7246 = vmatprep.mubr.msk.f32.mxu0 %vm927_vm2, %v890_v33  ;;  %v9174_v33 = vld [vmem:[#allocation2 + $0x10] sm:$0xff] }
 0x2ee   : > { %7247 = vmatmul.mubr.msk.f32.gmra.mrb[40].mxu0 %vm927_vm2, %v891_v34 }
 0x2ef   : > { %7249 = vmatprep.mubr.msk.f32.mxu0 %vm927_vm2, %v892_v35 }
 0x2f2   : > { %7250 = vmatmul.mubr.msk.f32.gmra.mrb[42].mxu0 %vm927_vm2, %v893_v36 }
 0x2f3   : > { %7252 = vmatprep.mubr.msk.f32.mxu0 %vm927_vm2, %v894_v37 }
 0x2f6   : > { %7253 = vmatmul.mubr.msk.f32.gmra.mrb[44].mxu0 %vm927_vm2, %v895_v39  ;;  %v1762_v39 = vcombine.high %v9121_v62, %v9121_v62 }
 0x2f7   : > { %7255 = vmatprep.mubr.msk.f32.mxu0 %vm927_vm2, %v896_v40 }
 0x2f8   : > { %v1924_v54 = vrot.slane %v1762_v39, %v9124_v63 }
 0x2fa   : > { %7256 = vmatmul.mubr.msk.f32.gmra.mrb[46].mxu0 %vm927_vm2, %v897_v41 }
 0x2fb   : > { %7258 = vmatprep.mubr.msk.f32.mxu0 %vm927_vm2, %v898_v42 }
 0x2fe   : > { %7259 = vmatmul.mubr.msk.f32.gmra.mrb[48].mxu0 %vm927_vm2, %v899_v43 }
 0x36d   : > { %v7169_v55 = vpop.f32.mrb[0].mxu0  ;;  %v7180_v58 = vpop.f32.mrb[0].mxu1 }
 0x36e   : > { %v1006_v56 = vadd.f32 %v7169_v55, %v6889_v51  ;;  %v1000_v57 = vpop.f32.mrb[1].mxu0  ;;  %v1098_v60 = vadd.f32 %v7180_v58, %v6892_v53  ;;  %v1092_v61 = vpop.f32.mrb[1].mxu1 }
 0x36f   : > { %v1001_v59 = vadd.f32 %v6889_v51, %v1000_v57  ;;  %v1093_v0 = vadd.f32 %v6892_v53, %v1092_v61 }
 0x371   : > { %v7397_v5 = vpack.c.bf16 %v1006_v56, %v1001_v59  ;;  %v9135_v6 = vpack.i.bf16 %v1006_v56, %v1001_v59  ;;  %v7403_v7 = vpack.c.bf16 %v1098_v60, %v1093_v0  ;;  %v9137_v8 = vpack.i.bf16 %v1098_v60, %v1093_v0 }
 0x372   : > { %v1909_v56 = vcombine.high %v9133_v2, %v9133_v2 }
 0x373   : > { %12438 = vst [vmem:[#allocation58_spill] sm:$0xff] %v9135_v6  ;;  %12439 = vst [vmem:[#allocation59_spill] sm:$0xff] %v9137_v8  ;;  %7399 = vmatprep.subr.msk.bf16.mxu1 %vm9128_vm4, %v7397_v5 }
 0x374   : > { %7402 = vmatpush3.bf16.xpose.msk.msra.mxu1 %vm9128_vm4, %v7397_v5  ;;  %v1717_v5 = vcombine.high %v9093_v38, %v9093_v38 }
 0x375   : > { %v7191_v12 = vpop.f32.mrb[2].mxu0  ;;  %7404 = vmatprep.subr.bf16.mxu1 %v7403_v7  ;;  %v7263_v16 = vpop.f32.mrb[2].mxu1 }
 0x376   : > { %v1376_v15 = vadd.f32 %v7191_v12, %v9141_v9  ;;  %v1370_v17 = vpop.f32.mrb[3].mxu0  ;;  %v1616_v18 = vadd.f32 %v7263_v16, %v9141_v9  ;;  %v1610_v20 = vpop.f32.mrb[3].mxu1 }
 0x377   : > { %v1371_v19 = vadd.f32 %v9141_v9, %v1370_v17  ;;  %v1611_v28 = vadd.f32 %v9141_v9, %v1610_v20  ;;  %v1928_v20 = vrot.slane %v1764_v4, %v9124_v63 }
 0x378   : > { %v9158_v21 = vmul.f32 %v1916_v10, %v1376_v15  ;;  %v9164_v24 = vmul.f32 %v2012_v13, %v1616_v18 }
 0x379   : > { %v7194_v25 = vpop.f32.mrb[4].mxu0  ;;  %v9168_v27 = vmul.f32 %v1916_v10, %v1371_v19  ;;  %v7266_v32 = vpop.f32.mrb[4].mxu1  ;;  %v9189_v42 = vmul.f32 %v2012_v13, %v1611_v28  ;;  %v2020_v10 = vrot.slane %v1909_v56, %v9124_v63 }
 0x37a   : > { %12440 = vst [vmem:[#allocation60_spill] sm:$0xff] %v9158_v21  ;;  %12441 = vst [vmem:[#allocation61_spill] sm:$0xff] %v9164_v24  ;;  %v1386_v29 = vadd.f32 %v7194_v25, %v9141_v9  ;;  %v2141_v30 = vsel %vm2137_vm3, %v9158_v21, 0.0  ;;  %v1380_v31 = vpop.f32.mrb[5].mxu0  ;;  %v2285_v34 = vsel %vm2137_vm3, %v9164_v24, 0.0  ;;  %v1626_v35 = vadd.f32 %v7266_v32, %v9141_v9  ;;  %v1620_v36 = vpop.f32.mrb[5].mxu1 }
 0x37b   : > { %12442 = vst [vmem:[#allocation62_spill] sm:$0xff] %v9168_v27  ;;  %2142 = vadd.xlane.f32.xlu0 %v2141_v30  ;;  %7290 = vmatmul.mubr.msk.f32.vlgmr.msra.gmra.mrb[18].mxu1 %vm2137_vm3, %v9162_v23  ;;  %12445 = vst [vmem:[#allocation65_spill] sm:$0xff] %v9189_v42  ;;  %v2138_v45 = vsel %vm2137_vm3, %v9168_v27, 0.0  ;;  %v1621_v46 = vadd.f32 %v9141_v9, %v1620_v36  ;;  %v1381_v52 = vadd.f32 %v9141_v9, %v1380_v31 }
 0x37c   : > { %v9181_v37 = vmul.f32 %v1920_v22, %v1386_v29  ;;  %2286 = vadd.xlane.f32.xlu1 %v2285_v34  ;;  %7406 = vmatpush3.bf16.msra.mxu1 %v7403_v7  ;;  %v9185_v40 = vmul.f32 %v2016_v26, %v1626_v35  ;;  %v2282_v61 = vsel %vm2137_vm3, %v9189_v42, 0.0  ;;  %v1864_v25 = vcombine.high %v9114_v50, %v9114_v50 }
 0x37d   : > { %v7197_v41 = vpop.f32.mrb[6].mxu0  ;;  %7292 = vmatprep.mubr.msk.f32.mxu1 %vm2137_vm3, %v9174_v33  ;;  %v7269_v51 = vpop.f32.mrb[6].mxu1  ;;  %v9206_v60 = vmul.f32 %v2016_v26, %v1621_v46  ;;  %v9210_v3 = vmul.f32 %v1920_v22, %v1381_v52  ;;  %v1731_v22 = vrot.slane %v1717_v5, %v9112_v49  ;;  %v1911_v31 = vcombine.high %v9153_v14, %v9153_v14 }
 0x37e   : > { %12443 = vst [vmem:[#allocation63_spill] sm:$0xff] %v9181_v37  ;;  %12444 = vst [vmem:[#allocation64_spill] sm:$0xff] %v9185_v40  ;;  %v2147_v43 = vsel %vm2137_vm3, %v9181_v37, 0.0  ;;  %v1390_v47 = vpop.f32.mrb[7].mxu0  ;;  %v1630_v53 = vpop.f32.mrb[7].mxu1  ;;  %v2291_v57 = vsel %vm2137_vm3, %v9185_v40, 0.0  ;;  %v1396_v58 = vadd.f32 %v7197_v41, %v9141_v9  ;;  %v1636_v15 = vadd.f32 %v7269_v51, %v9141_v9 }
 0x37f   : > { %2139 = vadd.xlane.f32.xlu0 %v2138_v45  ;;  %7293 = vmatmul.mubr.msk.f32.gmra.mrb[20].mxu1 %vm2137_vm3, %v9114_v50  ;;  %v1391_v55 = vadd.f32 %v9141_v9, %v1390_v47  ;;  %12446 = vst [vmem:[#allocation66_spill] sm:$0xff] %v9206_v60  ;;  %12447 = vst [vmem:[#allocation67_spill] sm:$0xff] %v9210_v3  ;;  %v1631_v12 = vadd.f32 %v9141_v9, %v1630_v53  ;;  %v2288_v17 = vsel %vm2137_vm3, %v9206_v60, 0.0 }
 0x380   : > { %2148 = vadd.xlane.f32.xlu1 %v2147_v43  ;;  %v9220_v13 = vmul.f32 %v1924_v54, %v1396_v58  ;;  %v2144_v19 = vsel %vm2137_vm3, %v9210_v3, 0.0  ;;  %v9238_v32 = vmul.f32 %v2020_v10, %v1636_v15  ;;  %v9246_v43 = vrot.slane %v1731_v22, %v9112_v49 }
 0x381   : > { %v7200_v59 = vpop.f32.mrb[8].mxu0  ;;  %v7272_v0 = vpop.f32.mrb[8].mxu1  ;;  %v9216_v7 = vmul.f32 %v1924_v54, %v1391_v55  ;;  %v9231_v28 = vmul.f32 %v2020_v10, %v1631_v12  ;;  %v1878_v45 = vrot.slane %v1864_v25, %v9112_v49  ;;  %v2024_v51 = vrot.slane %v1911_v31, %v9124_v63 }
 0x382   : > { %v1400_v62 = vpop.f32.mrb[9].mxu0  ;;  %v1640_v2 = vpop.f32.mrb[9].mxu1  ;;  %12449 = vst [vmem:[#allocation69_spill] sm:$0xff] %v9220_v13  ;;  %12451 = vst [vmem:[#allocation71_spill] sm:$0xff] %v9238_v32  ;;  %v2153_v34 = vsel %vm2137_vm3, %v9220_v13, 0.0  ;;  %v1406_v35 = vadd.f32 %v7200_v59, %v9141_v9  ;;  %v2297_v54 = vsel %vm2137_vm3, %v9238_v32, 0.0  ;;  %v1646_v55 = vadd.f32 %v7272_v0, %v9141_v9 }
 0x383   : > { %2283 = vadd.xlane.f32.xlu0 %v2282_v61  ;;  %12448 = vst [vmem:[#allocation68_spill] sm:$0xff] %v9216_v7  ;;  %12450 = vst [vmem:[#allocation70_spill] sm:$0xff] %v9231_v28  ;;  %v2150_v29 = vsel %vm2137_vm3, %v9216_v7, 0.0  ;;  %v1401_v30 = vadd.f32 %v9141_v9, %v1400_v62  ;;  %v2294_v47 = vsel %vm2137_vm3, %v9231_v28, 0.0  ;;  %v1641_v52 = vadd.f32 %v9141_v9, %v1640_v2 }
 0x384   : > { %2292 = vadd.xlane.f32.xlu1 %v2291_v57  ;;  %v9255_v53 = vmul.f32 %v1928_v20, %v1406_v35  ;;  %v1932_v59 = vrot.slane %v9246_v43, %v9124_v63  ;;  %v9267_v61 = vrot.slane %v1878_v45, %v9112_v49  ;;  %v1733_v5 = vcombine.high %v1731_v22, %v1731_v22 }
 0x385   : > { %v7203_v16 = vpop.f32.mrb[10].mxu0  ;;  %v7275_v18 = vpop.f32.mrb[10].mxu1  ;;  %v9249_v14 = vmul.f32 %v1928_v20, %v1401_v30  ;;  %v9271_v4 = vmul.f32 %v2024_v51, %v1641_v52  ;;  %v9276_v10 = vmul.f32 %v2024_v51, %v1646_v55 }
 0x386   : > { %v1410_v11 = vpop.f32.mrb[11].mxu0  ;;  %v1650_v26 = vpop.f32.mrb[11].mxu1  ;;  %12453 = vst [vmem:[#allocation73_spill] sm:$0xff] %v9255_v53  ;;  %v2159_v12 = vsel %vm2137_vm3, %v9255_v53, 0.0  ;;  %v1416_v15 = vadd.f32 %v7203_v16, %v9141_v9  ;;  %v2028_v25 = vrot.slane %v9267_v61, %v9124_v63  ;;  %v1761_v31 = vrot.slane %v1733_v5, %v9112_v49 }
 0x387   : > { %2289 = vadd.xlane.f32.xlu0 %v2288_v17  ;;  %12452 = vst [vmem:[#allocation72_spill] sm:$0xff] %v9249_v14  ;;  %12454 = vst [vmem:[#allocation74_spill] sm:$0xff] %v9271_v4  ;;  %v2156_v0 = vsel %vm2137_vm3, %v9249_v14, 0.0  ;;  %v1411_v2 = vadd.f32 %v9141_v9, %v1410_v11  ;;  %v2300_v30 = vsel %vm2137_vm3, %v9271_v4, 0.0  ;;  %v1651_v16 = vadd.f32 %v9141_v9, %v1650_v26 }
 0x388   : > { %2145 = vadd.xlane.f32.xlu1 %v2144_v19  ;;  %12455 = vst [vmem:[#allocation75_spill] sm:$0xff] %v9276_v10  ;;  %v2303_v35 = vsel %vm2137_vm3, %v9276_v10, 0.0  ;;  %v1936_v55 = vrot.slane %v1761_v31, %v9124_v63 }
 0x389   : > { %v7206_v36 = vpop.f32.mrb[12].mxu0  ;;  %v9243_v41 = vpop.f32.mrb[12].mxu1  ;;  %v9291_v22 = vmul.f32 %v1932_v59, %v1411_v2 }
 0x38a   : > { %v1420_v39 = vpop.f32.mrb[13].mxu0  ;;  %v1660_v46 = vpop.f32.mrb[13].mxu1  ;;  %v1426_v2 = vadd.f32 %v7206_v36, %v9141_v9 }
 0x38b   : > { %2151 = vadd.xlane.f32.xlu0 %v2150_v29  ;;  %v1880_v29 = vcombine.high %v1878_v45, %v1878_v45  ;;  %12456 = vst [vmem:[#allocation76_spill] sm:$0xff] %v9291_v22  ;;  %v2162_v26 = vsel %vm2137_vm3, %v9291_v22, 0.0 }
 0x38c   : > { %2154 = vadd.xlane.f32.xlu1 %v2153_v34  ;;  %v9297_v34 = vmul.f32 %v1932_v59, %v1416_v15  ;;  %v1421_v59 = vadd.f32 %v9141_v9, %v1420_v39  ;;  %v9333_v36 = vmul.f32 %v1936_v55, %v1426_v2 }
 0x38d   : > { %v9260_v56 = vpop.f32.mrb[14].mxu0  ;;  %v9262_v58 = vpop.f32.mrb[14].mxu1  ;;  %v9307_v52 = vrot.slane %v1880_v29, %v9112_v49 }
 0x38e   : > { %v1430_v57 = vpop.f32.mrb[15].mxu0  ;;  %v9269_v62 = vpop.f32.mrb[15].mxu1  ;;  %12457 = vst [vmem:[#allocation77_spill] sm:$0xff] %v9297_v34  ;;  %v9326_v29 = vmul.f32 %v1936_v55, %v1421_v59  ;;  %12461 = vst [vmem:[#allocation81_spill] sm:$0xff] %v9333_v36  ;;  %v1910_v59 = vcombine.high %v9267_v61, %v9267_v61 }
 0x38f   : > { %2295 = vadd.xlane.f32.xlu0 %v2294_v47  ;;  %v1656_v47 = vadd.f32 %v7275_v18, %v9141_v9  ;;  %v2165_v18 = vsel %vm2137_vm3, %v9297_v34, 0.0  ;;  %v2032_v15 = vrot.slane %v9307_v52, %v9124_v63 }
 0x390   : > { %2298 = vadd.xlane.f32.xlu1 %v2297_v54  ;;  %v9309_v54 = vmul.f32 %v2028_v25, %v1651_v16  ;;  %12460 = vst [vmem:[#allocation80_spill] sm:$0xff] %v9326_v29 }
 0x391   : > { %v9281_v17 = vpop.f32.mrb[16].mxu0  ;;  %v9285_v20 = vpop.f32.mrb[16].mxu1 }
 0x392   : > { %v9283_v19 = vpop.f32.mrb[17].mxu0  ;;  %v9289_v11 = vpop.f32.mrb[17].mxu1  ;;  %12458 = vst [vmem:[#allocation78_spill] sm:$0xff] %v9309_v54  ;;  %v2306_v39 = vsel %vm2137_vm3, %v9309_v54, 0.0 }
 0x393   : > { %2157 = vadd.xlane.f32.xlu0 %v2156_v0  ;;  %v9315_v0 = vmul.f32 %v2028_v25, %v1656_v47  ;;  %v1661_v25 = vadd.f32 %v9141_v9, %v1660_v46 }
 0x394   : > { %2160 = vadd.xlane.f32.xlu1 %v2159_v12 }
 0x395   : > { %v9302_v45 = vpop.f32.mrb[18].mxu0  ;;  %12459 = vst [vmem:[#allocation79_spill] sm:$0xff] %v9315_v0  ;;  %v2309_v16 = vsel %vm2137_vm3, %v9315_v0, 0.0  ;;  %v9345_v46 = vmul.f32 %v2032_v15, %v1661_v25  ;;  %v2036_v25 = vrot.slane %v1910_v59, %v9124_v63 }
 0x396   : > { %v9304_v51 = vpop.f32.mrb[19].mxu0 }
 0x397   : > { %2301 = vadd.xlane.f32.xlu0 %v2300_v30  ;;  %v1763_v30 = vcombine.high %v9246_v43, %v9246_v43  ;;  %12462 = vst [vmem:[#allocation82_spill] sm:$0xff] %v9345_v46  ;;  %v2168_v43 = vsel %vm2137_vm3, %v9326_v29, 0.0 }
 0x398   : > { %2304 = vadd.xlane.f32.xlu1 %v2303_v35  ;;  %v1666_v35 = vadd.f32 %v9243_v41, %v9141_v9  ;;  %v2171_v41 = vsel %vm2137_vm3, %v9333_v36, 0.0 }
 0x399   : > { %v9320_v5 = vpop.f32.mrb[20].mxu0  ;;  %v1940_v55 = vrot.slane %v1763_v30, %v9124_v63 }
 0x39a   : > { %v9322_v12 = vpop.f32.mrb[21].mxu0  ;;  %v9351_v2 = vmul.f32 %v2032_v15, %v1666_v35  ;;  %v1671_v15 = vadd.f32 %v9141_v9, %v9269_v62 }
 0x39b   : > { %2163 = vadd.xlane.f32.xlu0 %v2162_v26 }
 0x39c   : > { %2166 = vadd.xlane.f32.xlu1 %v2165_v18  ;;  %v1431_v18 = vadd.f32 %v9141_v9, %v1430_v57  ;;  %12463 = vst [vmem:[#allocation83_spill] sm:$0xff] %v9351_v2  ;;  %v2312_v57 = vsel %vm2137_vm3, %v9345_v46, 0.0  ;;  %v9381_v62 = vmul.f32 %v2036_v25, %v1671_v15  ;;  %v1466_v46 = vadd.f32 %v9320_v5, %v9141_v9 }
 0x39d   : > { %v9339_v47 = vpop.f32.mrb[22].mxu0 }
 0x39e   : > { %v9341_v26 = vpop.f32.mrb[23].mxu0  ;;  %v9362_v30 = vmul.f32 %v1940_v55, %v1431_v18  ;;  %12466 = vst [vmem:[#allocation86_spill] sm:$0xff] %v9381_v62 }
 0x39f   : > { %2307 = vadd.xlane.f32.xlu0 %v2306_v39  ;;  %v1436_v39 = vadd.f32 %v9260_v56, %v9141_v9  ;;  %v1773_v56 = vrot.slane %v9162_v23, %v9112_v49 }
 0x3a0   : > { %2310 = vadd.xlane.f32.xlu1 %v2309_v16  ;;  %v1765_v16 = vcombine.high %v1761_v31, %v1761_v31  ;;  %12464 = vst [vmem:[#allocation84_spill] sm:$0xff] %v9362_v30  ;;  %v1676_v31 = vadd.f32 %v9262_v58, %v9141_v9 }
 0x3a1   : > { %v9357_v44 = vpop.f32.mrb[24].mxu0  ;;  %v9370_v35 = vmul.f32 %v1940_v55, %v1436_v39  ;;  %v1781_v8 = vcombine.high %v1773_v56, %v1773_v56  ;;  %v2174_v55 = vsel %vm2137_vm3, %v9362_v30, 0.0  ;;  %v1441_v39 = vadd.f32 %v9141_v9, %v9283_v19 }
 0x3a2   : > { %v9359_v61 = vpop.f32.mrb[25].mxu0  ;;  %v9388_v58 = vmul.f32 %v2036_v25, %v1676_v31  ;;  %v2318_v19 = vsel %vm2137_vm3, %v9381_v62, 0.0  ;;  %v1766_v62 = vcombine.high %v9162_v23, %v9162_v23 }
 0x3a3   : > { %2169 = vadd.xlane.f32.xlu0 %v2168_v43  ;;  %12465 = vst [vmem:[#allocation85_spill] sm:$0xff] %v9370_v35  ;;  %v2315_v43 = vsel %vm2137_vm3, %v9351_v2, 0.0  ;;  %v1789_v2 = vrot.slane %v1773_v56, %v9112_v49  ;;  %v2177_v0 = vsel %vm2137_vm3, %v9370_v35, 0.0  ;;  %v1451_v56 = vadd.f32 %v9141_v9, %v9304_v51 }
 0x3a4   : > { %2172 = vadd.xlane.f32.xlu1 %v2171_v41  ;;  %v1944_v41 = vrot.slane %v1765_v16, %v9124_v63  ;;  %12467 = vst [vmem:[#allocation87_spill] sm:$0xff] %v9388_v58  ;;  %v1446_v16 = vadd.f32 %v9281_v17, %v9141_v9  ;;  %v2321_v17 = vsel %vm2137_vm3, %v9388_v58, 0.0  ;;  %v1780_v54 = vrot.slane %v1766_v62, %v9112_v49 }
 0x3a5   : > { %v9376_v59 = vpop.f32.mrb[26].mxu0  ;;  %v1948_v25 = vrot.slane %v1789_v2, %v9124_v63 }
 0x3a6   : > { %v9378_v18 = vpop.f32.mrb[27].mxu0  ;;  %v9399_v10 = vmul.f32 %v1944_v41, %v1441_v39  ;;  %v9406_v31 = vmul.f32 %v1944_v41, %v1446_v16  ;;  %v1461_v16 = vadd.f32 %v9141_v9, %v9322_v12 }
 0x3a7   : > { %2313 = vadd.xlane.f32.xlu0 %v2312_v57  ;;  %v9419_v51 = vmul.f32 %v1948_v25, %v1451_v56 }
 0x3a8   : > { %2316 = vadd.xlane.f32.xlu1 %v2315_v43  ;;  %v1803_v43 = vrot.slane %v1781_v8, %v9112_v49  ;;  %12468 = vst [vmem:[#allocation88_spill] sm:$0xff] %v9399_v10  ;;  %12469 = vst [vmem:[#allocation89_spill] sm:$0xff] %v9406_v31  ;;  %v2180_v41 = vsel %vm2137_vm3, %v9399_v10, 0.0 }
 0x3a9   : > { %v9394_v57 = vpop.f32.mrb[28].mxu0  ;;  %12470 = vst [vmem:[#allocation90_spill] sm:$0xff] %v9419_v51  ;;  %v2186_v12 = vsel %vm2137_vm3, %v9419_v51, 0.0 }
 0x3aa   : > { %v9396_v15 = vpop.f32.mrb[29].mxu0  ;;  %v1952_v39 = vrot.slane %v1803_v43, %v9124_v63  ;;  %v1813_v56 = vcombine.high %v1803_v43, %v1803_v43  ;;  %v1476_v43 = vadd.f32 %v9339_v47, %v9141_v9 }
 0x3ab   : > { %2175 = vadd.xlane.f32.xlu0 %v2174_v55  ;;  %v1456_v55 = vadd.f32 %v9302_v45, %v9141_v9  ;;  %v1811_v45 = vcombine.high %v1789_v2, %v1789_v2 }
 0x3ac   : > { %2178 = vadd.xlane.f32.xlu1 %v2177_v0  ;;  %v9436_v4 = vmul.f32 %v1952_v39, %v1461_v16  ;;  %v9443_v5 = vmul.f32 %v1952_v39, %v1466_v46  ;;  %v1960_v16 = vrot.slane %v1813_v56, %v9124_v63  ;;  %v1481_v46 = vadd.f32 %v9141_v9, %v9359_v61 }
 0x3ad   : > { %v9412_v8 = vpop.f32.mrb[30].mxu0  ;;  %v9425_v58 = vmul.f32 %v1948_v25, %v1456_v55  ;;  %v1956_v2 = vrot.slane %v1811_v45, %v9124_v63  ;;  %v1471_v25 = vadd.f32 %v9141_v9, %v9341_v26  ;;  %v1796_v45 = vrot.slane %v1780_v54, %v9112_v49 }
 0x3ae   : > { %v9414_v0 = vpop.f32.mrb[31].mxu0  ;;  %12472 = vst [vmem:[#allocation92_spill] sm:$0xff] %v9436_v4  ;;  %12473 = vst [vmem:[#allocation93_spill] sm:$0xff] %v9443_v5  ;;  %v2192_v26 = vsel %vm2137_vm3, %v9436_v4, 0.0  ;;  %v1782_v39 = vcombine.high %v1780_v54, %v1780_v54  ;;  %v1486_v56 = vadd.f32 %v9357_v44, %v9141_v9  ;;  %v9472_v40 = vmul.f32 %v1960_v16, %v1481_v46 }
 0x3af   : > { %2319 = vadd.xlane.f32.xlu0 %v2318_v19  ;;  %12471 = vst [vmem:[#allocation91_spill] sm:$0xff] %v9425_v58  ;;  %v2183_v19 = vsel %vm2137_vm3, %v9406_v31, 0.0  ;;  %v2189_v55 = vsel %vm2137_vm3, %v9425_v58, 0.0  ;;  %v9461_v47 = vmul.f32 %v1956_v2, %v1476_v43  ;;  %v2195_v31 = vsel %vm2137_vm3, %v9443_v5, 0.0 }
 0x3b0   : > { %2322 = vadd.xlane.f32.xlu1 %v2321_v17  ;;  %12476 = vst [vmem:[#allocation96_spill] sm:$0xff] %v9472_v40  ;;  %v1491_v61 = vadd.f32 %v9141_v9, %v9378_v18  ;;  %v9479_v43 = vmul.f32 %v1960_v16, %v1486_v56  ;;  %v1812_v46 = vcombine.high %v1796_v45, %v1796_v45  ;;  %v2204_v18 = vsel %vm2137_vm3, %v9472_v40, 0.0 }
 0x3b1   : > { %v9431_v32 = vpop.f32.mrb[32].mxu0  ;;  %12475 = vst [vmem:[#allocation95_spill] sm:$0xff] %v9461_v47  ;;  %v2201_v44 = vsel %vm2137_vm3, %v9461_v47, 0.0 }
 0x3b2   : > { %v9433_v17 = vpop.f32.mrb[33].mxu0  ;;  %12477 = vst [vmem:[#allocation97_spill] sm:$0xff] %v9479_v43 }
 0x3b3   : > { %2181 = vadd.xlane.f32.xlu0 %v2180_v41 }
 0x3b4   : > { %2184 = vadd.xlane.f32.xlu1 %v2183_v19  ;;  %v9455_v19 = vmul.f32 %v1956_v2, %v1471_v25  ;;  %v1964_v25 = vrot.slane %v1796_v45, %v9124_v63  ;;  %v1810_v2 = vrot.slane %v1782_v39, %v9112_v49  ;;  %v1501_v39 = vadd.f32 %v9141_v9, %v9396_v15 }
 0x3b5   : > { %v9449_v62 = vpop.f32.mrb[34].mxu0 }
 0x3b6   : > { %v9451_v41 = vpop.f32.mrb[35].mxu0  ;;  %12474 = vst [vmem:[#allocation94_spill] sm:$0xff] %v9455_v19  ;;  %v2198_v54 = vsel %vm2137_vm3, %v9455_v19, 0.0  ;;  %v9489_v28 = vmul.f32 %v1964_v25, %v1491_v61  ;;  %v1968_v16 = vrot.slane %v1810_v2, %v9124_v63  ;;  %v1814_v35 = vcombine.high %v1810_v2, %v1810_v2 }
 0x3b7   : > { %2187 = vadd.xlane.f32.xlu0 %v2186_v12  ;;  %v1516_v2 = vadd.f32 %v9412_v8, %v9141_v9 }
 0x3b8   : > { %2190 = vadd.xlane.f32.xlu1 %v2189_v55  ;;  %12478 = vst [vmem:[#allocation98_spill] sm:$0xff] %v9489_v28  ;;  %v9507_v10 = vmul.f32 %v1968_v16, %v1501_v39  ;;  %v2210_v15 = vsel %vm2137_vm3, %v9489_v28, 0.0 }
 0x3b9   : > { %v9467_v12 = vpop.f32.mrb[36].mxu0 }
 0x3ba   : > { %v9469_v55 = vpop.f32.mrb[37].mxu0  ;;  %12480 = vst [vmem:[#allocation100_spill] sm:$0xff] %v9507_v10 }
 0x3bb   : > { %2193 = vadd.xlane.f32.xlu0 %v2192_v26  ;;  %v1496_v26 = vadd.f32 %v9376_v59, %v9141_v9  ;;  %v2207_v59 = vsel %vm2137_vm3, %v9479_v43, 0.0 }
 0x3bc   : > { %2196 = vadd.xlane.f32.xlu1 %v2195_v31 }
 0x3bd   : > { %v9485_v24 = vpop.f32.mrb[38].mxu0  ;;  %v9496_v56 = vmul.f32 %v1964_v25, %v1496_v26  ;;  %v1511_v25 = vadd.f32 %v9141_v9, %v9414_v0 }
 0x3be   : > { %v9487_v31 = vpop.f32.mrb[39].mxu0 }
 0x3bf   : > { %2199 = vadd.xlane.f32.xlu0 %v2198_v54  ;;  %12479 = vst [vmem:[#allocation99_spill] sm:$0xff] %v9496_v56  ;;  %v1506_v54 = vadd.f32 %v9394_v57, %v9141_v9  ;;  %v1822_v57 = vrot.slane %v9174_v33, %v9112_v49 }
 0x3c0   : > { %2202 = vadd.xlane.f32.xlu1 %v2201_v44  ;;  %v1972_v44 = vrot.slane %v1812_v46, %v9124_v63 }
 0x3c1   : > { %v9502_v45 = vpop.f32.mrb[40].mxu0  ;;  %v9515_v26 = vmul.f32 %v1968_v16, %v1506_v54  ;;  %v1830_v60 = vcombine.high %v1822_v57, %v1822_v57  ;;  %v2216_v16 = vsel %vm2137_vm3, %v9507_v10, 0.0  ;;  %v1521_v54 = vadd.f32 %v9141_v9, %v9433_v17 }
 0x3c2   : > { %v9504_v61 = vpop.f32.mrb[41].mxu0  ;;  %v9526_v0 = vmul.f32 %v1972_v44, %v1511_v25  ;;  %v1838_v42 = vrot.slane %v1822_v57, %v9112_v49  ;;  %v9533_v8 = vmul.f32 %v1972_v44, %v1516_v2  ;;  %v1531_v57 = vadd.f32 %v9141_v9, %v9451_v41 }
 0x3c3   : > { %2205 = vadd.xlane.f32.xlu0 %v2204_v18  ;;  %12481 = vst [vmem:[#allocation101_spill] sm:$0xff] %v9515_v26  ;;  %v2213_v18 = vsel %vm2137_vm3, %v9496_v56, 0.0  ;;  %v2219_v30 = vsel %vm2137_vm3, %v9515_v26, 0.0 }
 0x3c4   : > { %2208 = vadd.xlane.f32.xlu1 %v2207_v59  ;;  %v1976_v59 = vrot.slane %v1814_v35, %v9124_v63  ;;  %12482 = vst [vmem:[#allocation102_spill] sm:$0xff] %v9526_v0  ;;  %12483 = vst [vmem:[#allocation103_spill] sm:$0xff] %v9533_v8  ;;  %v1526_v35 = vadd.f32 %v9431_v32, %v9141_v9  ;;  %v2222_v17 = vsel %vm2137_vm3, %v9526_v0, 0.0  ;;  %v2225_v32 = vsel %vm2137_vm3, %v9533_v8, 0.0 }
 0x3c5   : > { %v9521_v46 = vpop.f32.mrb[42].mxu0  ;;  %v1980_v44 = vrot.slane %v1838_v42, %v9124_v63  ;;  %v1860_v26 = vcombine.high %v1838_v42, %v1838_v42  ;;  %v1546_v42 = vadd.f32 %v9467_v12, %v9141_v9 }
 0x3c6   : > { %v9523_v39 = vpop.f32.mrb[43].mxu0  ;;  %v9544_v10 = vmul.f32 %v1976_v59, %v1521_v54  ;;  %v9551_v2 = vmul.f32 %v1976_v59, %v1526_v35  ;;  %v1541_v59 = vadd.f32 %v9141_v9, %v9469_v55  ;;  %v1815_v35 = vcombine.high %v9174_v33, %v9174_v33 }
 0x3c7   : > { %2211 = vadd.xlane.f32.xlu0 %v2210_v15  ;;  %v9560_v0 = vmul.f32 %v1980_v44, %v1531_v57  ;;  %v1988_v8 = vrot.slane %v1860_v26, %v9124_v63  ;;  %v1556_v26 = vadd.f32 %v9485_v24, %v9141_v9 }
 0x3c8   : > { %2214 = vadd.xlane.f32.xlu1 %v2213_v18  ;;  %v1852_v18 = vrot.slane %v1830_v60, %v9112_v49  ;;  %12484 = vst [vmem:[#allocation104_spill] sm:$0xff] %v9544_v10  ;;  %12485 = vst [vmem:[#allocation105_spill] sm:$0xff] %v9551_v2  ;;  %v2228_v41 = vsel %vm2137_vm3, %v9544_v10, 0.0 }
 0x3c9   : > { %v9539_v15 = vpop.f32.mrb[44].mxu0  ;;  %12486 = vst [vmem:[#allocation106_spill] sm:$0xff] %v9560_v0 }
 0x3ca   : > { %v9541_v25 = vpop.f32.mrb[45].mxu0  ;;  %v1984_v54 = vrot.slane %v1852_v18, %v9124_v63  ;;  %v1862_v10 = vcombine.high %v1852_v18, %v1852_v18 }
 0x3cb   : > { %2217 = vadd.xlane.f32.xlu0 %v2216_v16  ;;  %v1536_v16 = vadd.f32 %v9449_v62, %v9141_v9 }
 0x3cc   : > { %2220 = vadd.xlane.f32.xlu1 %v2219_v30  ;;  %v9577_v55 = vmul.f32 %v1984_v54, %v1541_v59  ;;  %v9584_v28 = vmul.f32 %v1984_v54, %v1546_v42  ;;  %v1992_v18 = vrot.slane %v1862_v10, %v9124_v63  ;;  %v1561_v54 = vadd.f32 %v9141_v9, %v9504_v61 }
 0x3cd   : > { %v9557_v60 = vpop.f32.mrb[46].mxu0  ;;  %v9568_v62 = vmul.f32 %v1980_v44, %v1536_v16  ;;  %v2234_v44 = vsel %vm2137_vm3, %v9560_v0, 0.0  ;;  %v1551_v16 = vadd.f32 %v9141_v9, %v9487_v31  ;;  %v1566_v10 = vadd.f32 %v9502_v45, %v9141_v9 }
 0x3ce   : > { %v1590_v30 = vpop.f32.mrb[47].mxu0  ;;  %12488 = vst [vmem:[#allocation108_spill] sm:$0xff] %v9577_v55  ;;  %12489 = vst [vmem:[#allocation109_spill] sm:$0xff] %v9584_v28  ;;  %v2240_v31 = vsel %vm2137_vm3, %v9577_v55, 0.0  ;;  %v2243_v24 = vsel %vm2137_vm3, %v9584_v28, 0.0  ;;  %v1576_v45 = vadd.f32 %v9521_v46, %v9141_v9  ;;  %v1586_v46 = vadd.f32 %v9539_v15, %v9141_v9 }
 0x3cf   : > { %2223 = vadd.xlane.f32.xlu0 %v2222_v17  ;;  %12487 = vst [vmem:[#allocation107_spill] sm:$0xff] %v9568_v62  ;;  %v2231_v17 = vsel %vm2137_vm3, %v9551_v2, 0.0  ;;  %v1829_v2 = vrot.slane %v1815_v35, %v9112_v49  ;;  %v2237_v12 = vsel %vm2137_vm3, %v9568_v62, 0.0  ;;  %v9591_v59 = vmul.f32 %v1988_v8, %v1551_v16 }
 0x3d0   : > { %2226 = vadd.xlane.f32.xlu1 %v2225_v32  ;;  %v1596_v15 = vadd.f32 %v9557_v60, %v9141_v9 }
 0x3d1   : > { %v9574_v32 = vpop.f32.mrb[48].mxu0  ;;  %12490 = vst [vmem:[#allocation110_spill] sm:$0xff] %v9591_v59  ;;  %v1845_v35 = vrot.slane %v1829_v2, %v9112_v49  ;;  %v2246_v16 = vsel %vm2137_vm3, %v9591_v59, 0.0 }
 0x3d2   : > { %v1600_v57 = vpop.f32.mrb[49].mxu0  ;;  %v1606_v60 = vadd.f32 %v9574_v32, %v9141_v9  ;;  %v1686_v32 = vadd.f32 %v9285_v20, %v9141_v9 }
 0x3d3   : > { %2229 = vadd.xlane.f32.xlu0 %v2228_v41  ;;  %v1831_v41 = vcombine.high %v1829_v2, %v1829_v2  ;;  %v1996_v61 = vrot.slane %v1845_v35, %v9124_v63  ;;  %v9612_v2 = vmul.f32 %v1992_v18, %v1566_v10 }
 0x3d4   : > { %2232 = vadd.xlane.f32.xlu1 %v2231_v17  ;;  %v9598_v17 = vmul.f32 %v1988_v8, %v1556_v26  ;;  %v1571_v8 = vadd.f32 %v9141_v9, %v9523_v39  ;;  %v1581_v39 = vadd.f32 %v9141_v9, %v9541_v25  ;;  %v1591_v25 = vadd.f32 %v9141_v9, %v1590_v30 }
 0x3d5   : > { %v1859_v42 = vrot.slane %v1831_v41, %v9112_v49  ;;  %12493 = vst [vmem:[#allocation113_spill] sm:$0xff] %v9612_v2  ;;  %v1912_v30 = vcombine.high %v9307_v52, %v9307_v52  ;;  %v1681_v52 = vadd.f32 %v9141_v9, %v9289_v11 }
 0x3d6   : > { %12491 = vst [vmem:[#allocation111_spill] sm:$0xff] %v9598_v17  ;;  %v9619_v26 = vmul.f32 %v1996_v61, %v1571_v8 }
 0x3d7   : > { %2235 = vadd.xlane.f32.xlu0 %v2234_v44  ;;  %v9605_v44 = vmul.f32 %v1992_v18, %v1561_v54  ;;  %v2000_v49 = vrot.slane %v1859_v42, %v9124_v63  ;;  %v1861_v18 = vcombine.high %v1845_v35, %v1845_v35  ;;  %v2255_v54 = vsel %vm2137_vm3, %v9612_v2, 0.0 }
 0x3d8   : > { %2238 = vadd.xlane.f32.xlu1 %v2237_v12  ;;  %v2249_v12 = vsel %vm2137_vm3, %v9598_v17, 0.0  ;;  %12494 = vst [vmem:[#allocation114_spill] sm:$0xff] %v9619_v26 }
 0x3d9   : > { %12492 = vst [vmem:[#allocation112_spill] sm:$0xff] %v9605_v44  ;;  %v2252_v41 = vsel %vm2137_vm3, %v9605_v44, 0.0  ;;  %v9631_v10 = vmul.f32 %v2000_v49, %v1581_v39  ;;  %v2004_v8 = vrot.slane %v1861_v18, %v9124_v63  ;;  %v9637_v35 = vmul.f32 %v2000_v49, %v1586_v46 }
 0x3db   : > { %2241 = vadd.xlane.f32.xlu0 %v2240_v31  ;;  %v9625_v31 = vmul.f32 %v1996_v61, %v1576_v45  ;;  %12496 = vst [vmem:[#allocation116_spill] sm:$0xff] %v9631_v10  ;;  %12497 = vst [vmem:[#allocation117_spill] sm:$0xff] %v9637_v35  ;;  %v2264_v45 = vsel %vm2137_vm3, %v9631_v10, 0.0  ;;  %v9651_v49 = vmul.f32 %v2004_v8, %v1596_v15  ;;  %v2267_v39 = vsel %vm2137_vm3, %v9637_v35, 0.0 }
 0x3dc   : > { %2244 = vadd.xlane.f32.xlu1 %v2243_v24  ;;  %v1863_v24 = vcombine.high %v1859_v42, %v1859_v42 }
 0x3dd   : > { %12495 = vst [vmem:[#allocation115_spill] sm:$0xff] %v9625_v31  ;;  %v2261_v61 = vsel %vm2137_vm3, %v9625_v31, 0.0  ;;  %12499 = vst [vmem:[#allocation119_spill] sm:$0xff] %v9651_v49 }
 0x3de   : > { %v2008_v42 = vrot.slane %v1863_v24, %v9124_v63  ;;  %v2273_v24 = vsel %vm2137_vm3, %v9651_v49, 0.0 }
 0x3df   : > { %2247 = vadd.xlane.f32.xlu0 %v2246_v16  ;;  %v2258_v16 = vsel %vm2137_vm3, %v9619_v26, 0.0 }
 0x3e0   : > { %2250 = vadd.xlane.f32.xlu1 %v2249_v12  ;;  %v9644_v12 = vmul.f32 %v2004_v8, %v1591_v25  ;;  %v9664_v46 = vmul.f32 %v2008_v42, %v1606_v60 }
 0x3e2   : > { %12498 = vst [vmem:[#allocation118_spill] sm:$0xff] %v9644_v12  ;;  %12501 = vst [vmem:[#allocation121_spill] sm:$0xff] %v9664_v46 }
 0x3e3   : > { %2253 = vadd.xlane.f32.xlu0 %v2252_v41  ;;  %v1601_v41 = vadd.f32 %v9141_v9, %v1600_v57  ;;  %v2040_v57 = vrot.slane %v1912_v30, %v9124_v63  ;;  %v2279_v63 = vsel %vm2137_vm3, %v9664_v46, 0.0 }
 0x3e4   : > { %2256 = vadd.xlane.f32.xlu1 %v2255_v54  ;;  %v2270_v54 = vsel %vm2137_vm3, %v9644_v12, 0.0 }
 0x3e5   : > { %v9657_v18 = vmul.f32 %v2008_v42, %v1601_v41  ;;  %v9674_v25 = vmul.f32 %v2040_v57, %v1686_v32 }
 0x3e7   : > { %2259 = vadd.xlane.f32.xlu0 %v2258_v16  ;;  %12500 = vst [vmem:[#allocation120_spill] sm:$0xff] %v9657_v18  ;;  %v9670_v16 = vmul.f32 %v2040_v57, %v1681_v52  ;;  %v2276_v8 = vsel %vm2137_vm3, %v9657_v18, 0.0  ;;  %12503 = vst [vmem:[#allocation123_spill] sm:$0xff] %v9674_v25  ;;  %v2327_v9 = vsel %vm2137_vm3, %v9674_v25, 0.0 }
 0x3e8   : > { %2262 = vadd.xlane.f32.xlu1 %v2261_v61 }
 0x3e9   : > { %12502 = vst [vmem:[#allocation122_spill] sm:$0xff] %v9670_v16  ;;  %v2324_v11 = vsel %vm2137_vm3, %v9670_v16, 0.0 }
 0x3eb   : > { %2265 = vadd.xlane.f32.xlu0 %v2264_v45 }
 0x3ec   : > { %2268 = vadd.xlane.f32.xlu1 %v2267_v39 }
 0x3ef   : > { %2271 = vadd.xlane.f32.xlu0 %v2270_v54 }
 0x3f0   : > { %2274 = vadd.xlane.f32.xlu1 %v2273_v24 }
 0x3f3   : > { %2277 = vadd.xlane.f32.xlu0 %v2276_v8 }
 0x3f4   : > { %2280 = vadd.xlane.f32.xlu1 %v2279_v63 }
 0x3f7   : > { %2325 = vadd.xlane.f32.xlu0 %v2324_v11 }
 0x3f8   : > { %2328 = vadd.xlane.f32.xlu1 %v2327_v9 }
 0x408   : > { %v9682_v20 = vpop.xlane.xlu0 %2142 }
 0x409   : > { %v9684_v61 = vpop.xlane.xlu1 %2286  ;;  %7666 = vrot.lane.b32.xlu1 %v9135_v6, %s8307_s1 }
 0x40c   : > { %v9688_v15 = vpop.xlane.xlu0 %2139 }
 0x40d   : > { %v2149_v42 = vpop.xlane.xlu1 %2148  ;;  %3480 = vrot.lane.b32.xlu1 %v9093_v38, %s8307_s1  ;;  %3096 = vrot.lane.b32.xlu0 %v9168_v27, %s8307_s1 }
 0x410   : > { %v9694_v45 = vpop.xlane.xlu0 %2283 }
 0x411   : > { %v9696_v41 = vpop.xlane.xlu1 %2292  ;;  %3482 = vrot.lane.b32.xlu1 %v9162_v23, %s8307_s1  ;;  %3100 = vrot.lane.b32.xlu0 %v9210_v3, %s8307_s1 }
 0x414   : > { %v9702_v30 = vpop.xlane.xlu0 %2289 }
 0x415   : > { %v2146_v39 = vpop.xlane.xlu1 %2145  ;;  %3484 = vrot.lane.b32.xlu1 %v9174_v33, %s8307_s1  ;;  %3104 = vrot.lane.b32.xlu0 %v9216_v7, %s8307_s1  ;;  %v12504_v7 = vlaneseq }
 0x417   : > { %v1708_v3 = vand.u32 127, %v12504_v7 }
 0x418   : > { %v2152_v38 = vpop.xlane.xlu0 %2151 }
 0x419   : > { %v2155_v60 = vpop.xlane.xlu1 %2154  ;;  %3486 = vrot.lane.b32.xlu1 %v9114_v50, %s8307_s1  ;;  %v2398_v46 = vadd.s32 4294967288, %v1708_v3  ;;  %v9738_v49 = vsub.s32 %v1708_v3, %v9109_v48 }
 0x41b   : > { %v9741_v35 = vsub.s32 %v2398_v46, %v9109_v48  ;;  %v2408_v31 = vrot.slane %v2146_v39, %v9738_v49  ;;  %v2417_v12 = vrot.slane %v2152_v38, %v9738_v49  ;;  %v2397_v10 = vrot.slane %v9688_v15, %v9738_v49 }
 0x41c   : > { %v9710_v54 = vpop.xlane.xlu0 %2295 }
 0x41d   : > { %v9712_v23 = vpop.xlane.xlu1 %2298  ;;  %3098 = vrot.lane.b32.xlu1 %v9158_v21, %s8307_s1  ;;  %v2421_v7 = vrot.slane %v2155_v60, %v9741_v35  ;;  %v2412_v2 = vrot.slane %v2149_v42, %v9741_v35  ;;  %v2402_v15 = vrot.slane %v9682_v20, %v9741_v35 }
 0x41f   : > { %v2413_v42 = vsel %vm2403_vm5, %v2412_v2, %v2408_v31 }
 0x420   : > { %v2158_v57 = vpop.xlane.xlu0 %2157 }
 0x421   : > { %v2161_v52 = vpop.xlane.xlu1 %2160  ;;  %3102 = vrot.lane.b32.xlu1 %v9181_v37, %s8307_s1  ;;  %v2426_v17 = vrot.slane %v2158_v57, %v9738_v49 }
 0x422   : > { %v2430_v26 = vrot.slane %v2161_v52, %v9741_v35  ;;  %v2422_v52 = vsel %vm2403_vm5, %v2421_v7, %v2417_v12  ;;  %v1711_v7 = vstv %s9754_s19 }
 0x424   : > { %v9718_v33 = vpop.xlane.xlu0 %2301  ;;  %v2431_v59 = vsel %vm2403_vm5, %v2430_v26, %v2426_v17 }
 0x425   : > { %v9720_v24 = vpop.xlane.xlu1 %2304  ;;  %3106 = vrot.lane.b32.xlu1 %v9220_v13, %s8307_s1 }
 0x428   : > { %v2164_v50 = vpop.xlane.xlu0 %2163 }
 0x429   : > { %v2167_v32 = vpop.xlane.xlu1 %2166  ;;  %v2435_v39 = vrot.slane %v2164_v50, %v9738_v49  ;;  %v2404_v50 = vsel %vm2403_vm5, %v2402_v15, %v2397_v10 }
 0x42a   : > { %v2439_v46 = vrot.slane %v2167_v32, %v9741_v35  ;;  %v1709_v32 = vstv %s6960_s23  ;;  %v2685_v31 = vsel %vm2684_vm6, %v2413_v42, %v2404_v50 }
 0x42b   : > { %v1710_v26 = vadd.s32 %v1709_v32, %v1708_v3 }
 0x42c   : > { %v9724_v8 = vpop.xlane.xlu0 %2307 }
 0x42d   : > { %v9726_v63 = vpop.xlane.xlu1 %2310  ;;  %vm9785_vm13 = vcmp.lt.s32.totalorder %v1710_v26, %v1711_v7 }
 0x430   : > { %v2170_v11 = vpop.xlane.xlu0 %2169 }
 0x431   : > { %v2173_v9 = vpop.xlane.xlu1 %2172  ;;  %v2444_v57 = vrot.slane %v2170_v11, %v9738_v49  ;;  %v2440_v11 = vsel %vm2403_vm5, %v2439_v46, %v2435_v39 }
 0x432   : > { %v2448_v60 = vrot.slane %v2173_v9, %v9741_v35 }
 0x434   : > { %v9728_v21 = vpop.xlane.xlu0 %2313 }
 0x435   : > { %v9730_v6 = vpop.xlane.xlu1 %2316 }
 0x438   : > { %v2176_v37 = vpop.xlane.xlu0 %2175 }
 0x439   : > { %v2179_v27 = vpop.xlane.xlu1 %2178  ;;  %v2453_v28 = vrot.slane %v2176_v37, %v9738_v49  ;;  %v2449_v37 = vsel %vm2403_vm5, %v2448_v60, %v2444_v57 }
 0x43a   : > { %v2457_v44 = vrot.slane %v2179_v27, %v9741_v35  ;;  %v2687_v27 = vsel %vm2686_vm7, %v2422_v52, %v2685_v31 }
 0x43b   : > { %v2689_v10 = vsel %vm2688_vm8, %v2431_v59, %v2687_v27 }
 0x43c   : > { %v9733_v25 = vpop.xlane.xlu0 %2319  ;;  %v2458_v17 = vsel %vm2403_vm5, %v2457_v44, %v2453_v28  ;;  %v2691_v9 = vsel %vm2690_vm9, %v2440_v11, %v2689_v10  ;;  %v12507_v28 = vmov 0 }
 0x43d   : > { %v9735_v13 = vpop.xlane.xlu1 %2322  ;;  %v2693_v39 = vsel %vm2692_vm10, %v2449_v37, %v2691_v9  ;;  %v12508_v28 = vsel %vm9785_vm13, 4294967295, %v12507_v28 }
 0x43e   : > { %v2695_v42 = vsel %vm2694_vm11, %v2458_v17, %v2693_v39  ;;  %12509 = vst [vmem:[#allocation124_spill] sm:$0xff] %v12508_v28 }
 0x440   : > { %v2182_v16 = vpop.xlane.xlu0 %2181 }
 0x441   : > { %v2185_v18 = vpop.xlane.xlu1 %2184  ;;  %v2462_v20 = vrot.slane %v2182_v16, %v9738_v49 }
 0x442   : > { %v2466_v55 = vrot.slane %v2185_v18, %v9741_v35 }
 0x444   : > { %v9751_v48 = vpop.xlane.xlu0 %2187  ;;  %v2467_v16 = vsel %vm2403_vm5, %v2466_v55, %v2462_v20 }
 0x445   : > { %v9759_v38 = vpop.xlane.xlu1 %2190  ;;  %v2697_v60 = vsel %vm2696_vm12, %v2467_v16, %v2695_v42  ;;  %v2471_v9 = vrot.slane %v9751_v48, %v9738_v49 }
 0x446   : > { %v2475_v16 = vrot.slane %v9759_v38, %v9741_v35 }
 0x448   : > { %v2194_v2 = vpop.xlane.xlu0 %2193 }
 0x449   : > { %v2197_v12 = vpop.xlane.xlu1 %2196  ;;  %v2480_v27 = vrot.slane %v2194_v2, %v9738_v49 }
 0x44a   : > { %v2484_v11 = vrot.slane %v2197_v12, %v9741_v35 }
 0x44c   : > { %v2200_v18 = vpop.xlane.xlu0 %2199  ;;  %v2485_v42 = vsel %vm2403_vm5, %v2484_v11, %v2480_v27 }
 0x44d   : > { %v2203_v46 = vpop.xlane.xlu1 %2202  ;;  %v2489_v17 = vrot.slane %v2200_v18, %v9738_v49 }
 0x44e   : > { %v7291_v15 = vpop.f32.mrb[18].mxu1  ;;  %v2493_v10 = vrot.slane %v2203_v46, %v9741_v35 }
 0x44f   : > { %v2803_v59 = vpop.f32.mrb[19].mxu1 }
 0x450   : > { %v2804_v3 = vadd.f32 %v2803_v59, %v2697_v60  ;;  %v2206_v44 = vpop.xlane.xlu0 %2205  ;;  %v2494_v38 = vsel %vm2403_vm5, %v2493_v10, %v2489_v17 }
 0x451   : > { %v2209_v55 = vpop.xlane.xlu1 %2208  ;;  %v2498_v39 = vrot.slane %v2206_v44, %v9738_v49 }
 0x452   : > { %v9791_v57 = vsel %vm9785_vm13, %v2804_v3, -1e+15  ;;  %v9793_v52 = vpop.f32.mrb[20].mxu1  ;;  %v2502_v7 = vrot.slane %v2209_v55, %v9741_v35  ;;  %v2476_v3 = vsel %vm2403_vm5, %v2475_v16, %v2471_v9 }
 0x453   : > { %v2827_v32 = vsel %vm2826_vm14, %v9791_v57, -inf  ;;  %v9797_v50 = vpop.f32.mrb[21].mxu1 }
 0x454   : > { %v2212_v20 = vpop.xlane.xlu0 %2211  ;;  %2828 = vmax.xlane.f32.xlu0 %v2827_v32  ;;  %v2503_v44 = vsel %vm2403_vm5, %v2502_v7, %v2498_v39  ;;  %v2698_v32 = vsel %vm2684_vm6, %v2485_v42, %v2476_v3  ;;  %v12297_v42 = vmov 0  }
 0x455   : > { %v2215_v31 = vpop.xlane.xlu1 %2214  ;;  %v2507_v2 = vrot.slane %v2212_v20, %v9738_v49  ;;  %7671 = vset.pattern.permute.xlu0 %v12297_v42  ;;  %7670 = vset.pattern.permute.xlu1 %v12297_v42  ;;  %v12537_v42 = vld [vmem:[#allocation71_spill] sm:$0xff] }
 0x456   : > { %v2511_v12 = vrot.slane %v2215_v31, %v9741_v35  ;;  %v2699_v31 = vsel %vm2686_vm7, %v2494_v38, %v2698_v32 }
 0x458   : > { %v2218_v37 = vpop.xlane.xlu0 %2217  ;;  %v2512_v20 = vsel %vm2403_vm5, %v2511_v12, %v2507_v2 }
 0x459   : > { %v2221_v26 = vpop.xlane.xlu1 %2220  ;;  %v2516_v18 = vrot.slane %v2218_v37, %v9738_v49  ;;  %v2700_v37 = vsel %vm2688_vm8, %v2503_v44, %v2699_v31 }
 0x45a   : > { %v2520_v46 = vrot.slane %v2221_v26, %v9741_v35  ;;  %v2701_v16 = vsel %vm2690_vm9, %v2512_v20, %v2700_v37 }
 0x45c   : > { %v2224_v60 = vpop.xlane.xlu0 %2223  ;;  %v2521_v11 = vsel %vm2403_vm5, %v2520_v46, %v2516_v18 }
 0x45d   : > { %v2227_v59 = vpop.xlane.xlu1 %2226  ;;  %v2525_v48 = vrot.slane %v2224_v60, %v9738_v49  ;;  %v2702_v7 = vsel %vm2692_vm10, %v2521_v11, %v2701_v16 }
 0x45e   : > { %v2529_v55 = vrot.slane %v2227_v59, %v9741_v35 }
 0x460   : > { %v2230_v27 = vpop.xlane.xlu0 %2229  ;;  %v2530_v10 = vsel %vm2403_vm5, %v2529_v55, %v2525_v48 }
 0x461   : > { %v2233_v17 = vpop.xlane.xlu1 %2232  ;;  %v2534_v26 = vrot.slane %v2230_v27, %v9738_v49  ;;  %v2703_v2 = vsel %vm2694_vm11, %v2530_v10, %v2702_v7 }
 0x462   : > { %v2538_v9 = vrot.slane %v2233_v17, %v9741_v35 }
 0x464   : > { %v2539_v39 = vsel %vm2403_vm5, %v2538_v9, %v2534_v26  ;;  %v2236_v12 = vpop.xlane.xlu0 %2235 }
 0x465   : > { %v2239_v46 = vpop.xlane.xlu1 %2238  ;;  %v2704_v18 = vsel %vm2696_vm12, %v2539_v39, %v2703_v2  ;;  %v2543_v55 = vrot.slane %v2236_v12, %v9738_v49 }
 0x466   : > { %v2809_v60 = vadd.f32 %v7291_v15, %v2704_v18  ;;  %v2547_v44 = vrot.slane %v2239_v46, %v9741_v35 }
 0x468   : > { %v2242_v38 = vpop.xlane.xlu0 %2241  ;;  %v9836_v59 = vsel %vm9785_vm13, %v2809_v60, -1e+15  ;;  %v2548_v37 = vsel %vm2403_vm5, %v2547_v44, %v2543_v55 }
 0x469   : > { %v2245_v48 = vpop.xlane.xlu1 %2244  ;;  %v2830_v3 = vsel %vm2826_vm14, %v9836_v59, -inf  ;;  %v2552_v20 = vrot.slane %v2242_v38, %v9738_v49 }
 0x46a   : > { %2831 = vmax.xlane.f32.xlu1 %v2830_v3  ;;  %v2556_v32 = vrot.slane %v2245_v48, %v9741_v35 }
 0x46c   : > { %v2248_v31 = vpop.xlane.xlu0 %2247  ;;  %v2557_v10 = vsel %vm2403_vm5, %v2556_v32, %v2552_v20 }
 0x46d   : > { %v2251_v15 = vpop.xlane.xlu1 %2250  ;;  %v2561_v27 = vrot.slane %v2248_v31, %v9738_v49  ;;  %v2705_v7 = vsel %vm2684_vm6, %v2557_v10, %v2548_v37  ;;  %v2624_v31 = vrot.slane %v9702_v30, %v9738_v49  ;;  %v2615_v37 = vrot.slane %v9694_v45, %v9738_v49 }
 0x46e   : > { %v2565_v11 = vrot.slane %v2251_v15, %v9741_v35  ;;  %v2637_v10 = vrot.slane %v9712_v23, %v9741_v35  ;;  %v2628_v30 = vrot.slane %v9696_v41, %v9741_v35  ;;  %v2619_v23 = vrot.slane %v9684_v61, %v9741_v35 }
 0x470   : > { %v2254_v17 = vpop.xlane.xlu0 %2253  ;;  %v2566_v39 = vsel %vm2403_vm5, %v2565_v11, %v2561_v27  ;;  %v2629_v41 = vsel %vm2403_vm5, %v2628_v30, %v2624_v31 }
 0x471   : > { %v2257_v26 = vpop.xlane.xlu1 %2256  ;;  %v2570_v9 = vrot.slane %v2254_v17, %v9738_v49  ;;  %v2706_v18 = vsel %vm2686_vm7, %v2566_v39, %v2705_v7  ;;  %v2633_v17 = vrot.slane %v9710_v54, %v9738_v49  ;;  %v2642_v7 = vrot.slane %v9718_v33, %v9738_v49 }
 0x472   : > { %v2574_v16 = vrot.slane %v2257_v26, %v9741_v35  ;;  %v2655_v54 = vrot.slane %v9726_v63, %v9741_v35  ;;  %v2651_v39 = vrot.slane %v9724_v8, %v9738_v49  ;;  %v2660_v33 = vrot.slane %v9728_v21, %v9738_v49 }
 0x473   : > { %v2638_v61 = vsel %vm2403_vm5, %v2637_v10, %v2633_v17  ;;  %v2673_v63 = vrot.slane %v9735_v13, %v9741_v35  ;;  %v2669_v8 = vrot.slane %v9733_v25, %v9738_v49 }
 0x474   : > { %v2260_v12 = vpop.xlane.xlu0 %2259  ;;  %v2575_v60 = vsel %vm2403_vm5, %v2574_v16, %v2570_v9  ;;  %v2646_v9 = vrot.slane %v9720_v24, %v9741_v35  ;;  %v2664_v24 = vrot.slane %v9730_v6, %v9741_v35 }
 0x475   : > { %v2263_v2 = vpop.xlane.xlu1 %2262  ;;  %v2579_v46 = vrot.slane %v2260_v12, %v9738_v49  ;;  %v2707_v3 = vsel %vm2688_vm8, %v2575_v60, %v2706_v18  ;;  %v2674_v31 = vsel %vm2403_vm5, %v2673_v63, %v2669_v8 }
 0x476   : > { %v2583_v38 = vrot.slane %v2263_v2, %v9741_v35  ;;  %v2647_v6 = vsel %vm2403_vm5, %v2646_v9, %v2642_v7 }
 0x478   : > { %v2266_v48 = vpop.xlane.xlu0 %2265  ;;  %v2584_v44 = vsel %vm2403_vm5, %v2583_v38, %v2579_v46  ;;  %v2620_v38 = vsel %vm2403_vm5, %v2619_v23, %v2615_v37 }
 0x479   : > { %v2269_v55 = vpop.xlane.xlu1 %2268  ;;  %v2588_v32 = vrot.slane %v2266_v48, %v9738_v49  ;;  %v2708_v27 = vsel %vm2690_vm9, %v2584_v44, %v2707_v3  ;;  %v2712_v3 = vsel %vm2684_vm6, %v2629_v41, %v2620_v38  ;;  %v2656_v44 = vsel %vm2403_vm5, %v2655_v54, %v2651_v39 }
 0x47a   : > { %v2592_v20 = vrot.slane %v2269_v55, %v9741_v35  ;;  %v2713_v13 = vsel %vm2686_vm7, %v2638_v61, %v2712_v3  ;;  %v2665_v55 = vsel %vm2403_vm5, %v2664_v24, %v2660_v33  ;;  %v12513_v3 = vld [vmem:[#allocation84_spill] sm:$0xff] }
 0x47c   : > { %v2593_v15 = vsel %vm2403_vm5, %v2592_v20, %v2588_v32  ;;  %v2272_v11 = vpop.xlane.xlu0 %2271  ;;  %v2714_v20 = vsel %vm2688_vm8, %v2647_v6, %v2713_v13  ;;  %v12514_v13 = vld [vmem:[#allocation100_spill] sm:$0xff] }
 0x47d   : > { %v2275_v26 = vpop.xlane.xlu1 %2274  ;;  %v2597_v16 = vrot.slane %v2272_v11, %v9738_v49  ;;  %v2709_v12 = vsel %vm2692_vm10, %v2593_v15, %v2708_v27  ;;  %v2715_v37 = vsel %vm2690_vm9, %v2656_v44, %v2714_v20 }
 0x47e   : > { %v2601_v45 = vrot.slane %v2275_v26, %v9741_v35  ;;  %v2716_v26 = vsel %vm2692_vm10, %v2665_v55, %v2715_v37  ;;  %v12520_v37 = vld [vmem:[#allocation88_spill] sm:$0xff] }
 0x47f   : > { %v2717_v9 = vsel %vm2694_vm11, %v2674_v31, %v2716_v26  ;;  %v12523_v26 = vld [vmem:[#allocation101_spill] sm:$0xff] }
 0x480   : > { %v2278_v2 = vpop.xlane.xlu0 %2277  ;;  %v2602_v46 = vsel %vm2403_vm5, %v2601_v45, %v2597_v16 }
 0x481   : > { %v2281_v18 = vpop.xlane.xlu1 %2280  ;;  %v2606_v60 = vrot.slane %v2278_v2, %v9738_v49  ;;  %v2710_v48 = vsel %vm2694_vm11, %v2602_v46, %v2709_v12 }
 0x482   : > { %v2610_v21 = vrot.slane %v2281_v18, %v9741_v35  ;;  %v1693_v18 = vld [vmem:[#allocation4] sm:$0xff] }
 0x484   : > { %v2326_v25 = vpop.xlane.xlu0 %2325  ;;  %v2611_v32 = vsel %vm2403_vm5, %v2610_v21, %v2606_v60 }
 0x485   : > { %v2329_v15 = vpop.xlane.xlu1 %2328  ;;  %v2678_v11 = vrot.slane %v2326_v25, %v9738_v49  ;;  %v2711_v27 = vsel %vm2696_vm12, %v2611_v32, %v2710_v48  ;;  %v12512_v48 = vld [vmem:[#allocation108_spill] sm:$0xff]  ;;  %v12515_v25 = vld [vmem:[#allocation110_spill] sm:$0xff]  ;;  %v1694_v32 = vld [vmem:[#allocation4 + $0x8] sm:$0xff] }
 0x486   : > { %v2682_v10 = vrot.slane %v2329_v15, %v9741_v35  ;;  %v2814_v17 = vadd.f32 %v9797_v50, %v2711_v27  ;;  %v12517_v15 = vld [vmem:[#allocation65_spill] sm:$0xff] }
 0x487   : > { %v12519_v27 = vld [vmem:[#allocation109_spill] sm:$0xff] }
 0x488   : > { %v2683_v16 = vsel %vm2403_vm5, %v2682_v10, %v2678_v11  ;;  %v9917_v30 = vsel %vm9785_vm13, %v2814_v17, -1e+15  ;;  %v9973_v2 = vpop.permute.xlu0 %3096  ;;  %v12518_v11 = vld [vmem:[#allocation66_spill] sm:$0xff]  ;;  %v12521_v10 = vld [vmem:[#allocation85_spill] sm:$0xff] }
 0x489   : > { %v7667_v7 = vpop.permute.xlu1 %7666  ;;  %v2833_v45 = vsel %vm2826_vm14, %v9917_v30, -inf  ;;  %v2718_v23 = vsel %vm2696_vm12, %v2683_v16, %v2717_v9  ;;  %v12522_v17 = vld [vmem:[#allocation102_spill] sm:$0xff]  ;;  %v12524_v16 = vld [vmem:[#allocation112_spill] sm:$0xff]  ;;  %v12525_v9 = vld [vmem:[#allocation111_spill] sm:$0xff] }
 0x48a   : > { %v7669_v54 = vunpack.i.h.bf16 %v7667_v7  ;;  %v7668_v39 = vunpack.i.l.bf16 %v7667_v7  ;;  %2834 = vmax.xlane.f32.xlu0 %v2833_v45  ;;  %v2819_v50 = vadd.f32 %v9793_v52, %v2718_v23  ;;  %v12510_v52 = vld [vmem:[#allocation98_spill] sm:$0xff]  ;;  %v12527_v45 = vld [vmem:[#allocation61_spill] sm:$0xff]  ;;  %v12528_v23 = vld [vmem:[#allocation104_spill] sm:$0xff] }
 0x48b   : > { %v12526_v7 = vld [vmem:[#allocation70_spill] sm:$0xff] }
 0x48c   : > { %v9924_v12 = vpack.c.bf16 %v7669_v54, %v7668_v39  ;;  %v9928_v41 = vsel %vm9785_vm13, %v2819_v50, -1e+15  ;;  %v9977_v61 = vpop.permute.xlu0 %3100  ;;  %v12529_v54 = vld [vmem:[#allocation64_spill] sm:$0xff]  ;;  %v12530_v39 = vld [vmem:[#allocation114_spill] sm:$0xff]  ;;  %v12531_v50 = vld [vmem:[#allocation89_spill] sm:$0xff] }
 0x48d   : > { %v2836_v24 = vsel %vm2826_vm14, %v9928_v41, -inf  ;;  %v9971_v33 = vpop.permute.xlu1 %3480 }
 0x48e   : > { %7409 = vmatprep.subr.msk.bf16.mxu1 %vm9128_vm4, %v9924_v12  ;;  %2837 = vmax.xlane.f32.xlu1 %v2836_v24  ;;  %v12532_v24 = vld [vmem:[#allocation74_spill] sm:$0xff] }
 0x490   : > { %v9981_v8 = vpop.permute.xlu0 %3104 }
 0x491   : > { %v9975_v46 = vpop.permute.xlu1 %3482 }
 0x495   : > { %v9979_v63 = vpop.permute.xlu1 %3484 }
 0x499   : > { %v9983_v60 = vpop.permute.xlu1 %3486 }
 0x49d   : > { %v9988_v21 = vpop.permute.xlu1 %3098 }
 0x49f   : > { %3130 = vrot.lane.b32.xlu1 %v9425_v58, %s8307_s1 }
 0x4a0   : > { %3128 = vrot.lane.b32.xlu0 %v9419_v51, %s8307_s1 }
 0x4a1   : > { %v9994_v44 = vpop.permute.xlu1 %3102 }
 0x4a3   : > { %3134 = vrot.lane.b32.xlu1 %v9443_v5, %s8307_s1 }
 0x4a4   : > { %3132 = vrot.lane.b32.xlu0 %v9436_v4, %s8307_s1 }
 0x4a5   : > { %v9998_v55 = vpop.permute.xlu1 %3106 }
 0x4a7   : > { %3110 = vrot.lane.b32.xlu1 %v9255_v53, %s8307_s1 }
 0x4a8   : > { %3108 = vrot.lane.b32.xlu0 %v9249_v14, %s8307_s1 }
 0x4ab   : > { %3138 = vrot.lane.b32.xlu1 %v9461_v47, %s8307_s1 }
 0x4ac   : > { %3136 = vrot.lane.b32.xlu0 %v9455_v19, %s8307_s1 }
 0x4af   : > { %3114 = vrot.lane.b32.xlu1 %v9297_v34, %s8307_s1 }
 0x4b0   : > { %3112 = vrot.lane.b32.xlu0 %v9291_v22, %s8307_s1 }
 0x4b3   : > { %3142 = vrot.lane.b32.xlu1 %v9479_v43, %s8307_s1 }
 0x4b4   : > { %3140 = vrot.lane.b32.xlu0 %v9472_v40, %s8307_s1 }
 0x4b7   : > { %3118 = vrot.lane.b32.xlu1 %v9333_v36, %s8307_s1 }
 0x4b8   : > { %3116 = vrot.lane.b32.xlu0 %v9326_v29, %s8307_s1 }
 0x4bb   : > { %3146 = vrot.lane.b32.xlu1 %v9496_v56, %s8307_s1 }
 0x4bc   : > { %3144 = vrot.lane.b32.xlu0 %v12510_v52, %s8307_s1 }
 0x4bf   : > { %3162 = vrot.lane.b32.xlu1 %v9568_v62, %s8307_s1 }
 0x4c0   : > { %3160 = vrot.lane.b32.xlu0 %v9560_v0, %s8307_s1 }
 0x4e1   : > { %v2829_v38 = vpop.xlane.xlu0 %2828 }
 0x4e2   : > { %v9985_v6 = vmax.f32 %v1693_v18, %v2829_v38  ;;  %v12533_v18 = vld [vmem:[#allocation103_spill] sm:$0xff]  ;;  %v12534_v38 = vld [vmem:[#allocation116_spill] sm:$0xff] }
 0x4e4   : > { %12511 = vst [vmem:[#allocation125_spill] sm:$0xff] %v9985_v6  ;;  %2857 = vperm.xlu0 %7671, %v9985_v6   ;;  %v12539_v6 = vld [vmem:[#allocation105_spill] sm:$0xff] }
 0x4e8   : > { %3164 = vrot.lane.b32.xlu0 %v12512_v48, %s8307_s1 }
 0x4ec   : > { %3120 = vrot.lane.b32.xlu0 %v12513_v3, %s8307_s1 }
 0x4f0   : > { %3148 = vrot.lane.b32.xlu0 %v12514_v13, %s8307_s1 }
 0x4f4   : > { %3168 = vrot.lane.b32.xlu0 %v12515_v25, %s8307_s1 }
 0x4f7   : > { %v2832_v20 = vpop.xlane.xlu1 %2831 }
 0x4f8   : > { %v10002_v31 = vmax.f32 %v1694_v32, %v2832_v20  ;;  %3192 = vrot.lane.b32.xlu0 %v12517_v15, %s8307_s1  ;;  %v12535_v32 = vld [vmem:[#allocation113_spill] sm:$0xff]  ;;  %v12536_v20 = vld [vmem:[#allocation78_spill] sm:$0xff] }
 0x4fa   : > { %12516 = vst [vmem:[#allocation126_spill] sm:$0xff] %v10002_v31  ;;  %2862 = vperm.xlu1 %7670, %v10002_v31   ;;  %v12538_v31 = vld [vmem:[#allocation118_spill] sm:$0xff] }
 0x4fc   : > { %3196 = vrot.lane.b32.xlu0 %v12518_v11, %s8307_s1 }
 0x4fe   : > { %3166 = vrot.lane.b32.xlu1 %v12519_v27, %s8307_s1 }
 0x500   : > { %3124 = vrot.lane.b32.xlu0 %v12520_v37, %s8307_s1 }
 0x502   : > { %3122 = vrot.lane.b32.xlu1 %v12521_v10, %s8307_s1 }
 0x504   : > { %3152 = vrot.lane.b32.xlu0 %v12522_v17, %s8307_s1 }
 0x506   : > { %3150 = vrot.lane.b32.xlu1 %v12523_v26, %s8307_s1 }
 0x508   : > { %3172 = vrot.lane.b32.xlu0 %v12524_v16, %s8307_s1 }
 0x50a   : > { %3170 = vrot.lane.b32.xlu1 %v12525_v9, %s8307_s1 }
 0x50c   : > { %3200 = vrot.lane.b32.xlu0 %v12526_v7, %s8307_s1 }
 0x50e   : > { %3194 = vrot.lane.b32.xlu1 %v12527_v45, %s8307_s1  ;;  %v12543_v45 = vld [vmem:[#allocation75_spill] sm:$0xff] }
 0x510   : > { %3156 = vrot.lane.b32.xlu0 %v12528_v23, %s8307_s1  ;;  %v12552_v23 = vld [vmem:[#allocation83_spill] sm:$0xff] }
 0x512   : > { %3198 = vrot.lane.b32.xlu1 %v12529_v54, %s8307_s1  ;;  %v12541_v54 = vld [vmem:[#allocation115_spill] sm:$0xff] }
 0x514   : > { %3176 = vrot.lane.b32.xlu0 %v12530_v39, %s8307_s1 }
 0x516   : > { %3126 = vrot.lane.b32.xlu1 %v12531_v50, %s8307_s1 }
 0x517   : > { %v2835_v50 = vpop.xlane.xlu0 %2834 }
 0x518   : > { %3204 = vrot.lane.b32.xlu0 %v12532_v24, %s8307_s1 }
 0x51a   : > { %3154 = vrot.lane.b32.xlu1 %v12533_v18, %s8307_s1  ;;  %v12540_v18 = vld [vmem:[#allocation82_spill] sm:$0xff] }
 0x51c   : > { %3180 = vrot.lane.b32.xlu0 %v12534_v38, %s8307_s1  ;;  %v2838_v38 = vpop.xlane.xlu1 %2837 }
 0x51e   : > { %3174 = vrot.lane.b32.xlu1 %v12535_v32, %s8307_s1  ;;  %v12542_v32 = vld [vmem:[#allocation120_spill] sm:$0xff] }
 0x520   : > { %3208 = vrot.lane.b32.xlu0 %v12536_v20, %s8307_s1 }
 0x522   : > { %3202 = vrot.lane.b32.xlu1 %v12537_v42, %s8307_s1  ;;  %v10059_v42 = vpop.permute.xlu0 %3128 }
 0x524   : > { %3184 = vrot.lane.b32.xlu0 %v12538_v31, %s8307_s1  ;;  %v12544_v31 = vld [vmem:[#allocation86_spill] sm:$0xff] }
 0x526   : > { %3158 = vrot.lane.b32.xlu1 %v12539_v6, %s8307_s1  ;;  %v12545_v6 = vld [vmem:[#allocation117_spill] sm:$0xff]  ;;  %v10067_v20 = vpop.permute.xlu0 %3132 }
 0x528   : > { %3212 = vrot.lane.b32.xlu0 %v12540_v18, %s8307_s1  ;;  %v12546_v18 = vld [vmem:[#allocation122_spill] sm:$0xff] }
 0x52a   : > { %3178 = vrot.lane.b32.xlu1 %v12541_v54, %s8307_s1  ;;  %v12547_v54 = vld [vmem:[#allocation79_spill] sm:$0xff]  ;;  %v10075_v24 = vpop.permute.xlu0 %3108 }
 0x52c   : > { %3188 = vrot.lane.b32.xlu0 %v12542_v32, %s8307_s1  ;;  %v10071_v32 = vld [vmem:[#allocation4 + $0x18] sm:$0xff] }
 0x52d   : > { %12548 = vst [vmem:[#allocation127_spill] sm:$0xff] %v10071_v32 }
 0x52e   : > { %3206 = vrot.lane.b32.xlu1 %v12543_v45, %s8307_s1  ;;  %v12549_v45 = vld [vmem:[#allocation119_spill] sm:$0xff]  ;;  %v10083_v39 = vpop.permute.xlu0 %3136 }
 0x530   : > { %3216 = vrot.lane.b32.xlu0 %v12544_v31, %s8307_s1  ;;  %v10078_v31 = vmax.f32 %v10071_v32, %v2838_v38 }
 0x532   : > { %3182 = vrot.lane.b32.xlu1 %v12545_v6, %s8307_s1  ;;  %12550 = vst [vmem:[#allocation128_spill] sm:$0xff] %v10078_v31  ;;  %v1695_v6 = vld [vmem:[#allocation4 + $0x10] sm:$0xff]  ;;  %v10088_v7 = vpop.permute.xlu0 %3112 }
 0x534   : > { %3220 = vrot.lane.b32.xlu0 %v12546_v18, %s8307_s1  ;;  %v10081_v18 = vmax.f32 %v1695_v6, %v2835_v50  ;;  %v12555_v50 = vld [vmem:[#allocation123_spill] sm:$0xff] }
 0x536   : > { %3210 = vrot.lane.b32.xlu1 %v12547_v54, %s8307_s1  ;;  %12551 = vst [vmem:[#allocation129_spill] sm:$0xff] %v10081_v18  ;;  %v3131_v54 = vpop.permute.xlu1 %3130  ;;  %v10092_v16 = vpop.permute.xlu0 %3140 }
 0x53a   : > { %3186 = vrot.lane.b32.xlu1 %v12549_v45, %s8307_s1  ;;  %v12553_v45 = vld [vmem:[#allocation121_spill] sm:$0xff]  ;;  %v3135_v38 = vpop.permute.xlu1 %3134  ;;  %v10100_v17 = vpop.permute.xlu0 %3116 }
 0x53b   : > { %v3345_v13 = vsel %vm2137_vm3, %v3135_v38, 0.0 }
 0x53e   : > { %2872 = vperm.xlu1 %7670, %v10078_v31   ;;  %v12554_v31 = vld [vmem:[#allocation87_spill] sm:$0xff]  ;;  %v3111_v6 = vpop.permute.xlu1 %3110  ;;  %v10104_v37 = vpop.permute.xlu0 %3144 }
 0x542   : > { %2867 = vperm.xlu1 %7670, %v10081_v18   ;;  %v3288_v18 = vsel %vm2137_vm3, %v9973_v2, 0.0  ;;  %v10110_v15 = vpop.permute.xlu0 %3160  ;;  %v3339_v2 = vsel %vm2137_vm3, %v3131_v54, 0.0 }
 0x546   : > { %3214 = vrot.lane.b32.xlu1 %v12552_v23, %s8307_s1  ;;  %v3294_v23 = vsel %vm2137_vm3, %v9977_v61, 0.0 }
 0x54a   : > { %3190 = vrot.lane.b32.xlu1 %v12553_v45, %s8307_s1  ;;  %v3139_v45 = vpop.permute.xlu1 %3138 }
 0x54e   : > { %3218 = vrot.lane.b32.xlu1 %v12554_v31, %s8307_s1  ;;  %v3297_v31 = vsel %vm2137_vm3, %v9994_v44, 0.0  ;;  %v3115_v11 = vpop.permute.xlu1 %3114 }
 0x552   : > { %3222 = vrot.lane.b32.xlu1 %v12555_v50, %s8307_s1  ;;  %v3303_v50 = vsel %vm2137_vm3, %v9998_v55, 0.0  ;;  %v3351_v55 = vsel %vm2137_vm3, %v3139_v45, 0.0 }
 0x553   : > { %3289 = vadd.xlane.f32.xlu0 %v3288_v18  ;;  %v3143_v18 = vpop.permute.xlu1 %3142 }
 0x554   : > { %v3357_v45 = vsel %vm2137_vm3, %v3143_v18, 0.0 }
 0x557   : > { %3295 = vadd.xlane.f32.xlu0 %v3294_v23  ;;  %v3119_v44 = vpop.permute.xlu1 %3118 }
 0x55b   : > { %3298 = vadd.xlane.f32.xlu0 %v3297_v31  ;;  %v3309_v31 = vsel %vm2137_vm3, %v3111_v6, 0.0  ;;  %v3147_v3 = vpop.permute.xlu1 %3146  ;;  %v3300_v6 = vsel %vm2137_vm3, %v9981_v8, 0.0 }
 0x55c   : > { %v3363_v18 = vsel %vm2137_vm3, %v3147_v3, 0.0 }
 0x55f   : > { %3304 = vadd.xlane.f32.xlu0 %v3303_v50 }
 0x563   : > { %3340 = vadd.xlane.f32.xlu0 %v3339_v2  ;;  %v2858_v61 = vpop.permute.xlu0 %2857  ;;  %v3315_v2 = vsel %vm2137_vm3, %v3115_v11, 0.0 }
 0x564   : > { %v2875_v23 = vsub.f32 %v9791_v57, %v2858_v61  ;;  %v3163_v57 = vpop.permute.xlu1 %3162  ;;  %v3321_v61 = vsel %vm2137_vm3, %v3119_v44, 0.0 }
 0x565   : > { %v3387_v44 = vsel %vm2137_vm3, %v3163_v57, 0.0 }
 0x566   : > { %v2879_v25 = vmul.f32 1.442695, %v2875_v23 }
 0x567   : > { %3346 = vadd.xlane.f32.xlu0 %v3345_v13  ;;  %v10117_v50 = vpop.permute.xlu0 %3164 }
 0x568   : > { %7715 = vpow2.f32 %v2879_v25  ;;  %v3291_v25 = vsel %vm2137_vm3, %v9988_v21, 0.0  ;;  %v3336_v21 = vsel %vm2137_vm3, %v10059_v42, 0.0 }
 0x56b   : > { %3310 = vadd.xlane.f32.xlu0 %v3309_v31  ;;  %v10124_v13 = vpop.permute.xlu0 %3120 }
 0x56f   : > { %3352 = vadd.xlane.f32.xlu0 %v3351_v55  ;;  %v10133_v23 = vpop.permute.xlu0 %3148 }
 0x572   : > { %v10119_v54 = vpop.eup %7715 }
 0x573   : > { %12556 = vst [vmem:[#allocation130_spill] sm:$0xff] %v10119_v54  ;;  %3316 = vadd.xlane.f32.xlu0 %v3315_v2  ;;  %7299 = vmatprep.mubr.msk.f32.mxu1 %vm2826_vm14, %v10119_v54  ;;  %v10138_v2 = vpop.permute.xlu0 %3168 }
 0x576   : > { %3292 = vadd.xlane.f32.xlu1 %v3291_v25 }
 0x577   : > { %3358 = vadd.xlane.f32.xlu0 %v3357_v45  ;;  %v3306_v45 = vsel %vm2137_vm3, %v10075_v24, 0.0 }
 0x579   : > { %v2863_v38 = vpop.permute.xlu1 %2862 }
 0x57a   : > { %v2876_v11 = vsub.f32 %v9836_v59, %v2863_v38  ;;  %3301 = vadd.xlane.f32.xlu1 %v3300_v6  ;;  %v3342_v59 = vsel %vm2137_vm3, %v10067_v20, 0.0  ;;  %v10146_v38 = vpop.permute.xlu0 %3192  ;;  %v3348_v20 = vsel %vm2137_vm3, %v10083_v39, 0.0  ;;  %v3354_v39 = vsel %vm2137_vm3, %v10092_v16, 0.0 }
 0x57b   : > { %3322 = vadd.xlane.f32.xlu0 %v3321_v61  ;;  %v3312_v61 = vsel %vm2137_vm3, %v10088_v7, 0.0 }
 0x57c   : > { %v2881_v31 = vmul.f32 1.442695, %v2876_v11 }
 0x57d   : > { %v3167_v55 = vpop.permute.xlu1 %3166 }
 0x57e   : > { %7717 = vpow2.f32 %v2881_v31  ;;  %3337 = vadd.xlane.f32.xlu1 %v3336_v21  ;;  %v3393_v42 = vsel %vm2137_vm3, %v3167_v55, 0.0  ;;  %v3197_v57 = vpop.permute.xlu0 %3196 }
 0x57f   : > { %3364 = vadd.xlane.f32.xlu0 %v3363_v18 }
 0x581   : > { %v3123_v8 = vpop.permute.xlu1 %3122 }
 0x582   : > { %3343 = vadd.xlane.f32.xlu1 %v3342_v59  ;;  %v3327_v24 = vsel %vm2137_vm3, %v3123_v8, 0.0  ;;  %v3125_v21 = vpop.permute.xlu0 %3124  ;;  %v3318_v8 = vsel %vm2137_vm3, %v10100_v17, 0.0 }
 0x583   : > { %3388 = vadd.xlane.f32.xlu0 %v3387_v44 }
 0x585   : > { %v3151_v25 = vpop.permute.xlu1 %3150 }
 0x586   : > { %3307 = vadd.xlane.f32.xlu1 %v3306_v45  ;;  %v3369_v31 = vsel %vm2137_vm3, %v3151_v25, 0.0  ;;  %v3153_v59 = vpop.permute.xlu0 %3152  ;;  %v3360_v25 = vsel %vm2137_vm3, %v10104_v37, 0.0 }
 0x587   : > { %3394 = vadd.xlane.f32.xlu0 %v3393_v42  ;;  %v3384_v42 = vsel %vm2137_vm3, %v10110_v15, 0.0 }
 0x588   : > { %v10148_v3 = vpop.eup %7717 }
 0x589   : > { %12557 = vst [vmem:[#allocation131_spill] sm:$0xff] %v10148_v3  ;;  %v3171_v6 = vpop.permute.xlu1 %3170  ;;  %7300 = vmatmul.mubr.msk.f32.vlgmr.msra.gmra.mrb[22].mxu1 %vm2826_vm14, %v10148_v3 }
 0x58a   : > { %7412 = vmatpush3.bf16.xpose.msk.msra.mxu1 %vm9128_vm4, %v9924_v12  ;;  %3349 = vadd.xlane.f32.xlu1 %v3348_v20  ;;  %v3399_v12 = vsel %vm2137_vm3, %v3171_v6, 0.0  ;;  %v3173_v6 = vpop.permute.xlu0 %3172 }
 0x58b   : > { %3328 = vadd.xlane.f32.xlu0 %v3327_v24  ;;  %v3390_v24 = vsel %vm2137_vm3, %v10117_v50, 0.0 }
 0x58d   : > { %v3195_v11 = vpop.permute.xlu1 %3194 }
 0x58e   : > { %3313 = vadd.xlane.f32.xlu1 %v3312_v61  ;;  %v3435_v7 = vsel %vm2137_vm3, %v3195_v11, 0.0  ;;  %v3201_v11 = vpop.permute.xlu0 %3200 }
 0x58f   : > { %3370 = vadd.xlane.f32.xlu0 %v3369_v31  ;;  %v3324_v31 = vsel %vm2137_vm3, %v10124_v13, 0.0 }
 0x591   : > { %v3199_v55 = vpop.permute.xlu1 %3198 }
 0x592   : > { %3355 = vadd.xlane.f32.xlu1 %v3354_v39  ;;  %v3441_v16 = vsel %vm2137_vm3, %v3199_v55, 0.0  ;;  %v3366_v39 = vsel %vm2137_vm3, %v10133_v23, 0.0 }
 0x593   : > { %3400 = vadd.xlane.f32.xlu0 %v3399_v12  ;;  %v3157_v12 = vpop.permute.xlu0 %3156 }
 0x595   : > { %v3127_v18 = vpop.permute.xlu1 %3126 }
 0x596   : > { %3319 = vadd.xlane.f32.xlu1 %v3318_v8  ;;  %v3333_v17 = vsel %vm2137_vm3, %v3127_v18, 0.0  ;;  %v3396_v8 = vsel %vm2137_vm3, %v10138_v2, 0.0 }
 0x597   : > { %3436 = vadd.xlane.f32.xlu0 %v3435_v7  ;;  %v3177_v7 = vpop.permute.xlu0 %3176 }
 0x599   : > { %v3155_v44 = vpop.permute.xlu1 %3154 }
 0x59a   : > { %3361 = vadd.xlane.f32.xlu1 %v3360_v25  ;;  %v3375_v37 = vsel %vm2137_vm3, %v3155_v44, 0.0  ;;  %v3432_v25 = vsel %vm2137_vm3, %v10146_v38, 0.0 }
 0x59b   : > { %3442 = vadd.xlane.f32.xlu0 %v3441_v16  ;;  %v3205_v2 = vpop.permute.xlu0 %3204 }
 0x59d   : > { %v3175_v45 = vpop.permute.xlu1 %3174 }
 0x59e   : > { %3385 = vadd.xlane.f32.xlu1 %v3384_v42  ;;  %v3405_v15 = vsel %vm2137_vm3, %v3175_v45, 0.0  ;;  %v3438_v45 = vsel %vm2137_vm3, %v3197_v57, 0.0 }
 0x59f   : > { %3334 = vadd.xlane.f32.xlu0 %v3333_v17  ;;  %v3181_v38 = vpop.permute.xlu0 %3180 }
 0x5a1   : > { %v3203_v20 = vpop.permute.xlu1 %3202 }
 0x5a2   : > { %3391 = vadd.xlane.f32.xlu1 %v3390_v24  ;;  %v3447_v50 = vsel %vm2137_vm3, %v3203_v20, 0.0  ;;  %v3330_v20 = vsel %vm2137_vm3, %v3125_v21, 0.0 }
 0x5a3   : > { %3376 = vadd.xlane.f32.xlu0 %v3375_v37 }
 0x5a5   : > { %v3159_v61 = vpop.permute.xlu1 %3158 }
 0x5a6   : > { %3325 = vadd.xlane.f32.xlu1 %v3324_v31  ;;  %v3381_v13 = vsel %vm2137_vm3, %v3159_v61, 0.0  ;;  %v3372_v61 = vsel %vm2137_vm3, %v3153_v59, 0.0  ;;  %v3444_v59 = vsel %vm2137_vm3, %v3201_v11, 0.0 }
 0x5a7   : > { %3406 = vadd.xlane.f32.xlu0 %v3405_v15 }
 0x5a9   : > { %v3179_v55 = vpop.permute.xlu1 %3178 }
 0x5aa   : > { %3367 = vadd.xlane.f32.xlu1 %v3366_v39  ;;  %v3411_v23 = vsel %vm2137_vm3, %v3179_v55, 0.0  ;;  %v3402_v55 = vsel %vm2137_vm3, %v3173_v6, 0.0 }
 0x5ab   : > { %3448 = vadd.xlane.f32.xlu0 %v3447_v50  ;;  %v3209_v50 = vpop.permute.xlu0 %3208 }
 0x5ad   : > { %v3207_v18 = vpop.permute.xlu1 %3206 }
 0x5ae   : > { %3397 = vadd.xlane.f32.xlu1 %v3396_v8  ;;  %v3453_v42 = vsel %vm2137_vm3, %v3207_v18, 0.0 }
 0x5af   : > { %3382 = vadd.xlane.f32.xlu0 %v3381_v13 }
 0x5b1   : > { %v3183_v44 = vpop.permute.xlu1 %3182 }
 0x5b2   : > { %3433 = vadd.xlane.f32.xlu1 %v3432_v25  ;;  %v3417_v24 = vsel %vm2137_vm3, %v3183_v44, 0.0  ;;  %v3185_v44 = vpop.permute.xlu0 %3184 }
 0x5b3   : > { %3412 = vadd.xlane.f32.xlu0 %v3411_v23 }
 0x5b5   : > { %v3211_v16 = vpop.permute.xlu1 %3210 }
 0x5b6   : > { %3439 = vadd.xlane.f32.xlu1 %v3438_v45  ;;  %v3459_v31 = vsel %vm2137_vm3, %v3211_v16, 0.0  ;;  %v3408_v16 = vsel %vm2137_vm3, %v3177_v7, 0.0  ;;  %v3213_v45 = vpop.permute.xlu0 %3212 }
 0x5b7   : > { %3454 = vadd.xlane.f32.xlu0 %v3453_v42 }
 0x5b9   : > { %v3187_v17 = vpop.permute.xlu1 %3186 }
 0x5ba   : > { %3331 = vadd.xlane.f32.xlu1 %v3330_v20  ;;  %v3423_v21 = vsel %vm2137_vm3, %v3187_v17, 0.0 }
 0x5bb   : > { %3418 = vadd.xlane.f32.xlu0 %v3417_v24  ;;  %v3189_v24 = vpop.permute.xlu0 %3188 }
 0x5bd   : > { %v2873_v37 = vpop.permute.xlu1 %2872 }
 0x5be   : > { %3373 = vadd.xlane.f32.xlu1 %v3372_v61  ;;  %v2878_v57 = vsub.f32 %v9928_v41, %v2873_v37  ;;  %v3414_v37 = vsel %vm2137_vm3, %v3181_v38, 0.0  ;;  %v3462_v38 = vsel %vm2137_vm3, %v3213_v45, 0.0 }
 0x5bf   : > { %3460 = vadd.xlane.f32.xlu0 %v3459_v31  ;;  %v3217_v61 = vpop.permute.xlu0 %3216 }
 0x5c0   : > { %v2885_v18 = vmul.f32 1.442695, %v2878_v57 }
 0x5c1   : > { %v2868_v15 = vpop.permute.xlu1 %2867 }
 0x5c2   : > { %v2877_v39 = vsub.f32 %v9917_v30, %v2868_v15  ;;  %3403 = vadd.xlane.f32.xlu1 %v3402_v55  ;;  %v3378_v30 = vsel %vm2137_vm3, %v3157_v12, 0.0  ;;  %v3450_v12 = vsel %vm2137_vm3, %v3205_v2, 0.0  ;;  %v3456_v2 = vsel %vm2137_vm3, %v3209_v50, 0.0  ;;  %v12561_v55 = vld [vmem:[#allocation67_spill] sm:$0xff]  ;;  %v12562_v50 = vld [vmem:[#allocation68_spill] sm:$0xff] }
 0x5c3   : > { %3424 = vadd.xlane.f32.xlu0 %v3423_v21  ;;  %v3221_v31 = vpop.permute.xlu0 %3220 }
 0x5c4   : > { %v2883_v8 = vmul.f32 1.442695, %v2877_v39  ;;  %v3474_v39 = vsel %vm2137_vm3, %v3221_v31, 0.0  ;;  %v12567_v31 = vld [vmem:[#allocation63_spill] sm:$0xff] }
 0x5c5   : > { %v3215_v13 = vpop.permute.xlu1 %3214 }
 0x5c6   : > { %7719 = vpow2.f32 %v2883_v8  ;;  %3445 = vadd.xlane.f32.xlu1 %v3444_v59  ;;  %v3465_v41 = vsel %vm2137_vm3, %v3215_v13, 0.0  ;;  %v12563_v13 = vld [vmem:[#allocation59_spill] sm:$0xff] }
 0x5c7   : > { %7721 = vpow2.f32 %v2885_v18  ;;  %3466 = vadd.xlane.f32.xlu0 %v3465_v41 }
 0x5c9   : > { %v3191_v6 = vpop.permute.xlu1 %3190 }
 0x5ca   : > { %3379 = vadd.xlane.f32.xlu1 %v3378_v30  ;;  %v3429_v25 = vsel %vm2137_vm3, %v3191_v6, 0.0  ;;  %v7779_v30 = vld [vmem:[#allocation2] sm:$0xff] }
 0x5cb   : > { %3430 = vadd.xlane.f32.xlu0 %v3429_v25 }
 0x5cd   : > { %v3219_v23 = vpop.permute.xlu1 %3218 }
 0x5ce   : > { %3409 = vadd.xlane.f32.xlu1 %v3408_v16  ;;  %v3471_v11 = vsel %vm2137_vm3, %v3219_v23, 0.0  ;;  %v7780_v16 = vld [vmem:[#allocation2 + $0x8] sm:$0xff] }
 0x5cf   : > { %3472 = vadd.xlane.f32.xlu0 %v3471_v11 }
 0x5d0   : > { %v10204_v42 = vpop.eup %7719 }
 0x5d1   : > { %12558 = vst [vmem:[#allocation132_spill] sm:$0xff] %v10204_v42  ;;  %v10206_v17 = vpop.eup %7721  ;;  %v3223_v20 = vpop.permute.xlu1 %3222  ;;  %7302 = vmatprep.mubr.msk.f32.mxu1 %vm2826_vm14, %v10204_v42 }
 0x5d2   : > { %12559 = vst [vmem:[#allocation133_spill] sm:$0xff] %v10206_v17  ;;  %7303 = vmatmul.mubr.msk.f32.gmra.mrb[24].mxu1 %vm2826_vm14, %v10206_v17  ;;  %3451 = vadd.xlane.f32.xlu1 %v3450_v12  ;;  %v3477_v7 = vsel %vm2137_vm3, %v3223_v20, 0.0  ;;  %v7781_v20 = vld [vmem:[#allocation2 + $0x10] sm:$0xff] }
 0x5d3   : > { %7309 = vmatprep.mubr.msk.f32.mxu1 %vm2137_vm3, %v9971_v33  ;;  %3478 = vadd.xlane.f32.xlu0 %v3477_v7  ;;  %v3420_v33 = vsel %vm2137_vm3, %v3185_v44, 0.0  ;;  %v12564_v44 = vld [vmem:[#allocation58_spill] sm:$0xff]  ;;  %v10268_v7 = vld [vmem:[#allocation2 + $0x18] sm:$0xff] }
 0x5d4   : > { %12565 = vst [vmem:[#allocation134_spill] sm:$0xff] %v10268_v7 }
 0x5d6   : > { %7310 = vmatmul.mubr.msk.f32.vlgmr.msra.gmra.mrb[26].mxu1 %vm2137_vm3, %v9975_v46  ;;  %3415 = vadd.xlane.f32.xlu1 %v3414_v37  ;;  %v3426_v46 = vsel %vm2137_vm3, %v3189_v24, 0.0 }
 0x5d7   : > { %7312 = vmatprep.mubr.msk.f32.mxu1 %vm2137_vm3, %v9979_v63  ;;  %v12560_v63 = vld [vmem:[#allocation62_spill] sm:$0xff] }
 0x5da   : > { %7313 = vmatmul.mubr.msk.f32.gmra.mrb[28].mxu1 %vm2137_vm3, %v9983_v60  ;;  %3457 = vadd.xlane.f32.xlu1 %v3456_v2  ;;  %v3468_v60 = vsel %vm2137_vm3, %v3217_v61, 0.0  ;;  %v12566_v2 = vld [vmem:[#allocation60_spill] sm:$0xff] }
 0x5de   : > { %3421 = vadd.xlane.f32.xlu1 %v3420_v33 }
 0x5e0   : > { %v10226_v57 = vpop.xlane.xlu0 %3289 }
 0x5e2   : > { %3463 = vadd.xlane.f32.xlu1 %v3462_v38 }
 0x5e4   : > { %v10232_v15 = vpop.xlane.xlu0 %3295 }
 0x5e6   : > { %3427 = vadd.xlane.f32.xlu1 %v3426_v46  ;;  %v12568_v46 = vld [vmem:[#allocation69_spill] sm:$0xff] }
 0x5e8   : > { %v10237_v21 = vpop.xlane.xlu0 %3298 }
 0x5e9   : > { %4206 = vrot.lane.b32.xlu0 %v12560_v63, %s8309_s4 }
 0x5ea   : > { %3469 = vadd.xlane.f32.xlu1 %v3468_v60 }
 0x5ec   : > { %v10241_v18 = vpop.xlane.xlu0 %3304 }
 0x5ed   : > { %4210 = vrot.lane.b32.xlu0 %v12561_v55, %s8309_s4  ;;  %v3581_v1 = vrot.slane %v10241_v18, %v9741_v35 }
 0x5ee   : > { %3475 = vadd.xlane.f32.xlu1 %v3474_v39 }
 0x5f0   : > { %v10243_v8 = vpop.xlane.xlu0 %3340 }
 0x5f1   : > { %4214 = vrot.lane.b32.xlu0 %v12562_v50, %s8309_s4 }
 0x5f4   : > { %v10247_v59 = vpop.xlane.xlu0 %3346 }
 0x5f8   : > { %v10256_v25 = vpop.xlane.xlu0 %3310 }
 0x5fc   : > { %v10261_v11 = vpop.xlane.xlu0 %3352 }
 0x5ff   : > { %7673 = vrot.lane.b32.xlu1 %v12563_v13, %s8307_s1 }
 0x600   : > { %v10272_v24 = vpop.xlane.xlu0 %3316 }
 0x603   : > { %v10249_v41 = vpop.xlane.xlu1 %3292  ;;  %7678 = vrot.lane.b32.xlu1 %v12564_v44, %s8309_s4 }
 0x604   : > { %v10278_v61 = vpop.xlane.xlu0 %3358 }
 0x607   : > { %v10253_v6 = vpop.xlane.xlu1 %3301  ;;  %4590 = vrot.lane.b32.xlu1 %v7779_v30, %s8309_s4 }
 0x608   : > { %v10288_v60 = vpop.xlane.xlu0 %3322 }
 0x60b   : > { %v10258_v23 = vpop.xlane.xlu1 %3337  ;;  %4592 = vrot.lane.b32.xlu1 %v7780_v16, %s8309_s4 }
 0x60c   : > { %v10292_v30 = vpop.xlane.xlu0 %3364 }
 0x60f   : > { %v10263_v45 = vpop.xlane.xlu1 %3343  ;;  %4594 = vrot.lane.b32.xlu1 %v7781_v20, %s8309_s4 }
 0x610   : > { %v10298_v50 = vpop.xlane.xlu0 %3388 }
 0x611   : > { %12570 = vst [vmem:[#allocation136_spill] sm:$0xff] %v10298_v50 }
 0x613   : > { %v10266_v12 = vpop.xlane.xlu1 %3307  ;;  %4596 = vrot.lane.b32.xlu1 %v10268_v7, %s8309_s4 }
 0x617   : > { %v10274_v37 = vpop.xlane.xlu1 %3349  ;;  %4208 = vrot.lane.b32.xlu1 %v12566_v2, %s8309_s4 }
 0x618   : > { %v3649_v18 = vrot.slane %v10274_v37, %v9738_v49  ;;  %v3599_v37 = vrot.slane %v10272_v24, %v9741_v35  ;;  %v3671_v24 = vrot.slane %v10292_v30, %v9741_v35 }
 0x61b   : > { %v10280_v33 = vpop.xlane.xlu1 %3313  ;;  %4212 = vrot.lane.b32.xlu1 %v12567_v31, %s8309_s4  ;;  %v10302_v31 = vpop.xlane.xlu0 %3394 }
 0x61c   : > { %12572 = vst [vmem:[#allocation138_spill] sm:$0xff] %v10302_v31 }
 0x61f   : > { %v10284_v38 = vpop.xlane.xlu1 %3355  ;;  %4216 = vrot.lane.b32.xlu1 %v12568_v46, %s8309_s4  ;;  %v10308_v46 = vpop.xlane.xlu0 %3328 }
 0x620   : > { %v3617_v30 = vrot.slane %v10308_v46, %v9741_v35 }
 0x623   : > { %v10290_v39 = vpop.xlane.xlu1 %3319  ;;  %v10312_v54 = vpop.xlane.xlu0 %3370 }
 0x627   : > { %v10294_v16 = vpop.xlane.xlu1 %3361  ;;  %v10318_v42 = vpop.xlane.xlu0 %3400 }
 0x628   : > { %12574 = vst [vmem:[#allocation140_spill] sm:$0xff] %v10318_v42 }
 0x62b   : > { %v10296_v20 = vpop.xlane.xlu1 %3385  ;;  %v10322_v7 = vpop.xlane.xlu0 %3436 }
 0x62c   : > { %12569 = vst [vmem:[#allocation135_spill] sm:$0xff] %v10296_v20 }
 0x62f   : > { %v10300_v55 = vpop.xlane.xlu1 %3391  ;;  %v10328_v26 = vpop.xlane.xlu0 %3442 }
 0x630   : > { %12571 = vst [vmem:[#allocation137_spill] sm:$0xff] %v10300_v55  ;;  %v3788_v46 = vrot.slane %v10328_v26, %v9741_v35 }
 0x633   : > { %v10304_v2 = vpop.xlane.xlu1 %3325  ;;  %v10332_v27 = vpop.xlane.xlu0 %3334 }
 0x637   : > { %v10306_v63 = vpop.xlane.xlu1 %3367  ;;  %v10340_v43 = vpop.xlane.xlu0 %3376 }
 0x63b   : > { %v10310_v17 = vpop.xlane.xlu1 %3397  ;;  %v10346_v52 = vpop.xlane.xlu0 %3406 }
 0x63c   : > { %12573 = vst [vmem:[#allocation139_spill] sm:$0xff] %v10310_v17  ;;  %12579 = vst [vmem:[#allocation145_spill] sm:$0xff] %v10346_v52 }
 0x63f   : > { %v10314_v44 = vpop.xlane.xlu1 %3433  ;;  %v10352_v29 = vpop.xlane.xlu0 %3448 }
 0x643   : > { %v10316_v13 = vpop.xlane.xlu1 %3439  ;;  %v10356_v20 = vpop.xlane.xlu0 %3382 }
 0x647   : > { %v10320_v3 = vpop.xlane.xlu1 %3331  ;;  %v10362_v31 = vpop.xlane.xlu0 %3412 }
 0x648   : > { %12583 = vst [vmem:[#allocation149_spill] sm:$0xff] %v10362_v31 }
 0x64b   : > { %v10324_v32 = vpop.xlane.xlu1 %3373  ;;  %v10366_v17 = vpop.xlane.xlu0 %3454 }
 0x64c   : > { %v3685_v26 = vrot.slane %v10324_v32, %v9738_v49  ;;  %v3622_v32 = vrot.slane %v10320_v3, %v9738_v49 }
 0x64f   : > { %v10326_v9 = vpop.xlane.xlu1 %3403  ;;  %v10370_v22 = vpop.xlane.xlu0 %3418 }
 0x650   : > { %12575 = vst [vmem:[#allocation141_spill] sm:$0xff] %v10326_v9 }
 0x653   : > { %v10330_v10 = vpop.xlane.xlu1 %3445  ;;  %v10374_v31 = vpop.xlane.xlu0 %3460 }
 0x657   : > { %v10334_v62 = vpop.xlane.xlu1 %3379  ;;  %v10379_v4 = vpop.xlane.xlu0 %3424 }
 0x65b   : > { %v10336_v56 = vpop.xlane.xlu1 %3409 }
 0x65c   : > { %12576 = vst [vmem:[#allocation142_spill] sm:$0xff] %v10336_v56  ;;  %v10338_v36 = vpop.f32.mrb[22].mxu1 }
 0x65d   : > { %12577 = vst [vmem:[#allocation143_spill] sm:$0xff] %v10338_v36  ;;  %v10342_v48 = vpop.f32.mrb[23].mxu1 }
 0x65e   : > { %12578 = vst [vmem:[#allocation144_spill] sm:$0xff] %v10342_v48 }
 0x65f   : > { %v10344_v0 = vpop.xlane.xlu1 %3451 }
 0x663   : > { %v10348_v50 = vpop.xlane.xlu1 %3415 }
 0x664   : > { %12580 = vst [vmem:[#allocation146_spill] sm:$0xff] %v10348_v50 }
 0x667   : > { %v10350_v42 = vpop.xlane.xlu1 %3457 }
 0x66b   : > { %v10354_v9 = vpop.xlane.xlu1 %3421 }
 0x66c   : > { %12581 = vst [vmem:[#allocation147_spill] sm:$0xff] %v10354_v9 }
 0x66f   : > { %v10358_v56 = vpop.xlane.xlu1 %3463 }
 0x673   : > { %v10360_v36 = vpop.xlane.xlu1 %3427 }
 0x674   : > { %12582 = vst [vmem:[#allocation148_spill] sm:$0xff] %v10360_v36 }
 0x677   : > { %v10364_v48 = vpop.xlane.xlu1 %3469 }
 0x67b   : > { %v10368_v52 = vpop.xlane.xlu1 %3475 }
 0x67f   : > { %v7674_v50 = vpop.permute.xlu1 %7673 }
 0x680   : > { %v7676_v55 = vunpack.i.h.bf16 %v7674_v50  ;;  %v7675_v40 = vunpack.i.l.bf16 %v7674_v50  ;;  %v3572_v50 = vrot.slane %v10237_v21, %v9741_v35  ;;  %v3635_v21 = vrot.slane %v10243_v8, %v9741_v35 }
 0x681   : > { %v3595_v8 = vrot.slane %v10280_v33, %v9738_v49  ;;  %v3662_v33 = vrot.slane %v10278_v61, %v9741_v35 }
 0x682   : > { %v7413_v9 = vpack.c.bf16 %v7676_v55, %v7675_v40  ;;  %v3568_v40 = vrot.slane %v10232_v15, %v9738_v49  ;;  %v3644_v15 = vrot.slane %v10247_v59, %v9741_v35  ;;  %v3631_v59 = vrot.slane %v10258_v23, %v9738_v49 }
 0x683   : > { %v7679_v19 = vpop.permute.xlu1 %7678 }
 0x684   : > { %v7681_v14 = vunpack.i.h.bf16 %v7679_v19  ;;  %v7680_v34 = vunpack.i.l.bf16 %v7679_v19  ;;  %7414 = vmatprep.subr.bf16.mxu1 %v7413_v9  ;;  %v3563_v19 = vrot.slane %v10249_v41, %v9741_v35  ;;  %v3573_v55 = vsel %vm2403_vm5, %v3572_v50, %v3568_v40 }
 0x685   : > { %7416 = vmatpush3.bf16.msra.mxu1 %v7413_v9  ;;  %v10387_v9 = vpop.xlane.xlu0 %3466  ;;  %v3640_v41 = vrot.slane %v10263_v45, %v9738_v49  ;;  %v3658_v45 = vrot.slane %v10284_v38, %v9738_v49  ;;  %v3608_v38 = vrot.slane %v10288_v60, %v9741_v35  ;;  %v3676_v60 = vrot.slane %v10306_v63, %v9738_v49 }
 0x686   : > { %v10372_v36 = vpack.c.bf16 %v7681_v14, %v7680_v34  ;;  %v3577_v14 = vrot.slane %v10253_v6, %v9738_v49  ;;  %v3559_v34 = vrot.slane %v10226_v57, %v9738_v49  ;;  %v3586_v6 = vrot.slane %v10266_v12, %v9738_v49 }
 0x687   : > { %v3590_v57 = vrot.slane %v10256_v25, %v9741_v35  ;;  %v3604_v12 = vrot.slane %v10290_v39, %v9738_v49  ;;  %v3653_v25 = vrot.slane %v10261_v11, %v9741_v35  ;;  %v3645_v39 = vsel %vm2403_vm5, %v3644_v15, %v3640_v41 }
 0x688   : > { %7419 = vmatprep.subr.msk.bf16.mxu1 %vm9128_vm4, %v10372_v36  ;;  %v3564_v50 = vsel %vm2403_vm5, %v3563_v19, %v3559_v34  ;;  %v3582_v40 = vsel %vm2403_vm5, %v3581_v1, %v3577_v14  ;;  %v3667_v1 = vrot.slane %v10294_v16, %v9738_v49  ;;  %v3600_v16 = vsel %vm2403_vm5, %v3599_v37, %v3595_v8 }
 0x689   : > { %v10426_v19 = vpop.xlane.xlu0 %3430  ;;  %v3844_v23 = vsel %vm2684_vm6, %v3573_v55, %v3564_v50  ;;  %v3591_v11 = vsel %vm2403_vm5, %v3590_v57, %v3586_v6  ;;  %v3654_v61 = vsel %vm2403_vm5, %v3653_v25, %v3649_v18  ;;  %v3636_v34 = vsel %vm2403_vm5, %v3635_v21, %v3631_v59 }
 0x68a   : > { %v3845_v14 = vsel %vm2686_vm7, %v3582_v40, %v3844_v23  ;;  %v3663_v55 = vsel %vm2403_vm5, %v3662_v33, %v3658_v45  ;;  %v3609_v50 = vsel %vm2403_vm5, %v3608_v38, %v3604_v12  ;;  %v3851_v15 = vsel %vm2684_vm6, %v3645_v39, %v3636_v34 }
 0x68b   : > { %v3846_v41 = vsel %vm2688_vm8, %v3591_v11, %v3845_v14  ;;  %v3672_v6 = vsel %vm2403_vm5, %v3671_v24, %v3667_v1  ;;  %v3852_v57 = vsel %vm2686_vm7, %v3654_v61, %v3851_v15  ;;  %v3680_v21 = vrot.slane %v10312_v54, %v9741_v35 }
 0x68c   : > { %v3613_v18 = vrot.slane %v10304_v2, %v9738_v49  ;;  %v3847_v8 = vsel %vm2690_vm9, %v3600_v16, %v3846_v41  ;;  %v3853_v63 = vsel %vm2688_vm8, %v3663_v55, %v3852_v57  ;;  %v3779_v40 = vrot.slane %v10322_v7, %v9741_v35 }
 0x68d   : > { %v3473_v59 = vpop.xlane.xlu0 %3472  ;;  %v3848_v45 = vsel %vm2692_vm10, %v3609_v50, %v3847_v8  ;;  %v3681_v12 = vsel %vm2403_vm5, %v3680_v21, %v3676_v60  ;;  %v3775_v54 = vrot.slane %v10314_v44, %v9738_v49  ;;  %v3784_v2 = vrot.slane %v10316_v13, %v9738_v49 }
 0x68e   : > { %v3854_v25 = vsel %vm2690_vm9, %v3672_v6, %v3853_v63  ;;  %v3626_v37 = vrot.slane %v10332_v27, %v9741_v35  ;;  %v3689_v7 = vrot.slane %v10340_v43, %v9741_v35  ;;  %v3793_v33 = vrot.slane %v10330_v10, %v9738_v49 }
 0x68f   : > { %v3797_v44 = vrot.slane %v10352_v29, %v9741_v35  ;;  %v3694_v13 = vrot.slane %v10334_v62, %v9738_v49  ;;  %v3802_v1 = vrot.slane %v10344_v0, %v9738_v49  ;;  %v3618_v27 = vsel %vm2403_vm5, %v3617_v30, %v3613_v18 }
 0x690   : > { %v3698_v43 = vrot.slane %v10356_v20, %v9741_v35  ;;  %v3811_v10 = vrot.slane %v10350_v42, %v9738_v49  ;;  %v3855_v23 = vsel %vm2692_vm10, %v3681_v12, %v3854_v25  ;;  %v3780_v29 = vsel %vm2403_vm5, %v3779_v40, %v3775_v54 }
 0x691   : > { %v3789_v62 = vsel %vm2403_vm5, %v3788_v46, %v3784_v2  ;;  %v3806_v0 = vrot.slane %v10366_v17, %v9741_v35  ;;  %v3820_v38 = vrot.slane %v10358_v56, %v9738_v49  ;;  %v3815_v20 = vrot.slane %v10374_v31, %v9741_v35  ;;  %v3479_v39 = vpop.xlane.xlu0 %3478 }
 0x692   : > { %v3798_v3 = vsel %vm2403_vm5, %v3797_v44, %v3793_v33  ;;  %v3829_v42 = vrot.slane %v10364_v48, %v9738_v49  ;;  %v3690_v14 = vsel %vm2403_vm5, %v3689_v7, %v3685_v26  ;;  %v3824_v24 = vrot.slane %v10387_v9, %v9741_v35 }
 0x693   : > { %v3807_v17 = vsel %vm2403_vm5, %v3806_v0, %v3802_v1  ;;  %v3838_v56 = vrot.slane %v10368_v52, %v9738_v49  ;;  %v3699_v31 = vsel %vm2403_vm5, %v3698_v43, %v3694_v13  ;;  %v3865_v16 = vsel %vm2684_vm6, %v3789_v62, %v3780_v29  ;;  %v12587_v43 = vld [vmem:[#allocation77_spill] sm:$0xff]  ;;  %v12591_v29 = vld [vmem:[#allocation96_spill] sm:$0xff] }
 0x694   : > { %v3833_v48 = vrot.slane %v3473_v59, %v9741_v35  ;;  %v3816_v34 = vsel %vm2403_vm5, %v3815_v20, %v3811_v10  ;;  %v3627_v55 = vsel %vm2403_vm5, %v3626_v37, %v3622_v32  ;;  %v3866_v50 = vsel %vm2686_vm7, %v3798_v3, %v3865_v16  ;;  %v12588_v32 = vld [vmem:[#allocation72_spill] sm:$0xff]  ;;  %v12589_v10 = vld [vmem:[#allocation94_spill] sm:$0xff]  ;;  %v12592_v62 = vld [vmem:[#allocation137_spill] sm:$0xff] }
 0x695   : > { %v3842_v9 = vrot.slane %v3479_v39, %v9741_v35  ;;  %v3825_v60 = vsel %vm2403_vm5, %v3824_v24, %v3820_v38  ;;  %v3856_v52 = vsel %vm2694_vm11, %v3690_v14, %v3855_v23  ;;  %v3867_v15 = vsel %vm2688_vm8, %v3807_v17, %v3866_v50  ;;  %v12590_v23 = vld [vmem:[#allocation76_spill] sm:$0xff]  ;;  %v12593_v38 = vld [vmem:[#allocation139_spill] sm:$0xff]  ;;  %v12594_v3 = vld [vmem:[#allocation138_spill] sm:$0xff] }
 0x696   : > { %v3857_v41 = vsel %vm2696_vm12, %v3699_v31, %v3856_v52  ;;  %v3849_v6 = vsel %vm2694_vm11, %v3618_v27, %v3848_v45  ;;  %v3834_v57 = vsel %vm2403_vm5, %v3833_v48, %v3829_v42  ;;  %v3868_v40 = vsel %vm2690_vm9, %v3816_v34, %v3867_v15  ;;  %v12586_v27 = vld [vmem:[#allocation92_spill] sm:$0xff]  ;;  %v12595_v42 = vld [vmem:[#allocation135_spill] sm:$0xff]  ;;  %v12596_v24 = vld [vmem:[#allocation141_spill] sm:$0xff] }
 0x697   : > { %v3850_v18 = vsel %vm2696_vm12, %v3627_v55, %v3849_v6  ;;  %v3843_v63 = vsel %vm2403_vm5, %v3842_v9, %v3838_v56  ;;  %v3869_v59 = vsel %vm2692_vm10, %v3825_v60, %v3868_v40  ;;  %v12339_v1 = vmov 1   ;;  %v12597_v56 = vld [vmem:[#allocation80_spill] sm:$0xff]  ;;  %v12599_v48 = vld [vmem:[#allocation142_spill] sm:$0xff]  ;;  %v12601_v60 = vld [vmem:[#allocation145_spill] sm:$0xff] }
 0x698   : > { %v3870_v54 = vsel %vm2694_vm11, %v3834_v57, %v3869_v59  ;;  %7682 = vset.pattern.permute.xlu0 %v12339_v1  ;;  %7683 = vset.pattern.permute.xlu1 %v12339_v1  ;;  %v3712_v0 = vrot.slane %v12592_v62, %v9738_v49  ;;  %v3721_v20 = vrot.slane %v12593_v38, %v9738_v49  ;;  %v12598_v31 = vld [vmem:[#allocation140_spill] sm:$0xff]  ;;  %v12602_v15 = vld [vmem:[#allocation146_spill] sm:$0xff]  ;;  %v12603_v6 = vld [vmem:[#allocation149_spill] sm:$0xff] }
 0x699   : > { %v3871_v2 = vsel %vm2696_vm12, %v3843_v63, %v3870_v54  ;;  %v3716_v39 = vrot.slane %v12594_v3, %v9741_v35  ;;  %v3703_v14 = vrot.slane %v12595_v42, %v9738_v49  ;;  %v3730_v17 = vrot.slane %v12596_v24, %v9738_v49  ;;  %v12600_v55 = vld [vmem:[#allocation136_spill] sm:$0xff]  ;;  %v12606_v54 = vld [vmem:[#allocation98_spill] sm:$0xff] }
 0x69a   : > { %v3725_v16 = vrot.slane %v12598_v31, %v9741_v35  ;;  %v3739_v34 = vrot.slane %v12599_v48, %v9738_v49  ;;  %v3707_v50 = vrot.slane %v12600_v55, %v9741_v35  ;;  %v3734_v52 = vrot.slane %v12601_v60, %v9741_v35  ;;  %v12608_v42 = vld [vmem:[#allocation108_spill] sm:$0xff]  ;;  %v12610_v31 = vld [vmem:[#allocation81_spill] sm:$0xff]  ;;  %v10639_v48 = vpop.permute.xlu1 %4590 }
 0x69b   : > { %v3717_v9 = vsel %vm2403_vm5, %v3716_v39, %v3712_v0  ;;  %v3743_v57 = vrot.slane %v12603_v6, %v9741_v35  ;;  %v3752_v63 = vrot.slane %v10370_v22, %v9741_v35  ;;  %v3770_v22 = vrot.slane %v10426_v19, %v9741_v35  ;;  %v12614_v55 = vld [vmem:[#allocation85_spill] sm:$0xff]  ;;  %v12635_v1 = vld [vmem:[#allocation116_spill] sm:$0xff] }
 0x69c   : > { %v3735_v40 = vsel %vm2403_vm5, %v3734_v52, %v3730_v17  ;;  %v12609_v17 = vld [vmem:[#allocation97_spill] sm:$0xff]  ;;  %v12616_v52 = vld [vmem:[#allocation111_spill] sm:$0xff] }
 0x6a5   : > { %v10499_v11 = vpop.f32.mrb[24].mxu1 }
 0x6a6   : > { %12584 = vst [vmem:[#allocation150_spill] sm:$0xff] %v10499_v11  ;;  %v10507_v61 = vpop.f32.mrb[25].mxu1  ;;  %v12636_v11 = vld [vmem:[#allocation78_spill] sm:$0xff] }
 0x6a7   : > { %12585 = vst [vmem:[#allocation151_spill] sm:$0xff] %v10507_v61 }
 0x6a9   : > { %v7311_v30 = vpop.f32.mrb[26].mxu1 }
 0x6aa   : > { %v3960_v21 = vadd.f32 %v7311_v30, %v3857_v41  ;;  %v3954_v8 = vpop.f32.mrb[27].mxu1  ;;  %v3748_v41 = vrot.slane %v12602_v15, %v9738_v49  ;;  %v3726_v30 = vsel %vm2403_vm5, %v3725_v16, %v3721_v20  ;;  %v12607_v20 = vld [vmem:[#allocation106_spill] sm:$0xff]  ;;  %v12611_v16 = vld [vmem:[#allocation99_spill] sm:$0xff] }
 0x6ab   : > { %v3955_v46 = vadd.f32 %v3954_v8, %v3850_v18  ;;  %v3708_v8 = vsel %vm2403_vm5, %v3707_v50, %v3703_v14  ;;  %v10645_v50 = vpop.permute.xlu1 %4592 }
 0x6ac   : > { %v10528_v12 = vsel %vm9785_vm13, %v3960_v21, -1e+15  ;;  %v12604_v21 = vld [vmem:[#allocation147_spill] sm:$0xff] }
 0x6ad   : > { %v10533_v45 = vsel %vm9785_vm13, %v3955_v46, -1e+15  ;;  %v7314_v25 = vpop.f32.mrb[28].mxu1  ;;  %v3980_v37 = vsel %vm2826_vm14, %v10528_v12, -inf  ;;  %v3757_v18 = vrot.slane %v12604_v21, %v9738_v49  ;;  %v12605_v46 = vld [vmem:[#allocation148_spill] sm:$0xff] }
 0x6ae   : > { %v3970_v7 = vadd.f32 %v7314_v25, %v3871_v2  ;;  %v3964_v26 = vpop.f32.mrb[29].mxu1  ;;  %3981 = vmax.xlane.f32.xlu0 %v3980_v37  ;;  %v3977_v33 = vsel %vm2826_vm14, %v10533_v45, -inf  ;;  %v3766_v59 = vrot.slane %v12605_v46, %v9738_v49  ;;  %v3858_v2 = vsel %vm2684_vm6, %v3717_v9, %v3708_v8  ;;  %v12615_v9 = vld [vmem:[#allocation101_spill] sm:$0xff] }
 0x6af   : > { %3978 = vmax.xlane.f32.xlu1 %v3977_v33  ;;  %v3761_v25 = vrot.slane %v10379_v4, %v9741_v35  ;;  %v3744_v37 = vsel %vm2403_vm5, %v3743_v57, %v3739_v34  ;;  %v3753_v33 = vsel %vm2403_vm5, %v3752_v63, %v3748_v41  ;;  %v12613_v34 = vld [vmem:[#allocation109_spill] sm:$0xff]  ;;  %v10649_v60 = vpop.permute.xlu1 %4594  ;;  %v10655_v41 = vpop.permute.xlu0 %4206 }
 0x6b0   : > { %v10542_v44 = vsel %vm9785_vm13, %v3970_v7, -1e+15  ;;  %v3859_v7 = vsel %vm2686_vm7, %v3726_v30, %v3858_v2  ;;  %v3771_v0 = vsel %vm2403_vm5, %v3770_v22, %v3766_v59  ;;  %v7783_v63 = vld [vmem:[#allocation4 + $0x8] sm:$0xff]  ;;  %v10669_v59 = vld [vmem:[#allocation4] sm:$0xff] }
 0x6b1   : > { %v3986_v13 = vsel %vm2826_vm14, %v10542_v44, -inf  ;;  %v3762_v62 = vsel %vm2403_vm5, %v3761_v25, %v3757_v18  ;;  %12618 = vst [vmem:[#allocation139_spill] sm:$0xff] %v10669_v59  ;;  %v12622_v22 = vld [vmem:[#allocation84_spill] sm:$0xff] }
 0x6b2   : > { %3987 = vmax.xlane.f32.xlu0 %v3986_v13  ;;  %v3860_v13 = vsel %vm2688_vm8, %v3735_v40, %v3859_v7 }
 0x6b3   : > { %v3861_v38 = vsel %vm2690_vm9, %v3744_v37, %v3860_v13  ;;  %v10653_v15 = vpop.permute.xlu1 %4596  ;;  %v10659_v6 = vpop.permute.xlu0 %4210  ;;  %v12620_v37 = vld [vmem:[#allocation127_spill] sm:$0xff]  ;;  %v12624_v13 = vld [vmem:[#allocation100_spill] sm:$0xff] }
 0x6b4   : > { %v3862_v4 = vsel %vm2692_vm10, %v3753_v33, %v3861_v38  ;;  %v12623_v33 = vmov 0   ;;  %v12627_v38 = vld [vmem:[#allocation66_spill] sm:$0xff] }
 0x6b5   : > { %v3863_v3 = vsel %vm2694_vm11, %v3762_v62, %v3862_v4  ;;  %v12625_v62 = vld [vmem:[#allocation110_spill] sm:$0xff]  ;;  %v12628_v4 = vld [vmem:[#allocation88_spill] sm:$0xff] }
 0x6b6   : > { %v3864_v39 = vsel %vm2696_vm12, %v3771_v0, %v3863_v3  ;;  %v12626_v0 = vld [vmem:[#allocation65_spill] sm:$0xff]  ;;  %v12629_v3 = vld [vmem:[#allocation102_spill] sm:$0xff] }
 0x6b7   : > { %v3965_v19 = vadd.f32 %v3964_v26, %v3864_v39  ;;  %v12612_v26 = vld [vmem:[#allocation107_spill] sm:$0xff]  ;;  %v10657_v30 = vpop.permute.xlu1 %4208  ;;  %v10663_v21 = vpop.permute.xlu0 %4214  ;;  %v12630_v39 = vld [vmem:[#allocation112_spill] sm:$0xff] }
 0x6b9   : > { %v10627_v14 = vsel %vm9785_vm13, %v3965_v19, -1e+15  ;;  %v12631_v19 = vld [vmem:[#allocation70_spill] sm:$0xff] }
 0x6ba   : > { %v3983_v24 = vsel %vm2826_vm14, %v10627_v14, -inf }
 0x6bb   : > { %v10661_v57 = vpop.permute.xlu1 %4212 }
 0x6bf   : > { %v10665_v18 = vpop.permute.xlu1 %4216 }
 0x6c0   : > { %4240 = vrot.lane.b32.xlu1 %v9425_v58, %s8309_s4 }
 0x6c4   : > { %4244 = vrot.lane.b32.xlu1 %v9443_v5, %s8309_s4 }
 0x6c8   : > { %4220 = vrot.lane.b32.xlu1 %v9255_v53, %s8309_s4  ;;  %4238 = vrot.lane.b32.xlu0 %v9419_v51, %s8309_s4 }
 0x6cc   : > { %4248 = vrot.lane.b32.xlu1 %v9461_v47, %s8309_s4  ;;  %4242 = vrot.lane.b32.xlu0 %v12586_v27, %s8309_s4 }
 0x6d0   : > { %4224 = vrot.lane.b32.xlu1 %v12587_v43, %s8309_s4  ;;  %4218 = vrot.lane.b32.xlu0 %v12588_v32, %s8309_s4 }
 0x6d4   : > { %4246 = vrot.lane.b32.xlu0 %v12589_v10, %s8309_s4 }
 0x6d8   : > { %4222 = vrot.lane.b32.xlu0 %v12590_v23, %s8309_s4 }
 0x6dc   : > { %4250 = vrot.lane.b32.xlu0 %v12591_v29, %s8309_s4 }
 0x6e0   : > { %4226 = vrot.lane.b32.xlu0 %v12597_v56, %s8309_s4 }
 0x6e4   : > { %4254 = vrot.lane.b32.xlu0 %v12606_v54, %s8309_s4 }
 0x6e8   : > { %4270 = vrot.lane.b32.xlu0 %v12607_v20, %s8309_s4 }
 0x6ec   : > { %4274 = vrot.lane.b32.xlu0 %v12608_v42, %s8309_s4 }
 0x6f4   : > { %3984 = vmax.xlane.f32.xlu1 %v3983_v24 }
 0x705   : > { %4252 = vrot.lane.b32.xlu1 %v12609_v17, %s8309_s4 }
 0x709   : > { %4228 = vrot.lane.b32.xlu1 %v12610_v31, %s8309_s4 }
 0x70d   : > { %4256 = vrot.lane.b32.xlu1 %v12611_v16, %s8309_s4 }
 0x711   : > { %4272 = vrot.lane.b32.xlu1 %v12612_v26, %s8309_s4 }
 0x715   : > { %4276 = vrot.lane.b32.xlu1 %v12613_v34, %s8309_s4 }
 0x719   : > { %4232 = vrot.lane.b32.xlu1 %v12614_v55, %s8309_s4 }
 0x71d   : > { %4260 = vrot.lane.b32.xlu1 %v12615_v9, %s8309_s4  ;;  %v12646_v9 = vld [vmem:[#allocation103_spill] sm:$0xff] }
 0x721   : > { %4280 = vrot.lane.b32.xlu1 %v12616_v52, %s8309_s4 }
 0x73b   : > { %v3982_v8 = vpop.xlane.xlu0 %3981 }
 0x73c   : > { %v10667_v40 = vmax.f32 %v7783_v63, %v3982_v8  ;;  %v3979_v46 = vpop.xlane.xlu1 %3978  ;;  %v12632_v8 = vld [vmem:[#allocation104_spill] sm:$0xff]  ;;  %v12633_v63 = vld [vmem:[#allocation114_spill] sm:$0xff] }
 0x73d   : > { %v10672_v2 = vmax.f32 %v10669_v59, %v3979_v46 }
 0x73e   : > { %12617 = vst [vmem:[#allocation137_spill] sm:$0xff] %v10667_v40  ;;  %4012 = vperm.xlu0 %7682, %v10667_v40  }
 0x73f   : > { %12619 = vst [vmem:[#allocation138_spill] sm:$0xff] %v10672_v2  ;;  %4007 = vperm.xlu1 %7683, %v10672_v2   ;;  %v3988_v25 = vpop.xlane.xlu0 %3987 }
 0x740   : > { %v10677_v7 = vmax.f32 %v12620_v37, %v3988_v25  ;;  %v10699_v24 = vpop.permute.xlu1 %4240  ;;  %v12634_v25 = vld [vmem:[#allocation74_spill] sm:$0xff] }
 0x742   : > { %12621 = vst [vmem:[#allocation135_spill] sm:$0xff] %v10677_v7  ;;  %4230 = vrot.lane.b32.xlu0 %v12622_v22, %s8309_s4 }
 0x743   : > { %4022 = vperm.xlu1 %7683, %v10677_v7   ;;  %7694 = vset.pattern.permute.xlu0 %v12623_v33  ;;  %v12637_v33 = vld [vmem:[#allocation118_spill] sm:$0xff] }
 0x744   : > { %v10705_v46 = vpop.permute.xlu1 %4244 }
 0x746   : > { %4258 = vrot.lane.b32.xlu0 %v12624_v13, %s8309_s4  ;;  %v4398_v13 = vsel %vm2137_vm3, %v10655_v41, 0.0 }
 0x748   : > { %v10709_v37 = vpop.permute.xlu1 %4220 }
 0x74a   : > { %4278 = vrot.lane.b32.xlu0 %v12625_v62, %s8309_s4 }
 0x74c   : > { %v10715_v61 = vpop.permute.xlu1 %4248 }
 0x74e   : > { %4302 = vrot.lane.b32.xlu0 %v12626_v0, %s8309_s4  ;;  %v12649_v0 = vld [vmem:[#allocation105_spill] sm:$0xff] }
 0x752   : > { %4306 = vrot.lane.b32.xlu0 %v12627_v38, %s8309_s4 }
 0x756   : > { %4234 = vrot.lane.b32.xlu0 %v12628_v4, %s8309_s4  ;;  %v12643_v4 = vld [vmem:[#allocation122_spill] sm:$0xff] }
 0x75a   : > { %4262 = vrot.lane.b32.xlu0 %v12629_v3, %s8309_s4  ;;  %v12640_v3 = vld [vmem:[#allocation120_spill] sm:$0xff] }
 0x75e   : > { %4282 = vrot.lane.b32.xlu0 %v12630_v39, %s8309_s4 }
 0x762   : > { %4310 = vrot.lane.b32.xlu0 %v12631_v19, %s8309_s4 }
 0x766   : > { %4266 = vrot.lane.b32.xlu0 %v12632_v8, %s8309_s4  ;;  %v10719_v8 = vpop.permute.xlu1 %4224 }
 0x76a   : > { %4286 = vrot.lane.b32.xlu0 %v12633_v63, %s8309_s4  ;;  %v12638_v63 = vld [vmem:[#allocation82_spill] sm:$0xff] }
 0x76e   : > { %4314 = vrot.lane.b32.xlu0 %v12634_v25, %s8309_s4  ;;  %v7785_v25 = vld [vmem:[#allocation4 + $0x10] sm:$0xff] }
 0x772   : > { %4290 = vrot.lane.b32.xlu0 %v12635_v1, %s8309_s4  ;;  %v4239_v1 = vpop.permute.xlu0 %4238 }
 0x776   : > { %4318 = vrot.lane.b32.xlu0 %v12636_v11, %s8309_s4  ;;  %v12641_v11 = vld [vmem:[#allocation86_spill] sm:$0xff]  ;;  %v4243_v52 = vpop.permute.xlu0 %4242 }
 0x77a   : > { %4294 = vrot.lane.b32.xlu0 %v12637_v33, %s8309_s4  ;;  %v12642_v33 = vld [vmem:[#allocation61_spill] sm:$0xff] }
 0x77e   : > { %4322 = vrot.lane.b32.xlu0 %v12638_v63, %s8309_s4  ;;  %v12644_v63 = vld [vmem:[#allocation64_spill] sm:$0xff] }
 0x781   : > { %v3985_v19 = vpop.xlane.xlu1 %3984 }
 0x782   : > { %v10723_v39 = vmax.f32 %v7785_v25, %v3985_v19  ;;  %4298 = vrot.lane.b32.xlu0 %v12640_v3, %s8309_s4  ;;  %v4219_v19 = vpop.permute.xlu0 %4218  ;;  %v12645_v3 = vld [vmem:[#allocation89_spill] sm:$0xff] }
 0x784   : > { %12639 = vst [vmem:[#allocation141_spill] sm:$0xff] %v10723_v39  ;;  %4017 = vperm.xlu1 %7683, %v10723_v39  }
 0x785   : > { %v10736_v25 = vpop.permute.xlu1 %4252 }
 0x786   : > { %4326 = vrot.lane.b32.xlu0 %v12641_v11, %s8309_s4  ;;  %v4247_v11 = vpop.permute.xlu0 %4246 }
 0x788   : > { %4304 = vrot.lane.b32.xlu1 %v12642_v33, %s8309_s4  ;;  %v12647_v33 = vld [vmem:[#allocation113_spill] sm:$0xff] }
 0x789   : > { %v10742_v38 = vpop.permute.xlu1 %4228 }
 0x78a   : > { %4330 = vrot.lane.b32.xlu0 %v12643_v4, %s8309_s4  ;;  %v4223_v55 = vpop.permute.xlu0 %4222 }
 0x78c   : > { %4308 = vrot.lane.b32.xlu1 %v12644_v63, %s8309_s4  ;;  %v12648_v63 = vld [vmem:[#allocation71_spill] sm:$0xff] }
 0x78d   : > { %v10746_v4 = vpop.permute.xlu1 %4256 }
 0x78e   : > { %v4251_v34 = vpop.permute.xlu0 %4250 }
 0x790   : > { %4236 = vrot.lane.b32.xlu1 %v12645_v3, %s8309_s4 }
 0x791   : > { %v10752_v3 = vpop.permute.xlu1 %4272 }
 0x792   : > { %v4227_v62 = vpop.permute.xlu0 %4226 }
 0x794   : > { %4264 = vrot.lane.b32.xlu1 %v12646_v9, %s8309_s4  ;;  %v12650_v9 = vld [vmem:[#allocation115_spill] sm:$0xff] }
 0x795   : > { %v10756_v26 = vpop.permute.xlu1 %4276 }
 0x796   : > { %v4255_v16 = vpop.permute.xlu0 %4254 }
 0x798   : > { %4284 = vrot.lane.b32.xlu1 %v12647_v33, %s8309_s4  ;;  %v12651_v33 = vld [vmem:[#allocation75_spill] sm:$0xff] }
 0x799   : > { %v10766_v22 = vpop.permute.xlu1 %4232 }
 0x79a   : > { %v4271_v31 = vpop.permute.xlu0 %4270 }
 0x79c   : > { %4312 = vrot.lane.b32.xlu1 %v12648_v63, %s8309_s4  ;;  %v12652_v63 = vld [vmem:[#allocation117_spill] sm:$0xff] }
 0x79d   : > { %v10772_v41 = vpop.permute.xlu1 %4260 }
 0x7a0   : > { %4268 = vrot.lane.b32.xlu1 %v12649_v0, %s8309_s4  ;;  %v4404_v0 = vsel %vm2137_vm3, %v10659_v6, 0.0  ;;  %v4410_v6 = vsel %vm2137_vm3, %v10663_v21, 0.0 }
 0x7a1   : > { %v10781_v42 = vpop.permute.xlu1 %4280 }
 0x7a4   : > { %4288 = vrot.lane.b32.xlu1 %v12650_v9, %s8309_s4  ;;  %v12653_v9 = vld [vmem:[#allocation79_spill] sm:$0xff] }
 0x7a8   : > { %4316 = vrot.lane.b32.xlu1 %v12651_v33, %s8309_s4  ;;  %v4407_v33 = vsel %vm2137_vm3, %v10661_v57, 0.0  ;;  %v12656_v57 = vld [vmem:[#allocation121_spill] sm:$0xff] }
 0x7a9   : > { %4399 = vadd.xlane.f32.xlu0 %v4398_v13  ;;  %v12654_v13 = vld [vmem:[#allocation119_spill] sm:$0xff] }
 0x7ac   : > { %4292 = vrot.lane.b32.xlu1 %v12652_v63, %s8309_s4  ;;  %v4446_v63 = vsel %vm2137_vm3, %v4239_v1, 0.0  ;;  %v4416_v1 = vsel %vm2137_vm3, %v4219_v19, 0.0 }
 0x7ad   : > { %4405 = vadd.xlane.f32.xlu0 %v4404_v0  ;;  %v12655_v0 = vld [vmem:[#allocation83_spill] sm:$0xff] }
 0x7b0   : > { %4320 = vrot.lane.b32.xlu1 %v12653_v9, %s8309_s4  ;;  %v4275_v9 = vpop.permute.xlu0 %4274 }
 0x7b1   : > { %4408 = vadd.xlane.f32.xlu0 %v4407_v33  ;;  %v4452_v33 = vsel %vm2137_vm3, %v4243_v52, 0.0  ;;  %v12658_v52 = vld [vmem:[#allocation123_spill] sm:$0xff] }
 0x7b4   : > { %4296 = vrot.lane.b32.xlu1 %v12654_v13, %s8309_s4 }
 0x7b5   : > { %4411 = vadd.xlane.f32.xlu0 %v4410_v6 }
 0x7b8   : > { %4324 = vrot.lane.b32.xlu1 %v12655_v0, %s8309_s4  ;;  %v12657_v0 = vld [vmem:[#allocation87_spill] sm:$0xff] }
 0x7b9   : > { %4447 = vadd.xlane.f32.xlu0 %v4446_v63 }
 0x7bc   : > { %4300 = vrot.lane.b32.xlu1 %v12656_v57, %s8309_s4 }
 0x7bd   : > { %4453 = vadd.xlane.f32.xlu0 %v4452_v33  ;;  %v4013_v13 = vpop.permute.xlu0 %4012  ;;  %v4458_v33 = vsel %vm2137_vm3, %v4247_v11, 0.0 }
 0x7be   : > { %v4026_v20 = vsub.f32 %v10528_v12, %v4013_v13  ;;  %v4008_v21 = vpop.permute.xlu1 %4007  ;;  %v4464_v13 = vsel %vm2137_vm3, %v4251_v34, 0.0 }
 0x7bf   : > { %v4025_v6 = vsub.f32 %v10533_v45, %v4008_v21  ;;  %v4422_v45 = vsel %vm2137_vm3, %v4223_v55, 0.0  ;;  %v4470_v55 = vsel %vm2137_vm3, %v4255_v16, 0.0 }
 0x7c0   : > { %v4031_v54 = vmul.f32 1.442695, %v4026_v20  ;;  %4328 = vrot.lane.b32.xlu1 %v12657_v0, %s8309_s4 }
 0x7c1   : > { %v4029_v63 = vmul.f32 1.442695, %v4025_v6  ;;  %4417 = vadd.xlane.f32.xlu0 %v4416_v1  ;;  %v4231_v7 = vpop.permute.xlu0 %4230 }
 0x7c3   : > { %7723 = vpow2.f32 %v4029_v63  ;;  %v4494_v63 = vsel %vm2137_vm3, %v4271_v31, 0.0  ;;  %v4413_v31 = vsel %vm2137_vm3, %v10665_v18, 0.0  ;;  %v4419_v18 = vsel %vm2137_vm3, %v10709_v37, 0.0 }
 0x7c4   : > { %7725 = vpow2.f32 %v4031_v54  ;;  %4332 = vrot.lane.b32.xlu1 %v12658_v52, %s8309_s4  ;;  %v4428_v54 = vsel %vm2137_vm3, %v4227_v62, 0.0  ;;  %v4401_v62 = vsel %vm2137_vm3, %v10657_v30, 0.0  ;;  %v4455_v30 = vsel %vm2137_vm3, %v10705_v46, 0.0  ;;  %v4023_v46 = vpop.permute.xlu1 %4022  ;;  %v12672_v52 = vld [vmem:[#allocation133_spill] sm:$0xff] }
 0x7c5   : > { %4459 = vadd.xlane.f32.xlu0 %v4458_v33  ;;  %v4259_v12 = vpop.permute.xlu0 %4258  ;;  %v4500_v33 = vsel %vm2137_vm3, %v4275_v9, 0.0  ;;  %v4028_v37 = vsub.f32 %v10542_v44, %v4023_v46  ;;  %v4479_v46 = vsel %vm2137_vm3, %v10772_v41, 0.0  ;;  %v2900_v0 = vsel %vm2826_vm14, %v12672_v52, 0.0 }
 0x7c9   : > { %4423 = vadd.xlane.f32.xlu0 %v4422_v45  ;;  %v4279_v20 = vpop.permute.xlu0 %4278 }
 0x7ca   : > { %v4506_v16 = vsel %vm2137_vm3, %v4279_v20, 0.0 }
 0x7cd   : > { %v10796_v21 = vpop.eup %7723  ;;  %4465 = vadd.xlane.f32.xlu0 %v4464_v13  ;;  %v4303_v19 = vpop.permute.xlu0 %4302  ;;  %v4434_v13 = vsel %vm2137_vm3, %v4231_v7, 0.0 }
 0x7ce   : > { %12659 = vst [vmem:[#allocation140_spill] sm:$0xff] %v10796_v21  ;;  %v10798_v6 = vpop.eup %7725  ;;  %7319 = vmatprep.mubr.msk.f32.mxu1 %vm2826_vm14, %v10796_v21  ;;  %v4542_v9 = vsel %vm2137_vm3, %v4303_v19, 0.0 }
 0x7cf   : > { %12660 = vst [vmem:[#allocation142_spill] sm:$0xff] %v10798_v6  ;;  %7320 = vmatmul.mubr.msk.f32.vlgmr.msra.gmra.mrb[30].mxu1 %vm2826_vm14, %v10798_v6 }
 0x7d0   : > { %7422 = vmatpush3.bf16.xpose.msk.msra.mxu1 %vm9128_vm4, %v10372_v36  ;;  %v4476_v36 = vsel %vm2137_vm3, %v4259_v12, 0.0  ;;  %v4449_v12 = vsel %vm2137_vm3, %v10699_v24, 0.0 }
 0x7d1   : > { %4429 = vadd.xlane.f32.xlu0 %v4428_v54  ;;  %v4307_v34 = vpop.permute.xlu0 %4306 }
 0x7d5   : > { %4471 = vadd.xlane.f32.xlu0 %v4470_v55  ;;  %v4235_v1 = vpop.permute.xlu0 %4234  ;;  %v4548_v55 = vsel %vm2137_vm3, %v4307_v34, 0.0  ;;  %v4461_v34 = vsel %vm2137_vm3, %v10715_v61, 0.0 }
 0x7d6   : > { %v4440_v20 = vsel %vm2137_vm3, %v4235_v1, 0.0  ;;  %v4425_v1 = vsel %vm2137_vm3, %v10719_v8, 0.0 }
 0x7d9   : > { %4495 = vadd.xlane.f32.xlu0 %v4494_v63  ;;  %v4263_v45 = vpop.permute.xlu0 %4262 }
 0x7da   : > { %v4482_v19 = vsel %vm2137_vm3, %v4263_v45, 0.0 }
 0x7dd   : > { %4501 = vadd.xlane.f32.xlu0 %v4500_v33  ;;  %v4283_v21 = vpop.permute.xlu0 %4282 }
 0x7de   : > { %v4512_v33 = vsel %vm2137_vm3, %v4283_v21, 0.0 }
 0x7e1   : > { %4435 = vadd.xlane.f32.xlu0 %v4434_v13  ;;  %v4311_v54 = vpop.permute.xlu0 %4310 }
 0x7e2   : > { %v4554_v13 = vsel %vm2137_vm3, %v4311_v54, 0.0  ;;  %v4431_v54 = vsel %vm2137_vm3, %v10742_v38, 0.0 }
 0x7e5   : > { %4477 = vadd.xlane.f32.xlu0 %v4476_v36  ;;  %v4267_v7 = vpop.permute.xlu0 %4266 }
 0x7e6   : > { %v4488_v21 = vsel %vm2137_vm3, %v4267_v7, 0.0 }
 0x7e8   : > { %4402 = vadd.xlane.f32.xlu1 %v4401_v62  ;;  %v4467_v62 = vsel %vm2137_vm3, %v10736_v25, 0.0 }
 0x7e9   : > { %4507 = vadd.xlane.f32.xlu0 %v4506_v16  ;;  %v4287_v63 = vpop.permute.xlu0 %4286  ;;  %v4035_v16 = vmul.f32 1.442695, %v4028_v37 }
 0x7ea   : > { %v4518_v44 = vsel %vm2137_vm3, %v4287_v63, 0.0 }
 0x7ec   : > { %4414 = vadd.xlane.f32.xlu1 %v4413_v31 }
 0x7ed   : > { %4543 = vadd.xlane.f32.xlu0 %v4542_v9  ;;  %v4315_v24 = vpop.permute.xlu0 %4314 }
 0x7ee   : > { %v4560_v7 = vsel %vm2137_vm3, %v4315_v24, 0.0  ;;  %v4437_v24 = vsel %vm2137_vm3, %v10766_v22, 0.0 }
 0x7f0   : > { %4450 = vadd.xlane.f32.xlu1 %v4449_v12 }
 0x7f1   : > { %4549 = vadd.xlane.f32.xlu0 %v4548_v55  ;;  %v4291_v36 = vpop.permute.xlu0 %4290 }
 0x7f2   : > { %v4524_v38 = vsel %vm2137_vm3, %v4291_v36, 0.0 }
 0x7f4   : > { %4456 = vadd.xlane.f32.xlu1 %v4455_v30  ;;  %v4497_v30 = vsel %vm2137_vm3, %v10752_v3, 0.0 }
 0x7f5   : > { %4441 = vadd.xlane.f32.xlu0 %v4440_v20  ;;  %v4319_v8 = vpop.permute.xlu0 %4318 }
 0x7f6   : > { %v4566_v3 = vsel %vm2137_vm3, %v4319_v8, 0.0 }
 0x7f8   : > { %4420 = vadd.xlane.f32.xlu1 %v4419_v18 }
 0x7f9   : > { %4483 = vadd.xlane.f32.xlu0 %v4482_v19  ;;  %v4295_v12 = vpop.permute.xlu0 %4294 }
 0x7fc   : > { %4462 = vadd.xlane.f32.xlu1 %v4461_v34 }
 0x7fd   : > { %4513 = vadd.xlane.f32.xlu0 %v4512_v33  ;;  %v4323_v18 = vpop.permute.xlu0 %4322 }
 0x800   : > { %4426 = vadd.xlane.f32.xlu1 %v4425_v1 }
 0x801   : > { %4555 = vadd.xlane.f32.xlu0 %v4554_v13  ;;  %v4299_v34 = vpop.permute.xlu0 %4298 }
 0x803   : > { %v4018_v45 = vpop.permute.xlu1 %4017 }
 0x804   : > { %v4027_v61 = vsub.f32 %v10627_v14, %v4018_v45  ;;  %4468 = vadd.xlane.f32.xlu1 %v4467_v62  ;;  %v4473_v14 = vsel %vm2137_vm3, %v10746_v4, 0.0  ;;  %v4503_v4 = vsel %vm2137_vm3, %v10756_v26, 0.0  ;;  %v4530_v26 = vsel %vm2137_vm3, %v4295_v12, 0.0 }
 0x805   : > { %4489 = vadd.xlane.f32.xlu0 %v4488_v21  ;;  %v4327_v22 = vpop.permute.xlu0 %4326 }
 0x806   : > { %v4033_v31 = vmul.f32 1.442695, %v4027_v61  ;;  %v4578_v41 = vsel %vm2137_vm3, %v4327_v22, 0.0 }
 0x807   : > { %v4305_v9 = vpop.permute.xlu1 %4304 }
 0x808   : > { %7727 = vpow2.f32 %v4033_v31  ;;  %4432 = vadd.xlane.f32.xlu1 %v4431_v54  ;;  %v4545_v13 = vsel %vm2137_vm3, %v4305_v9, 0.0 }
 0x809   : > { %7729 = vpow2.f32 %v4035_v16  ;;  %4519 = vadd.xlane.f32.xlu0 %v4518_v44  ;;  %v4331_v37 = vpop.permute.xlu0 %4330 }
 0x80a   : > { %v4584_v45 = vsel %vm2137_vm3, %v4331_v37, 0.0  ;;  %v12665_v37 = vld [vmem:[#allocation131_spill] sm:$0xff] }
 0x80b   : > { %v4309_v25 = vpop.permute.xlu1 %4308 }
 0x80c   : > { %4474 = vadd.xlane.f32.xlu1 %v4473_v14  ;;  %v4551_v36 = vsel %vm2137_vm3, %v4309_v25, 0.0 }
 0x80d   : > { %4561 = vadd.xlane.f32.xlu0 %v4560_v7  ;;  %v12664_v7 = vld [vmem:[#allocation134_spill] sm:$0xff] }
 0x80f   : > { %v4237_v55 = vpop.permute.xlu1 %4236 }
 0x810   : > { %4498 = vadd.xlane.f32.xlu1 %v4497_v30 }
 0x811   : > { %4525 = vadd.xlane.f32.xlu0 %v4524_v38 }
 0x812   : > { %v10848_v20 = vpop.eup %7727 }
 0x813   : > { %12662 = vst [vmem:[#allocation136_spill] sm:$0xff] %v10848_v20  ;;  %v10850_v63 = vpop.eup %7729  ;;  %7322 = vmatprep.mubr.msk.f32.mxu1 %vm2826_vm14, %v10848_v20  ;;  %v4265_v19 = vpop.permute.xlu1 %4264 }
 0x814   : > { %12663 = vst [vmem:[#allocation145_spill] sm:$0xff] %v10850_v63  ;;  %4504 = vadd.xlane.f32.xlu1 %v4503_v4  ;;  %7323 = vmatmul.mubr.msk.f32.gmra.mrb[32].mxu1 %vm2826_vm14, %v10850_v63  ;;  %v4485_v61 = vsel %vm2137_vm3, %v4265_v19, 0.0  ;;  %v12671_v63 = vld [vmem:[#allocation130_spill] sm:$0xff] }
 0x815   : > { %7329 = vmatprep.mubr.msk.f32.mxu1 %vm2137_vm3, %v10639_v48  ;;  %4567 = vadd.xlane.f32.xlu0 %v4566_v3  ;;  %v4572_v48 = vsel %vm2137_vm3, %v4323_v18, 0.0  ;;  %v2891_v20 = vsel %vm2826_vm14, %v12671_v63, 0.0 }
 0x817   : > { %v4285_v33 = vpop.permute.xlu1 %4284 }
 0x818   : > { %4438 = vadd.xlane.f32.xlu1 %v4437_v24  ;;  %7330 = vmatmul.mubr.msk.f32.vlgmr.msra.gmra.mrb[34].mxu1 %vm2137_vm3, %v10645_v50  ;;  %v4509_v50 = vsel %vm2137_vm3, %v10781_v42, 0.0  ;;  %v4443_v42 = vsel %vm2137_vm3, %v4237_v55, 0.0  ;;  %v4515_v16 = vsel %vm2137_vm3, %v4285_v33, 0.0 }
 0x819   : > { %7332 = vmatprep.mubr.msk.f32.mxu1 %vm2137_vm3, %v10649_v60  ;;  %4531 = vadd.xlane.f32.xlu0 %v4530_v26  ;;  %v4536_v60 = vsel %vm2137_vm3, %v4299_v34, 0.0 }
 0x81b   : > { %v4313_v1 = vpop.permute.xlu1 %4312 }
 0x81c   : > { %4480 = vadd.xlane.f32.xlu1 %v4479_v46  ;;  %7333 = vmatmul.mubr.msk.f32.gmra.mrb[36].mxu1 %vm2137_vm3, %v10653_v15  ;;  %v4557_v8 = vsel %vm2137_vm3, %v4313_v1, 0.0 }
 0x81d   : > { %4573 = vadd.xlane.f32.xlu0 %v4572_v48 }
 0x81f   : > { %v4269_v15 = vpop.permute.xlu1 %4268 }
 0x820   : > { %4510 = vadd.xlane.f32.xlu1 %v4509_v50  ;;  %v4491_v44 = vsel %vm2137_vm3, %v4269_v15, 0.0  ;;  %v2894_v15 = vsel %vm2826_vm14, %v12665_v37, 0.0 }
 0x821   : > { %4537 = vadd.xlane.f32.xlu0 %v4536_v60 }
 0x823   : > { %v4289_v62 = vpop.permute.xlu1 %4288 }
 0x824   : > { %4546 = vadd.xlane.f32.xlu1 %v4545_v13  ;;  %v4521_v12 = vsel %vm2137_vm3, %v4289_v62, 0.0 }
 0x825   : > { %4579 = vadd.xlane.f32.xlu0 %v4578_v41 }
 0x827   : > { %v4317_v21 = vpop.permute.xlu1 %4316 }
 0x828   : > { %4552 = vadd.xlane.f32.xlu1 %v4551_v36  ;;  %v4563_v30 = vsel %vm2137_vm3, %v4317_v21, 0.0 }
 0x829   : > { %4585 = vadd.xlane.f32.xlu0 %v4584_v45 }
 0x82b   : > { %v4293_v9 = vpop.permute.xlu1 %4292 }
 0x82c   : > { %4444 = vadd.xlane.f32.xlu1 %v4443_v42  ;;  %v4527_v4 = vsel %vm2137_vm3, %v4293_v9, 0.0  ;;  %v12666_v42 = vld [vmem:[#allocation132_spill] sm:$0xff]  ;;  %v12668_v9 = vld [vmem:[#allocation58_spill] sm:$0xff] }
 0x82d   : > { %v2897_v62 = vsel %vm2826_vm14, %v12666_v42, 0.0 }
 0x82f   : > { %v4321_v25 = vpop.permute.xlu1 %4320 }
 0x830   : > { %4486 = vadd.xlane.f32.xlu1 %v4485_v61  ;;  %v4569_v24 = vsel %vm2137_vm3, %v4321_v25, 0.0 }
 0x833   : > { %v4297_v38 = vpop.permute.xlu1 %4296 }
 0x834   : > { %4516 = vadd.xlane.f32.xlu1 %v4515_v16  ;;  %v4533_v34 = vsel %vm2137_vm3, %v4297_v38, 0.0  ;;  %v7787_v38 = vld [vmem:[#allocation2 + $0x8] sm:$0xff] }
 0x836   : > { %v10883_v31 = vpop.xlane.xlu0 %4399 }
 0x837   : > { %v4325_v19 = vpop.permute.xlu1 %4324  ;;  %v4669_v23 = vrot.slane %v10883_v31, %v9738_v49 }
 0x838   : > { %4558 = vadd.xlane.f32.xlu1 %v4557_v8  ;;  %v4575_v48 = vsel %vm2137_vm3, %v4325_v19, 0.0  ;;  %v12667_v8 = vld [vmem:[#allocation59_spill] sm:$0xff]  ;;  %v7788_v19 = vld [vmem:[#allocation2 + $0x10] sm:$0xff] }
 0x83a   : > { %v10886_v54 = vpop.xlane.xlu0 %4405 }
 0x83b   : > { %v4301_v33 = vpop.permute.xlu1 %4300  ;;  %v4678_v51 = vrot.slane %v10886_v54, %v9738_v49 }
 0x83c   : > { %4492 = vadd.xlane.f32.xlu1 %v4491_v44  ;;  %v4539_v1 = vsel %vm2137_vm3, %v4301_v33, 0.0 }
 0x83e   : > { %v10889_v14 = vpop.xlane.xlu0 %4408 }
 0x83f   : > { %5704 = vrot.lane.b32.xlu0 %v12664_v7, %s8311_s20  ;;  %v4329_v22 = vpop.permute.xlu1 %4328  ;;  %v7786_v7 = vld [vmem:[#allocation2] sm:$0xff]  ;;  %v4682_v58 = vrot.slane %v10889_v14, %v9741_v35 }
 0x840   : > { %4522 = vadd.xlane.f32.xlu1 %v4521_v12  ;;  %v4581_v13 = vsel %vm2137_vm3, %v4329_v22, 0.0 }
 0x841   : > { %v4683_v10 = vsel %vm2403_vm5, %v4682_v58, %v4678_v51 }
 0x842   : > { %v10894_v55 = vpop.xlane.xlu0 %4411 }
 0x843   : > { %v4333_v41 = vpop.permute.xlu1 %4332  ;;  %v4687_v14 = vrot.slane %v10894_v55, %v9738_v49 }
 0x844   : > { %4564 = vadd.xlane.f32.xlu1 %v4563_v30  ;;  %v4587_v45 = vsel %vm2137_vm3, %v4333_v41, 0.0 }
 0x846   : > { %v10897_v18 = vpop.xlane.xlu0 %4447 }
 0x847   : > { %v4741_v11 = vrot.slane %v10897_v18, %v9738_v49 }
 0x848   : > { %4528 = vadd.xlane.f32.xlu1 %v4527_v4 }
 0x84a   : > { %v10900_v3 = vpop.xlane.xlu0 %4453 }
 0x84b   : > { %v4750_v54 = vrot.slane %v10900_v3, %v9738_v49 }
 0x84c   : > { %4570 = vadd.xlane.f32.xlu1 %v4569_v24 }
 0x84e   : > { %v10903_v26 = vpop.xlane.xlu0 %4417 }
 0x84f   : > { %v4696_v31 = vrot.slane %v10903_v26, %v9738_v49 }
 0x850   : > { %4534 = vadd.xlane.f32.xlu1 %v4533_v34 }
 0x852   : > { %v10906_v46 = vpop.xlane.xlu0 %4459 }
 0x853   : > { %v4759_v58 = vrot.slane %v10906_v46, %v9738_v49 }
 0x854   : > { %4576 = vadd.xlane.f32.xlu1 %v4575_v48 }
 0x856   : > { %v10909_v50 = vpop.xlane.xlu0 %4423 }
 0x857   : > { %v4705_v51 = vrot.slane %v10909_v50, %v9738_v49 }
 0x858   : > { %4540 = vadd.xlane.f32.xlu1 %v4539_v1 }
 0x85a   : > { %v10912_v60 = vpop.xlane.xlu0 %4465 }
 0x85b   : > { %v4768_v18 = vrot.slane %v10912_v60, %v9738_v49 }
 0x85c   : > { %4582 = vadd.xlane.f32.xlu1 %v4581_v13 }
 0x85e   : > { %2895 = vadd.xlane.f32.xlu0 %v2894_v15  ;;  %v10917_v36 = vpop.xlane.xlu0 %4429 }
 0x85f   : > { %v4714_v3 = vrot.slane %v10917_v36, %v9738_v49 }
 0x860   : > { %4588 = vadd.xlane.f32.xlu1 %v4587_v45 }
 0x862   : > { %2898 = vadd.xlane.f32.xlu0 %v2897_v62  ;;  %v10922_v61 = vpop.xlane.xlu0 %4471 }
 0x863   : > { %v4777_v46 = vrot.slane %v10922_v61, %v9738_v49 }
 0x866   : > { %v10924_v21 = vpop.xlane.xlu0 %4495 }
 0x867   : > { %v4813_v50 = vrot.slane %v10924_v21, %v9738_v49 }
 0x86a   : > { %v10926_v16 = vpop.xlane.xlu0 %4501 }
 0x86e   : > { %v10934_v25 = vpop.xlane.xlu0 %4435 }
 0x871   : > { %7685 = vrot.lane.b32.xlu1 %v12667_v8, %s8309_s4 }
 0x872   : > { %v10939_v30 = vpop.xlane.xlu0 %4477 }
 0x875   : > { %7690 = vrot.lane.b32.xlu1 %v12668_v9, %s8311_s20  ;;  %v10932_v44 = vpop.xlane.xlu1 %4402 }
 0x876   : > { %v10947_v34 = vpop.xlane.xlu0 %4507  ;;  %v4673_v29 = vrot.slane %v10932_v44, %v9741_v35 }
 0x879   : > { %5698 = vrot.lane.b32.xlu1 %v7786_v7, %s8311_s20  ;;  %v10937_v12 = vpop.xlane.xlu1 %4414 }
 0x87a   : > { %v10951_v48 = vpop.xlane.xlu0 %4543  ;;  %v4691_v44 = vrot.slane %v10937_v12, %v9741_v35  ;;  %v4674_v12 = vsel %vm2403_vm5, %v4673_v29, %v4669_v23  ;;  %v4723_v23 = vrot.slane %v10934_v25, %v9738_v49  ;;  %v4786_v29 = vrot.slane %v10939_v30, %v9738_v49 }
 0x87b   : > { %v4954_v21 = vsel %vm2684_vm6, %v4683_v10, %v4674_v12  ;;  %v4885_v25 = vrot.slane %v10951_v48, %v9738_v49 }
 0x87c   : > { %v4692_v36 = vsel %vm2403_vm5, %v4691_v44, %v4687_v14 }
 0x87d   : > { %5700 = vrot.lane.b32.xlu1 %v7787_v38, %s8311_s20  ;;  %v10942_v4 = vpop.xlane.xlu1 %4450 }
 0x87e   : > { %v10957_v13 = vpop.xlane.xlu0 %4549  ;;  %v4745_v60 = vrot.slane %v10942_v4, %v9741_v35 }
 0x880   : > { %v4746_v14 = vsel %vm2403_vm5, %v4745_v60, %v4741_v11 }
 0x881   : > { %5702 = vrot.lane.b32.xlu1 %v7788_v19, %s8311_s20  ;;  %v10945_v24 = vpop.xlane.xlu1 %4456 }
 0x882   : > { %v10961_v37 = vpop.xlane.xlu0 %4441  ;;  %v4754_v55 = vrot.slane %v10945_v24, %v9741_v35  ;;  %v4822_v24 = vrot.slane %v10926_v16, %v9738_v49  ;;  %v4831_v16 = vrot.slane %v10947_v34, %v9738_v49  ;;  %v4955_v34 = vsel %vm2686_vm7, %v4692_v36, %v4954_v21 }
 0x884   : > { %v4755_v4 = vsel %vm2403_vm5, %v4754_v55, %v4750_v54 }
 0x885   : > { %v10949_v33 = vpop.xlane.xlu1 %4420  ;;  %v4961_v48 = vsel %vm2684_vm6, %v4755_v4, %v4746_v14 }
 0x886   : > { %v10967_v42 = vpop.xlane.xlu0 %4483  ;;  %v4700_v26 = vrot.slane %v10949_v33, %v9741_v35 }
 0x888   : > { %v4701_v30 = vsel %vm2403_vm5, %v4700_v26, %v4696_v31 }
 0x889   : > { %v10953_v22 = vpop.xlane.xlu1 %4462  ;;  %v4956_v11 = vsel %vm2688_vm8, %v4701_v30, %v4955_v34 }
 0x88a   : > { %v10971_v9 = vpop.xlane.xlu0 %4513  ;;  %v4763_v61 = vrot.slane %v10953_v22, %v9741_v35 }
 0x88c   : > { %v4764_v31 = vsel %vm2403_vm5, %v4763_v61, %v4759_v58 }
 0x88d   : > { %v10955_v1 = vpop.xlane.xlu1 %4426  ;;  %v4962_v58 = vsel %vm2686_vm7, %v4764_v31, %v4961_v48 }
 0x88e   : > { %v10983_v8 = vpop.xlane.xlu0 %4555  ;;  %v4709_v33 = vrot.slane %v10955_v1, %v9741_v35  ;;  %v4894_v1 = vrot.slane %v10957_v13, %v9738_v49  ;;  %v4795_v13 = vrot.slane %v10967_v42, %v9738_v49 }
 0x88f   : > { %v4903_v42 = vrot.slane %v10983_v8, %v9738_v49 }
 0x890   : > { %v4710_v55 = vsel %vm2403_vm5, %v4709_v33, %v4705_v51 }
 0x891   : > { %v10959_v41 = vpop.xlane.xlu1 %4468  ;;  %v4957_v36 = vsel %vm2690_vm9, %v4710_v55, %v4956_v11 }
 0x892   : > { %v10989_v39 = vpop.xlane.xlu0 %4489  ;;  %v4772_v22 = vrot.slane %v10959_v41, %v9741_v35  ;;  %v4732_v41 = vrot.slane %v10961_v37, %v9738_v49 }
 0x894   : > { %v4773_v12 = vsel %vm2403_vm5, %v4772_v22, %v4768_v18 }
 0x895   : > { %v10963_v15 = vpop.xlane.xlu1 %4432  ;;  %v4963_v8 = vsel %vm2688_vm8, %v4773_v12, %v4962_v58 }
 0x896   : > { %v4718_v10 = vrot.slane %v10963_v15, %v9741_v35 }
 0x898   : > { %v4719_v26 = vsel %vm2403_vm5, %v4718_v10, %v4714_v3 }
 0x899   : > { %v10965_v45 = vpop.xlane.xlu1 %4474  ;;  %v4958_v61 = vsel %vm2692_vm10, %v4719_v26, %v4957_v36 }
 0x89a   : > { %v4781_v54 = vrot.slane %v10965_v45, %v9741_v35  ;;  %v4840_v45 = vrot.slane %v10971_v9, %v9738_v49 }
 0x89c   : > { %v4782_v60 = vsel %vm2403_vm5, %v4781_v54, %v4777_v46 }
 0x89d   : > { %v10969_v62 = vpop.xlane.xlu1 %4498 }
 0x89e   : > { %v4817_v37 = vrot.slane %v10969_v62, %v9741_v35  ;;  %v4804_v62 = vrot.slane %v10989_v39, %v9738_v49 }
 0x8a0   : > { %v4818_v21 = vsel %vm2403_vm5, %v4817_v37, %v4813_v50 }
 0x8a1   : > { %v10973_v7 = vpop.xlane.xlu1 %4504 }
 0x8a2   : > { %v10975_v38 = vpop.f32.mrb[30].mxu1  ;;  %v4826_v15 = vrot.slane %v10973_v7, %v9741_v35 }
 0x8a3   : > { %12669 = vst [vmem:[#allocation146_spill] sm:$0xff] %v10975_v38  ;;  %v10977_v19 = vpop.f32.mrb[31].mxu1 }
 0x8a4   : > { %12670 = vst [vmem:[#allocation149_spill] sm:$0xff] %v10977_v19  ;;  %v10995_v19 = vpop.xlane.xlu0 %4519  ;;  %v4827_v3 = vsel %vm2403_vm5, %v4826_v15, %v4822_v24  ;;  %v4964_v24 = vsel %vm2690_vm9, %v4782_v60, %v4963_v8 }
 0x8a5   : > { %2892 = vadd.xlane.f32.xlu1 %v2891_v20  ;;  %v10981_v6 = vpop.xlane.xlu1 %4438  ;;  %v4849_v46 = vrot.slane %v10995_v19, %v9738_v49  ;;  %v4968_v4 = vsel %vm2684_vm6, %v4827_v3, %v4818_v21 }
 0x8a6   : > { %v4727_v7 = vrot.slane %v10981_v6, %v9741_v35 }
 0x8a8   : > { %v10999_v20 = vpop.xlane.xlu0 %4561 }
 0x8a9   : > { %2901 = vadd.xlane.f32.xlu1 %v2900_v0  ;;  %v10987_v57 = vpop.xlane.xlu1 %4480 }
 0x8aa   : > { %v4790_v9 = vrot.slane %v10987_v57, %v9741_v35  ;;  %v4912_v57 = vrot.slane %v10999_v20, %v9738_v49 }
 0x8ac   : > { %v11005_v52 = vpop.xlane.xlu0 %4525  ;;  %v4791_v19 = vsel %vm2403_vm5, %v4790_v9, %v4786_v29 }
 0x8ad   : > { %v10991_v2 = vpop.xlane.xlu1 %4510  ;;  %v4858_v39 = vrot.slane %v11005_v52, %v9738_v49 }
 0x8ae   : > { %v4835_v6 = vrot.slane %v10991_v2, %v9741_v35  ;;  %v4728_v2 = vsel %vm2403_vm5, %v4727_v7, %v4723_v23 }
 0x8b0   : > { %v11009_v43 = vpop.xlane.xlu0 %4567  ;;  %v4836_v52 = vsel %vm2403_vm5, %v4835_v6, %v4831_v16 }
 0x8b1   : > { %v10993_v38 = vpop.xlane.xlu1 %4546  ;;  %v4921_v33 = vrot.slane %v11009_v43, %v9738_v49  ;;  %v4969_v34 = vsel %vm2686_vm7, %v4836_v52, %v4968_v4 }
 0x8b2   : > { %v4889_v20 = vrot.slane %v10993_v38, %v9741_v35 }
 0x8b4   : > { %v11015_v5 = vpop.xlane.xlu0 %4531 }
 0x8b5   : > { %v10997_v63 = vpop.xlane.xlu1 %4552  ;;  %v4867_v50 = vrot.slane %v11015_v5, %v9738_v49  ;;  %v4959_v5 = vsel %vm2694_vm11, %v4728_v2, %v4958_v61 }
 0x8b6   : > { %v4898_v22 = vrot.slane %v10997_v63, %v9741_v35 }
 0x8b8   : > { %v11028_v32 = vpop.xlane.xlu0 %4573 }
 0x8b9   : > { %v11001_v40 = vpop.xlane.xlu1 %4444  ;;  %v4930_v43 = vrot.slane %v11028_v32, %v9738_v49  ;;  %v4965_v32 = vsel %vm2692_vm10, %v4791_v19, %v4964_v24 }
 0x8ba   : > { %v4736_v23 = vrot.slane %v11001_v40, %v9741_v35 }
 0x8bc   : > { %v11078_v28 = vpop.xlane.xlu0 %4537  ;;  %v4737_v48 = vsel %vm2403_vm5, %v4736_v23, %v4732_v41 }
 0x8bd   : > { %v11003_v17 = vpop.xlane.xlu1 %4486  ;;  %v4876_v16 = vrot.slane %v11078_v28, %v9738_v49  ;;  %v4899_v28 = vsel %vm2403_vm5, %v4898_v22, %v4894_v1 }
 0x8be   : > { %v4799_v29 = vrot.slane %v11003_v17, %v9741_v35  ;;  %v4890_v17 = vsel %vm2403_vm5, %v4889_v20, %v4885_v25 }
 0x8c0   : > { %v11119_v51 = vpop.xlane.xlu0 %4579 }
 0x8c1   : > { %v11007_v0 = vpop.xlane.xlu1 %4516 }
 0x8c2   : > { %v4844_v38 = vrot.slane %v11007_v0, %v9741_v35  ;;  %v4939_v0 = vrot.slane %v11119_v51, %v9738_v49 }
 0x8c4   : > { %v4586_v10 = vpop.xlane.xlu0 %4585  ;;  %v4845_v31 = vsel %vm2403_vm5, %v4844_v38, %v4840_v45 }
 0x8c5   : > { %v11011_v47 = vpop.xlane.xlu1 %4558  ;;  %v4970_v37 = vsel %vm2688_vm8, %v4845_v31, %v4969_v34 }
 0x8c6   : > { %v4907_v63 = vrot.slane %v11011_v47, %v9741_v35  ;;  %v4948_v47 = vrot.slane %v4586_v10, %v9738_v49 }
 0x8c8   : > { %v4908_v1 = vsel %vm2403_vm5, %v4907_v63, %v4903_v42 }
 0x8c9   : > { %v11013_v53 = vpop.xlane.xlu1 %4492 }
 0x8ca   : > { %v4808_v40 = vrot.slane %v11013_v53, %v9741_v35 }
 0x8cc   : > { %v4809_v45 = vsel %vm2403_vm5, %v4808_v40, %v4804_v62 }
 0x8cd   : > { %v11019_v56 = vpop.xlane.xlu1 %4522 }
 0x8ce   : > { %v4853_v14 = vrot.slane %v11019_v56, %v9741_v35  ;;  %v4800_v56 = vsel %vm2403_vm5, %v4799_v29, %v4795_v13  ;;  %v4960_v13 = vsel %vm2696_vm12, %v4737_v48, %v4959_v5 }
 0x8cf   : > { %v4966_v42 = vsel %vm2694_vm11, %v4800_v56, %v4965_v32 }
 0x8d0   : > { %v4854_v12 = vsel %vm2403_vm5, %v4853_v14, %v4849_v46 }
 0x8d1   : > { %v11030_v27 = vpop.xlane.xlu1 %4564  ;;  %v4971_v46 = vsel %vm2690_vm9, %v4854_v12, %v4970_v37  ;;  %v12684_v37 = vld [vmem:[#allocation72_spill] sm:$0xff] }
 0x8d2   : > { %v4916_v53 = vrot.slane %v11030_v27, %v9741_v35 }
 0x8d4   : > { %v4917_v7 = vsel %vm2403_vm5, %v4916_v53, %v4912_v57 }
 0x8d5   : > { %v11063_v59 = vpop.xlane.xlu1 %4528 }
 0x8d6   : > { %v4862_v25 = vrot.slane %v11063_v59, %v9741_v35  ;;  %v4975_v59 = vsel %vm2684_vm6, %v4899_v28, %v4890_v17 }
 0x8d7   : > { %v4976_v60 = vsel %vm2686_vm7, %v4908_v1, %v4975_v59  ;;  %v12679_v59 = vld [vmem:[#allocation62_spill] sm:$0xff] }
 0x8d8   : > { %v4863_v9 = vsel %vm2403_vm5, %v4862_v25, %v4858_v39  ;;  %v4977_v57 = vsel %vm2688_vm8, %v4917_v7, %v4976_v60  ;;  %v12676_v25 = vld [vmem:[#allocation125_spill] sm:$0xff]  ;;  %v12685_v7 = vld [vmem:[#allocation63_spill] sm:$0xff]  ;;  %v12688_v60 = vld [vmem:[#allocation76_spill] sm:$0xff] }
 0x8d9   : > { %v11093_v44 = vpop.xlane.xlu1 %4570  ;;  %v4972_v20 = vsel %vm2692_vm10, %v4863_v9, %v4971_v46  ;;  %v12689_v9 = vld [vmem:[#allocation69_spill] sm:$0xff] }
 0x8da   : > { %v4925_v15 = vrot.slane %v11093_v44, %v9741_v35  ;;  %v12697_v46 = vld [vmem:[#allocation77_spill] sm:$0xff] }
 0x8dc   : > { %v4926_v51 = vsel %vm2403_vm5, %v4925_v15, %v4921_v33  ;;  %v12677_v15 = vld [vmem:[#allocation139_spill] sm:$0xff] }
 0x8dd   : > { %v11121_v18 = vpop.xlane.xlu1 %4534  ;;  %v4978_v19 = vsel %vm2690_vm9, %v4926_v51, %v4977_v57  ;;  %v2843_v56 = vsub.f32 %v12677_v15, %v12676_v25  ;;  %v12690_v51 = vld [vmem:[#allocation96_spill] sm:$0xff]  ;;  %v12698_v57 = vld [vmem:[#allocation97_spill] sm:$0xff] }
 0x8de   : > { %v4871_v55 = vrot.slane %v11121_v18, %v9741_v35  ;;  %v4967_v18 = vsel %vm2696_vm12, %v4809_v45, %v4966_v42  ;;  %v12361_v45 = vmov 2   ;;  %v12687_v42 = vld [vmem:[#allocation68_spill] sm:$0xff] }
 0x8df   : > { %7695 = vset.pattern.permute.xlu1 %v12361_v45 }
 0x8e0   : > { %v4872_v8 = vsel %vm2403_vm5, %v4871_v55, %v4867_v50 }
 0x8e1   : > { %v4577_v30 = vpop.xlane.xlu1 %4576  ;;  %v4973_v22 = vsel %vm2694_vm11, %v4872_v8, %v4972_v20  ;;  %v12696_v8 = vld [vmem:[#allocation95_spill] sm:$0xff] }
 0x8e2   : > { %v4934_v27 = vrot.slane %v4577_v30, %v9741_v35 }
 0x8e4   : > { %v4935_v3 = vsel %vm2403_vm5, %v4934_v27, %v4930_v43  ;;  %v2847_v27 = vmul.f32 1.442695, %v2843_v56  ;;  %v12712_v56 = vld [vmem:[#allocation135_spill] sm:$0xff] }
 0x8e5   : > { %v4541_v54 = vpop.xlane.xlu1 %4540  ;;  %v4979_v50 = vsel %vm2692_vm10, %v4935_v3, %v4978_v19  ;;  %v12693_v3 = vld [vmem:[#allocation91_spill] sm:$0xff] }
 0x8e6   : > { %v4880_v44 = vrot.slane %v4541_v54, %v9741_v35  ;;  %7731 = vpow2.f32 %v2847_v27  ;;  %v12713_v27 = vld [vmem:[#allocation128_spill] sm:$0xff] }
 0x8e7   : > { %v11183_v11 = vpop.f32.mrb[32].mxu1 }
 0x8e8   : > { %12673 = vst [vmem:[#allocation147_spill] sm:$0xff] %v11183_v11  ;;  %v11190_v41 = vpop.f32.mrb[33].mxu1  ;;  %v4881_v39 = vsel %vm2403_vm5, %v4880_v44, %v4876_v16  ;;  %v12681_v44 = vld [vmem:[#allocation60_spill] sm:$0xff] }
 0x8e9   : > { %12674 = vst [vmem:[#allocation148_spill] sm:$0xff] %v11190_v41  ;;  %v4583_v26 = vpop.xlane.xlu1 %4582  ;;  %v4974_v29 = vsel %vm2696_vm12, %v4881_v39, %v4973_v22  ;;  %v11300_v39 = vpop.permute.xlu0 %5704  ;;  %v11310_v22 = vld [vmem:[#allocation4 + $0x8] sm:$0xff] }
 0x8ea   : > { %v4943_v58 = vrot.slane %v4583_v26, %v9741_v35  ;;  %v12682_v26 = vld [vmem:[#allocation92_spill] sm:$0xff] }
 0x8eb   : > { %v7331_v62 = vpop.f32.mrb[34].mxu1 }
 0x8ec   : > { %v5070_v6 = vadd.f32 %v7331_v62, %v4967_v18  ;;  %v5064_v36 = vpop.f32.mrb[35].mxu1  ;;  %v4944_v24 = vsel %vm2403_vm5, %v4943_v58, %v4939_v0  ;;  %v12686_v58 = vld [vmem:[#allocation94_spill] sm:$0xff]  ;;  %v12692_v62 = vld [vmem:[#allocation80_spill] sm:$0xff] }
 0x8ed   : > { %v5065_v61 = vadd.f32 %v5064_v36, %v4960_v13  ;;  %v4589_v21 = vpop.xlane.xlu1 %4588  ;;  %v4980_v10 = vsel %vm2694_vm11, %v4944_v24, %v4979_v50  ;;  %v12683_v13 = vld [vmem:[#allocation67_spill] sm:$0xff]  ;;  %v12691_v18 = vld [vmem:[#allocation90_spill] sm:$0xff]  ;;  %v12695_v36 = vld [vmem:[#allocation73_spill] sm:$0xff]  ;;  %v11304_v19 = vpop.xlane.xlu0 %2895 }
 0x8ee   : > { %v11213_v4 = vsel %vm9785_vm13, %v5070_v6, -1e+15  ;;  %v4952_v33 = vrot.slane %v4589_v21, %v9741_v35  ;;  %v12694_v6 = vld [vmem:[#allocation93_spill] sm:$0xff]  ;;  %12700 = vst [vmem:[#allocation131_spill] sm:$0xff] %v11304_v19 }
 0x8ef   : > { %v11220_v30 = vsel %vm9785_vm13, %v5065_v61, -1e+15  ;;  %v7334_v52 = vpop.f32.mrb[36].mxu1  ;;  %v5090_v23 = vsel %vm2826_vm14, %v11213_v4, -inf }
 0x8f0   : > { %v4953_v43 = vsel %vm2403_vm5, %v4952_v33, %v4948_v47  ;;  %v5074_v38 = vpop.f32.mrb[37].mxu1  ;;  %5091 = vmax.xlane.f32.xlu1 %v5090_v23  ;;  %v5087_v5 = vsel %vm2826_vm14, %v11220_v30, -inf  ;;  %v11254_v12 = vpop.eup %7731 }
 0x8f1   : > { %v4981_v16 = vsel %vm2696_vm12, %v4953_v43, %v4980_v10  ;;  %v5075_v63 = vadd.f32 %v5074_v38, %v4974_v29  ;;  %v7686_v40 = vpop.permute.xlu1 %7685  ;;  %5088 = vmax.xlane.f32.xlu0 %v5087_v5  ;;  %12680 = vst [vmem:[#allocation127_spill] sm:$0xff] %v11254_v12  ;;  %v11308_v50 = vpop.xlane.xlu0 %2898  ;;  %v12704_v10 = vld [vmem:[#allocation137_spill] sm:$0xff]  ;;  %v12705_v29 = vld [vmem:[#allocation126_spill] sm:$0xff]  ;;  %v11318_v5 = vld [vmem:[#allocation4] sm:$0xff] }
 0x8f2   : > { %v5080_v32 = vadd.f32 %v7334_v52, %v4981_v16  ;;  %v7688_v34 = vunpack.i.h.bf16 %v7686_v40  ;;  %v7687_v17 = vunpack.i.l.bf16 %v7686_v40  ;;  %12702 = vst [vmem:[#allocation58_spill] sm:$0xff] %v11308_v50  ;;  %v6424_v38 = vsel %vm6422_vm15, %v12705_v29, %v12704_v10 }
 0x8f3   : > { %v11234_v0 = vsel %vm9785_vm13, %v5075_v63, -1e+15  ;;  %v12707_v63 = vld [vmem:[#allocation138_spill] sm:$0xff] }
 0x8f4   : > { %v11238_v14 = vsel %vm9785_vm13, %v5080_v32, -1e+15  ;;  %v5093_v54 = vsel %vm2826_vm14, %v11234_v0, -inf  ;;  %v7423_v28 = vpack.c.bf16 %v7688_v34, %v7687_v17  ;;  %v6423_v40 = vsel %vm6422_vm15, %v12676_v25, %v12707_v63  ;;  %v7792_v25 = vld [vmem:[#allocation4 + $0x18] sm:$0xff] }
 0x8f5   : > { %v7691_v47 = vpop.permute.xlu1 %7690  ;;  %5094 = vmax.xlane.f32.xlu0 %v5093_v54  ;;  %v5096_v53 = vsel %vm2826_vm14, %v11238_v14, -inf  ;;  %v11336_v54 = vld [vmem:[#allocation4 + $0x10] sm:$0xff] }
 0x8f6   : > { %v7693_v48 = vunpack.i.h.bf16 %v7691_v47  ;;  %v7692_v31 = vunpack.i.l.bf16 %v7691_v47  ;;  %7424 = vmatprep.subr.bf16.mxu1 %v7423_v28  ;;  %5097 = vmax.xlane.f32.xlu1 %v5096_v53  ;;  %v12709_v53 = vld [vmem:[#allocation141_spill] sm:$0xff] }
 0x8f7   : > { %7426 = vmatpush3.bf16.msra.mxu1 %v7423_v28 }
 0x8f8   : > { %v11246_v1 = vpack.c.bf16 %v7693_v48, %v7692_v31  ;;  %v12710_v48 = vld [vmem:[#allocation129_spill] sm:$0xff] }
 0x8f9   : > { %v11294_v61 = vpop.permute.xlu1 %5698  ;;  %v6425_v31 = vsel %vm6422_vm15, %v12710_v48, %v12709_v53 }
 0x8fa   : > { %7429 = vmatprep.subr.msk.bf16.mxu1 %vm9128_vm4, %v11246_v1 }
 0x8fd   : > { %v11296_v21 = vpop.permute.xlu1 %5700 }
 0x901   : > { %v11298_v24 = vpop.permute.xlu1 %5702 }
 0x907   : > { %5314 = vrot.lane.b32.xlu1 %v12679_v59, %s8311_s20  ;;  %v6426_v59 = vsel %vm6422_vm15, %v12713_v27, %v12712_v56 }
 0x90b   : > { %3006 = vperm.xlu0 %7694, %v11254_v12   ;;  %5316 = vrot.lane.b32.xlu1 %v12681_v44, %s8311_s20 }
 0x90f   : > { %5350 = vrot.lane.b32.xlu0 %v12682_v26, %s8311_s20  ;;  %5318 = vrot.lane.b32.xlu1 %v12683_v13, %s8311_s20  ;;  %v12714_v26 = vld [vmem:[#allocation98_spill] sm:$0xff] }
 0x910   : > { %7696 = vset.pattern.permute.xlu0 %v12361_v45 }
 0x913   : > { %5326 = vrot.lane.b32.xlu0 %v12684_v37, %s8311_s20  ;;  %5320 = vrot.lane.b32.xlu1 %v12685_v7, %s8311_s20  ;;  %v12715_v37 = vld [vmem:[#allocation106_spill] sm:$0xff]  ;;  %v12716_v7 = vld [vmem:[#allocation108_spill] sm:$0xff] }
 0x917   : > { %5354 = vrot.lane.b32.xlu0 %v12686_v58, %s8311_s20  ;;  %5322 = vrot.lane.b32.xlu1 %v12687_v42, %s8311_s20  ;;  %v12717_v58 = vld [vmem:[#allocation81_spill] sm:$0xff]  ;;  %v12718_v42 = vld [vmem:[#allocation84_spill] sm:$0xff] }
 0x91b   : > { %5330 = vrot.lane.b32.xlu0 %v12688_v60, %s8311_s20  ;;  %5324 = vrot.lane.b32.xlu1 %v12689_v9, %s8311_s20  ;;  %v12719_v60 = vld [vmem:[#allocation99_spill] sm:$0xff]  ;;  %v12720_v9 = vld [vmem:[#allocation100_spill] sm:$0xff] }
 0x91f   : > { %5358 = vrot.lane.b32.xlu0 %v12690_v51, %s8311_s20  ;;  %5346 = vrot.lane.b32.xlu1 %v12691_v18, %s8311_s20  ;;  %v12721_v51 = vld [vmem:[#allocation107_spill] sm:$0xff]  ;;  %v12722_v18 = vld [vmem:[#allocation110_spill] sm:$0xff] }
 0x923   : > { %5334 = vrot.lane.b32.xlu0 %v12692_v62, %s8311_s20  ;;  %5348 = vrot.lane.b32.xlu1 %v12693_v3, %s8311_s20  ;;  %v12723_v62 = vld [vmem:[#allocation109_spill] sm:$0xff] }
 0x924   : > { %v12724_v3 = vld [vmem:[#allocation65_spill] sm:$0xff] }
 0x927   : > { %5352 = vrot.lane.b32.xlu1 %v12694_v6, %s8311_s20  ;;  %v12725_v6 = vld [vmem:[#allocation85_spill] sm:$0xff] }
 0x92b   : > { %5328 = vrot.lane.b32.xlu1 %v12695_v36, %s8311_s20  ;;  %v12726_v36 = vld [vmem:[#allocation66_spill] sm:$0xff] }
 0x92f   : > { %5356 = vrot.lane.b32.xlu1 %v12696_v8, %s8311_s20  ;;  %v12727_v8 = vld [vmem:[#allocation101_spill] sm:$0xff] }
 0x932   : > { %v11302_v33 = vpop.xlane.xlu1 %2892 }
 0x933   : > { %5332 = vrot.lane.b32.xlu1 %v12697_v46, %s8311_s20  ;;  %12699 = vst [vmem:[#allocation134_spill] sm:$0xff] %v11302_v33  ;;  %v12728_v46 = vld [vmem:[#allocation88_spill] sm:$0xff] }
 0x936   : > { %v11306_v20 = vpop.xlane.xlu1 %2901 }
 0x937   : > { %5360 = vrot.lane.b32.xlu1 %v12698_v57, %s8311_s20  ;;  %12701 = vst [vmem:[#allocation132_spill] sm:$0xff] %v11306_v20  ;;  %v12729_v57 = vld [vmem:[#allocation111_spill] sm:$0xff] }
 0x97d   : > { %v5092_v52 = vpop.xlane.xlu1 %5091 }
 0x97e   : > { %v11313_v23 = vmax.f32 %v11310_v22, %v5092_v52  ;;  %v5089_v43 = vpop.xlane.xlu0 %5088  ;;  %v12730_v52 = vld [vmem:[#allocation102_spill] sm:$0xff] }
 0x97f   : > { %v11321_v16 = vmax.f32 %v11318_v5, %v5089_v43  ;;  %v12731_v43 = vld [vmem:[#allocation61_spill] sm:$0xff] }
 0x980   : > { %12703 = vst [vmem:[#allocation130_spill] sm:$0xff] %v11313_v23  ;;  %v11328_v32 = vsel %vm6427_vm0, %v6424_v38, %v11313_v23  ;;  %5122 = vperm.xlu1 %7695, %v11313_v23   ;;  %v12732_v38 = vld [vmem:[#allocation112_spill] sm:$0xff] }
 0x981   : > { %12706 = vst [vmem:[#allocation133_spill] sm:$0xff] %v11321_v16  ;;  %v11333_v34 = vsel %vm6427_vm0, %v6423_v40, %v11321_v16  ;;  %5117 = vperm.xlu0 %7696, %v11321_v16   ;;  %v12733_v40 = vld [vmem:[#allocation64_spill] sm:$0xff] }
 0x982   : > { %v5095_v17 = vpop.xlane.xlu0 %5094 }
 0x983   : > { %v11339_v28 = vmax.f32 %v11336_v54, %v5095_v17  ;;  %v5098_v47 = vpop.xlane.xlu1 %5097  ;;  %v12734_v17 = vld [vmem:[#allocation70_spill] sm:$0xff] }
 0x984   : > { %v11344_v15 = vmax.f32 %v7792_v25, %v5098_v47  ;;  %v12735_v47 = vld [vmem:[#allocation89_spill] sm:$0xff]  ;;  %v12736_v25 = vld [vmem:[#allocation104_spill] sm:$0xff] }
 0x985   : > { %12708 = vst [vmem:[#allocation124_spill] sm:$0xff] %v11339_v28  ;;  %v11351_v44 = vsel %vm6427_vm0, %v6425_v31, %v11339_v28  ;;  %5362 = vrot.lane.b32.xlu0 %v12714_v26, %s8311_s20 }
 0x986   : > { %12711 = vst [vmem:[#allocation125_spill] sm:$0xff] %v11344_v15  ;;  %v11357_v13 = vsel %vm6427_vm0, %v6426_v59, %v11344_v15  ;;  %5132 = vperm.xlu1 %7695, %v11344_v15   ;;  %v12737_v59 = vld [vmem:[#allocation103_spill] sm:$0xff] }
 0x987   : > { %v5315_v31 = vpop.permute.xlu1 %5314 }
 0x989   : > { %5378 = vrot.lane.b32.xlu0 %v12715_v37, %s8311_s20  ;;  %v12738_v37 = vld [vmem:[#allocation114_spill] sm:$0xff] }
 0x98a   : > { %5127 = vperm.xlu1 %7695, %v11339_v28  }
 0x98b   : > { %v11407_v26 = vpop.permute.xlu1 %5316 }
 0x98d   : > { %5382 = vrot.lane.b32.xlu0 %v12716_v7, %s8311_s20  ;;  %v12739_v7 = vld [vmem:[#allocation113_spill] sm:$0xff] }
 0x98e   : > { %5336 = vrot.lane.b32.xlu1 %v12717_v58, %s8311_s20  ;;  %v12740_v58 = vld [vmem:[#allocation74_spill] sm:$0xff] }
 0x991   : > { %5338 = vrot.lane.b32.xlu0 %v12718_v42, %s8311_s20  ;;  %v12741_v42 = vld [vmem:[#allocation71_spill] sm:$0xff] }
 0x992   : > { %5364 = vrot.lane.b32.xlu1 %v12719_v60, %s8311_s20  ;;  %v5319_v60 = vpop.permute.xlu1 %5318 }
 0x995   : > { %5366 = vrot.lane.b32.xlu0 %v12720_v9, %s8311_s20  ;;  %v12742_v9 = vld [vmem:[#allocation116_spill] sm:$0xff] }
 0x996   : > { %5380 = vrot.lane.b32.xlu1 %v12721_v51, %s8311_s20  ;;  %v12743_v51 = vld [vmem:[#allocation105_spill] sm:$0xff] }
 0x999   : > { %5386 = vrot.lane.b32.xlu0 %v12722_v18, %s8311_s20  ;;  %v5321_v18 = vpop.permute.xlu1 %5320 }
 0x99a   : > { %5384 = vrot.lane.b32.xlu1 %v12723_v62, %s8311_s20  ;;  %v12744_v62 = vld [vmem:[#allocation78_spill] sm:$0xff] }
 0x99d   : > { %5410 = vrot.lane.b32.xlu0 %v12724_v3, %s8311_s20  ;;  %v12745_v3 = vld [vmem:[#allocation115_spill] sm:$0xff] }
 0x99e   : > { %5340 = vrot.lane.b32.xlu1 %v12725_v6, %s8311_s20  ;;  %v12746_v6 = vld [vmem:[#allocation118_spill] sm:$0xff] }
 0x9a1   : > { %5414 = vrot.lane.b32.xlu0 %v12726_v36, %s8311_s20  ;;  %v12747_v36 = vld [vmem:[#allocation75_spill] sm:$0xff] }
 0x9a2   : > { %5368 = vrot.lane.b32.xlu1 %v12727_v8, %s8311_s20  ;;  %v5323_v8 = vpop.permute.xlu1 %5322 }
 0x9a5   : > { %5342 = vrot.lane.b32.xlu0 %v12728_v46, %s8311_s20  ;;  %v12748_v46 = vld [vmem:[#allocation82_spill] sm:$0xff] }
 0x9a6   : > { %5388 = vrot.lane.b32.xlu1 %v12729_v57, %s8311_s20  ;;  %v12749_v57 = vld [vmem:[#allocation117_spill] sm:$0xff] }
 0x9a9   : > { %5370 = vrot.lane.b32.xlu0 %v12730_v52, %s8311_s20  ;;  %v5325_v52 = vpop.permute.xlu1 %5324 }
 0x9aa   : > { %5412 = vrot.lane.b32.xlu1 %v12731_v43, %s8311_s20  ;;  %v12750_v43 = vld [vmem:[#allocation120_spill] sm:$0xff] }
 0x9ad   : > { %5390 = vrot.lane.b32.xlu0 %v12732_v38, %s8311_s20  ;;  %v12751_v38 = vld [vmem:[#allocation79_spill] sm:$0xff] }
 0x9ae   : > { %5416 = vrot.lane.b32.xlu1 %v12733_v40, %s8311_s20  ;;  %v12752_v40 = vld [vmem:[#allocation86_spill] sm:$0xff] }
 0x9b1   : > { %5418 = vrot.lane.b32.xlu0 %v12734_v17, %s8311_s20  ;;  %v12753_v17 = vld [vmem:[#allocation119_spill] sm:$0xff] }
 0x9b2   : > { %5344 = vrot.lane.b32.xlu1 %v12735_v47, %s8311_s20  ;;  %v5347_v47 = vpop.permute.xlu1 %5346 }
 0x9b5   : > { %5374 = vrot.lane.b32.xlu0 %v12736_v25, %s8311_s20  ;;  %v11441_v25 = vpop.permute.xlu0 %3006 }
 0x9b6   : > { %5372 = vrot.lane.b32.xlu1 %v12737_v59, %s8311_s20  ;;  %12754 = vst [vmem:[#allocation139_spill] sm:$0xff] %v11441_v25  ;;  %v12755_v59 = vld [vmem:[#allocation122_spill] sm:$0xff] }
 0x9b9   : > { %5394 = vrot.lane.b32.xlu0 %v12738_v37, %s8311_s20  ;;  %v12756_v37 = vld [vmem:[#allocation83_spill] sm:$0xff] }
 0x9ba   : > { %5392 = vrot.lane.b32.xlu1 %v12739_v7, %s8311_s20  ;;  %v5349_v7 = vpop.permute.xlu1 %5348 }
 0x9bd   : > { %5422 = vrot.lane.b32.xlu0 %v12740_v58, %s8311_s20  ;;  %v5351_v58 = vpop.permute.xlu0 %5350 }
 0x9be   : > { %5420 = vrot.lane.b32.xlu1 %v12741_v42, %s8311_s20  ;;  %v12757_v42 = vld [vmem:[#allocation121_spill] sm:$0xff] }
 0x9c1   : > { %5398 = vrot.lane.b32.xlu0 %v12742_v9, %s8311_s20  ;;  %v12758_v9 = vld [vmem:[#allocation87_spill] sm:$0xff] }
 0x9c2   : > { %5376 = vrot.lane.b32.xlu1 %v12743_v51, %s8311_s20  ;;  %v5353_v51 = vpop.permute.xlu1 %5352 }
 0x9c5   : > { %5426 = vrot.lane.b32.xlu0 %v12744_v62, %s8311_s20  ;;  %v5327_v62 = vpop.permute.xlu0 %5326 }
 0x9c6   : > { %5396 = vrot.lane.b32.xlu1 %v12745_v3, %s8311_s20  ;;  %v12759_v3 = vld [vmem:[#allocation123_spill] sm:$0xff] }
 0x9c9   : > { %5402 = vrot.lane.b32.xlu0 %v12746_v6, %s8311_s20  ;;  %v11453_v6 = vpop.permute.xlu1 %5328 }
 0x9ca   : > { %5424 = vrot.lane.b32.xlu1 %v12747_v36, %s8311_s20  ;;  %v5355_v36 = vpop.permute.xlu0 %5354 }
 0x9cd   : > { %5430 = vrot.lane.b32.xlu0 %v12748_v46, %s8311_s20  ;;  %v11455_v46 = vpop.permute.xlu1 %5356 }
 0x9ce   : > { %5400 = vrot.lane.b32.xlu1 %v12749_v57, %s8311_s20  ;;  %v5331_v57 = vpop.permute.xlu0 %5330 }
 0x9d1   : > { %5406 = vrot.lane.b32.xlu0 %v12750_v43, %s8311_s20  ;;  %v11457_v43 = vpop.permute.xlu1 %5332 }
 0x9d2   : > { %5428 = vrot.lane.b32.xlu1 %v12751_v38, %s8311_s20  ;;  %v11459_v38 = vpop.permute.xlu0 %5358 }
 0x9d3   : > { %v5572_v55 = vsel %vm2137_vm3, %v11459_v38, 0.0  ;;  %v5533_v38 = vsel %vm2137_vm3, %v11457_v43, 0.0 }
 0x9d5   : > { %5434 = vrot.lane.b32.xlu0 %v12752_v40, %s8311_s20  ;;  %v5506_v40 = vsel %vm2137_vm3, %v5315_v31, 0.0  ;;  %v5518_v31 = vsel %vm2137_vm3, %v5323_v8, 0.0  ;;  %v5560_v8 = vsel %vm2137_vm3, %v5351_v58, 0.0 }
 0x9d6   : > { %5404 = vrot.lane.b32.xlu1 %v12753_v17, %s8311_s20  ;;  %v11462_v17 = vpop.permute.xlu1 %5360 }
 0x9d9   : > { %5438 = vrot.lane.b32.xlu0 %v12755_v59, %s8311_s20  ;;  %v5512_v59 = vsel %vm2137_vm3, %v5319_v60, 0.0 }
 0x9da   : > { %5432 = vrot.lane.b32.xlu1 %v12756_v37, %s8311_s20  ;;  %v11465_v37 = vpop.permute.xlu0 %5334 }
 0x9de   : > { %5408 = vrot.lane.b32.xlu1 %v12757_v42, %s8311_s20 }
 0x9e2   : > { %5436 = vrot.lane.b32.xlu1 %v12758_v9, %s8311_s20  ;;  %v5515_v9 = vsel %vm2137_vm3, %v5321_v18, 0.0  ;;  %v5554_v18 = vsel %vm2137_vm3, %v5347_v47, 0.0 }
 0x9e6   : > { %5440 = vrot.lane.b32.xlu1 %v12759_v3, %s8311_s20 }
 0x9f8   : > { %5507 = vadd.xlane.f32.xlu0 %v5506_v40 }
 0x9fc   : > { %5513 = vadd.xlane.f32.xlu0 %v5512_v59 }
 0x9ff   : > { %v5123_v42 = vpop.permute.xlu1 %5122 }
 0xa00   : > { %v5136_v3 = vsub.f32 %v11213_v4, %v5123_v42  ;;  %5516 = vadd.xlane.f32.xlu0 %v5515_v9  ;;  %v5118_v45 = vpop.permute.xlu0 %5117 }
 0xa01   : > { %v5135_v33 = vsub.f32 %v11220_v30, %v5118_v45  ;;  %v5509_v30 = vsel %vm2137_vm3, %v11407_v26, 0.0 }
 0xa02   : > { %v5141_v12 = vmul.f32 1.442695, %v5136_v3  ;;  %v5524_v3 = vsel %vm2137_vm3, %v5327_v62, 0.0  ;;  %v5566_v62 = vsel %vm2137_vm3, %v5355_v36, 0.0 }
 0xa03   : > { %v5139_v20 = vmul.f32 1.442695, %v5135_v33 }
 0xa04   : > { %5519 = vadd.xlane.f32.xlu0 %v5518_v31  ;;  %v11471_v40 = vpop.permute.xlu0 %5362 }
 0xa05   : > { %7733 = vpow2.f32 %v5139_v20  ;;  %v5133_v60 = vpop.permute.xlu1 %5132 }
 0xa06   : > { %7735 = vpow2.f32 %v5141_v12  ;;  %v5138_v59 = vsub.f32 %v11238_v14, %v5133_v60  ;;  %v5521_v14 = vsel %vm2137_vm3, %v5325_v52, 0.0  ;;  %v5557_v52 = vsel %vm2137_vm3, %v5349_v7, 0.0 }
 0xa08   : > { %5555 = vadd.xlane.f32.xlu0 %v5554_v18  ;;  %v11475_v4 = vpop.permute.xlu0 %5378  ;;  %v5145_v33 = vmul.f32 1.442695, %v5138_v59  ;;  %v5563_v59 = vsel %vm2137_vm3, %v5353_v51, 0.0  ;;  %v5530_v18 = vsel %vm2137_vm3, %v5331_v57, 0.0  ;;  %v5569_v57 = vsel %vm2137_vm3, %v11455_v46, 0.0 }
 0xa09   : > { %v5128_v42 = vpop.permute.xlu1 %5127  ;;  %v5578_v46 = vsel %vm2137_vm3, %v11471_v40, 0.0 }
 0xa0a   : > { %v5137_v45 = vsub.f32 %v11234_v0, %v5128_v42  ;;  %5510 = vadd.xlane.f32.xlu1 %v5509_v30 }
 0xa0c   : > { %v5143_v20 = vmul.f32 1.442695, %v5137_v45  ;;  %5561 = vadd.xlane.f32.xlu0 %v5560_v8  ;;  %v5383_v12 = vpop.permute.xlu0 %5382 }
 0xa0d   : > { %v5337_v9 = vpop.permute.xlu1 %5336 }
 0xa0e   : > { %7737 = vpow2.f32 %v5143_v20  ;;  %5522 = vadd.xlane.f32.xlu1 %v5521_v14  ;;  %v5539_v43 = vsel %vm2137_vm3, %v5337_v9, 0.0 }
 0xa0f   : > { %v11482_v47 = vpop.eup %7733  ;;  %7739 = vpow2.f32 %v5145_v33 }
 0xa10   : > { %12760 = vst [vmem:[#allocation57_spill] sm:$0xff] %v11482_v47  ;;  %v11485_v26 = vpop.eup %7735  ;;  %5525 = vadd.xlane.f32.xlu0 %v5524_v3  ;;  %7339 = vmatprep.mubr.msk.f32.mxu1 %vm2826_vm14, %v11482_v47  ;;  %v5339_v0 = vpop.permute.xlu0 %5338 }
 0xa11   : > { %v5365_v58 = vpop.permute.xlu1 %5364  ;;  %7340 = vmatmul.mubr.msk.f32.vlgmr.msra.gmra.mrb[38].mxu1 %vm2826_vm14, %v11485_v26 }
 0xa12   : > { %7432 = vmatpush3.bf16.xpose.msk.msra.mxu1 %vm9128_vm4, %v11246_v1  ;;  %5558 = vadd.xlane.f32.xlu1 %v5557_v52  ;;  %v5527_v1 = vsel %vm2137_vm3, %v11453_v6, 0.0  ;;  %v5536_v6 = vsel %vm2137_vm3, %v11465_v37, 0.0  ;;  %v5602_v37 = vsel %vm2137_vm3, %v11475_v4, 0.0  ;;  %v5581_v3 = vsel %vm2137_vm3, %v5365_v58, 0.0 }
 0xa13   : > { %vm6437_vm4 = vcmask 31744  }
 0xa14   : > { %5567 = vadd.xlane.f32.xlu0 %v5566_v62  ;;  %v5367_v31 = vpop.permute.xlu0 %5366 }
 0xa15   : > { %v5381_v60 = vpop.permute.xlu1 %5380 }
 0xa16   : > { %5564 = vadd.xlane.f32.xlu1 %v5563_v59  ;;  %v5605_v62 = vsel %vm2137_vm3, %v5381_v60, 0.0  ;;  %v5584_v59 = vsel %vm2137_vm3, %v5367_v31, 0.0 }
 0xa18   : > { %v11498_v42 = vpop.eup %7737  ;;  %5531 = vadd.xlane.f32.xlu0 %v5530_v18  ;;  %v5387_v30 = vpop.permute.xlu0 %5386 }
 0xa19   : > { %v11500_v7 = vpop.eup %7739  ;;  %v5385_v45 = vpop.permute.xlu1 %5384  ;;  %7342 = vmatprep.mubr.msk.f32.mxu1 %vm2826_vm14, %v11498_v42  ;;  %v5614_v18 = vsel %vm2137_vm3, %v5387_v30, 0.0 }
 0xa1a   : > { %12761 = vst [vmem:[#allocation62_spill] sm:$0xff] %v11500_v7  ;;  %5528 = vadd.xlane.f32.xlu1 %v5527_v1  ;;  %7343 = vmatmul.mubr.msk.f32.gmra.mrb[40].mxu1 %vm2826_vm14, %v11500_v7  ;;  %v5611_v9 = vsel %vm2137_vm3, %v5385_v45, 0.0 }
 0xa1b   : > { %7349 = vmatprep.mubr.msk.f32.mxu1 %vm2137_vm3, %v11294_v61 }
 0xa1c   : > { %5573 = vadd.xlane.f32.xlu0 %v5572_v55  ;;  %v5411_v51 = vpop.permute.xlu0 %5410 }
 0xa1d   : > { %v5341_v36 = vpop.permute.xlu1 %5340 }
 0xa1e   : > { %5570 = vadd.xlane.f32.xlu1 %v5569_v57  ;;  %7350 = vmatmul.mubr.msk.f32.vlgmr.msra.gmra.mrb[42].mxu1 %vm2137_vm3, %v11296_v21  ;;  %v5545_v58 = vsel %vm2137_vm3, %v5341_v36, 0.0 }
 0xa1f   : > { %7352 = vmatprep.mubr.msk.f32.mxu1 %vm2137_vm3, %v11298_v24  ;;  %v5575_v24 = vsel %vm2137_vm3, %v11462_v17, 0.0  ;;  %v5542_v17 = vsel %vm2137_vm3, %v5339_v0, 0.0  ;;  %v5650_v0 = vsel %vm2137_vm3, %v5411_v51, 0.0 }
 0xa20   : > { %5537 = vadd.xlane.f32.xlu0 %v5536_v6  ;;  %v5415_v61 = vpop.permute.xlu0 %5414 }
 0xa21   : > { %v5369_v33 = vpop.permute.xlu1 %5368  ;;  %v5656_v31 = vsel %vm2137_vm3, %v5415_v61, 0.0 }
 0xa22   : > { %5534 = vadd.xlane.f32.xlu1 %v5533_v38  ;;  %7353 = vmatmul.mubr.msk.f32.gmra.mrb[44].mxu1 %vm2137_vm3, %v11300_v39  ;;  %v5608_v39 = vsel %vm2137_vm3, %v5383_v12, 0.0  ;;  %v5587_v60 = vsel %vm2137_vm3, %v5369_v33, 0.0 }
 0xa24   : > { %5579 = vadd.xlane.f32.xlu0 %v5578_v46  ;;  %v5343_v8 = vpop.permute.xlu0 %5342 }
 0xa25   : > { %v5389_v21 = vpop.permute.xlu1 %5388  ;;  %v5548_v30 = vsel %vm2137_vm3, %v5343_v8, 0.0 }
 0xa26   : > { %5576 = vadd.xlane.f32.xlu1 %v5575_v24  ;;  %v5617_v45 = vsel %vm2137_vm3, %v5389_v21, 0.0 }
 0xa28   : > { %5603 = vadd.xlane.f32.xlu0 %v5602_v37  ;;  %v5371_v14 = vpop.permute.xlu0 %5370 }
 0xa29   : > { %v5413_v20 = vpop.permute.xlu1 %5412  ;;  %v5590_v51 = vsel %vm2137_vm3, %v5371_v14, 0.0 }
 0xa2a   : > { %5540 = vadd.xlane.f32.xlu1 %v5539_v43  ;;  %v5653_v36 = vsel %vm2137_vm3, %v5413_v20, 0.0 }
 0xa2c   : > { %5609 = vadd.xlane.f32.xlu0 %v5608_v39  ;;  %v5391_v4 = vpop.permute.xlu0 %5390 }
 0xa2d   : > { %v5417_v40 = vpop.permute.xlu1 %5416  ;;  %v5620_v61 = vsel %vm2137_vm3, %v5391_v4, 0.0 }
 0xa2e   : > { %5582 = vadd.xlane.f32.xlu1 %v5581_v3  ;;  %v5659_v33 = vsel %vm2137_vm3, %v5417_v40, 0.0 }
 0xa30   : > { %5543 = vadd.xlane.f32.xlu0 %v5542_v17  ;;  %v5419_v1 = vpop.permute.xlu0 %5418 }
 0xa31   : > { %v5345_v52 = vpop.permute.xlu1 %5344  ;;  %v5662_v8 = vsel %vm2137_vm3, %v5419_v1, 0.0 }
 0xa32   : > { %5606 = vadd.xlane.f32.xlu1 %v5605_v62  ;;  %v5551_v21 = vsel %vm2137_vm3, %v5345_v52, 0.0 }
 0xa34   : > { %5585 = vadd.xlane.f32.xlu0 %v5584_v59  ;;  %v5375_v57 = vpop.permute.xlu0 %5374 }
 0xa35   : > { %v5373_v12 = vpop.permute.xlu1 %5372  ;;  %v5596_v39 = vsel %vm2137_vm3, %v5375_v57, 0.0 }
 0xa36   : > { %5612 = vadd.xlane.f32.xlu1 %v5611_v9  ;;  %v5593_v20 = vsel %vm2137_vm3, %v5373_v12, 0.0 }
 0xa38   : > { %5615 = vadd.xlane.f32.xlu0 %v5614_v18  ;;  %v5395_v38 = vpop.permute.xlu0 %5394 }
 0xa39   : > { %v5393_v55 = vpop.permute.xlu1 %5392  ;;  %v5626_v17 = vsel %vm2137_vm3, %v5395_v38, 0.0 }
 0xa3a   : > { %5546 = vadd.xlane.f32.xlu1 %v5545_v58  ;;  %v5623_v40 = vsel %vm2137_vm3, %v5393_v55, 0.0 }
 0xa3c   : > { %5651 = vadd.xlane.f32.xlu0 %v5650_v0  ;;  %v5423_v24 = vpop.permute.xlu0 %5422 }
 0xa3d   : > { %v5421_v6 = vpop.permute.xlu1 %5420  ;;  %v5668_v4 = vsel %vm2137_vm3, %v5423_v24, 0.0 }
 0xa3e   : > { %5588 = vadd.xlane.f32.xlu1 %v5587_v60  ;;  %v5665_v52 = vsel %vm2137_vm3, %v5421_v6, 0.0 }
 0xa40   : > { %5657 = vadd.xlane.f32.xlu0 %v5656_v31  ;;  %v5399_v43 = vpop.permute.xlu0 %5398 }
 0xa41   : > { %v5377_v46 = vpop.permute.xlu1 %5376  ;;  %v5632_v12 = vsel %vm2137_vm3, %v5399_v43, 0.0 }
 0xa42   : > { %5618 = vadd.xlane.f32.xlu1 %v5617_v45  ;;  %v5599_v9 = vsel %vm2137_vm3, %v5377_v46, 0.0 }
 0xa44   : > { %5549 = vadd.xlane.f32.xlu0 %v5548_v30  ;;  %v5427_v3 = vpop.permute.xlu0 %5426 }
 0xa45   : > { %v5397_v37 = vpop.permute.xlu1 %5396  ;;  %v5674_v0 = vsel %vm2137_vm3, %v5427_v3, 0.0 }
 0xa46   : > { %5654 = vadd.xlane.f32.xlu1 %v5653_v36  ;;  %v5629_v1 = vsel %vm2137_vm3, %v5397_v37, 0.0 }
 0xa48   : > { %5591 = vadd.xlane.f32.xlu0 %v5590_v51  ;;  %v5403_v59 = vpop.permute.xlu0 %5402 }
 0xa49   : > { %v5425_v14 = vpop.permute.xlu1 %5424  ;;  %v5638_v57 = vsel %vm2137_vm3, %v5403_v59, 0.0 }
 0xa4a   : > { %5660 = vadd.xlane.f32.xlu1 %v5659_v33  ;;  %v5671_v55 = vsel %vm2137_vm3, %v5425_v14, 0.0 }
 0xa4c   : > { %5621 = vadd.xlane.f32.xlu0 %v5620_v61  ;;  %v5431_v58 = vpop.permute.xlu0 %5430 }
 0xa4d   : > { %v5401_v62 = vpop.permute.xlu1 %5400  ;;  %v5680_v6 = vsel %vm2137_vm3, %v5431_v58, 0.0 }
 0xa4e   : > { %5552 = vadd.xlane.f32.xlu1 %v5551_v21  ;;  %v5635_v45 = vsel %vm2137_vm3, %v5401_v62, 0.0 }
 0xa50   : > { %5663 = vadd.xlane.f32.xlu0 %v5662_v8  ;;  %v5407_v31 = vpop.permute.xlu0 %5406 }
 0xa51   : > { %v5429_v18 = vpop.permute.xlu1 %5428  ;;  %v5644_v51 = vsel %vm2137_vm3, %v5407_v31, 0.0 }
 0xa52   : > { %5594 = vadd.xlane.f32.xlu1 %v5593_v20  ;;  %v5677_v38 = vsel %vm2137_vm3, %v5429_v18, 0.0 }
 0xa54   : > { %5597 = vadd.xlane.f32.xlu0 %v5596_v39  ;;  %v5435_v36 = vpop.permute.xlu0 %5434 }
 0xa55   : > { %v5405_v60 = vpop.permute.xlu1 %5404  ;;  %v5686_v24 = vsel %vm2137_vm3, %v5435_v36, 0.0 }
 0xa56   : > { %5624 = vadd.xlane.f32.xlu1 %v5623_v40  ;;  %v5641_v46 = vsel %vm2137_vm3, %v5405_v60, 0.0 }
 0xa58   : > { %5627 = vadd.xlane.f32.xlu0 %v5626_v17  ;;  %v5439_v61 = vpop.permute.xlu0 %5438 }
 0xa59   : > { %v5433_v30 = vpop.permute.xlu1 %5432  ;;  %v5692_v37 = vsel %vm2137_vm3, %v5439_v61, 0.0 }
 0xa5a   : > { %5666 = vadd.xlane.f32.xlu1 %v5665_v52  ;;  %v5683_v21 = vsel %vm2137_vm3, %v5433_v30, 0.0 }
 0xa5c   : > { %5669 = vadd.xlane.f32.xlu0 %v5668_v4 }
 0xa5d   : > { %v5409_v33 = vpop.permute.xlu1 %5408 }
 0xa5e   : > { %5600 = vadd.xlane.f32.xlu1 %v5599_v9  ;;  %v5647_v43 = vsel %vm2137_vm3, %v5409_v33, 0.0 }
 0xa60   : > { %5633 = vadd.xlane.f32.xlu0 %v5632_v12 }
 0xa61   : > { %v5437_v8 = vpop.permute.xlu1 %5436 }
 0xa62   : > { %5630 = vadd.xlane.f32.xlu1 %v5629_v1  ;;  %v5689_v20 = vsel %vm2137_vm3, %v5437_v8, 0.0 }
 0xa64   : > { %5675 = vadd.xlane.f32.xlu0 %v5674_v0 }
 0xa65   : > { %v5441_v39 = vpop.permute.xlu1 %5440 }
 0xa66   : > { %5672 = vadd.xlane.f32.xlu1 %v5671_v55  ;;  %v5695_v14 = vsel %vm2137_vm3, %v5441_v39, 0.0 }
 0xa68   : > { %5639 = vadd.xlane.f32.xlu0 %v5638_v57 }
 0xa6a   : > { %5636 = vadd.xlane.f32.xlu1 %v5635_v45 }
 0xa6c   : > { %5681 = vadd.xlane.f32.xlu0 %v5680_v6 }
 0xa6e   : > { %5678 = vadd.xlane.f32.xlu1 %v5677_v38 }
 0xa70   : > { %5645 = vadd.xlane.f32.xlu0 %v5644_v51 }
 0xa72   : > { %5642 = vadd.xlane.f32.xlu1 %v5641_v46 }
 0xa74   : > { %5687 = vadd.xlane.f32.xlu0 %v5686_v24 }
 0xa76   : > { %5684 = vadd.xlane.f32.xlu1 %v5683_v21 }
 0xa78   : > { %5693 = vadd.xlane.f32.xlu0 %v5692_v37 }
 0xa7a   : > { %5648 = vadd.xlane.f32.xlu1 %v5647_v43 }
 0xa7e   : > { %5690 = vadd.xlane.f32.xlu1 %v5689_v20 }
 0xa82   : > { %5696 = vadd.xlane.f32.xlu1 %v5695_v14 }
 0xa85   : > { %v5508_v40 = vpop.xlane.xlu0 %5507 }
 0xa86   : > { %v5777_v18 = vrot.slane %v5508_v40, %v9738_v49 }
 0xa89   : > { %v5514_v3 = vpop.xlane.xlu0 %5513 }
 0xa8a   : > { %v5786_v52 = vrot.slane %v5514_v3, %v9738_v49 }
 0xa8d   : > { %v5517_v17 = vpop.xlane.xlu0 %5516 }
 0xa8e   : > { %v5790_v62 = vrot.slane %v5517_v17, %v9741_v35 }
 0xa90   : > { %v5791_v4 = vsel %vm2403_vm5, %v5790_v62, %v5786_v52 }
 0xa91   : > { %v5520_v59 = vpop.xlane.xlu0 %5519 }
 0xa92   : > { %v5795_v57 = vrot.slane %v5520_v59, %v9738_v49 }
 0xa95   : > { %v5556_v9 = vpop.xlane.xlu0 %5555 }
 0xa96   : > { %v5849_v33 = vrot.slane %v5556_v9, %v9738_v49 }
 0xa97   : > { %v5511_v12 = vpop.xlane.xlu1 %5510 }
 0xa98   : > { %v5781_v1 = vrot.slane %v5511_v12, %v9741_v35 }
 0xa99   : > { %v5562_v58 = vpop.xlane.xlu0 %5561 }
 0xa9a   : > { %v5782_v0 = vsel %vm2403_vm5, %v5781_v1, %v5777_v18  ;;  %v5858_v24 = vrot.slane %v5562_v58, %v9738_v49 }
 0xa9b   : > { %v6062_v55 = vsel %vm2684_vm6, %v5791_v4, %v5782_v0  ;;  %v5523_v60 = vpop.xlane.xlu1 %5522 }
 0xa9c   : > { %v5799_v31 = vrot.slane %v5523_v60, %v9741_v35 }
 0xa9d   : > { %v5526_v45 = vpop.xlane.xlu0 %5525 }
 0xa9e   : > { %v5800_v6 = vsel %vm2403_vm5, %v5799_v31, %v5795_v57  ;;  %v5804_v39 = vrot.slane %v5526_v45, %v9738_v49 }
 0xa9f   : > { %v6063_v30 = vsel %vm2686_vm7, %v5800_v6, %v6062_v55  ;;  %v5559_v38 = vpop.xlane.xlu1 %5558 }
 0xaa0   : > { %v5853_v51 = vrot.slane %v5559_v38, %v9741_v35 }
 0xaa1   : > { %v5568_v36 = vpop.xlane.xlu0 %5567 }
 0xaa2   : > { %v5854_v37 = vsel %vm2403_vm5, %v5853_v51, %v5849_v33  ;;  %v5867_v50 = vrot.slane %v5568_v36, %v9738_v49 }
 0xaa3   : > { %v5565_v46 = vpop.xlane.xlu1 %5564 }
 0xaa4   : > { %v5862_v61 = vrot.slane %v5565_v46, %v9741_v35 }
 0xaa5   : > { %v11588_v21 = vpop.xlane.xlu0 %5531 }
 0xaa6   : > { %v5863_v8 = vsel %vm2403_vm5, %v5862_v61, %v5858_v24 }
 0xaa7   : > { %v6069_v43 = vsel %vm2684_vm6, %v5863_v8, %v5854_v37  ;;  %v5529_v20 = vpop.xlane.xlu1 %5528 }
 0xaa8   : > { %v5808_v14 = vrot.slane %v5529_v20, %v9741_v35 }
 0xaa9   : > { %v5574_v40 = vpop.xlane.xlu0 %5573 }
 0xaaa   : > { %v5809_v3 = vsel %vm2403_vm5, %v5808_v14, %v5804_v39 }
 0xaab   : > { %v11597_v17 = vsel %vm2688_vm8, %v5809_v3, %v6063_v30  ;;  %v5571_v52 = vpop.xlane.xlu1 %5570 }
 0xaac   : > { %v5871_v3 = vrot.slane %v5571_v52, %v9741_v35  ;;  %v5813_v52 = vrot.slane %v11588_v21, %v9738_v49 }
 0xaad   : > { %v5538_v62 = vpop.xlane.xlu0 %5537 }
 0xaae   : > { %v5872_v16 = vsel %vm2403_vm5, %v5871_v3, %v5867_v50 }
 0xaaf   : > { %v5535_v4 = vpop.xlane.xlu1 %5534 }
 0xab0   : > { %v5817_v11 = vrot.slane %v5535_v4, %v9741_v35 }
 0xab1   : > { %v5580_v59 = vpop.xlane.xlu0 %5579 }
 0xab2   : > { %v5885_v56 = vrot.slane %v5580_v59, %v9738_v49 }
 0xab3   : > { %v5577_v9 = vpop.xlane.xlu1 %5576 }
 0xab4   : > { %v5880_v47 = vrot.slane %v5577_v9, %v9741_v35 }
 0xab5   : > { %v11599_v12 = vpop.xlane.xlu0 %5603 }
 0xab7   : > { %v5541_v18 = vpop.xlane.xlu1 %5540 }
 0xab8   : > { %v5826_v9 = vrot.slane %v5541_v18, %v9741_v35 }
 0xab9   : > { %v11601_v1 = vpop.xlane.xlu0 %5609 }
 0xabb   : > { %v5583_v58 = vpop.xlane.xlu1 %5582 }
 0xabc   : > { %v5889_v41 = vrot.slane %v5583_v58, %v9741_v35  ;;  %v6070_v58 = vsel %vm2686_vm7, %v5872_v16, %v6069_v43 }
 0xabd   : > { %v5544_v0 = vpop.xlane.xlu0 %5543 }
 0xabf   : > { %v11603_v55 = vpop.xlane.xlu1 %5606 }
 0xac1   : > { %v5586_v60 = vpop.xlane.xlu0 %5585 }
 0xac2   : > { %v5894_v21 = vrot.slane %v5586_v60, %v9738_v49 }
 0xac3   : > { %v11605_v57 = vpop.xlane.xlu1 %5612 }
 0xac5   : > { %v11607_v31 = vpop.xlane.xlu0 %5615 }
 0xac7   : > { %v5547_v45 = vpop.xlane.xlu1 %5546 }
 0xac9   : > { %v11609_v6 = vpop.xlane.xlu0 %5651 }
 0xacb   : > { %v5589_v30 = vpop.xlane.xlu1 %5588 }
 0xacc   : > { %v5898_v36 = vrot.slane %v5589_v30, %v9741_v35  ;;  %v5818_v30 = vsel %vm2403_vm5, %v5817_v11, %v5813_v52 }
 0xacd   : > { %v11611_v38 = vpop.xlane.xlu0 %5657 }
 0xace   : > { %v5899_v53 = vsel %vm2403_vm5, %v5898_v36, %v5894_v21 }
 0xacf   : > { %v11613_v51 = vpop.xlane.xlu1 %5618 }
 0xad1   : > { %v5550_v46 = vpop.xlane.xlu0 %5549 }
 0xad2   : > { %v5840_v11 = vrot.slane %v5550_v46, %v9738_v49  ;;  %v6065_v46 = vsel %vm2690_vm9, %v5818_v30, %v11597_v17 }
 0xad3   : > { %v11615_v33 = vpop.xlane.xlu1 %5654 }
 0xad5   : > { %v5592_v24 = vpop.xlane.xlu0 %5591 }
 0xad6   : > { %v5903_v59 = vrot.slane %v5592_v24, %v9738_v49 }
 0xad7   : > { %v11617_v61 = vpop.xlane.xlu1 %5660 }
 0xad9   : > { %v11619_v37 = vpop.xlane.xlu0 %5621 }
 0xadb   : > { %v5553_v8 = vpop.xlane.xlu1 %5552 }
 0xadc   : > { %v5844_v18 = vrot.slane %v5553_v8, %v9741_v35 }
 0xadd   : > { %v11621_v20 = vpop.xlane.xlu0 %5663 }
 0xadf   : > { %v5595_v39 = vpop.xlane.xlu1 %5594 }
 0xae0   : > { %v5907_v50 = vrot.slane %v5595_v39, %v9741_v35  ;;  %v5831_v39 = vrot.slane %v5544_v0, %v9738_v49 }
 0xae1   : > { %v5598_v14 = vpop.xlane.xlu0 %5597 }
 0xae2   : > { %v5912_v16 = vrot.slane %v5598_v14, %v9738_v49 }
 0xae3   : > { %v11624_v19 = vpop.xlane.xlu1 %5624 }
 0xae4   : > { %v11626_v25 = vpop.f32.mrb[38].mxu1 }
 0xae5   : > { %12762 = vst [vmem:[#allocation60_spill] sm:$0xff] %v11626_v25  ;;  %v11629_v15 = vpop.f32.mrb[39].mxu1  ;;  %v11631_v28 = vpop.xlane.xlu0 %5627  ;;  %v5876_v25 = vrot.slane %v5574_v40, %v9738_v49  ;;  %v5835_v40 = vrot.slane %v5547_v45, %v9741_v35 }
 0xae6   : > { %12763 = vst [vmem:[#allocation92_spill] sm:$0xff] %v11629_v15  ;;  %v5822_v15 = vrot.slane %v5538_v62, %v9738_v49  ;;  %v5890_v62 = vsel %vm2403_vm5, %v5889_v41, %v5885_v56  ;;  %v5908_v41 = vsel %vm2403_vm5, %v5907_v50, %v5903_v59 }
 0xae7   : > { %v11637_v23 = vpop.xlane.xlu1 %5666  ;;  %v5881_v3 = vsel %vm2403_vm5, %v5880_v47, %v5876_v25  ;;  %v5836_v8 = vsel %vm2403_vm5, %v5835_v40, %v5831_v39 }
 0xae8   : > { %v6071_v47 = vsel %vm2688_vm8, %v5881_v3, %v6070_v58  ;;  %v5827_v43 = vsel %vm2403_vm5, %v5826_v9, %v5822_v15  ;;  %v5845_v15 = vsel %vm2403_vm5, %v5844_v18, %v5840_v11 }
 0xae9   : > { %v11647_v4 = vpop.xlane.xlu0 %5669  ;;  %v6072_v24 = vsel %vm2690_vm9, %v5890_v62, %v6071_v47  ;;  %v6066_v36 = vsel %vm2692_vm10, %v5827_v43, %v6065_v46  ;;  %v5952_v46 = vrot.slane %v11624_v19, %v9741_v35 }
 0xaea   : > { %v6073_v14 = vsel %vm2692_vm10, %v5899_v53, %v6072_v24  ;;  %v6067_v3 = vsel %vm2694_vm11, %v5836_v8, %v6066_v36  ;;  %v5930_v24 = vrot.slane %v11601_v1, %v9738_v49  ;;  %v5925_v8 = vrot.slane %v11603_v55, %v9741_v35 }
 0xaeb   : > { %v5601_v7 = vpop.xlane.xlu1 %5600  ;;  %v6074_v52 = vsel %vm2694_vm11, %v5908_v41, %v6073_v14  ;;  %v6068_v40 = vsel %vm2696_vm12, %v5845_v15, %v6067_v3  ;;  %v5943_v14 = vrot.slane %v11613_v51, %v9741_v35  ;;  %v5948_v55 = vrot.slane %v11619_v37, %v9738_v49 }
 0xaec   : > { %v5916_v25 = vrot.slane %v5601_v7, %v9741_v35 }
 0xaed   : > { %v11665_v56 = vpop.f32.mrb[40].mxu1  ;;  %v5634_v60 = vpop.xlane.xlu0 %5633 }
 0xaee   : > { %v11667_v45 = vpop.f32.mrb[41].mxu1  ;;  %v5917_v0 = vsel %vm2403_vm5, %v5916_v25, %v5912_v16  ;;  %v5966_v37 = vrot.slane %v5634_v60, %v9738_v49  ;;  %v6015_v60 = vrot.slane %v11637_v23, %v9741_v35 }
 0xaef   : > { %v5631_v7 = vpop.xlane.xlu1 %5630  ;;  %v6075_v9 = vsel %vm2696_vm12, %v5917_v0, %v6074_v52  ;;  %v5934_v0 = vrot.slane %v11605_v57, %v9741_v35  ;;  %v5921_v52 = vrot.slane %v11599_v12, %v9738_v49  ;;  %v5939_v57 = vrot.slane %v11607_v31, %v9738_v49 }
 0xaf0   : > { %v5961_v1 = vrot.slane %v5631_v7, %v9741_v35  ;;  %v5957_v12 = vrot.slane %v11631_v28, %v9738_v49  ;;  %v5993_v7 = vrot.slane %v11609_v6, %v9738_v49  ;;  %v6002_v28 = vrot.slane %v11611_v38, %v9738_v49 }
 0xaf1   : > { %v7351_v50 = vpop.f32.mrb[42].mxu1  ;;  %v11679_v58 = vpop.xlane.xlu0 %5675  ;;  %v5935_v36 = vsel %vm2403_vm5, %v5934_v0, %v5930_v24  ;;  %v5944_v19 = vsel %vm2403_vm5, %v5943_v14, %v5939_v57  ;;  %v8313_v0 = vmov 3   ;;  %v5997_v6 = vrot.slane %v11615_v33, %v9741_v35 }
 0xaf2   : > { %v6178_v21 = vadd.f32 %v7351_v50, %v6075_v9  ;;  %v6172_v53 = vpop.f32.mrb[43].mxu1  ;;  %v5926_v50 = vsel %vm2403_vm5, %v5925_v8, %v5921_v52  ;;  %7698 = vset.pattern.permute.xlu1 %v8313_v0  ;;  %7697 = vset.pattern.permute.xlu0 %v8313_v0  ;;  %v6011_v52 = vrot.slane %v11621_v20, %v9738_v49 }
 0xaf3   : > { %v6173_v62 = vadd.f32 %v6172_v53, %v6068_v40  ;;  %v11683_v59 = vpop.xlane.xlu1 %5672  ;;  %v6076_v31 = vsel %vm2684_vm6, %v5935_v36, %v5926_v50  ;;  %v5953_v40 = vsel %vm2403_vm5, %v5952_v46, %v5948_v55  ;;  %v6006_v53 = vrot.slane %v11617_v61, %v9741_v35 }
 0xaf4   : > { %v11687_v17 = vsel %vm9785_vm13, %v6178_v21, -1e+15  ;;  %v6024_v14 = vrot.slane %v11683_v59, %v9741_v35  ;;  %v6020_v57 = vrot.slane %v11647_v4, %v9738_v49  ;;  %v5998_v55 = vsel %vm2403_vm5, %v5997_v6, %v5993_v7 }
 0xaf5   : > { %v11691_v30 = vsel %vm9785_vm13, %v6173_v62, -1e+15  ;;  %v11693_v18 = vpop.f32.mrb[44].mxu1  ;;  %v5640_v39 = vpop.xlane.xlu0 %5639  ;;  %v6198_v16 = vsel %vm2826_vm14, %v11687_v17, -inf  ;;  %v5962_v62 = vsel %vm2403_vm5, %v5961_v1, %v5957_v12  ;;  %v6007_v33 = vsel %vm2403_vm5, %v6006_v53, %v6002_v28 }
 0xaf6   : > { %v11697_v25 = vpop.f32.mrb[45].mxu1  ;;  %6199 = vmax.xlane.f32.xlu1 %v6198_v16  ;;  %v6195_v47 = vsel %vm2826_vm14, %v11691_v30, -inf  ;;  %v5975_v16 = vrot.slane %v5640_v39, %v9738_v49  ;;  %v6029_v20 = vrot.slane %v11679_v58, %v9738_v49 }
 0xaf7   : > { %v5637_v43 = vpop.xlane.xlu1 %5636  ;;  %6196 = vmax.xlane.f32.xlu0 %v6195_v47  ;;  %v6077_v47 = vsel %vm2686_vm7, %v5944_v19, %v6076_v31 }
 0xaf8   : > { %v5970_v51 = vrot.slane %v5637_v43, %v9741_v35  ;;  %v6078_v61 = vsel %vm2688_vm8, %v5953_v40, %v6077_v47 }
 0xaf9   : > { %v11701_v11 = vpop.xlane.xlu0 %5681  ;;  %v6079_v8 = vsel %vm2690_vm9, %v5962_v62, %v6078_v61 }
 0xafa   : > { %v5971_v43 = vsel %vm2403_vm5, %v5970_v51, %v5966_v37  ;;  %v6016_v51 = vsel %vm2403_vm5, %v6015_v60, %v6011_v52  ;;  %v6038_v4 = vrot.slane %v11701_v11, %v9738_v49 }
 0xafb   : > { %v5679_v41 = vpop.xlane.xlu1 %5678  ;;  %v6080_v23 = vsel %vm2692_vm10, %v5971_v43, %v6079_v8 }
 0xafc   : > { %v6033_v36 = vrot.slane %v5679_v41, %v9741_v35  ;;  %v6025_v41 = vsel %vm2403_vm5, %v6024_v14, %v6020_v57  ;;  %v2845_v57 = vsub.f32 %v11336_v54, %v12710_v48  ;;  %v12767_v48 = vld [vmem:[#allocation136_spill] sm:$0xff] }
 0xafd   : > { %v5646_v9 = vpop.xlane.xlu0 %5645 }
 0xafe   : > { %v6034_v31 = vsel %vm2403_vm5, %v6033_v36, %v6029_v20 }
 0xaff   : > { %v5643_v15 = vpop.xlane.xlu1 %5642 }
 0xb00   : > { %v5979_v3 = vrot.slane %v5643_v15, %v9741_v35  ;;  %v5984_v15 = vrot.slane %v5646_v9, %v9738_v49 }
 0xb01   : > { %v5688_v38 = vpop.xlane.xlu0 %5687 }
 0xb02   : > { %v5980_v39 = vsel %vm2403_vm5, %v5979_v3, %v5975_v16  ;;  %v6047_v7 = vrot.slane %v5688_v38, %v9738_v49 }
 0xb03   : > { %v5685_v21 = vpop.xlane.xlu1 %5684  ;;  %v6081_v1 = vsel %vm2694_vm11, %v5980_v39, %v6080_v23 }
 0xb04   : > { %v6042_v59 = vrot.slane %v5685_v21, %v9741_v35  ;;  %v6083_v21 = vsel %vm2684_vm6, %v6007_v33, %v5998_v55  ;;  %v12765_v33 = vmov 1   ;;  %v2851_v55 = vmul.f32 1.442695, %v2845_v57 }
 0xb05   : > { %v5694_v40 = vpop.xlane.xlu0 %5693  ;;  %v6084_v58 = vsel %vm2686_vm7, %v6016_v51, %v6083_v21  ;;  %v12769_v21 = vmov 2  }
 0xb06   : > { %v6043_v37 = vsel %vm2403_vm5, %v6042_v59, %v6038_v4  ;;  %v6085_v11 = vsel %vm2688_vm8, %v6025_v41, %v6084_v58  ;;  %v6056_v47 = vrot.slane %v5694_v40, %v9738_v49  ;;  %v12766_v59 = vld [vmem:[#allocation142_spill] sm:$0xff]  ;;  %v12768_v4 = vmov 0  }
 0xb07   : > { %v5649_v24 = vpop.xlane.xlu1 %5648  ;;  %v6086_v28 = vsel %vm2690_vm9, %v6034_v31, %v6085_v11  ;;  %v12770_v31 = vld [vmem:[#allocation140_spill] sm:$0xff]  ;;  %v5154_v40 = vsel %vm2826_vm14, %v11485_v26, 0.0  ;;  %v3994_v58 = vsub.f32 %v11310_v22, %v12704_v10  ;;  %v12774_v26 = vld [vmem:[#allocation135_spill] sm:$0xff] }
 0xb08   : > { %v5988_v46 = vrot.slane %v5649_v24, %v9741_v35  ;;  %v6087_v6 = vsel %vm2692_vm10, %v6043_v37, %v6086_v28  ;;  %v12771_v37 = vld [vmem:[#allocation145_spill] sm:$0xff] }
 0xb09   : > { %v4050_v11 = vsel %vm2826_vm14, %v12771_v37, 0.0 }
 0xb0a   : > { %v5989_v9 = vsel %vm2403_vm5, %v5988_v46, %v5984_v15  ;;  %v12764_v46 = vld [vmem:[#allocation59_spill] sm:$0xff] }
 0xb0b   : > { %v5691_v50 = vpop.xlane.xlu1 %5690  ;;  %v6082_v19 = vsel %vm2696_vm12, %v5989_v9, %v6081_v1  ;;  %v4044_v9 = vsel %vm2826_vm14, %v12766_v59, 0.0 }
 0xb0c   : > { %v6051_v12 = vrot.slane %v5691_v50, %v9741_v35  ;;  %v6183_v3 = vadd.f32 %v11697_v25, %v6082_v19  ;;  %v4047_v50 = vsel %vm2826_vm14, %v12767_v48, 0.0 }
 0xb0e   : > { %v11780_v53 = vsel %vm9785_vm13, %v6183_v3, -1e+15  ;;  %v6052_v62 = vsel %vm2403_vm5, %v6051_v12, %v6047_v7  ;;  %v4041_v7 = vsel %vm2826_vm14, %v12770_v31, 0.0  ;;  %v12781_v31 = vld [vmem:[#allocation57_spill] sm:$0xff] }
 0xb0f   : > { %v5697_v25 = vpop.xlane.xlu1 %5696  ;;  %v6201_v16 = vsel %vm2826_vm14, %v11780_v53, -inf  ;;  %v6088_v61 = vsel %vm2694_vm11, %v6052_v62, %v6087_v6  ;;  %v5157_v62 = vsel %vm2826_vm14, %v11498_v42, 0.0 }
 0xb10   : > { %v6060_v43 = vrot.slane %v5697_v25, %v9741_v35  ;;  %6202 = vmax.xlane.f32.xlu0 %v6201_v16  ;;  %v3999_v25 = vmul.f32 1.442695, %v3994_v58  ;;  %v12772_v16 = vld [vmem:[#allocation141_spill] sm:$0xff] }
 0xb11   : > { %v3995_v28 = vsub.f32 %v11336_v54, %v12772_v16  ;;  %v11918_v58 = vld [vmem:[#allocation3 + $0x8] sm:$0xff]  ;;  %v11923_v16 = vld [vmem:[#allocation3 + $0x10] sm:$0xff] }
 0xb12   : > { %v6061_v60 = vsel %vm2403_vm5, %v6060_v43, %v6056_v47  ;;  %v12773_v47 = vld [vmem:[#allocation62_spill] sm:$0xff]  ;;  %vm6466_vm5 = vcmask 195584  }
 0xb13   : > { %v6089_v39 = vsel %vm2696_vm12, %v6061_v60, %v6088_v61  ;;  %v5160_v43 = vsel %vm2826_vm14, %v12773_v47, 0.0  ;;  %v4001_v6 = vmul.f32 1.442695, %v3995_v28  ;;  %v12775_v61 = vld [vmem:[#allocation130_spill] sm:$0xff]  ;;  %v12783_v28 = vld [vmem:[#allocation143_spill] sm:$0xff] }
 0xb14   : > { %v6188_v38 = vadd.f32 %v11693_v18, %v6089_v39  ;;  %v5104_v60 = vsub.f32 %v11310_v22, %v12775_v61 }
 0xb16   : > { %v11796_v24 = vsel %vm9785_vm13, %v6188_v38, -1e+15  ;;  %v5109_v42 = vmul.f32 1.442695, %v5104_v60  ;;  %v11931_v60 = vld [vmem:[#allocation3 + $0x18] sm:$0xff] }
 0xb17   : > { %v6204_v49 = vsel %vm2826_vm14, %v11796_v24, -inf }
 0xb18   : > { %6205 = vmax.xlane.f32.xlu1 %v6204_v49 }
 0xb83   : > { %v6200_v35 = vpop.xlane.xlu1 %6199 }
 0xb84   : > { %v11801_v8 = vmax.f32 %v11310_v22, %v6200_v35  ;;  %v6197_v14 = vpop.xlane.xlu0 %6196 }
 0xb85   : > { %v11804_v15 = vmax.f32 %v11318_v5, %v6197_v14 }
 0xb86   : > { %v6434_v2 = vsel %vm6432_vm1, %v11328_v32, %v11801_v8  ;;  %6230 = vperm.xlu1 %7698, %v11801_v8   ;;  %v2844_v32 = vsub.f32 %v11310_v22, %v12705_v29  ;;  %v11832_v29 = vld [vmem:[#allocation4 + $0x18] sm:$0xff] }
 0xb87   : > { %6439 = vst.msk [vmem:[#allocation4 + $0x8] sm:$0xff] %vm6437_vm4, %v6434_v2  ;;  %v6433_v18 = vsel %vm6432_vm1, %v11333_v34, %v11804_v15  ;;  %6225 = vperm.xlu0 %7697, %v11804_v15   ;;  %v2846_v51 = vsub.f32 %v11832_v29, %v12713_v27  ;;  %v3993_v27 = vsub.f32 %v11318_v5, %v12707_v63  ;;  %v12776_v2 = vld [vmem:[#allocation149_spill] sm:$0xff] }
 0xb88   : > { %6438 = vst.msk [vmem:[#allocation4] sm:$0xff] %vm6437_vm4, %v6433_v18  ;;  %v2849_v36 = vmul.f32 1.442695, %v2844_v32  ;;  %v3996_v10 = vsub.f32 %v11832_v29, %v12774_v26  ;;  %v12777_v18 = vld [vmem:[#allocation146_spill] sm:$0xff] }
 0xb89   : > { %v2853_v19 = vmul.f32 1.442695, %v2846_v51 }
 0xb8a   : > { %7700 = vrot.lane.b32.xlu1 %v12764_v46, %s8311_s20  ;;  %7741 = vpow2.f32 %v2849_v36  ;;  %v4003_v39 = vmul.f32 1.442695, %v3996_v10 }
 0xb8b   : > { %7705 = vset.pattern.permute.xlu0 %v12765_v33  ;;  %7743 = vpow2.f32 %v2851_v55  ;;  %v12779_v55 = vld [vmem:[#allocation147_spill] sm:$0xff] }
 0xb8c   : > { %7745 = vpow2.f32 %v2853_v19 }
 0xb94   : > { %v11849_v41 = vpop.eup %7741 }
 0xb95   : > { %v11853_v12 = vpop.eup %7743 }
 0xb96   : > { %v11856_v3 = vpop.eup %7745 }
 0xb9d   : > { %v6203_v52 = vpop.xlane.xlu0 %6202 }
 0xb9e   : > { %v11822_v23 = vmax.f32 %v11336_v54, %v6203_v52  ;;  %v12778_v52 = vld [vmem:[#allocation148_spill] sm:$0xff] }
 0xba0   : > { %v6435_v34 = vsel %vm6432_vm1, %v11351_v44, %v11822_v23 }
 0xba1   : > { %6440 = vst.msk [vmem:[#allocation4 + $0x10] sm:$0xff] %vm6437_vm4, %v6435_v34 }
 0xba5   : > { %v6206_v1 = vpop.xlane.xlu1 %6205 }
 0xba6   : > { %v11837_v20 = vmax.f32 %v11832_v29, %v6206_v1  ;;  %4045 = vadd.xlane.f32.xlu0 %v4044_v9 }
 0xba8   : > { %v6436_v44 = vsel %vm6432_vm1, %v11357_v13, %v11837_v20  ;;  %6240 = vperm.xlu1 %7698, %v11837_v20   ;;  %v3997_v13 = vmul.f32 1.442695, %v3993_v27 }
 0xba9   : > { %6441 = vst.msk [vmem:[#allocation4 + $0x18] sm:$0xff] %vm6437_vm4, %v6436_v44 }
 0xbaa   : > { %4048 = vadd.xlane.f32.xlu0 %v4047_v50  ;;  %7747 = vpow2.f32 %v3997_v13 }
 0xbab   : > { %7749 = vpow2.f32 %v3999_v25 }
 0xbac   : > { %6235 = vperm.xlu1 %7698, %v11822_v23   ;;  %7751 = vpow2.f32 %v4001_v6 }
 0xbad   : > { %7753 = vpow2.f32 %v4003_v39  ;;  %v12785_v39 = vld [vmem:[#allocation151_spill] sm:$0xff] }
 0xbae   : > { %7755 = vpow2.f32 %v5109_v42 }
 0xbb0   : > { %7704 = vset.pattern.permute.xlu1 %v12768_v4  ;;  %v12780_v4 = vld [vmem:[#allocation133_spill] sm:$0xff] }
 0xbb1   : > { %3011 = vperm.xlu1 %7704, %v11849_v41   ;;  %v5103_v13 = vsub.f32 %v11318_v5, %v12780_v4 }
 0xbb3   : > { %v5107_v37 = vmul.f32 1.442695, %v5103_v13 }
 0xbb4   : > { %v11860_v63 = vpop.eup %7747 }
 0xbb5   : > { %3016 = vperm.xlu1 %7704, %v11853_v12   ;;  %v11882_v38 = vpop.eup %7749 }
 0xbb6   : > { %v11885_v49 = vpop.eup %7751 }
 0xbb7   : > { %v11888_v35 = vpop.eup %7753 }
 0xbb8   : > { %v11891_v14 = vpop.eup %7755 }
 0xbb9   : > { %3021 = vperm.xlu1 %7704, %v11856_v3  }
 0xbbd   : > { %7706 = vset.pattern.permute.xlu1 %v12765_v33 }
 0xbc0   : > { %4164 = vperm.xlu0 %7705, %v11860_v63  }
 0xbc4   : > { %7708 = vset.pattern.permute.xlu0 %v12769_v21 }
 0xbdd   : > { %4042 = vadd.xlane.f32.xlu1 %v4041_v7  ;;  %v5151_v7 = vsel %vm2826_vm14, %v12781_v31, 0.0 }
 0xbdf   : > { %5155 = vadd.xlane.f32.xlu0 %v5154_v40 }
 0xbe1   : > { %4051 = vadd.xlane.f32.xlu1 %v4050_v11  ;;  %v12782_v11 = vld [vmem:[#allocation124_spill] sm:$0xff] }
 0xbe3   : > { %5158 = vadd.xlane.f32.xlu0 %v5157_v62  ;;  %v5105_v62 = vsub.f32 %v11336_v54, %v12782_v11 }
 0xbe7   : > { %5161 = vadd.xlane.f32.xlu0 %v5160_v43  ;;  %v12784_v43 = vld [vmem:[#allocation125_spill] sm:$0xff] }
 0xbe8   : > { %v5106_v26 = vsub.f32 %v11832_v29, %v12784_v43 }
 0xbf2   : > { %4169 = vperm.xlu1 %7706, %v11882_v38  }
 0xbf6   : > { %4174 = vperm.xlu1 %7706, %v11885_v49  }
 0xbfa   : > { %4179 = vperm.xlu1 %7706, %v11888_v35  }
 0xbfd   : > { %5277 = vperm.xlu0 %7708, %v11891_v14  }
 0xbfe   : > { %4190 = vrot.lane.b32.xlu1 %v12776_v2, %s8314_s21 }
 0xbff   : > { %7707 = vset.pattern.permute.xlu1 %v12769_v21 }
 0xc01   : > { %7710 = vset.pattern.permute.xlu0 %v8313_v0 }
 0xc02   : > { %4192 = vrot.lane.b32.xlu1 %v12777_v18, %s8314_s21  ;;  %v5113_v18 = vmul.f32 1.442695, %v5106_v26 }
 0xc05   : > { %v6231_v46 = vpop.permute.xlu1 %6230 }
 0xc06   : > { %v6244_v33 = vsub.f32 %v11687_v17, %v6231_v46  ;;  %4194 = vrot.lane.b32.xlu1 %v12778_v52, %s8314_s21  ;;  %v6226_v32 = vpop.permute.xlu0 %6225 }
 0xc07   : > { %v6243_v34 = vsub.f32 %v11691_v30, %v6226_v32  ;;  %v6212_v32 = vsub.f32 %v11310_v22, %v11801_v8  ;;  %v6211_v22 = vsub.f32 %v11318_v5, %v11804_v15  ;;  %v12787_v8 = vld [vmem:[#allocation92_spill] sm:$0xff] }
 0xc08   : > { %v6249_v36 = vmul.f32 1.442695, %v6244_v33 }
 0xc09   : > { %v6247_v57 = vmul.f32 1.442695, %v6243_v34  ;;  %v7701_v1 = vpop.permute.xlu1 %7700  ;;  %v12786_v34 = vld [vmem:[#allocation150_spill] sm:$0xff] }
 0xc0a   : > { %v7703_v59 = vunpack.i.h.bf16 %v7701_v1  ;;  %v7702_v9 = vunpack.i.l.bf16 %v7701_v1  ;;  %4196 = vrot.lane.b32.xlu1 %v12779_v55, %s8314_s21  ;;  %v6217_v1 = vmul.f32 1.442695, %v6212_v32  ;;  %v6215_v55 = vmul.f32 1.442695, %v6211_v22 }
 0xc0b   : > { %7757 = vpow2.f32 %v6247_v57 }
 0xc0c   : > { %7759 = vpow2.f32 %v6249_v36  ;;  %v7433_v51 = vpack.c.bf16 %v7703_v59, %v7702_v9 }
 0xc0e   : > { %7434 = vmatprep.subr.bf16.mxu1 %v7433_v51 }
 0xc0f   : > { %7436 = vmatpush3.bf16.msra.mxu1 %v7433_v51 }
 0xc15   : > { %v11906_v17 = vpop.eup %7757 }
 0xc16   : > { %v7760_v44 = vpop.eup %7759  ;;  %7359 = vmatprep.mubr.msk.f32.mxu1 %vm2826_vm14, %v11906_v17 }
 0xc17   : > { %7360 = vmatmul.mubr.msk.f32.vlgmr.msra.gmra.mrb[46].mxu1 %vm2826_vm14, %v7760_v44  ;;  %v6262_v30 = vsel %vm2826_vm14, %v7760_v44, 0.0  ;;  %v12788_v44 = vld [vmem:[#allocation60_spill] sm:$0xff] }
 0xc1c   : > { %6263 = vadd.xlane.f32.xlu0 %v6262_v30 }
 0xc27   : > { %v6241_v48 = vpop.permute.xlu1 %6240 }
 0xc28   : > { %v6246_v50 = vsub.f32 %v11796_v24, %v6241_v48 }
 0xc2a   : > { %v6253_v19 = vmul.f32 1.442695, %v6246_v50 }
 0xc2b   : > { %v6236_v27 = vpop.permute.xlu1 %6235 }
 0xc2c   : > { %7761 = vpow2.f32 %v6253_v19  ;;  %v6245_v21 = vsub.f32 %v11780_v53, %v6236_v27  ;;  %v5111_v53 = vmul.f32 1.442695, %v5105_v62 }
 0xc2e   : > { %v6251_v40 = vmul.f32 1.442695, %v6245_v21  ;;  %5152 = vadd.xlane.f32.xlu1 %v5151_v7  ;;  %v12789_v21 = vld [vmem:[#allocation58_spill] sm:$0xff] }
 0xc30   : > { %7763 = vpow2.f32 %v6251_v40  ;;  %v3012_v24 = vpop.permute.xlu1 %3011 }
 0xc31   : > { %v3025_v25 = vmul.f32 %v3012_v24, %v11918_v58  ;;  %7765 = vpow2.f32 %v5107_v37  ;;  %v11983_v24 = vld [vmem:[#allocation3] sm:$0xff] }
 0xc32   : > { %7767 = vpow2.f32 %v5111_v53  ;;  %v6213_v53 = vsub.f32 %v11336_v54, %v11822_v23 }
 0xc33   : > { %v11926_v47 = vadd.f32 %v12783_v28, %v3025_v25  ;;  %7769 = vpow2.f32 %v5113_v18  ;;  %v4046_v5 = vpop.xlane.xlu0 %4045  ;;  %v6214_v18 = vsub.f32 %v11832_v29, %v11837_v20 }
 0xc34   : > { %v3017_v10 = vpop.permute.xlu1 %3016  ;;  %7771 = vpow2.f32 %v6217_v1 }
 0xc35   : > { %v3026_v6 = vmul.f32 %v3017_v10, %v11923_v16  ;;  %7773 = vpow2.f32 %v6215_v55  ;;  %v6259_v10 = vsel %vm2826_vm14, %v11906_v17, 0.0  ;;  %v6221_v23 = vmul.f32 1.442695, %v6214_v18 }
 0xc36   : > { %v7762_v61 = vpop.eup %7761 }
 0xc37   : > { %v11934_v42 = vadd.f32 %v3026_v6, %v12785_v39  ;;  %v6268_v2 = vsel %vm2826_vm14, %v7762_v61, 0.0  ;;  %v4049_v15 = vpop.xlane.xlu0 %4048  ;;  %v12791_v6 = vld [vmem:[#allocation144_spill] sm:$0xff] }
 0xc38   : > { %6269 = vadd.xlane.f32.xlu0 %v6268_v2  ;;  %v3022_v46 = vpop.permute.xlu1 %3021  ;;  %v6219_v2 = vmul.f32 1.442695, %v6213_v53 }
 0xc39   : > { %v3027_v33 = vmul.f32 %v3022_v46, %v11931_v60 }
 0xc3a   : > { %v11938_v52 = vpop.eup %7763  ;;  %7775 = vpow2.f32 %v6219_v2 }
 0xc3b   : > { %v11943_v36 = vadd.f32 %v12786_v34, %v3027_v33  ;;  %7362 = vmatprep.mubr.msk.f32.mxu1 %vm2826_vm14, %v11938_v52  ;;  %v11948_v57 = vpop.eup %7765  ;;  %7777 = vpow2.f32 %v6221_v23 }
 0xc3c   : > { %7363 = vmatmul.mubr.msk.f32.gmra.mrb[48].mxu1 %vm2826_vm14, %v7762_v61  ;;  %v7768_v59 = vpop.eup %7767 }
 0xc3d   : > { %v11951_v9 = vpop.eup %7769 }
 0xc3e   : > { %v11958_v51 = vpop.eup %7771 }
 0xc3f   : > { %5272 = vperm.xlu1 %7707, %v11948_v57   ;;  %v11964_v30 = vpop.eup %7773  ;;  %v4165_v48 = vpop.permute.xlu0 %4164 }
 0xc40   : > { %v4182_v43 = vmul.f32 %v4165_v48, %v11983_v24  ;;  %v1698_v48 = vld [vmem:[#allocation5 + $0x8] sm:$0xff] }
 0xc43   : > { %5282 = vperm.xlu1 %7707, %v7768_v59  }
 0xc47   : > { %5287 = vperm.xlu1 %7707, %v11951_v9  }
 0xc4b   : > { %5298 = vrot.lane.b32.xlu1 %v12787_v8, %s8315_s13 }
 0xc4c   : > { %7709 = vset.pattern.permute.xlu1 %v8313_v0  ;;  %v11969_v0 = vld [vmem:[#allocation5 + $0x10] sm:$0xff] }
 0xc4d   : > { %v4039_v19 = vmul.f32 %v11885_v49, %v11969_v0  ;;  %v5149_v13 = vmul.f32 %v7768_v59, %v11969_v0 }
 0xc4e   : > { %6385 = vperm.xlu0 %7710, %v11958_v51  }
 0xc4f   : > { %5300 = vrot.lane.b32.xlu1 %v12788_v44, %s8315_s13  ;;  %v4055_v4 = vadd.f32 %v4049_v15, %v4039_v19  ;;  %v12005_v44 = vpop.eup %7775  ;;  %v4038_v19 = vmul.f32 %v11882_v38, %v1698_v48  ;;  %v6265_v38 = vsel %vm2826_vm14, %v11938_v52, 0.0 }
 0xc50   : > { %v7778_v15 = vpop.eup %7777 }
 0xc53   : > { %5302 = vrot.lane.b32.xlu1 %v11667_v45, %s8315_s13  ;;  %v2889_v45 = vmul.f32 %v11853_v12, %v11969_v0  ;;  %v12790_v12 = vld [vmem:[#allocation139_spill] sm:$0xff] }
 0xc54   : > { %v3024_v28 = vmul.f32 %v12790_v12, %v11983_v24 }
 0xc55   : > { %v2905_v31 = vadd.f32 %v12789_v21, %v2889_v45  ;;  %v5148_v45 = vmul.f32 %v11891_v14, %v1698_v48  ;;  %v1700_v14 = vld [vmem:[#allocation5 + $0x18] sm:$0xff] }
 0xc56   : > { %v3028_v61 = vadd.f32 %v3024_v28, %v12791_v6  ;;  %v2890_v12 = vmul.f32 %v11856_v3, %v1700_v14  ;;  %v6258_v6 = vmul.f32 %v7778_v15, %v1700_v14 }
 0xc57   : > { %5304 = vrot.lane.b32.xlu1 %v11665_v56, %s8315_s13  ;;  %v6444_v37 = vsel %vm6422_vm15, %v2905_v31, %v4055_v4  ;;  %v12792_v31 = vld [vmem:[#allocation131_spill] sm:$0xff] }
 0xc5b   : > { %6380 = vperm.xlu1 %7709, %v11964_v30  }
 0xc6a   : > { %v11967_v50 = vpop.xlane.xlu1 %4042 }
 0xc6c   : > { %v5156_v27 = vpop.xlane.xlu0 %5155 }
 0xc6d   : > { %v5164_v21 = vadd.f32 %v5156_v27, %v5148_v45  ;;  %v4040_v27 = vmul.f32 %v11888_v35, %v1700_v14 }
 0xc6e   : > { %v11975_v56 = vpop.xlane.xlu1 %4051 }
 0xc6f   : > { %v4056_v28 = vadd.f32 %v11975_v56, %v4040_v27 }
 0xc70   : > { %v5159_v7 = vpop.xlane.xlu0 %5158 }
 0xc71   : > { %v5165_v40 = vadd.f32 %v5159_v7, %v5149_v13  ;;  %v4054_v13 = vadd.f32 %v4046_v5, %v4038_v19 }
 0xc72   : > { %v4170_v11 = vpop.permute.xlu1 %4169 }
 0xc73   : > { %v11981_v62 = vsel %vm6427_vm0, %v6444_v37, %v5165_v40  ;;  %v4183_v46 = vmul.f32 %v4170_v11, %v11918_v58 }
 0xc76   : > { %v4175_v49 = vpop.permute.xlu1 %4174 }
 0xc77   : > { %v4184_v34 = vmul.f32 %v4175_v49, %v11923_v16 }
 0xc7a   : > { %v4180_v25 = vpop.permute.xlu1 %4179 }
 0xc7b   : > { %v4185_v22 = vmul.f32 %v4180_v25, %v11931_v60 }
 0xc7e   : > { %v4191_v26 = vpop.permute.xlu1 %4190 }
 0xc7f   : > { %v4202_v39 = vadd.f32 %v4191_v26, %v4182_v43  ;;  %6260 = vadd.xlane.f32.xlu1 %v6259_v10  ;;  %v12793_v26 = vld [vmem:[#allocation132_spill] sm:$0xff] }
 0xc80   : > { %v2906_v10 = vadd.f32 %v12793_v26, %v2890_v12 }
 0xc81   : > { %v6458_v33 = vsel %vm2137_vm3, %v3028_v61, %v4202_v39 }
 0xc82   : > { %v4193_v32 = vpop.permute.xlu1 %4192  ;;  %v6445_v52 = vsel %vm6422_vm15, %v2906_v10, %v4056_v28 }
 0xc83   : > { %v4203_v54 = vadd.f32 %v4193_v32, %v4183_v46 }
 0xc85   : > { %v6459_v17 = vsel %vm2137_vm3, %v11926_v47, %v4203_v54  ;;  %v5162_v47 = vpop.xlane.xlu0 %5161 }
 0xc86   : > { %v4195_v1 = vpop.permute.xlu1 %4194 }
 0xc87   : > { %v4204_v59 = vadd.f32 %v4195_v1, %v4184_v34 }
 0xc89   : > { %v6460_v29 = vsel %vm2137_vm3, %v11934_v42, %v4204_v59  ;;  %v5278_v4 = vpop.permute.xlu0 %5277  ;;  %v2888_v42 = vmul.f32 %v11849_v41, %v1698_v48 }
 0xc8a   : > { %v4197_v20 = vpop.permute.xlu1 %4196  ;;  %v5291_v46 = vmul.f32 %v5278_v4, %v11918_v58 }
 0xc8b   : > { %v4205_v8 = vadd.f32 %v4197_v20, %v4185_v22  ;;  %v2904_v7 = vadd.f32 %v12792_v31, %v2888_v42 }
 0xc8d   : > { %v6461_v55 = vsel %vm2137_vm3, %v11943_v36, %v4205_v8  ;;  %v6256_v36 = vmul.f32 %v11958_v51, %v1698_v48  ;;  %v6443_v37 = vsel %vm6422_vm15, %v2904_v7, %v4054_v13  ;;  %v5150_v51 = vmul.f32 %v11951_v9, %v1700_v14  ;;  %v12794_v13 = vld [vmem:[#allocation127_spill] sm:$0xff]  ;;  %v12795_v7 = vld [vmem:[#allocation134_spill] sm:$0xff] }
 0xc8e   : > { %v6447_v49 = vsel %vm6427_vm0, %v6443_v37, %v5164_v21 }
 0xc8f   : > { %v5166_v53 = vadd.f32 %v5162_v47, %v5150_v51 }
 0xc90   : > { %6390 = vperm.xlu1 %7709, %v12005_v44  }
 0xc91   : > { %v6449_v2 = vsel %vm6427_vm0, %v6445_v52, %v5166_v53 }
 0xc94   : > { %6395 = vperm.xlu1 %7709, %v7778_v15  }
 0xca9   : > { %v6264_v40 = vpop.xlane.xlu0 %6263 }
 0xcaa   : > { %v6272_v11 = vadd.f32 %v6264_v40, %v6256_v36 }
 0xcac   : > { %v6451_v25 = vsel %vm6432_vm1, %v6447_v49, %v6272_v11 }
 0xcad   : > { %6455 = vst.msk [vmem:[#allocation5 + $0x8] sm:$0xff] %vm6437_vm4, %v6451_v25 }
 0xcb8   : > { %6266 = vadd.xlane.f32.xlu1 %v6265_v38 }
 0xcbb   : > { %v5153_v41 = vpop.xlane.xlu1 %5152 }
 0xcbf   : > { %v5273_v5 = vpop.permute.xlu1 %5272 }
 0xcc0   : > { %v5290_v3 = vmul.f32 %v5273_v5, %v11983_v24 }
 0xcc3   : > { %v5283_v43 = vpop.permute.xlu1 %5282 }
 0xcc4   : > { %v5292_v34 = vmul.f32 %v5283_v43, %v11923_v16 }
 0xcc5   : > { %v6270_v61 = vpop.xlane.xlu0 %6269 }
 0xcc6   : > { %v6274_v39 = vadd.f32 %v6270_v61, %v6258_v6 }
 0xcc7   : > { %v5288_v18 = vpop.permute.xlu1 %5287 }
 0xcc8   : > { %v6453_v35 = vsel %vm6432_vm1, %v6449_v2, %v6274_v39  ;;  %v5293_v20 = vmul.f32 %v5288_v18, %v11931_v60 }
 0xcc9   : > { %6457 = vst.msk [vmem:[#allocation5 + $0x18] sm:$0xff] %vm6437_vm4, %v6453_v35  ;;  %v8317_v35 = vmov (!%p7001_p11), 0  }
 0xcca   : > { %7795 = vset.pattern.permute.xlu1 (!%p7001_p11), %v8317_v35  ;;  %7794 = vset.pattern.permute.xlu0 (!%p7001_p11), %v8317_v35 }
 0xccb   : > { %v5299_v9 = vpop.permute.xlu1 %5298 }
 0xccc   : > { %v5310_v56 = vadd.f32 %v5299_v9, %v5290_v3 }
 0xccd   : > { %v6386_v27 = vpop.permute.xlu0 %6385 }
 0xcce   : > { %v6462_v32 = vsel %vm2826_vm14, %v6458_v33, %v5310_v56  ;;  %v1697_v33 = vld [vmem:[#allocation5] sm:$0xff]  ;;  %v6399_v51 = vmul.f32 %v6386_v27, %v11918_v58 }
 0xccf   : > { %v5301_v54 = vpop.permute.xlu1 %5300  ;;  %v4037_v4 = vmul.f32 %v11860_v63, %v1697_v33  ;;  %v2887_v21 = vmul.f32 %v12794_v13, %v1697_v33 }
 0xcd0   : > { %v5311_v23 = vadd.f32 %v5301_v54, %v5291_v46  ;;  %v8319_v54 = vmov (!%p7001_p11), 2  }
 0xcd1   : > { %v4053_v31 = vadd.f32 %v11967_v50, %v4037_v4  ;;  %v2903_v36 = vadd.f32 %v12795_v7, %v2887_v21 }
 0xcd2   : > { %v6463_v1 = vsel %vm2826_vm14, %v6459_v17, %v5311_v23  ;;  %v5147_v17 = vmul.f32 %v11948_v57, %v1697_v33  ;;  %v8320_v23 = vmov (!%p7001_p11), 3  }
 0xcd3   : > { %v5303_v59 = vpop.permute.xlu1 %5302  ;;  %v6442_v37 = vsel %vm6422_vm15, %v2903_v36, %v4053_v31 }
 0xcd4   : > { %v5312_v22 = vadd.f32 %v5303_v59, %v5292_v34 }
 0xcd6   : > { %v6464_v8 = vsel %vm2826_vm14, %v6460_v29, %v5312_v22  ;;  %v5163_v29 = vadd.f32 %v5153_v41, %v5147_v17  ;;  %v6257_v41 = vmul.f32 %v12005_v44, %v11969_v0 }
 0xcd7   : > { %v5305_v15 = vpop.permute.xlu1 %5304 }
 0xcd8   : > { %v5313_v47 = vadd.f32 %v5305_v15, %v5293_v20  ;;  %v6446_v49 = vsel %vm6427_vm0, %v6442_v37, %v5163_v29 }
 0xcda   : > { %v6465_v48 = vsel %vm2826_vm14, %v6461_v55, %v5313_v47  ;;  %v6255_v55 = vmul.f32 %v11964_v30, %v1697_v33 }
 0xcdb   : > { %v6381_v42 = vpop.permute.xlu1 %6380 }
 0xcdc   : > { %v6398_v53 = vmul.f32 %v6381_v42, %v11983_v24 }
 0xcea   : > { %v7361_v19 = vpop.f32.mrb[46].mxu1 }
 0xceb   : > { %v6359_v45 = vpop.f32.mrb[47].mxu1  ;;  %6408 = vrot.lane.b32.xlu1 %v7361_v19, %s8316_s2 }
 0xcef   : > { %6406 = vrot.lane.b32.xlu1 %v6359_v45, %s8316_s2 }
 0xd0c   : > { %v6261_v40 = vpop.xlane.xlu1 %6260 }
 0xd0d   : > { %v6271_v11 = vadd.f32 %v6261_v40, %v6255_v55 }
 0xd0f   : > { %v6450_v63 = vsel %vm6432_vm1, %v6446_v49, %v6271_v11  ;;  %v7364_v25 = vpop.f32.mrb[48].mxu1 }
 0xd10   : > { %6454 = vst.msk [vmem:[#allocation5] sm:$0xff] %vm6437_vm4, %v6450_v63  ;;  %v6369_v57 = vpop.f32.mrb[49].mxu1  ;;  %v6391_v50 = vpop.permute.xlu1 %6390 }
 0xd11   : > { %6410 = vrot.lane.b32.xlu1 %v6369_v57, %s8316_s2 }
 0xd14   : > { %v6396_v38 = vpop.permute.xlu1 %6395 }
 0xd15   : > { %6412 = vrot.lane.b32.xlu1 %v7364_v25, %s8316_s2  ;;  %v6401_v58 = vmul.f32 %v6396_v38, %v11931_v60  ;;  %v6480_v60 = vld [vmem:[#allocation5 + $0x8] sm:$0xff] (!%p7001_p11) }
 0xd17   : > { %v6479_v18 = vld [vmem:[#allocation5] sm:$0xff] (!%p7001_p11) }
 0xd45   : > { %v6267_v30 = vpop.xlane.xlu1 %6266 }
 0xd46   : > { %v6273_v14 = vadd.f32 %v6267_v30, %v6257_v41 }
 0xd48   : > { %v6452_v5 = vsel %vm6432_vm1, %v11981_v62, %v6273_v14  ;;  %v6400_v62 = vmul.f32 %v6391_v50, %v11923_v16  ;;  %v6482_v16 = vld [vmem:[#allocation5 + $0x18] sm:$0xff] (!%p7001_p11) }
 0xd49   : > { %6456 = vst.msk [vmem:[#allocation5 + $0x10] sm:$0xff] %vm6437_vm4, %v6452_v5 }
 0xd50   : > { %v6481_v2 = vld [vmem:[#allocation5 + $0x10] sm:$0xff] (!%p7001_p11) }
 0xd51   : > { %7802 = vrcp.f32 (!%p7001_p11), %v6481_v2 }
 0xd52   : > { %7804 = vrcp.f32 (!%p7001_p11), %v6479_v18 }
 0xd53   : > { %7806 = vrcp.f32 (!%p7001_p11), %v6482_v16 }
 0xd54   : > { %7808 = vrcp.f32 (!%p7001_p11), %v6480_v60 }
 0xd5b   : > { %v7803_v3 = vpop.eup (!%p7001_p11), %7802 }
 0xd5c   : > { %v7805_v9 = vpop.eup (!%p7001_p11), %7804  ;;  %6503 = vperm.xlu1 (!%p7001_p11), %7795, %v7803_v3  }
 0xd5d   : > { %v6409_v12 = vpop.permute.xlu1 %6408  ;;  %v7807_v56 = vpop.eup (!%p7001_p11), %7806  ;;  %6493 = vperm.xlu0 (!%p7001_p11), %7794, %v7805_v9  }
 0xd5e   : > { %v6419_v28 = vadd.f32 %v6409_v12, %v6399_v51  ;;  %v7809_v46 = vpop.eup (!%p7001_p11), %7808 }
 0xd60   : > { %v6468_v43 = vsel %vm6466_vm5, %v6463_v1, %v6419_v28  ;;  %6508 = vperm.xlu1 (!%p7001_p11), %7795, %v7807_v56  }
 0xd61   : > { %6472 = vst.msk [vmem:[#allocation3 + $0x8] sm:$0xff] %vm927_vm2, %v6468_v43  ;;  %v6407_v0 = vpop.permute.xlu1 %6406  ;;  %6498 = vperm.xlu0 (!%p7001_p11), %7794, %v7809_v46  }
 0xd62   : > { %v6418_v44 = vadd.f32 %v6407_v0, %v6398_v53 }
 0xd64   : > { %v6467_v26 = vsel %vm6466_vm5, %v6462_v32, %v6418_v44  ;;  %v8318_v32 = vmov (!%p7001_p11), 1  }
 0xd65   : > { %6471 = vst.msk [vmem:[#allocation3] sm:$0xff] %vm927_vm2, %v6467_v26  ;;  %7797 = vset.pattern.permute.xlu1 (!%p7001_p11), %v8318_v32  ;;  %7796 = vset.pattern.permute.xlu0 (!%p7001_p11), %v8318_v32 }
 0xd66   : > { %6520 = vperm.xlu1 (!%p7001_p11), %7797, %v7809_v46   ;;  %6516 = vperm.xlu0 (!%p7001_p11), %7796, %v7805_v9  }
 0xd68   : > { %v6488_v29 = vld [vmem:[#allocation3 + $0x8] sm:$0xff] (!%p7001_p11) }
 0xd6a   : > { %6524 = vperm.xlu1 (!%p7001_p11), %7797, %v7803_v3   ;;  %6528 = vperm.xlu0 (!%p7001_p11), %7796, %v7807_v56  }
 0xd6e   : > { %7798 = vset.pattern.permute.xlu1 (!%p7001_p11), %v8319_v54  ;;  %7799 = vset.pattern.permute.xlu0 (!%p7001_p11), %v8319_v54 }
 0xd6f   : > { %6536 = vperm.xlu1 (!%p7001_p11), %7798, %v7805_v9   ;;  %6540 = vperm.xlu0 (!%p7001_p11), %7799, %v7809_v46  }
 0xd73   : > { %6544 = vperm.xlu1 (!%p7001_p11), %7798, %v7803_v3   ;;  %7800 = vset.pattern.permute.xlu0 (!%p7001_p11), %v8320_v23 }
 0xd74   : > { %6556 = vperm.xlu0 (!%p7001_p11), %7800, %v7805_v9  }
 0xd77   : > { %6548 = vperm.xlu1 (!%p7001_p11), %7798, %v7807_v56  }
 0xd78   : > { %6568 = vperm.xlu0 (!%p7001_p11), %7800, %v7807_v56  }
 0xd7b   : > { %7801 = vset.pattern.permute.xlu1 (!%p7001_p11), %v8320_v23 }
 0xd7c   : > { %6560 = vperm.xlu1 (!%p7001_p11), %7801, %v7809_v46  }
 0xd80   : > { %6564 = vperm.xlu1 (!%p7001_p11), %7801, %v7803_v3  }
 0xd83   : > { %v6411_v10 = vpop.permute.xlu1 %6410 }
 0xd84   : > { %v6420_v6 = vadd.f32 %v6411_v10, %v6400_v62 }
 0xd85   : > { %6478 = sbr.rel (%p7001_p11) target bundleno = 3588 (0xe04), region = 124 }
 0xd86   : > { %v6469_v61 = vsel %vm6466_vm5, %v6464_v8, %v6420_v6 }
 0xd87   : > { %6473 = vst.msk [vmem:[#allocation3 + $0x10] sm:$0xff] %vm927_vm2, %v6469_v61  ;;  %v6413_v24 = vpop.permute.xlu1 %6412 }
 0xd88   : > { %v6421_v52 = vadd.f32 %v6413_v24, %v6401_v58 }
 0xd8a   : > { %v6470_v39 = vsel %vm6466_vm5, %v6465_v48, %v6421_v52  ;;  %v6487_v48 = vld [vmem:[#allocation3] sm:$0xff] (!%p7001_p11) }
 0xd8b   : > { %6474 = vst.msk [vmem:[#allocation3 + $0x18] sm:$0xff] %vm927_vm2, %v6470_v39 }
 0xd8e   : > { %v6489_v14 = vld [vmem:[#allocation3 + $0x10] sm:$0xff] }
 0xd92   : > { %v6490_v13 = vld [vmem:[#allocation3 + $0x18] sm:$0xff] }
 0xddb   : > { %v6504_v34 = vpop.permute.xlu1 %6503 }
 0xddc   : > { %v6494_v1 = vpop.permute.xlu0 %6493  ;;  %v6513_v0 = vmul.f32 %v6504_v34, %v6489_v14 }
 0xddd   : > { %v6511_v33 = vmul.f32 %v6494_v1, %v6487_v48 }
 0xddf   : > { %v6509_v59 = vpop.permute.xlu1 %6508 }
 0xde0   : > { %v6499_v22 = vpop.permute.xlu0 %6498  ;;  %v6514_v55 = vmul.f32 %v6509_v59, %v6490_v13 }
 0xde1   : > { %v6512_v63 = vmul.f32 %v6499_v22, %v6488_v29 }
 0xde5   : > { %v6521_v20 = vpop.permute.xlu1 %6520  ;;  %v6517_v8 = vpop.permute.xlu0 %6516 }
 0xde6   : > { %v6531_v4 = vmul.f32 %v6517_v8, %v6487_v48  ;;  %v6532_v25 = vmul.f32 %v6521_v20, %v6488_v29 }
 0xde8   : > { %v6575_v7 = vsel %vm2137_vm3, %v6511_v33, %v6531_v4  ;;  %v6576_v51 = vsel %vm2137_vm3, %v6512_v63, %v6532_v25 }
 0xde9   : > { %v6525_v15 = vpop.permute.xlu1 %6524  ;;  %v6529_v47 = vpop.permute.xlu0 %6528 }
 0xdea   : > { %v6534_v21 = vmul.f32 %v6529_v47, %v6490_v13  ;;  %v6533_v12 = vmul.f32 %v6525_v15, %v6489_v14 }
 0xdec   : > { %v6578_v57 = vsel %vm2137_vm3, %v6514_v55, %v6534_v21  ;;  %v6577_v62 = vsel %vm2137_vm3, %v6513_v0, %v6533_v12 }
 0xdee   : > { %v6537_v19 = vpop.permute.xlu1 %6536  ;;  %v6541_v45 = vpop.permute.xlu0 %6540 }
 0xdef   : > { %v6551_v17 = vmul.f32 %v6537_v19, %v6487_v48  ;;  %v6552_v38 = vmul.f32 %v6541_v45, %v6488_v29 }
 0xdf1   : > { %v6579_v40 = vsel %vm2826_vm14, %v6575_v7, %v6551_v17  ;;  %v6580_v53 = vsel %vm2826_vm14, %v6576_v51, %v6552_v38 }
 0xdf2   : > { %v6545_v42 = vpop.permute.xlu1 %6544 }
 0xdf3   : > { %v6557_v31 = vpop.permute.xlu0 %6556  ;;  %v6553_v43 = vmul.f32 %v6545_v42, %v6489_v14 }
 0xdf4   : > { %v6571_v36 = vmul.f32 %v6557_v31, %v6487_v48 }
 0xdf5   : > { %v6581_v6 = vsel %vm2826_vm14, %v6577_v62, %v6553_v43 }
 0xdf6   : > { %v6549_v37 = vpop.permute.xlu1 %6548  ;;  %v6583_v11 = vsel %vm6466_vm5, %v6579_v40, %v6571_v36 }
 0xdf7   : > { %v6554_v49 = vmul.f32 %v6549_v37, %v6490_v13  ;;  %6587 = vst.msk [vmem:[%s8937_s24] sm:$0xff] %vm927_vm2, %v6583_v11  ;;  %v6569_v50 = vpop.permute.xlu0 %6568 }
 0xdf8   : > { %v6574_v30 = vmul.f32 %v6569_v50, %v6490_v13 }
 0xdf9   : > { %v6582_v41 = vsel %vm2826_vm14, %v6578_v57, %v6554_v49 }
 0xdfa   : > { %v6586_v5 = vsel %vm6466_vm5, %v6582_v41, %v6574_v30 }
 0xdfb   : > { %v6561_v27 = vpop.permute.xlu1 %6560  ;;  %6590 = vst.msk [vmem:[%s8937_s24 + $0x18] sm:$0xff] %vm927_vm2, %v6586_v5 }
 0xdfc   : > { %v6572_v28 = vmul.f32 %v6561_v27, %v6488_v29 }
 0xdfe   : > { %v6584_v44 = vsel %vm6466_vm5, %v6580_v53, %v6572_v28 }
 0xdff   : > { %6588 = vst.msk [vmem:[%s8937_s24 + $0x8] sm:$0xff] %vm927_vm2, %v6584_v44  ;;  %v6565_v26 = vpop.permute.xlu1 %6564 }
 0xe00   : > { %v6573_v10 = vmul.f32 %v6565_v26, %v6489_v14 }
 0xe02   : > { %v6585_v58 = vsel %vm6466_vm5, %v6581_v6, %v6573_v10 }
 0xe03   : > { %6589 = vst.msk [vmem:[%s8937_s24 + $0x10] sm:$0xff] %vm927_vm2, %v6585_v58 }
 0xe04 PF: > { %s12796_s7 = sld [smem:[#allocation46_spill]]  ;;  %s12797_s14 = sld [smem:[#allocation55_spill]] }
 0xe05   : > { %s12798_s29 = sld [smem:[#allocation159_spill]]  ;;  %s6605_s15 = sshll.u32 %s8937_s24, 4  ;;  %s12091_s15 = int_to_ptr.vmem [resolvable:$true] %s6605_s15 }
 0xe06   : > { %s6592_s1 = scalar_lea.sflag [#allocation10], %s8891_s30  ;;  %s8128_s6 = scalar_lea.vmem %s12091_s15, 512 }
 0xe07   : > { %p8129_p9 = scmp.ne.s32.totalorder %s12091_s15, %s8128_s6  ;;  %s8321_s28 = smov [#allocation28]  }
 0xe08   : > { %s8132_s19 = sshll.u32 %s8321_s28, 4  ;;  %s8133_s19 = int_to_ptr.vmem [resolvable:$false] %s8132_s19 }
 0xe09   : > { %s8134_s23 = scalar_lea.vmem %s8133_s19, 1024  ;;  %p8135_p6 = scmp.lt.s32.totalorder %s12091_s15, %s8133_s19 }
 0xe0a   : > { %s7008_s5 = sshll.u32 %s12796_s7, 9  ;;  %p12799_p3 = scmp.ne.s32.totalorder %s12797_s14, 0 }
 0xe0b   : > { %s12088_s16 = scalar_lea.hbm %s12798_s29, %s7008_s5  ;;  %p8136_p2 = scmp.lt.s32.totalorder %s8134_s23, %s8128_s6 }
 0xe0c   : > { %p8130_p4 = pnand %p8129_p9, %p12799_p3 }
 0xe0d   : > { %p8137_p10 = por %p8136_p2, %p8135_p6 }
 0xe0e   : > { %p8131_p13 = pneg %p8130_p4 }
 0xe10   : > { %p8138_p1 = pnand %p8137_p10, %p8131_p13 }
 0xe12   : > { %8141 = shalt.err (!%p8138_p1)
}
 0xe13   : > { %s8142_s24 = scalar_lea.hbm %s12088_s16, 512  ;;  %s8146_s13 = scalar_lea.hbm %s12798_s29, 1024 }
 0xe14   : > { %p8143_p7 = scmp.ne.s32.totalorder %s12088_s16, %s8142_s24  ;;  %p8147_p5 = scmp.lt.u32.totalorder %s12088_s16, %s12798_s29 }
 0xe15   : > { %p8148_p12 = scmp.lt.u32.totalorder %s8146_s13, %s8142_s24  ;;  %p8150_p9 = scmp.lt.u32.totalorder %s8142_s24, %s12088_s16 }
 0xe16   : > { %p8144_p8 = pnand %p8143_p7, %p12799_p3 }
 0xe17   : > { %p8149_p11 = por %p8148_p12, %p8147_p5 }
 0xe18   : > { %p8145_p0 = pneg %p8144_p8 }
 0xe19   : > { %p8151_p4 = por %p8150_p9, %p8149_p11 }
 0xe1b   : > { %p8152_p13 = pnand %p8151_p4, %p8145_p0 }
 0xe1d   : > { %8155 = shalt.err (!%p8152_p13)
}
 0xe1e   : > { %s8322_s5 = smov 128  }
 0xe1f   : > { %7492 = dma.vmem_to_hbm [thread:$0]  (%p12799_p3), %s12091_s15, 512, %s12088_s16, %s6592_s1, %s8322_s5, %s8322_s5, %s8314_s21  }
 0xe20 PF: > { %s12800_s18 = sld [smem:[#allocation43_spill]]  ;;  %p7539_p6 = scmp.ge.s32.totalorder %s8280_s27, 2 }
 0xe21   : > { %s12801_s17 = sld [smem:[#allocation56_spill]] }
 0xe26   : > { %s6620_s6 = sand.u32 1, %s12800_s18  }
 0xe27   : > { %p12802_p2 = scmp.ne.s32.totalorder %s12801_s17, 0  ;;  %s6621_s28 = scalar_lea.sflag [#allocation10], %s6620_s6 }
 0xe29   : > { %p7520_p10 = pnand %p7539_p6, %p12802_p2 }
 0xe2b   : > { %8235 = dma.done.wait (!%p7520_p10), %s6621_s28, 512  }
 0xe2c   : > { %8237 = vsyncadd (!%p7520_p10), %s6621_s28, 4294966784  ;;  %s43_s27 = sadd.s32 1, %s8280_s27   ;;  %s12803_s18 = sld [smem:[#allocation42_spill]] }
 0xe2d   : > { %p40_p1 = scmp.ge.s32.totalorder %s43_s27, 6   ;;  %s12804_s30 = sld [smem:[#allocation53_spill]] }
 0xe2e   : > { %s12805_s20 = sld [smem:[#allocation44_spill]]  ;;  %s12806_s14 = sld [smem:[#allocation52_spill]] }
 0xe2f   : > { %s12807_s16 = sld [smem:[#allocation48_spill]]  ;;  %s12808_s15 = sld [smem:[#allocation50_spill]] }
 0xe30   : > { %s12809_s19 = smov %s8248_s0  ;;  %s12811_s21 = smov %s8260_s22 }
 0xe31   : > { %s12813_s23 = smov %s8272_s25  ;;  %s12814_s24 = smov %s8276_s26 }
 0xe32   :  { %42 = sbr.rel (!%p40_p1) target bundleno = 32 (0x20), region = 195 }
 0xe33   : > { %s12810_s0 = smov %s12804_s30 }
 0xe34   : > { %s12812_s22 = smov %s12806_s14 }
 0xe35   : > { %s12815_s25 = smov %s12807_s16  ;;  %s12816_s26 = smov %s12808_s15 }
 0xe39   :  { %6626 = vsyncpa [#allocation9], 1 }
 0xe3a   :  { %6628 = vsyncpa [#allocation9 + $0x1], 1 }
 0xe3b   :  { %6629 = vsyncpa [#allocation12], 1 }
 0xe3c   :  { %6631 = vsyncpa [#allocation12 + $0x1], 1 }
 0xe3d   :  { %6632 = vsyncpa [#allocation15], 1 }
 0xe3e   :  { %6634 = vsyncpa [#allocation15 + $0x1], 1 }
 0xe3f   :  { %6635 = vsyncpa [#allocation18], 1 }
 0xe40   :  { %6636 = vsyncpa [#allocation21], 1 }
 0xe41   :  { %6637 = vsyncpa [#allocation24], 1 }
 0xe42   :  { %6638 = vsyncpa [#allocation27], 1 }
 0xe43   :  { %6639 = vsyncpa [#allocation10], 1 }
 0xe44   :  { %6641 = vsyncpa [#allocation10 + $0x1], 1 }

</bundles_post_ra>
